<compile_context>
chip_gen: v7x
topology: tpu7x:2x2x1
jax: 0.10.0
libtpu: 0.0.40
codegen_flags: <defaults>
</compile_context>

<pallas_src>
import numpy as np
import jax
import jax.numpy as jnp
from jax.experimental import pallas as pl
from jax.experimental.pallas import tpu as pltpu


def _round_up(x, m):
    return ((x + m - 1) // m) * m


# ------------------------------ Pallas kernel ------------------------------ #
def _make_fused_kernel(block_dims):
    """block_dims: per block dict(hi, wi, cin_pad, cout_pad) -- all static ints."""
    n_blocks = len(block_dims)

    def kernel(*refs):
        # refs = [x, (w2, bias, scale, shift)*n_blocks, pmat*(n_blocks-1), out, scratch*(n_blocks-1)]
        idx = 0
        x_ref = refs[idx]; idx += 1
        blk_refs = []
        for _ in range(n_blocks):
            blk_refs.append(refs[idx:idx + 4]); idx += 4
        p_refs = refs[idx:idx + n_blocks - 1]; idx += n_blocks - 1
        out_ref = refs[idx]; idx += 1
        scr_refs = refs[idx:]

        for b in range(n_blocks):
            d = block_dims[b]
            ho, wo = d["hi"] // 2, d["wi"] // 2
            co = d["cout_pad"]
            w_ref, bias_ref, scale_ref, shift_ref = blk_refs[b]

            if b == 0:
                def load_row(h, dj, _x=x_ref, _wo=wo):
                    return _x[0, h, dj:dj + _wo, :]
            else:
                def load_row(h, dj, _s=scr_refs[b - 1], _wo=wo):
                    return _s[h, dj:dj + _wo, :]

            # Conv(k=4, s=2, p=1) as 8 accumulated matmuls per output row.
            accs = [jnp.zeros((wo, co), jnp.float32) for _ in range(ho)]
            for t in range(8):
                ri, dj = divmod(t, 2)
                wt = w_ref[t]                                     # [2*cin_pad, co] bf16
                for i in range(ho):
                    lhs = load_row(2 * i + ri, dj).astype(jnp.bfloat16)
                    accs[i] = accs[i] + jnp.dot(
                        lhs, wt, preferred_element_type=jnp.float32)

            # Epilogue constants hoisted out of the row loop.
            bias = jnp.broadcast_to(bias_ref[...], (wo, co))
            scale = jnp.broadcast_to(scale_ref[...], (wo, co))
            shift = jnp.broadcast_to(shift_ref[...], (wo, co))
            rows = []
            for i in range(ho):
                y = accs[i] + bias                                # conv bias
                y = jnp.where(y >= 0, y, 0.2 * y)                 # LeakyReLU(0.2)
                # Dropout2d(0.5): identity in eval mode.
                y = y * scale + shift                             # norm (eval-mode affine)
                rows.append(y)

            if b == n_blocks - 1:
                for i in range(ho):
                    out_ref[0, i, :, :] = rows[i].astype(out_ref.dtype)
            else:
                # Write into the next block's padded, column-parity-folded layout.
                nscr = scr_refs[b]
                nscr[...] = jnp.zeros(nscr.shape, nscr.dtype)     # zero pad border
                pmat = p_refs[b][...]                             # [wo, wo] 0/1 selector
                wo2 = wo // 2
                for i in range(ho):
                    r = jnp.dot(pmat, rows[i],
                                preferred_element_type=jnp.float32)
                    # even output columns -> lane half [co:2co], q' = 0..wo2-1
                    nscr[i + 1, 0:wo2, co:2 * co] = r[0:wo2, :].astype(nscr.dtype)
                    # odd output columns  -> lane half [0:co],  q' = 1..wo2
                    nscr[i + 1, 1:wo2 + 1, 0:co] = r[wo2:wo, :].astype(nscr.dtype)

    return kernel


# ------------------------------- host-side packing -------------------------- #
def _pack_input(x_nchw, cin_pad):
    n, c, h, w = x_nchw.shape
    x = jnp.transpose(x_nchw, (0, 2, 3, 1))                       # NHWC
    x = jnp.pad(x, ((0, 0), (1, 1), (1, 1), (0, cin_pad - c)))    # spatial + channel pad
    x = x.reshape(n, h + 2, (w + 2) // 2, 2 * cin_pad)            # fold column parity into lanes
    return x.astype(jnp.float32)


def _pack_weight(w, cin_pad, cout_pad):
    cout, cin, kh, kw = w.shape                                   # kh = kw = 4
    wt = jnp.transpose(w, (2, 3, 1, 0))                           # [kh, kw, cin, cout]
    wt = jnp.pad(wt, ((0, 0), (0, 0), (0, cin_pad - cin), (0, cout_pad - cout)))
    wt = wt.reshape(kh, 2, 2, cin_pad, cout_pad)                  # kw -> (dj, parity)
    wt = wt.reshape(kh * 2, 2 * cin_pad, cout_pad)                # taps t = ri*2+dj
    return wt.astype(jnp.bfloat16)


def _pad_row(v, cout_pad, fill):
    c = v.shape[0]
    return jnp.pad(v.astype(jnp.float32), (0, cout_pad - c),
                   constant_values=fill).reshape(1, cout_pad)


def _deinterleave_matrix(wo):
    src = np.concatenate([np.arange(0, wo, 2), np.arange(1, wo, 2)])
    p = np.zeros((wo, wo), np.float32)
    p[np.arange(wo), src] = 1.0
    return jnp.asarray(p)


def cnn_module_forward(x, params):
    """Full CNNModule.forward (the Sequential; the Linear head is unused in forward)."""
    n, c, h, w = x.shape
    n_blocks = len(params)

    block_dims, inputs, in_specs, pmats, pmat_specs = [], [], [], [], []
    hi, wi = h, w
    cin_pad = max(64, _round_up(c, 64))               # 2*cin_pad is a multiple of 128
    x2 = _pack_input(x, cin_pad)
    inputs.append(x2)
    in_specs.append(pl.BlockSpec((1,) + x2.shape[1:], lambda i: (i, 0, 0, 0)))

    for b, (wb, bb, scale_b, shift_b) in enumerate(params):
        cout = wb.shape[0]
        cout_pad = max(128, _round_up(cout, 128))
        block_dims.append(dict(hi=hi, wi=wi, cin_pad=cin_pad, cout_pad=cout_pad))
        inputs += [_pack_weight(wb, cin_pad, cout_pad),
                   _pad_row(bb, cout_pad, 0.0),
                   _pad_row(scale_b, cout_pad, 1.0),
                   _pad_row(shift_b, cout_pad, 0.0)]
        in_specs += [pl.BlockSpec((8, 2 * cin_pad, cout_pad), lambda i: (0, 0, 0)),
                     pl.BlockSpec((1, cout_pad), lambda i: (0, 0)),
                     pl.BlockSpec((1, cout_pad), lambda i: (0, 0)),
                     pl.BlockSpec((1, cout_pad), lambda i: (0, 0))]
        if b < n_blocks - 1:
            pmats.append(_deinterleave_matrix(wi // 2))
            pmat_specs.append(pl.BlockSpec((wi // 2, wi // 2), lambda i: (0, 0)))
        hi, wi = hi // 2, wi // 2
        cin_pad = cout_pad

    inputs += pmats
    in_specs += pmat_specs

    cof = block_dims[-1]["cout_pad"]
    out_shape = jax.ShapeDtypeStruct((n, hi, wi, cof), jnp.float32)
    out_spec = pl.BlockSpec((1, hi, wi, cof), lambda i: (i, 0, 0, 0))

    scratch_shapes = [
        pltpu.VMEM((block_dims[b]["hi"] + 2,
                    (block_dims[b]["wi"] + 2) // 2,
                    2 * block_dims[b]["cin_pad"]), jnp.float32)
        for b in range(1, n_blocks)
    ]

    out = pl.pallas_call(
        _make_fused_kernel(block_dims),
        out_shape=out_shape,
        grid=(n,),
        in_specs=in_specs,
        out_specs=out_spec,
        scratch_shapes=scratch_shapes,
        compiler_params=pltpu.CompilerParams(
            dimension_semantics=("parallel",)),
    )(*inputs)

    cout_real = params[-1][0].shape[0]
    return jnp.transpose(out[..., :cout_real], (0, 3, 1, 2))      # back to NCHW


# --------------------------------- reference -------------------------------- #
def reference_block(x, w, b, scale, shift):
    """Pure-JAX reference matching the kernel's numerics (bf16 operands, f32 accum)."""
    xq = x.astype(jnp.bfloat16).astype(jnp.float32)
    wq = w.astype(jnp.bfloat16).astype(jnp.float32)
    y = jax.lax.conv_general_dilated(
        xq, wq, window_strides=(2, 2), padding=((1, 1), (1, 1)),
        dimension_numbers=("NCHW", "OIHW", "NCHW"),
        precision=jax.lax.Precision.HIGHEST)
    y = y + b.reshape(1, -1, 1, 1)
    y = jnp.where(y >= 0, y, 0.2 * y)
    y = y * scale.reshape(1, -1, 1, 1) + shift.reshape(1, -1, 1, 1)
    return y


# ------------------------------------ main ----------------------------------- #
if __name__ == "__main__":
    # CNNModule(out_size=16, n_blocks=2, ndf=8, output_nch=3, "bn"), eval mode.
    out_size, n_blocks, ndf, output_nch = 16, 2, 8, 3
    assert out_size % 2 ** n_blocks == 0 and n_blocks > 0

    key = jax.random.PRNGKey(0)
    keys = jax.random.split(key, 32)
    kit = iter(range(32))

    params = []
    in_ch = output_nch
    mult = ndf
    for i in range(n_blocks):
        if i == 0:
            out_ch = ndf                       # block 0: output_nch -> ndf (no norm)
        else:
            out_ch = 2 * mult                  # block i>0: mult -> 2*mult (+ norm)
            mult = out_ch
        w = 0.1 * jax.random.normal(keys[next(kit)], (out_ch, in_ch, 4, 4), jnp.float32)
        b = 0.1 * jax.random.normal(keys[next(kit)], (out_ch,), jnp.float32)
        if i == 0:
            scale = jnp.ones((out_ch,), jnp.float32)
            shift = jnp.zeros((out_ch,), jnp.float32)
        else:
            # eval-mode norm: scale = gamma / sqrt(var+eps), shift = beta - mean*scale
            gamma = 1.0 + 0.1 * jax.random.normal(keys[next(kit)], (out_ch,), jnp.float32)
            beta = 0.1 * jax.random.normal(keys[next(kit)], (out_ch,), jnp.float32)
            rmean = 0.05 * jax.random.normal(keys[next(kit)], (out_ch,), jnp.float32)
            rvar = 1.0 + 0.1 * jnp.abs(jax.random.normal(keys[next(kit)], (out_ch,), jnp.float32))
            scale = gamma / jnp.sqrt(rvar + 1e-5)
            shift = beta - rmean * scale
        params.append((w, b, scale, shift))
        in_ch = out_ch

    x = jax.random.normal(keys[next(kit)], (2, output_nch, out_size, out_size), jnp.float32)

    out = jax.jit(cnn_module_forward)(x, params)
    out = jax.block_until_ready(out)

    ref = x
    for (w, b, scale, shift) in params:
        ref = reference_block(ref, w, b, scale, shift)

    final = out_size // 2 ** n_blocks
    assert out.shape == (2, params[-1][0].shape[0], final, final), out.shape
    err = float(jnp.max(jnp.abs(out - ref)))
    assert jnp.allclose(out, ref, atol=5e-3, rtol=5e-3), err
    print("KERNEL_OK")
</pallas_src>

<mosaic_0001>
module attributes {stable_mosaic.version = 11 : i64} {
  func.func @kernel(%arg0: i32, %arg1: memref<1x18x9x128xf32, #tpu.memory_space<vmem>>, %arg2: memref<8x128x128xbf16, #tpu.memory_space<vmem>>, %arg3: memref<1x128xf32, #tpu.memory_space<vmem>>, %arg4: memref<1x128xf32, #tpu.memory_space<vmem>>, %arg5: memref<1x128xf32, #tpu.memory_space<vmem>>, %arg6: memref<8x256x128xbf16, #tpu.memory_space<vmem>>, %arg7: memref<1x128xf32, #tpu.memory_space<vmem>>, %arg8: memref<1x128xf32, #tpu.memory_space<vmem>>, %arg9: memref<1x128xf32, #tpu.memory_space<vmem>>, %arg10: memref<8x8xf32, #tpu.memory_space<vmem>>, %arg11: memref<1x4x4x128xf32, #tpu.memory_space<vmem>>, %arg12: memref<10x5x256xf32, #tpu.memory_space<vmem>>) attributes {dimension_semantics = [#tpu.dimension_semantics<parallel>], iteration_bounds = array<i64: 2>, scalar_prefetch = 0 : i64, scratch_operands = 1 : i64, tpu.core_type = #tpu.core_type<tc>, window_params = [{transform_indices = @transform_0, window_bounds = array<i64: 1, 18, 9, 128>}, {pipeline_mode = #tpu.pipeline_mode<synchronous>, transform_indices = @transform_1, window_bounds = array<i64: 8, 128, 128>}, {pipeline_mode = #tpu.pipeline_mode<synchronous>, transform_indices = @transform_2, window_bounds = array<i64: 1, 128>}, {pipeline_mode = #tpu.pipeline_mode<synchronous>, transform_indices = @transform_3, window_bounds = array<i64: 1, 128>}, {pipeline_mode = #tpu.pipeline_mode<synchronous>, transform_indices = @transform_4, window_bounds = array<i64: 1, 128>}, {pipeline_mode = #tpu.pipeline_mode<synchronous>, transform_indices = @transform_5, window_bounds = array<i64: 8, 256, 128>}, {pipeline_mode = #tpu.pipeline_mode<synchronous>, transform_indices = @transform_6, window_bounds = array<i64: 1, 128>}, {pipeline_mode = #tpu.pipeline_mode<synchronous>, transform_indices = @transform_7, window_bounds = array<i64: 1, 128>}, {pipeline_mode = #tpu.pipeline_mode<synchronous>, transform_indices = @transform_8, window_bounds = array<i64: 1, 128>}, {pipeline_mode = #tpu.pipeline_mode<synchronous>, transform_indices = @transform_9, window_bounds = array<i64: 8, 8>}, {transform_indices = @transform_10, window_bounds = array<i64: 1, 4, 4, 128>}]} {
    %cst = arith.constant 0.000000e+00 : f32
    %0 = vector.broadcast %cst : f32 to vector<8x128xf32>
    %cst_0 = arith.constant 0.000000e+00 : f32
    %1 = vector.broadcast %cst_0 : f32 to vector<8x128xf32>
    %cst_1 = arith.constant 0.000000e+00 : f32
    %2 = vector.broadcast %cst_1 : f32 to vector<8x128xf32>
    %cst_2 = arith.constant 0.000000e+00 : f32
    %3 = vector.broadcast %cst_2 : f32 to vector<8x128xf32>
    %cst_3 = arith.constant 0.000000e+00 : f32
    %4 = vector.broadcast %cst_3 : f32 to vector<8x128xf32>
    %cst_4 = arith.constant 0.000000e+00 : f32
    %5 = vector.broadcast %cst_4 : f32 to vector<8x128xf32>
    %cst_5 = arith.constant 0.000000e+00 : f32
    %6 = vector.broadcast %cst_5 : f32 to vector<8x128xf32>
    %cst_6 = arith.constant 0.000000e+00 : f32
    %7 = vector.broadcast %cst_6 : f32 to vector<8x128xf32>
    %c0 = arith.constant 0 : index
    %c0_7 = arith.constant 0 : index
    %c0_8 = arith.constant 0 : index
    %8 = vector.load %arg2[%c0, %c0_7, %c0_8] : memref<8x128x128xbf16, #tpu.memory_space<vmem>>, vector<1x128x128xbf16>
    %9 = vector.shape_cast %8 : vector<1x128x128xbf16> to vector<128x128xbf16>
    %c0_9 = arith.constant 0 : index
    %c0_10 = arith.constant 0 : index
    %c0_11 = arith.constant 0 : index
    %c0_12 = arith.constant 0 : index
    %10 = vector.load %arg1[%c0_9, %c0_10, %c0_11, %c0_12] : memref<1x18x9x128xf32, #tpu.memory_space<vmem>>, vector<1x1x8x128xf32>
    %11 = vector.shape_cast %10 : vector<1x1x8x128xf32> to vector<8x128xf32>
    %12 = arith.truncf %11 : vector<8x128xf32> to vector<8x128xbf16>
    %cst_13 = arith.constant dense<0.000000e+00> : vector<8x128xf32>
    %13 = tpu.matmul %12, %9, %cst_13 {dimension_numbers = #tpu.dot_dimension_numbers<[1], [0], [0], [1], [0, 0, 1, 1], [], []>} : vector<8x128xbf16>, vector<128x128xbf16>, vector<8x128xf32> -> vector<8x128xf32>
    %14 = arith.addf %0, %13 : vector<8x128xf32>
    %c0_14 = arith.constant 0 : index
    %c2 = arith.constant 2 : index
    %c0_15 = arith.constant 0 : index
    %c0_16 = arith.constant 0 : index
    %15 = vector.load %arg1[%c0_14, %c2, %c0_15, %c0_16] : memref<1x18x9x128xf32, #tpu.memory_space<vmem>>, vector<1x1x8x128xf32>
    %16 = vector.shape_cast %15 : vector<1x1x8x128xf32> to vector<8x128xf32>
    %17 = arith.truncf %16 : vector<8x128xf32> to vector<8x128xbf16>
    %cst_17 = arith.constant dense<0.000000e+00> : vector<8x128xf32>
    %18 = tpu.matmul %17, %9, %cst_17 {dimension_numbers = #tpu.dot_dimension_numbers<[1], [0], [0], [1], [0, 0, 1, 1], [], []>} : vector<8x128xbf16>, vector<128x128xbf16>, vector<8x128xf32> -> vector<8x128xf32>
    %19 = arith.addf %1, %18 : vector<8x128xf32>
    %c0_18 = arith.constant 0 : index
    %c4 = arith.constant 4 : index
    %c0_19 = arith.constant 0 : index
    %c0_20 = arith.constant 0 : index
    %20 = vector.load %arg1[%c0_18, %c4, %c0_19, %c0_20] : memref<1x18x9x128xf32, #tpu.memory_space<vmem>>, vector<1x1x8x128xf32>
    %21 = vector.shape_cast %20 : vector<1x1x8x128xf32> to vector<8x128xf32>
    %22 = arith.truncf %21 : vector<8x128xf32> to vector<8x128xbf16>
    %cst_21 = arith.constant dense<0.000000e+00> : vector<8x128xf32>
    %23 = tpu.matmul %22, %9, %cst_21 {dimension_numbers = #tpu.dot_dimension_numbers<[1], [0], [0], [1], [0, 0, 1, 1], [], []>} : vector<8x128xbf16>, vector<128x128xbf16>, vector<8x128xf32> -> vector<8x128xf32>
    %24 = arith.addf %2, %23 : vector<8x128xf32>
    %c0_22 = arith.constant 0 : index
    %c6 = arith.constant 6 : index
    %c0_23 = arith.constant 0 : index
    %c0_24 = arith.constant 0 : index
    %25 = vector.load %arg1[%c0_22, %c6, %c0_23, %c0_24] : memref<1x18x9x128xf32, #tpu.memory_space<vmem>>, vector<1x1x8x128xf32>
    %26 = vector.shape_cast %25 : vector<1x1x8x128xf32> to vector<8x128xf32>
    %27 = arith.truncf %26 : vector<8x128xf32> to vector<8x128xbf16>
    %cst_25 = arith.constant dense<0.000000e+00> : vector<8x128xf32>
    %28 = tpu.matmul %27, %9, %cst_25 {dimension_numbers = #tpu.dot_dimension_numbers<[1], [0], [0], [1], [0, 0, 1, 1], [], []>} : vector<8x128xbf16>, vector<128x128xbf16>, vector<8x128xf32> -> vector<8x128xf32>
    %29 = arith.addf %3, %28 : vector<8x128xf32>
    %c0_26 = arith.constant 0 : index
    %c8 = arith.constant 8 : index
    %c0_27 = arith.constant 0 : index
    %c0_28 = arith.constant 0 : index
    %30 = vector.load %arg1[%c0_26, %c8, %c0_27, %c0_28] : memref<1x18x9x128xf32, #tpu.memory_space<vmem>>, vector<1x1x8x128xf32>
    %31 = vector.shape_cast %30 : vector<1x1x8x128xf32> to vector<8x128xf32>
    %32 = arith.truncf %31 : vector<8x128xf32> to vector<8x128xbf16>
    %cst_29 = arith.constant dense<0.000000e+00> : vector<8x128xf32>
    %33 = tpu.matmul %32, %9, %cst_29 {dimension_numbers = #tpu.dot_dimension_numbers<[1], [0], [0], [1], [0, 0, 1, 1], [], []>} : vector<8x128xbf16>, vector<128x128xbf16>, vector<8x128xf32> -> vector<8x128xf32>
    %34 = arith.addf %4, %33 : vector<8x128xf32>
    %c0_30 = arith.constant 0 : index
    %c10 = arith.constant 10 : index
    %c0_31 = arith.constant 0 : index
    %c0_32 = arith.constant 0 : index
    %35 = vector.load %arg1[%c0_30, %c10, %c0_31, %c0_32] : memref<1x18x9x128xf32, #tpu.memory_space<vmem>>, vector<1x1x8x128xf32>
    %36 = vector.shape_cast %35 : vector<1x1x8x128xf32> to vector<8x128xf32>
    %37 = arith.truncf %36 : vector<8x128xf32> to vector<8x128xbf16>
    %cst_33 = arith.constant dense<0.000000e+00> : vector<8x128xf32>
    %38 = tpu.matmul %37, %9, %cst_33 {dimension_numbers = #tpu.dot_dimension_numbers<[1], [0], [0], [1], [0, 0, 1, 1], [], []>} : vector<8x128xbf16>, vector<128x128xbf16>, vector<8x128xf32> -> vector<8x128xf32>
    %39 = arith.addf %5, %38 : vector<8x128xf32>
    %c0_34 = arith.constant 0 : index
    %c12 = arith.constant 12 : index
    %c0_35 = arith.constant 0 : index
    %c0_36 = arith.constant 0 : index
    %40 = vector.load %arg1[%c0_34, %c12, %c0_35, %c0_36] : memref<1x18x9x128xf32, #tpu.memory_space<vmem>>, vector<1x1x8x128xf32>
    %41 = vector.shape_cast %40 : vector<1x1x8x128xf32> to vector<8x128xf32>
    %42 = arith.truncf %41 : vector<8x128xf32> to vector<8x128xbf16>
    %cst_37 = arith.constant dense<0.000000e+00> : vector<8x128xf32>
    %43 = tpu.matmul %42, %9, %cst_37 {dimension_numbers = #tpu.dot_dimension_numbers<[1], [0], [0], [1], [0, 0, 1, 1], [], []>} : vector<8x128xbf16>, vector<128x128xbf16>, vector<8x128xf32> -> vector<8x128xf32>
    %44 = arith.addf %6, %43 : vector<8x128xf32>
    %c0_38 = arith.constant 0 : index
    %c14 = arith.constant 14 : index
    %c0_39 = arith.constant 0 : index
    %c0_40 = arith.constant 0 : index
    %45 = vector.load %arg1[%c0_38, %c14, %c0_39, %c0_40] : memref<1x18x9x128xf32, #tpu.memory_space<vmem>>, vector<1x1x8x128xf32>
    %46 = vector.shape_cast %45 : vector<1x1x8x128xf32> to vector<8x128xf32>
    %47 = arith.truncf %46 : vector<8x128xf32> to vector<8x128xbf16>
    %cst_41 = arith.constant dense<0.000000e+00> : vector<8x128xf32>
    %48 = tpu.matmul %47, %9, %cst_41 {dimension_numbers = #tpu.dot_dimension_numbers<[1], [0], [0], [1], [0, 0, 1, 1], [], []>} : vector<8x128xbf16>, vector<128x128xbf16>, vector<8x128xf32> -> vector<8x128xf32>
    %49 = arith.addf %7, %48 : vector<8x128xf32>
    %c1 = arith.constant 1 : index
    %c0_42 = arith.constant 0 : index
    %c0_43 = arith.constant 0 : index
    %50 = vector.load %arg2[%c1, %c0_42, %c0_43] : memref<8x128x128xbf16, #tpu.memory_space<vmem>>, vector<1x128x128xbf16>
    %51 = vector.shape_cast %50 : vector<1x128x128xbf16> to vector<128x128xbf16>
    %c0_44 = arith.constant 0 : index
    %c0_45 = arith.constant 0 : index
    %c1_46 = arith.constant 1 : index
    %c0_47 = arith.constant 0 : index
    %52 = vector.load %arg1[%c0_44, %c0_45, %c1_46, %c0_47] : memref<1x18x9x128xf32, #tpu.memory_space<vmem>>, vector<1x1x8x128xf32>
    %53 = vector.shape_cast %52 : vector<1x1x8x128xf32> to vector<8x128xf32>
    %54 = arith.truncf %53 : vector<8x128xf32> to vector<8x128xbf16>
    %cst_48 = arith.constant dense<0.000000e+00> : vector<8x128xf32>
    %55 = tpu.matmul %54, %51, %cst_48 {dimension_numbers = #tpu.dot_dimension_numbers<[1], [0], [0], [1], [0, 0, 1, 1], [], []>} : vector<8x128xbf16>, vector<128x128xbf16>, vector<8x128xf32> -> vector<8x128xf32>
    %56 = arith.addf %14, %55 : vector<8x128xf32>
    %c0_49 = arith.constant 0 : index
    %c2_50 = arith.constant 2 : index
    %c1_51 = arith.constant 1 : index
    %c0_52 = arith.constant 0 : index
    %57 = vector.load %arg1[%c0_49, %c2_50, %c1_51, %c0_52] : memref<1x18x9x128xf32, #tpu.memory_space<vmem>>, vector<1x1x8x128xf32>
    %58 = vector.shape_cast %57 : vector<1x1x8x128xf32> to vector<8x128xf32>
    %59 = arith.truncf %58 : vector<8x128xf32> to vector<8x128xbf16>
    %cst_53 = arith.constant dense<0.000000e+00> : vector<8x128xf32>
    %60 = tpu.matmul %59, %51, %cst_53 {dimension_numbers = #tpu.dot_dimension_numbers<[1], [0], [0], [1], [0, 0, 1, 1], [], []>} : vector<8x128xbf16>, vector<128x128xbf16>, vector<8x128xf32> -> vector<8x128xf32>
    %61 = arith.addf %19, %60 : vector<8x128xf32>
    %c0_54 = arith.constant 0 : index
    %c4_55 = arith.constant 4 : index
    %c1_56 = arith.constant 1 : index
    %c0_57 = arith.constant 0 : index
    %62 = vector.load %arg1[%c0_54, %c4_55, %c1_56, %c0_57] : memref<1x18x9x128xf32, #tpu.memory_space<vmem>>, vector<1x1x8x128xf32>
    %63 = vector.shape_cast %62 : vector<1x1x8x128xf32> to vector<8x128xf32>
    %64 = arith.truncf %63 : vector<8x128xf32> to vector<8x128xbf16>
    %cst_58 = arith.constant dense<0.000000e+00> : vector<8x128xf32>
    %65 = tpu.matmul %64, %51, %cst_58 {dimension_numbers = #tpu.dot_dimension_numbers<[1], [0], [0], [1], [0, 0, 1, 1], [], []>} : vector<8x128xbf16>, vector<128x128xbf16>, vector<8x128xf32> -> vector<8x128xf32>
    %66 = arith.addf %24, %65 : vector<8x128xf32>
    %c0_59 = arith.constant 0 : index
    %c6_60 = arith.constant 6 : index
    %c1_61 = arith.constant 1 : index
    %c0_62 = arith.constant 0 : index
    %67 = vector.load %arg1[%c0_59, %c6_60, %c1_61, %c0_62] : memref<1x18x9x128xf32, #tpu.memory_space<vmem>>, vector<1x1x8x128xf32>
    %68 = vector.shape_cast %67 : vector<1x1x8x128xf32> to vector<8x128xf32>
    %69 = arith.truncf %68 : vector<8x128xf32> to vector<8x128xbf16>
    %cst_63 = arith.constant dense<0.000000e+00> : vector<8x128xf32>
    %70 = tpu.matmul %69, %51, %cst_63 {dimension_numbers = #tpu.dot_dimension_numbers<[1], [0], [0], [1], [0, 0, 1, 1], [], []>} : vector<8x128xbf16>, vector<128x128xbf16>, vector<8x128xf32> -> vector<8x128xf32>
    %71 = arith.addf %29, %70 : vector<8x128xf32>
    %c0_64 = arith.constant 0 : index
    %c8_65 = arith.constant 8 : index
    %c1_66 = arith.constant 1 : index
    %c0_67 = arith.constant 0 : index
    %72 = vector.load %arg1[%c0_64, %c8_65, %c1_66, %c0_67] : memref<1x18x9x128xf32, #tpu.memory_space<vmem>>, vector<1x1x8x128xf32>
    %73 = vector.shape_cast %72 : vector<1x1x8x128xf32> to vector<8x128xf32>
    %74 = arith.truncf %73 : vector<8x128xf32> to vector<8x128xbf16>
    %cst_68 = arith.constant dense<0.000000e+00> : vector<8x128xf32>
    %75 = tpu.matmul %74, %51, %cst_68 {dimension_numbers = #tpu.dot_dimension_numbers<[1], [0], [0], [1], [0, 0, 1, 1], [], []>} : vector<8x128xbf16>, vector<128x128xbf16>, vector<8x128xf32> -> vector<8x128xf32>
    %76 = arith.addf %34, %75 : vector<8x128xf32>
    %c0_69 = arith.constant 0 : index
    %c10_70 = arith.constant 10 : index
    %c1_71 = arith.constant 1 : index
    %c0_72 = arith.constant 0 : index
    %77 = vector.load %arg1[%c0_69, %c10_70, %c1_71, %c0_72] : memref<1x18x9x128xf32, #tpu.memory_space<vmem>>, vector<1x1x8x128xf32>
    %78 = vector.shape_cast %77 : vector<1x1x8x128xf32> to vector<8x128xf32>
    %79 = arith.truncf %78 : vector<8x128xf32> to vector<8x128xbf16>
    %cst_73 = arith.constant dense<0.000000e+00> : vector<8x128xf32>
    %80 = tpu.matmul %79, %51, %cst_73 {dimension_numbers = #tpu.dot_dimension_numbers<[1], [0], [0], [1], [0, 0, 1, 1], [], []>} : vector<8x128xbf16>, vector<128x128xbf16>, vector<8x128xf32> -> vector<8x128xf32>
    %81 = arith.addf %39, %80 : vector<8x128xf32>
    %c0_74 = arith.constant 0 : index
    %c12_75 = arith.constant 12 : index
    %c1_76 = arith.constant 1 : index
    %c0_77 = arith.constant 0 : index
    %82 = vector.load %arg1[%c0_74, %c12_75, %c1_76, %c0_77] : memref<1x18x9x128xf32, #tpu.memory_space<vmem>>, vector<1x1x8x128xf32>
    %83 = vector.shape_cast %82 : vector<1x1x8x128xf32> to vector<8x128xf32>
    %84 = arith.truncf %83 : vector<8x128xf32> to vector<8x128xbf16>
    %cst_78 = arith.constant dense<0.000000e+00> : vector<8x128xf32>
    %85 = tpu.matmul %84, %51, %cst_78 {dimension_numbers = #tpu.dot_dimension_numbers<[1], [0], [0], [1], [0, 0, 1, 1], [], []>} : vector<8x128xbf16>, vector<128x128xbf16>, vector<8x128xf32> -> vector<8x128xf32>
    %86 = arith.addf %44, %85 : vector<8x128xf32>
    %c0_79 = arith.constant 0 : index
    %c14_80 = arith.constant 14 : index
    %c1_81 = arith.constant 1 : index
    %c0_82 = arith.constant 0 : index
    %87 = vector.load %arg1[%c0_79, %c14_80, %c1_81, %c0_82] : memref<1x18x9x128xf32, #tpu.memory_space<vmem>>, vector<1x1x8x128xf32>
    %88 = vector.shape_cast %87 : vector<1x1x8x128xf32> to vector<8x128xf32>
    %89 = arith.truncf %88 : vector<8x128xf32> to vector<8x128xbf16>
    %cst_83 = arith.constant dense<0.000000e+00> : vector<8x128xf32>
    %90 = tpu.matmul %89, %51, %cst_83 {dimension_numbers = #tpu.dot_dimension_numbers<[1], [0], [0], [1], [0, 0, 1, 1], [], []>} : vector<8x128xbf16>, vector<128x128xbf16>, vector<8x128xf32> -> vector<8x128xf32>
    %91 = arith.addf %49, %90 : vector<8x128xf32>
    %c2_84 = arith.constant 2 : index
    %c0_85 = arith.constant 0 : index
    %c0_86 = arith.constant 0 : index
    %92 = vector.load %arg2[%c2_84, %c0_85, %c0_86] : memref<8x128x128xbf16, #tpu.memory_space<vmem>>, vector<1x128x128xbf16>
    %93 = vector.shape_cast %92 : vector<1x128x128xbf16> to vector<128x128xbf16>
    %c0_87 = arith.constant 0 : index
    %c1_88 = arith.constant 1 : index
    %c0_89 = arith.constant 0 : index
    %c0_90 = arith.constant 0 : index
    %94 = vector.load %arg1[%c0_87, %c1_88, %c0_89, %c0_90] : memref<1x18x9x128xf32, #tpu.memory_space<vmem>>, vector<1x1x8x128xf32>
    %95 = vector.shape_cast %94 : vector<1x1x8x128xf32> to vector<8x128xf32>
    %96 = arith.truncf %95 : vector<8x128xf32> to vector<8x128xbf16>
    %cst_91 = arith.constant dense<0.000000e+00> : vector<8x128xf32>
    %97 = tpu.matmul %96, %93, %cst_91 {dimension_numbers = #tpu.dot_dimension_numbers<[1], [0], [0], [1], [0, 0, 1, 1], [], []>} : vector<8x128xbf16>, vector<128x128xbf16>, vector<8x128xf32> -> vector<8x128xf32>
    %98 = arith.addf %56, %97 : vector<8x128xf32>
    %c0_92 = arith.constant 0 : index
    %c3 = arith.constant 3 : index
    %c0_93 = arith.constant 0 : index
    %c0_94 = arith.constant 0 : index
    %99 = vector.load %arg1[%c0_92, %c3, %c0_93, %c0_94] : memref<1x18x9x128xf32, #tpu.memory_space<vmem>>, vector<1x1x8x128xf32>
    %100 = vector.shape_cast %99 : vector<1x1x8x128xf32> to vector<8x128xf32>
    %101 = arith.truncf %100 : vector<8x128xf32> to vector<8x128xbf16>
    %cst_95 = arith.constant dense<0.000000e+00> : vector<8x128xf32>
    %102 = tpu.matmul %101, %93, %cst_95 {dimension_numbers = #tpu.dot_dimension_numbers<[1], [0], [0], [1], [0, 0, 1, 1], [], []>} : vector<8x128xbf16>, vector<128x128xbf16>, vector<8x128xf32> -> vector<8x128xf32>
    %103 = arith.addf %61, %102 : vector<8x128xf32>
    %c0_96 = arith.constant 0 : index
    %c5 = arith.constant 5 : index
    %c0_97 = arith.constant 0 : index
    %c0_98 = arith.constant 0 : index
    %104 = vector.load %arg1[%c0_96, %c5, %c0_97, %c0_98] : memref<1x18x9x128xf32, #tpu.memory_space<vmem>>, vector<1x1x8x128xf32>
    %105 = vector.shape_cast %104 : vector<1x1x8x128xf32> to vector<8x128xf32>
    %106 = arith.truncf %105 : vector<8x128xf32> to vector<8x128xbf16>
    %cst_99 = arith.constant dense<0.000000e+00> : vector<8x128xf32>
    %107 = tpu.matmul %106, %93, %cst_99 {dimension_numbers = #tpu.dot_dimension_numbers<[1], [0], [0], [1], [0, 0, 1, 1], [], []>} : vector<8x128xbf16>, vector<128x128xbf16>, vector<8x128xf32> -> vector<8x128xf32>
    %108 = arith.addf %66, %107 : vector<8x128xf32>
    %c0_100 = arith.constant 0 : index
    %c7 = arith.constant 7 : index
    %c0_101 = arith.constant 0 : index
    %c0_102 = arith.constant 0 : index
    %109 = vector.load %arg1[%c0_100, %c7, %c0_101, %c0_102] : memref<1x18x9x128xf32, #tpu.memory_space<vmem>>, vector<1x1x8x128xf32>
    %110 = vector.shape_cast %109 : vector<1x1x8x128xf32> to vector<8x128xf32>
    %111 = arith.truncf %110 : vector<8x128xf32> to vector<8x128xbf16>
    %cst_103 = arith.constant dense<0.000000e+00> : vector<8x128xf32>
    %112 = tpu.matmul %111, %93, %cst_103 {dimension_numbers = #tpu.dot_dimension_numbers<[1], [0], [0], [1], [0, 0, 1, 1], [], []>} : vector<8x128xbf16>, vector<128x128xbf16>, vector<8x128xf32> -> vector<8x128xf32>
    %113 = arith.addf %71, %112 : vector<8x128xf32>
    %c0_104 = arith.constant 0 : index
    %c9 = arith.constant 9 : index
    %c0_105 = arith.constant 0 : index
    %c0_106 = arith.constant 0 : index
    %114 = vector.load %arg1[%c0_104, %c9, %c0_105, %c0_106] : memref<1x18x9x128xf32, #tpu.memory_space<vmem>>, vector<1x1x8x128xf32>
    %115 = vector.shape_cast %114 : vector<1x1x8x128xf32> to vector<8x128xf32>
    %116 = arith.truncf %115 : vector<8x128xf32> to vector<8x128xbf16>
    %cst_107 = arith.constant dense<0.000000e+00> : vector<8x128xf32>
    %117 = tpu.matmul %116, %93, %cst_107 {dimension_numbers = #tpu.dot_dimension_numbers<[1], [0], [0], [1], [0, 0, 1, 1], [], []>} : vector<8x128xbf16>, vector<128x128xbf16>, vector<8x128xf32> -> vector<8x128xf32>
    %118 = arith.addf %76, %117 : vector<8x128xf32>
    %c0_108 = arith.constant 0 : index
    %c11 = arith.constant 11 : index
    %c0_109 = arith.constant 0 : index
    %c0_110 = arith.constant 0 : index
    %119 = vector.load %arg1[%c0_108, %c11, %c0_109, %c0_110] : memref<1x18x9x128xf32, #tpu.memory_space<vmem>>, vector<1x1x8x128xf32>
    %120 = vector.shape_cast %119 : vector<1x1x8x128xf32> to vector<8x128xf32>
    %121 = arith.truncf %120 : vector<8x128xf32> to vector<8x128xbf16>
    %cst_111 = arith.constant dense<0.000000e+00> : vector<8x128xf32>
    %122 = tpu.matmul %121, %93, %cst_111 {dimension_numbers = #tpu.dot_dimension_numbers<[1], [0], [0], [1], [0, 0, 1, 1], [], []>} : vector<8x128xbf16>, vector<128x128xbf16>, vector<8x128xf32> -> vector<8x128xf32>
    %123 = arith.addf %81, %122 : vector<8x128xf32>
    %c0_112 = arith.constant 0 : index
    %c13 = arith.constant 13 : index
    %c0_113 = arith.constant 0 : index
    %c0_114 = arith.constant 0 : index
    %124 = vector.load %arg1[%c0_112, %c13, %c0_113, %c0_114] : memref<1x18x9x128xf32, #tpu.memory_space<vmem>>, vector<1x1x8x128xf32>
    %125 = vector.shape_cast %124 : vector<1x1x8x128xf32> to vector<8x128xf32>
    %126 = arith.truncf %125 : vector<8x128xf32> to vector<8x128xbf16>
    %cst_115 = arith.constant dense<0.000000e+00> : vector<8x128xf32>
    %127 = tpu.matmul %126, %93, %cst_115 {dimension_numbers = #tpu.dot_dimension_numbers<[1], [0], [0], [1], [0, 0, 1, 1], [], []>} : vector<8x128xbf16>, vector<128x128xbf16>, vector<8x128xf32> -> vector<8x128xf32>
    %128 = arith.addf %86, %127 : vector<8x128xf32>
    %c0_116 = arith.constant 0 : index
    %c15 = arith.constant 15 : index
    %c0_117 = arith.constant 0 : index
    %c0_118 = arith.constant 0 : index
    %129 = vector.load %arg1[%c0_116, %c15, %c0_117, %c0_118] : memref<1x18x9x128xf32, #tpu.memory_space<vmem>>, vector<1x1x8x128xf32>
    %130 = vector.shape_cast %129 : vector<1x1x8x128xf32> to vector<8x128xf32>
    %131 = arith.truncf %130 : vector<8x128xf32> to vector<8x128xbf16>
    %cst_119 = arith.constant dense<0.000000e+00> : vector<8x128xf32>
    %132 = tpu.matmul %131, %93, %cst_119 {dimension_numbers = #tpu.dot_dimension_numbers<[1], [0], [0], [1], [0, 0, 1, 1], [], []>} : vector<8x128xbf16>, vector<128x128xbf16>, vector<8x128xf32> -> vector<8x128xf32>
    %133 = arith.addf %91, %132 : vector<8x128xf32>
    %c3_120 = arith.constant 3 : index
    %c0_121 = arith.constant 0 : index
    %c0_122 = arith.constant 0 : index
    %134 = vector.load %arg2[%c3_120, %c0_121, %c0_122] : memref<8x128x128xbf16, #tpu.memory_space<vmem>>, vector<1x128x128xbf16>
    %135 = vector.shape_cast %134 : vector<1x128x128xbf16> to vector<128x128xbf16>
    %c0_123 = arith.constant 0 : index
    %c1_124 = arith.constant 1 : index
    %c1_125 = arith.constant 1 : index
    %c0_126 = arith.constant 0 : index
    %136 = vector.load %arg1[%c0_123, %c1_124, %c1_125, %c0_126] : memref<1x18x9x128xf32, #tpu.memory_space<vmem>>, vector<1x1x8x128xf32>
    %137 = vector.shape_cast %136 : vector<1x1x8x128xf32> to vector<8x128xf32>
    %138 = arith.truncf %137 : vector<8x128xf32> to vector<8x128xbf16>
    %cst_127 = arith.constant dense<0.000000e+00> : vector<8x128xf32>
    %139 = tpu.matmul %138, %135, %cst_127 {dimension_numbers = #tpu.dot_dimension_numbers<[1], [0], [0], [1], [0, 0, 1, 1], [], []>} : vector<8x128xbf16>, vector<128x128xbf16>, vector<8x128xf32> -> vector<8x128xf32>
    %140 = arith.addf %98, %139 : vector<8x128xf32>
    %c0_128 = arith.constant 0 : index
    %c3_129 = arith.constant 3 : index
    %c1_130 = arith.constant 1 : index
    %c0_131 = arith.constant 0 : index
    %141 = vector.load %arg1[%c0_128, %c3_129, %c1_130, %c0_131] : memref<1x18x9x128xf32, #tpu.memory_space<vmem>>, vector<1x1x8x128xf32>
    %142 = vector.shape_cast %141 : vector<1x1x8x128xf32> to vector<8x128xf32>
    %143 = arith.truncf %142 : vector<8x128xf32> to vector<8x128xbf16>
    %cst_132 = arith.constant dense<0.000000e+00> : vector<8x128xf32>
    %144 = tpu.matmul %143, %135, %cst_132 {dimension_numbers = #tpu.dot_dimension_numbers<[1], [0], [0], [1], [0, 0, 1, 1], [], []>} : vector<8x128xbf16>, vector<128x128xbf16>, vector<8x128xf32> -> vector<8x128xf32>
    %145 = arith.addf %103, %144 : vector<8x128xf32>
    %c0_133 = arith.constant 0 : index
    %c5_134 = arith.constant 5 : index
    %c1_135 = arith.constant 1 : index
    %c0_136 = arith.constant 0 : index
    %146 = vector.load %arg1[%c0_133, %c5_134, %c1_135, %c0_136] : memref<1x18x9x128xf32, #tpu.memory_space<vmem>>, vector<1x1x8x128xf32>
    %147 = vector.shape_cast %146 : vector<1x1x8x128xf32> to vector<8x128xf32>
    %148 = arith.truncf %147 : vector<8x128xf32> to vector<8x128xbf16>
    %cst_137 = arith.constant dense<0.000000e+00> : vector<8x128xf32>
    %149 = tpu.matmul %148, %135, %cst_137 {dimension_numbers = #tpu.dot_dimension_numbers<[1], [0], [0], [1], [0, 0, 1, 1], [], []>} : vector<8x128xbf16>, vector<128x128xbf16>, vector<8x128xf32> -> vector<8x128xf32>
    %150 = arith.addf %108, %149 : vector<8x128xf32>
    %c0_138 = arith.constant 0 : index
    %c7_139 = arith.constant 7 : index
    %c1_140 = arith.constant 1 : index
    %c0_141 = arith.constant 0 : index
    %151 = vector.load %arg1[%c0_138, %c7_139, %c1_140, %c0_141] : memref<1x18x9x128xf32, #tpu.memory_space<vmem>>, vector<1x1x8x128xf32>
    %152 = vector.shape_cast %151 : vector<1x1x8x128xf32> to vector<8x128xf32>
    %153 = arith.truncf %152 : vector<8x128xf32> to vector<8x128xbf16>
    %cst_142 = arith.constant dense<0.000000e+00> : vector<8x128xf32>
    %154 = tpu.matmul %153, %135, %cst_142 {dimension_numbers = #tpu.dot_dimension_numbers<[1], [0], [0], [1], [0, 0, 1, 1], [], []>} : vector<8x128xbf16>, vector<128x128xbf16>, vector<8x128xf32> -> vector<8x128xf32>
    %155 = arith.addf %113, %154 : vector<8x128xf32>
    %c0_143 = arith.constant 0 : index
    %c9_144 = arith.constant 9 : index
    %c1_145 = arith.constant 1 : index
    %c0_146 = arith.constant 0 : index
    %156 = vector.load %arg1[%c0_143, %c9_144, %c1_145, %c0_146] : memref<1x18x9x128xf32, #tpu.memory_space<vmem>>, vector<1x1x8x128xf32>
    %157 = vector.shape_cast %156 : vector<1x1x8x128xf32> to vector<8x128xf32>
    %158 = arith.truncf %157 : vector<8x128xf32> to vector<8x128xbf16>
    %cst_147 = arith.constant dense<0.000000e+00> : vector<8x128xf32>
    %159 = tpu.matmul %158, %135, %cst_147 {dimension_numbers = #tpu.dot_dimension_numbers<[1], [0], [0], [1], [0, 0, 1, 1], [], []>} : vector<8x128xbf16>, vector<128x128xbf16>, vector<8x128xf32> -> vector<8x128xf32>
    %160 = arith.addf %118, %159 : vector<8x128xf32>
    %c0_148 = arith.constant 0 : index
    %c11_149 = arith.constant 11 : index
    %c1_150 = arith.constant 1 : index
    %c0_151 = arith.constant 0 : index
    %161 = vector.load %arg1[%c0_148, %c11_149, %c1_150, %c0_151] : memref<1x18x9x128xf32, #tpu.memory_space<vmem>>, vector<1x1x8x128xf32>
    %162 = vector.shape_cast %161 : vector<1x1x8x128xf32> to vector<8x128xf32>
    %163 = arith.truncf %162 : vector<8x128xf32> to vector<8x128xbf16>
    %cst_152 = arith.constant dense<0.000000e+00> : vector<8x128xf32>
    %164 = tpu.matmul %163, %135, %cst_152 {dimension_numbers = #tpu.dot_dimension_numbers<[1], [0], [0], [1], [0, 0, 1, 1], [], []>} : vector<8x128xbf16>, vector<128x128xbf16>, vector<8x128xf32> -> vector<8x128xf32>
    %165 = arith.addf %123, %164 : vector<8x128xf32>
    %c0_153 = arith.constant 0 : index
    %c13_154 = arith.constant 13 : index
    %c1_155 = arith.constant 1 : index
    %c0_156 = arith.constant 0 : index
    %166 = vector.load %arg1[%c0_153, %c13_154, %c1_155, %c0_156] : memref<1x18x9x128xf32, #tpu.memory_space<vmem>>, vector<1x1x8x128xf32>
    %167 = vector.shape_cast %166 : vector<1x1x8x128xf32> to vector<8x128xf32>
    %168 = arith.truncf %167 : vector<8x128xf32> to vector<8x128xbf16>
    %cst_157 = arith.constant dense<0.000000e+00> : vector<8x128xf32>
    %169 = tpu.matmul %168, %135, %cst_157 {dimension_numbers = #tpu.dot_dimension_numbers<[1], [0], [0], [1], [0, 0, 1, 1], [], []>} : vector<8x128xbf16>, vector<128x128xbf16>, vector<8x128xf32> -> vector<8x128xf32>
    %170 = arith.addf %128, %169 : vector<8x128xf32>
    %c0_158 = arith.constant 0 : index
    %c15_159 = arith.constant 15 : index
    %c1_160 = arith.constant 1 : index
    %c0_161 = arith.constant 0 : index
    %171 = vector.load %arg1[%c0_158, %c15_159, %c1_160, %c0_161] : memref<1x18x9x128xf32, #tpu.memory_space<vmem>>, vector<1x1x8x128xf32>
    %172 = vector.shape_cast %171 : vector<1x1x8x128xf32> to vector<8x128xf32>
    %173 = arith.truncf %172 : vector<8x128xf32> to vector<8x128xbf16>
    %cst_162 = arith.constant dense<0.000000e+00> : vector<8x128xf32>
    %174 = tpu.matmul %173, %135, %cst_162 {dimension_numbers = #tpu.dot_dimension_numbers<[1], [0], [0], [1], [0, 0, 1, 1], [], []>} : vector<8x128xbf16>, vector<128x128xbf16>, vector<8x128xf32> -> vector<8x128xf32>
    %175 = arith.addf %133, %174 : vector<8x128xf32>
    %c4_163 = arith.constant 4 : index
    %c0_164 = arith.constant 0 : index
    %c0_165 = arith.constant 0 : index
    %176 = vector.load %arg2[%c4_163, %c0_164, %c0_165] : memref<8x128x128xbf16, #tpu.memory_space<vmem>>, vector<1x128x128xbf16>
    %177 = vector.shape_cast %176 : vector<1x128x128xbf16> to vector<128x128xbf16>
    %c0_166 = arith.constant 0 : index
    %c2_167 = arith.constant 2 : index
    %c0_168 = arith.constant 0 : index
    %c0_169 = arith.constant 0 : index
    %178 = vector.load %arg1[%c0_166, %c2_167, %c0_168, %c0_169] : memref<1x18x9x128xf32, #tpu.memory_space<vmem>>, vector<1x1x8x128xf32>
    %179 = vector.shape_cast %178 : vector<1x1x8x128xf32> to vector<8x128xf32>
    %180 = arith.truncf %179 : vector<8x128xf32> to vector<8x128xbf16>
    %cst_170 = arith.constant dense<0.000000e+00> : vector<8x128xf32>
    %181 = tpu.matmul %180, %177, %cst_170 {dimension_numbers = #tpu.dot_dimension_numbers<[1], [0], [0], [1], [0, 0, 1, 1], [], []>} : vector<8x128xbf16>, vector<128x128xbf16>, vector<8x128xf32> -> vector<8x128xf32>
    %182 = arith.addf %140, %181 : vector<8x128xf32>
    %c0_171 = arith.constant 0 : index
    %c4_172 = arith.constant 4 : index
    %c0_173 = arith.constant 0 : index
    %c0_174 = arith.constant 0 : index
    %183 = vector.load %arg1[%c0_171, %c4_172, %c0_173, %c0_174] : memref<1x18x9x128xf32, #tpu.memory_space<vmem>>, vector<1x1x8x128xf32>
    %184 = vector.shape_cast %183 : vector<1x1x8x128xf32> to vector<8x128xf32>
    %185 = arith.truncf %184 : vector<8x128xf32> to vector<8x128xbf16>
    %cst_175 = arith.constant dense<0.000000e+00> : vector<8x128xf32>
    %186 = tpu.matmul %185, %177, %cst_175 {dimension_numbers = #tpu.dot_dimension_numbers<[1], [0], [0], [1], [0, 0, 1, 1], [], []>} : vector<8x128xbf16>, vector<128x128xbf16>, vector<8x128xf32> -> vector<8x128xf32>
    %187 = arith.addf %145, %186 : vector<8x128xf32>
    %c0_176 = arith.constant 0 : index
    %c6_177 = arith.constant 6 : index
    %c0_178 = arith.constant 0 : index
    %c0_179 = arith.constant 0 : index
    %188 = vector.load %arg1[%c0_176, %c6_177, %c0_178, %c0_179] : memref<1x18x9x128xf32, #tpu.memory_space<vmem>>, vector<1x1x8x128xf32>
    %189 = vector.shape_cast %188 : vector<1x1x8x128xf32> to vector<8x128xf32>
    %190 = arith.truncf %189 : vector<8x128xf32> to vector<8x128xbf16>
    %cst_180 = arith.constant dense<0.000000e+00> : vector<8x128xf32>
    %191 = tpu.matmul %190, %177, %cst_180 {dimension_numbers = #tpu.dot_dimension_numbers<[1], [0], [0], [1], [0, 0, 1, 1], [], []>} : vector<8x128xbf16>, vector<128x128xbf16>, vector<8x128xf32> -> vector<8x128xf32>
    %192 = arith.addf %150, %191 : vector<8x128xf32>
    %c0_181 = arith.constant 0 : index
    %c8_182 = arith.constant 8 : index
    %c0_183 = arith.constant 0 : index
    %c0_184 = arith.constant 0 : index
    %193 = vector.load %arg1[%c0_181, %c8_182, %c0_183, %c0_184] : memref<1x18x9x128xf32, #tpu.memory_space<vmem>>, vector<1x1x8x128xf32>
    %194 = vector.shape_cast %193 : vector<1x1x8x128xf32> to vector<8x128xf32>
    %195 = arith.truncf %194 : vector<8x128xf32> to vector<8x128xbf16>
    %cst_185 = arith.constant dense<0.000000e+00> : vector<8x128xf32>
    %196 = tpu.matmul %195, %177, %cst_185 {dimension_numbers = #tpu.dot_dimension_numbers<[1], [0], [0], [1], [0, 0, 1, 1], [], []>} : vector<8x128xbf16>, vector<128x128xbf16>, vector<8x128xf32> -> vector<8x128xf32>
    %197 = arith.addf %155, %196 : vector<8x128xf32>
    %c0_186 = arith.constant 0 : index
    %c10_187 = arith.constant 10 : index
    %c0_188 = arith.constant 0 : index
    %c0_189 = arith.constant 0 : index
    %198 = vector.load %arg1[%c0_186, %c10_187, %c0_188, %c0_189] : memref<1x18x9x128xf32, #tpu.memory_space<vmem>>, vector<1x1x8x128xf32>
    %199 = vector.shape_cast %198 : vector<1x1x8x128xf32> to vector<8x128xf32>
    %200 = arith.truncf %199 : vector<8x128xf32> to vector<8x128xbf16>
    %cst_190 = arith.constant dense<0.000000e+00> : vector<8x128xf32>
    %201 = tpu.matmul %200, %177, %cst_190 {dimension_numbers = #tpu.dot_dimension_numbers<[1], [0], [0], [1], [0, 0, 1, 1], [], []>} : vector<8x128xbf16>, vector<128x128xbf16>, vector<8x128xf32> -> vector<8x128xf32>
    %202 = arith.addf %160, %201 : vector<8x128xf32>
    %c0_191 = arith.constant 0 : index
    %c12_192 = arith.constant 12 : index
    %c0_193 = arith.constant 0 : index
    %c0_194 = arith.constant 0 : index
    %203 = vector.load %arg1[%c0_191, %c12_192, %c0_193, %c0_194] : memref<1x18x9x128xf32, #tpu.memory_space<vmem>>, vector<1x1x8x128xf32>
    %204 = vector.shape_cast %203 : vector<1x1x8x128xf32> to vector<8x128xf32>
    %205 = arith.truncf %204 : vector<8x128xf32> to vector<8x128xbf16>
    %cst_195 = arith.constant dense<0.000000e+00> : vector<8x128xf32>
    %206 = tpu.matmul %205, %177, %cst_195 {dimension_numbers = #tpu.dot_dimension_numbers<[1], [0], [0], [1], [0, 0, 1, 1], [], []>} : vector<8x128xbf16>, vector<128x128xbf16>, vector<8x128xf32> -> vector<8x128xf32>
    %207 = arith.addf %165, %206 : vector<8x128xf32>
    %c0_196 = arith.constant 0 : index
    %c14_197 = arith.constant 14 : index
    %c0_198 = arith.constant 0 : index
    %c0_199 = arith.constant 0 : index
    %208 = vector.load %arg1[%c0_196, %c14_197, %c0_198, %c0_199] : memref<1x18x9x128xf32, #tpu.memory_space<vmem>>, vector<1x1x8x128xf32>
    %209 = vector.shape_cast %208 : vector<1x1x8x128xf32> to vector<8x128xf32>
    %210 = arith.truncf %209 : vector<8x128xf32> to vector<8x128xbf16>
    %cst_200 = arith.constant dense<0.000000e+00> : vector<8x128xf32>
    %211 = tpu.matmul %210, %177, %cst_200 {dimension_numbers = #tpu.dot_dimension_numbers<[1], [0], [0], [1], [0, 0, 1, 1], [], []>} : vector<8x128xbf16>, vector<128x128xbf16>, vector<8x128xf32> -> vector<8x128xf32>
    %212 = arith.addf %170, %211 : vector<8x128xf32>
    %c0_201 = arith.constant 0 : index
    %c16 = arith.constant 16 : index
    %c0_202 = arith.constant 0 : index
    %c0_203 = arith.constant 0 : index
    %213 = vector.load %arg1[%c0_201, %c16, %c0_202, %c0_203] : memref<1x18x9x128xf32, #tpu.memory_space<vmem>>, vector<1x1x8x128xf32>
    %214 = vector.shape_cast %213 : vector<1x1x8x128xf32> to vector<8x128xf32>
    %215 = arith.truncf %214 : vector<8x128xf32> to vector<8x128xbf16>
    %cst_204 = arith.constant dense<0.000000e+00> : vector<8x128xf32>
    %216 = tpu.matmul %215, %177, %cst_204 {dimension_numbers = #tpu.dot_dimension_numbers<[1], [0], [0], [1], [0, 0, 1, 1], [], []>} : vector<8x128xbf16>, vector<128x128xbf16>, vector<8x128xf32> -> vector<8x128xf32>
    %217 = arith.addf %175, %216 : vector<8x128xf32>
    %c5_205 = arith.constant 5 : index
    %c0_206 = arith.constant 0 : index
    %c0_207 = arith.constant 0 : index
    %218 = vector.load %arg2[%c5_205, %c0_206, %c0_207] : memref<8x128x128xbf16, #tpu.memory_space<vmem>>, vector<1x128x128xbf16>
    %219 = vector.shape_cast %218 : vector<1x128x128xbf16> to vector<128x128xbf16>
    %c0_208 = arith.constant 0 : index
    %c2_209 = arith.constant 2 : index
    %c1_210 = arith.constant 1 : index
    %c0_211 = arith.constant 0 : index
    %220 = vector.load %arg1[%c0_208, %c2_209, %c1_210, %c0_211] : memref<1x18x9x128xf32, #tpu.memory_space<vmem>>, vector<1x1x8x128xf32>
    %221 = vector.shape_cast %220 : vector<1x1x8x128xf32> to vector<8x128xf32>
    %222 = arith.truncf %221 : vector<8x128xf32> to vector<8x128xbf16>
    %cst_212 = arith.constant dense<0.000000e+00> : vector<8x128xf32>
    %223 = tpu.matmul %222, %219, %cst_212 {dimension_numbers = #tpu.dot_dimension_numbers<[1], [0], [0], [1], [0, 0, 1, 1], [], []>} : vector<8x128xbf16>, vector<128x128xbf16>, vector<8x128xf32> -> vector<8x128xf32>
    %224 = arith.addf %182, %223 : vector<8x128xf32>
    %c0_213 = arith.constant 0 : index
    %c4_214 = arith.constant 4 : index
    %c1_215 = arith.constant 1 : index
    %c0_216 = arith.constant 0 : index
    %225 = vector.load %arg1[%c0_213, %c4_214, %c1_215, %c0_216] : memref<1x18x9x128xf32, #tpu.memory_space<vmem>>, vector<1x1x8x128xf32>
    %226 = vector.shape_cast %225 : vector<1x1x8x128xf32> to vector<8x128xf32>
    %227 = arith.truncf %226 : vector<8x128xf32> to vector<8x128xbf16>
    %cst_217 = arith.constant dense<0.000000e+00> : vector<8x128xf32>
    %228 = tpu.matmul %227, %219, %cst_217 {dimension_numbers = #tpu.dot_dimension_numbers<[1], [0], [0], [1], [0, 0, 1, 1], [], []>} : vector<8x128xbf16>, vector<128x128xbf16>, vector<8x128xf32> -> vector<8x128xf32>
    %229 = arith.addf %187, %228 : vector<8x128xf32>
    %c0_218 = arith.constant 0 : index
    %c6_219 = arith.constant 6 : index
    %c1_220 = arith.constant 1 : index
    %c0_221 = arith.constant 0 : index
    %230 = vector.load %arg1[%c0_218, %c6_219, %c1_220, %c0_221] : memref<1x18x9x128xf32, #tpu.memory_space<vmem>>, vector<1x1x8x128xf32>
    %231 = vector.shape_cast %230 : vector<1x1x8x128xf32> to vector<8x128xf32>
    %232 = arith.truncf %231 : vector<8x128xf32> to vector<8x128xbf16>
    %cst_222 = arith.constant dense<0.000000e+00> : vector<8x128xf32>
    %233 = tpu.matmul %232, %219, %cst_222 {dimension_numbers = #tpu.dot_dimension_numbers<[1], [0], [0], [1], [0, 0, 1, 1], [], []>} : vector<8x128xbf16>, vector<128x128xbf16>, vector<8x128xf32> -> vector<8x128xf32>
    %234 = arith.addf %192, %233 : vector<8x128xf32>
    %c0_223 = arith.constant 0 : index
    %c8_224 = arith.constant 8 : index
    %c1_225 = arith.constant 1 : index
    %c0_226 = arith.constant 0 : index
    %235 = vector.load %arg1[%c0_223, %c8_224, %c1_225, %c0_226] : memref<1x18x9x128xf32, #tpu.memory_space<vmem>>, vector<1x1x8x128xf32>
    %236 = vector.shape_cast %235 : vector<1x1x8x128xf32> to vector<8x128xf32>
    %237 = arith.truncf %236 : vector<8x128xf32> to vector<8x128xbf16>
    %cst_227 = arith.constant dense<0.000000e+00> : vector<8x128xf32>
    %238 = tpu.matmul %237, %219, %cst_227 {dimension_numbers = #tpu.dot_dimension_numbers<[1], [0], [0], [1], [0, 0, 1, 1], [], []>} : vector<8x128xbf16>, vector<128x128xbf16>, vector<8x128xf32> -> vector<8x128xf32>
    %239 = arith.addf %197, %238 : vector<8x128xf32>
    %c0_228 = arith.constant 0 : index
    %c10_229 = arith.constant 10 : index
    %c1_230 = arith.constant 1 : index
    %c0_231 = arith.constant 0 : index
    %240 = vector.load %arg1[%c0_228, %c10_229, %c1_230, %c0_231] : memref<1x18x9x128xf32, #tpu.memory_space<vmem>>, vector<1x1x8x128xf32>
    %241 = vector.shape_cast %240 : vector<1x1x8x128xf32> to vector<8x128xf32>
    %242 = arith.truncf %241 : vector<8x128xf32> to vector<8x128xbf16>
    %cst_232 = arith.constant dense<0.000000e+00> : vector<8x128xf32>
    %243 = tpu.matmul %242, %219, %cst_232 {dimension_numbers = #tpu.dot_dimension_numbers<[1], [0], [0], [1], [0, 0, 1, 1], [], []>} : vector<8x128xbf16>, vector<128x128xbf16>, vector<8x128xf32> -> vector<8x128xf32>
    %244 = arith.addf %202, %243 : vector<8x128xf32>
    %c0_233 = arith.constant 0 : index
    %c12_234 = arith.constant 12 : index
    %c1_235 = arith.constant 1 : index
    %c0_236 = arith.constant 0 : index
    %245 = vector.load %arg1[%c0_233, %c12_234, %c1_235, %c0_236] : memref<1x18x9x128xf32, #tpu.memory_space<vmem>>, vector<1x1x8x128xf32>
    %246 = vector.shape_cast %245 : vector<1x1x8x128xf32> to vector<8x128xf32>
    %247 = arith.truncf %246 : vector<8x128xf32> to vector<8x128xbf16>
    %cst_237 = arith.constant dense<0.000000e+00> : vector<8x128xf32>
    %248 = tpu.matmul %247, %219, %cst_237 {dimension_numbers = #tpu.dot_dimension_numbers<[1], [0], [0], [1], [0, 0, 1, 1], [], []>} : vector<8x128xbf16>, vector<128x128xbf16>, vector<8x128xf32> -> vector<8x128xf32>
    %249 = arith.addf %207, %248 : vector<8x128xf32>
    %c0_238 = arith.constant 0 : index
    %c14_239 = arith.constant 14 : index
    %c1_240 = arith.constant 1 : index
    %c0_241 = arith.constant 0 : index
    %250 = vector.load %arg1[%c0_238, %c14_239, %c1_240, %c0_241] : memref<1x18x9x128xf32, #tpu.memory_space<vmem>>, vector<1x1x8x128xf32>
    %251 = vector.shape_cast %250 : vector<1x1x8x128xf32> to vector<8x128xf32>
    %252 = arith.truncf %251 : vector<8x128xf32> to vector<8x128xbf16>
    %cst_242 = arith.constant dense<0.000000e+00> : vector<8x128xf32>
    %253 = tpu.matmul %252, %219, %cst_242 {dimension_numbers = #tpu.dot_dimension_numbers<[1], [0], [0], [1], [0, 0, 1, 1], [], []>} : vector<8x128xbf16>, vector<128x128xbf16>, vector<8x128xf32> -> vector<8x128xf32>
    %254 = arith.addf %212, %253 : vector<8x128xf32>
    %c0_243 = arith.constant 0 : index
    %c16_244 = arith.constant 16 : index
    %c1_245 = arith.constant 1 : index
    %c0_246 = arith.constant 0 : index
    %255 = vector.load %arg1[%c0_243, %c16_244, %c1_245, %c0_246] : memref<1x18x9x128xf32, #tpu.memory_space<vmem>>, vector<1x1x8x128xf32>
    %256 = vector.shape_cast %255 : vector<1x1x8x128xf32> to vector<8x128xf32>
    %257 = arith.truncf %256 : vector<8x128xf32> to vector<8x128xbf16>
    %cst_247 = arith.constant dense<0.000000e+00> : vector<8x128xf32>
    %258 = tpu.matmul %257, %219, %cst_247 {dimension_numbers = #tpu.dot_dimension_numbers<[1], [0], [0], [1], [0, 0, 1, 1], [], []>} : vector<8x128xbf16>, vector<128x128xbf16>, vector<8x128xf32> -> vector<8x128xf32>
    %259 = arith.addf %217, %258 : vector<8x128xf32>
    %c6_248 = arith.constant 6 : index
    %c0_249 = arith.constant 0 : index
    %c0_250 = arith.constant 0 : index
    %260 = vector.load %arg2[%c6_248, %c0_249, %c0_250] : memref<8x128x128xbf16, #tpu.memory_space<vmem>>, vector<1x128x128xbf16>
    %261 = vector.shape_cast %260 : vector<1x128x128xbf16> to vector<128x128xbf16>
    %c0_251 = arith.constant 0 : index
    %c3_252 = arith.constant 3 : index
    %c0_253 = arith.constant 0 : index
    %c0_254 = arith.constant 0 : index
    %262 = vector.load %arg1[%c0_251, %c3_252, %c0_253, %c0_254] : memref<1x18x9x128xf32, #tpu.memory_space<vmem>>, vector<1x1x8x128xf32>
    %263 = vector.shape_cast %262 : vector<1x1x8x128xf32> to vector<8x128xf32>
    %264 = arith.truncf %263 : vector<8x128xf32> to vector<8x128xbf16>
    %cst_255 = arith.constant dense<0.000000e+00> : vector<8x128xf32>
    %265 = tpu.matmul %264, %261, %cst_255 {dimension_numbers = #tpu.dot_dimension_numbers<[1], [0], [0], [1], [0, 0, 1, 1], [], []>} : vector<8x128xbf16>, vector<128x128xbf16>, vector<8x128xf32> -> vector<8x128xf32>
    %266 = arith.addf %224, %265 : vector<8x128xf32>
    %c0_256 = arith.constant 0 : index
    %c5_257 = arith.constant 5 : index
    %c0_258 = arith.constant 0 : index
    %c0_259 = arith.constant 0 : index
    %267 = vector.load %arg1[%c0_256, %c5_257, %c0_258, %c0_259] : memref<1x18x9x128xf32, #tpu.memory_space<vmem>>, vector<1x1x8x128xf32>
    %268 = vector.shape_cast %267 : vector<1x1x8x128xf32> to vector<8x128xf32>
    %269 = arith.truncf %268 : vector<8x128xf32> to vector<8x128xbf16>
    %cst_260 = arith.constant dense<0.000000e+00> : vector<8x128xf32>
    %270 = tpu.matmul %269, %261, %cst_260 {dimension_numbers = #tpu.dot_dimension_numbers<[1], [0], [0], [1], [0, 0, 1, 1], [], []>} : vector<8x128xbf16>, vector<128x128xbf16>, vector<8x128xf32> -> vector<8x128xf32>
    %271 = arith.addf %229, %270 : vector<8x128xf32>
    %c0_261 = arith.constant 0 : index
    %c7_262 = arith.constant 7 : index
    %c0_263 = arith.constant 0 : index
    %c0_264 = arith.constant 0 : index
    %272 = vector.load %arg1[%c0_261, %c7_262, %c0_263, %c0_264] : memref<1x18x9x128xf32, #tpu.memory_space<vmem>>, vector<1x1x8x128xf32>
    %273 = vector.shape_cast %272 : vector<1x1x8x128xf32> to vector<8x128xf32>
    %274 = arith.truncf %273 : vector<8x128xf32> to vector<8x128xbf16>
    %cst_265 = arith.constant dense<0.000000e+00> : vector<8x128xf32>
    %275 = tpu.matmul %274, %261, %cst_265 {dimension_numbers = #tpu.dot_dimension_numbers<[1], [0], [0], [1], [0, 0, 1, 1], [], []>} : vector<8x128xbf16>, vector<128x128xbf16>, vector<8x128xf32> -> vector<8x128xf32>
    %276 = arith.addf %234, %275 : vector<8x128xf32>
    %c0_266 = arith.constant 0 : index
    %c9_267 = arith.constant 9 : index
    %c0_268 = arith.constant 0 : index
    %c0_269 = arith.constant 0 : index
    %277 = vector.load %arg1[%c0_266, %c9_267, %c0_268, %c0_269] : memref<1x18x9x128xf32, #tpu.memory_space<vmem>>, vector<1x1x8x128xf32>
    %278 = vector.shape_cast %277 : vector<1x1x8x128xf32> to vector<8x128xf32>
    %279 = arith.truncf %278 : vector<8x128xf32> to vector<8x128xbf16>
    %cst_270 = arith.constant dense<0.000000e+00> : vector<8x128xf32>
    %280 = tpu.matmul %279, %261, %cst_270 {dimension_numbers = #tpu.dot_dimension_numbers<[1], [0], [0], [1], [0, 0, 1, 1], [], []>} : vector<8x128xbf16>, vector<128x128xbf16>, vector<8x128xf32> -> vector<8x128xf32>
    %281 = arith.addf %239, %280 : vector<8x128xf32>
    %c0_271 = arith.constant 0 : index
    %c11_272 = arith.constant 11 : index
    %c0_273 = arith.constant 0 : index
    %c0_274 = arith.constant 0 : index
    %282 = vector.load %arg1[%c0_271, %c11_272, %c0_273, %c0_274] : memref<1x18x9x128xf32, #tpu.memory_space<vmem>>, vector<1x1x8x128xf32>
    %283 = vector.shape_cast %282 : vector<1x1x8x128xf32> to vector<8x128xf32>
    %284 = arith.truncf %283 : vector<8x128xf32> to vector<8x128xbf16>
    %cst_275 = arith.constant dense<0.000000e+00> : vector<8x128xf32>
    %285 = tpu.matmul %284, %261, %cst_275 {dimension_numbers = #tpu.dot_dimension_numbers<[1], [0], [0], [1], [0, 0, 1, 1], [], []>} : vector<8x128xbf16>, vector<128x128xbf16>, vector<8x128xf32> -> vector<8x128xf32>
    %286 = arith.addf %244, %285 : vector<8x128xf32>
    %c0_276 = arith.constant 0 : index
    %c13_277 = arith.constant 13 : index
    %c0_278 = arith.constant 0 : index
    %c0_279 = arith.constant 0 : index
    %287 = vector.load %arg1[%c0_276, %c13_277, %c0_278, %c0_279] : memref<1x18x9x128xf32, #tpu.memory_space<vmem>>, vector<1x1x8x128xf32>
    %288 = vector.shape_cast %287 : vector<1x1x8x128xf32> to vector<8x128xf32>
    %289 = arith.truncf %288 : vector<8x128xf32> to vector<8x128xbf16>
    %cst_280 = arith.constant dense<0.000000e+00> : vector<8x128xf32>
    %290 = tpu.matmul %289, %261, %cst_280 {dimension_numbers = #tpu.dot_dimension_numbers<[1], [0], [0], [1], [0, 0, 1, 1], [], []>} : vector<8x128xbf16>, vector<128x128xbf16>, vector<8x128xf32> -> vector<8x128xf32>
    %291 = arith.addf %249, %290 : vector<8x128xf32>
    %c0_281 = arith.constant 0 : index
    %c15_282 = arith.constant 15 : index
    %c0_283 = arith.constant 0 : index
    %c0_284 = arith.constant 0 : index
    %292 = vector.load %arg1[%c0_281, %c15_282, %c0_283, %c0_284] : memref<1x18x9x128xf32, #tpu.memory_space<vmem>>, vector<1x1x8x128xf32>
    %293 = vector.shape_cast %292 : vector<1x1x8x128xf32> to vector<8x128xf32>
    %294 = arith.truncf %293 : vector<8x128xf32> to vector<8x128xbf16>
    %cst_285 = arith.constant dense<0.000000e+00> : vector<8x128xf32>
    %295 = tpu.matmul %294, %261, %cst_285 {dimension_numbers = #tpu.dot_dimension_numbers<[1], [0], [0], [1], [0, 0, 1, 1], [], []>} : vector<8x128xbf16>, vector<128x128xbf16>, vector<8x128xf32> -> vector<8x128xf32>
    %296 = arith.addf %254, %295 : vector<8x128xf32>
    %c0_286 = arith.constant 0 : index
    %c17 = arith.constant 17 : index
    %c0_287 = arith.constant 0 : index
    %c0_288 = arith.constant 0 : index
    %297 = vector.load %arg1[%c0_286, %c17, %c0_287, %c0_288] : memref<1x18x9x128xf32, #tpu.memory_space<vmem>>, vector<1x1x8x128xf32>
    %298 = vector.shape_cast %297 : vector<1x1x8x128xf32> to vector<8x128xf32>
    %299 = arith.truncf %298 : vector<8x128xf32> to vector<8x128xbf16>
    %cst_289 = arith.constant dense<0.000000e+00> : vector<8x128xf32>
    %300 = tpu.matmul %299, %261, %cst_289 {dimension_numbers = #tpu.dot_dimension_numbers<[1], [0], [0], [1], [0, 0, 1, 1], [], []>} : vector<8x128xbf16>, vector<128x128xbf16>, vector<8x128xf32> -> vector<8x128xf32>
    %301 = arith.addf %259, %300 : vector<8x128xf32>
    %c7_290 = arith.constant 7 : index
    %c0_291 = arith.constant 0 : index
    %c0_292 = arith.constant 0 : index
    %302 = vector.load %arg2[%c7_290, %c0_291, %c0_292] : memref<8x128x128xbf16, #tpu.memory_space<vmem>>, vector<1x128x128xbf16>
    %303 = vector.shape_cast %302 : vector<1x128x128xbf16> to vector<128x128xbf16>
    %c0_293 = arith.constant 0 : index
    %c3_294 = arith.constant 3 : index
    %c1_295 = arith.constant 1 : index
    %c0_296 = arith.constant 0 : index
    %304 = vector.load %arg1[%c0_293, %c3_294, %c1_295, %c0_296] : memref<1x18x9x128xf32, #tpu.memory_space<vmem>>, vector<1x1x8x128xf32>
    %305 = vector.shape_cast %304 : vector<1x1x8x128xf32> to vector<8x128xf32>
    %306 = arith.truncf %305 : vector<8x128xf32> to vector<8x128xbf16>
    %cst_297 = arith.constant dense<0.000000e+00> : vector<8x128xf32>
    %307 = tpu.matmul %306, %303, %cst_297 {dimension_numbers = #tpu.dot_dimension_numbers<[1], [0], [0], [1], [0, 0, 1, 1], [], []>} : vector<8x128xbf16>, vector<128x128xbf16>, vector<8x128xf32> -> vector<8x128xf32>
    %308 = arith.addf %266, %307 : vector<8x128xf32>
    %c0_298 = arith.constant 0 : index
    %c5_299 = arith.constant 5 : index
    %c1_300 = arith.constant 1 : index
    %c0_301 = arith.constant 0 : index
    %309 = vector.load %arg1[%c0_298, %c5_299, %c1_300, %c0_301] : memref<1x18x9x128xf32, #tpu.memory_space<vmem>>, vector<1x1x8x128xf32>
    %310 = vector.shape_cast %309 : vector<1x1x8x128xf32> to vector<8x128xf32>
    %311 = arith.truncf %310 : vector<8x128xf32> to vector<8x128xbf16>
    %cst_302 = arith.constant dense<0.000000e+00> : vector<8x128xf32>
    %312 = tpu.matmul %311, %303, %cst_302 {dimension_numbers = #tpu.dot_dimension_numbers<[1], [0], [0], [1], [0, 0, 1, 1], [], []>} : vector<8x128xbf16>, vector<128x128xbf16>, vector<8x128xf32> -> vector<8x128xf32>
    %313 = arith.addf %271, %312 : vector<8x128xf32>
    %c0_303 = arith.constant 0 : index
    %c7_304 = arith.constant 7 : index
    %c1_305 = arith.constant 1 : index
    %c0_306 = arith.constant 0 : index
    %314 = vector.load %arg1[%c0_303, %c7_304, %c1_305, %c0_306] : memref<1x18x9x128xf32, #tpu.memory_space<vmem>>, vector<1x1x8x128xf32>
    %315 = vector.shape_cast %314 : vector<1x1x8x128xf32> to vector<8x128xf32>
    %316 = arith.truncf %315 : vector<8x128xf32> to vector<8x128xbf16>
    %cst_307 = arith.constant dense<0.000000e+00> : vector<8x128xf32>
    %317 = tpu.matmul %316, %303, %cst_307 {dimension_numbers = #tpu.dot_dimension_numbers<[1], [0], [0], [1], [0, 0, 1, 1], [], []>} : vector<8x128xbf16>, vector<128x128xbf16>, vector<8x128xf32> -> vector<8x128xf32>
    %318 = arith.addf %276, %317 : vector<8x128xf32>
    %c0_308 = arith.constant 0 : index
    %c9_309 = arith.constant 9 : index
    %c1_310 = arith.constant 1 : index
    %c0_311 = arith.constant 0 : index
    %319 = vector.load %arg1[%c0_308, %c9_309, %c1_310, %c0_311] : memref<1x18x9x128xf32, #tpu.memory_space<vmem>>, vector<1x1x8x128xf32>
    %320 = vector.shape_cast %319 : vector<1x1x8x128xf32> to vector<8x128xf32>
    %321 = arith.truncf %320 : vector<8x128xf32> to vector<8x128xbf16>
    %cst_312 = arith.constant dense<0.000000e+00> : vector<8x128xf32>
    %322 = tpu.matmul %321, %303, %cst_312 {dimension_numbers = #tpu.dot_dimension_numbers<[1], [0], [0], [1], [0, 0, 1, 1], [], []>} : vector<8x128xbf16>, vector<128x128xbf16>, vector<8x128xf32> -> vector<8x128xf32>
    %323 = arith.addf %281, %322 : vector<8x128xf32>
    %c0_313 = arith.constant 0 : index
    %c11_314 = arith.constant 11 : index
    %c1_315 = arith.constant 1 : index
    %c0_316 = arith.constant 0 : index
    %324 = vector.load %arg1[%c0_313, %c11_314, %c1_315, %c0_316] : memref<1x18x9x128xf32, #tpu.memory_space<vmem>>, vector<1x1x8x128xf32>
    %325 = vector.shape_cast %324 : vector<1x1x8x128xf32> to vector<8x128xf32>
    %326 = arith.truncf %325 : vector<8x128xf32> to vector<8x128xbf16>
    %cst_317 = arith.constant dense<0.000000e+00> : vector<8x128xf32>
    %327 = tpu.matmul %326, %303, %cst_317 {dimension_numbers = #tpu.dot_dimension_numbers<[1], [0], [0], [1], [0, 0, 1, 1], [], []>} : vector<8x128xbf16>, vector<128x128xbf16>, vector<8x128xf32> -> vector<8x128xf32>
    %328 = arith.addf %286, %327 : vector<8x128xf32>
    %c0_318 = arith.constant 0 : index
    %c13_319 = arith.constant 13 : index
    %c1_320 = arith.constant 1 : index
    %c0_321 = arith.constant 0 : index
    %329 = vector.load %arg1[%c0_318, %c13_319, %c1_320, %c0_321] : memref<1x18x9x128xf32, #tpu.memory_space<vmem>>, vector<1x1x8x128xf32>
    %330 = vector.shape_cast %329 : vector<1x1x8x128xf32> to vector<8x128xf32>
    %331 = arith.truncf %330 : vector<8x128xf32> to vector<8x128xbf16>
    %cst_322 = arith.constant dense<0.000000e+00> : vector<8x128xf32>
    %332 = tpu.matmul %331, %303, %cst_322 {dimension_numbers = #tpu.dot_dimension_numbers<[1], [0], [0], [1], [0, 0, 1, 1], [], []>} : vector<8x128xbf16>, vector<128x128xbf16>, vector<8x128xf32> -> vector<8x128xf32>
    %333 = arith.addf %291, %332 : vector<8x128xf32>
    %c0_323 = arith.constant 0 : index
    %c15_324 = arith.constant 15 : index
    %c1_325 = arith.constant 1 : index
    %c0_326 = arith.constant 0 : index
    %334 = vector.load %arg1[%c0_323, %c15_324, %c1_325, %c0_326] : memref<1x18x9x128xf32, #tpu.memory_space<vmem>>, vector<1x1x8x128xf32>
    %335 = vector.shape_cast %334 : vector<1x1x8x128xf32> to vector<8x128xf32>
    %336 = arith.truncf %335 : vector<8x128xf32> to vector<8x128xbf16>
    %cst_327 = arith.constant dense<0.000000e+00> : vector<8x128xf32>
    %337 = tpu.matmul %336, %303, %cst_327 {dimension_numbers = #tpu.dot_dimension_numbers<[1], [0], [0], [1], [0, 0, 1, 1], [], []>} : vector<8x128xbf16>, vector<128x128xbf16>, vector<8x128xf32> -> vector<8x128xf32>
    %338 = arith.addf %296, %337 : vector<8x128xf32>
    %c0_328 = arith.constant 0 : index
    %c17_329 = arith.constant 17 : index
    %c1_330 = arith.constant 1 : index
    %c0_331 = arith.constant 0 : index
    %339 = vector.load %arg1[%c0_328, %c17_329, %c1_330, %c0_331] : memref<1x18x9x128xf32, #tpu.memory_space<vmem>>, vector<1x1x8x128xf32>
    %340 = vector.shape_cast %339 : vector<1x1x8x128xf32> to vector<8x128xf32>
    %341 = arith.truncf %340 : vector<8x128xf32> to vector<8x128xbf16>
    %cst_332 = arith.constant dense<0.000000e+00> : vector<8x128xf32>
    %342 = tpu.matmul %341, %303, %cst_332 {dimension_numbers = #tpu.dot_dimension_numbers<[1], [0], [0], [1], [0, 0, 1, 1], [], []>} : vector<8x128xbf16>, vector<128x128xbf16>, vector<8x128xf32> -> vector<8x128xf32>
    %343 = arith.addf %301, %342 : vector<8x128xf32>
    %c0_333 = arith.constant 0 : index
    %c0_334 = arith.constant 0 : index
    %344 = vector.load %arg3[%c0_333, %c0_334] : memref<1x128xf32, #tpu.memory_space<vmem>>, vector<1x128xf32>
    %345 = vector.shape_cast %344 : vector<1x128xf32> to vector<1x128xf32>
    %346 = vector.broadcast %345 : vector<1x128xf32> to vector<8x128xf32>
    %c0_335 = arith.constant 0 : index
    %c0_336 = arith.constant 0 : index
    %347 = vector.load %arg4[%c0_335, %c0_336] : memref<1x128xf32, #tpu.memory_space<vmem>>, vector<1x128xf32>
    %348 = vector.shape_cast %347 : vector<1x128xf32> to vector<1x128xf32>
    %349 = vector.broadcast %348 : vector<1x128xf32> to vector<8x128xf32>
    %c0_337 = arith.constant 0 : index
    %c0_338 = arith.constant 0 : index
    %350 = vector.load %arg5[%c0_337, %c0_338] : memref<1x128xf32, #tpu.memory_space<vmem>>, vector<1x128xf32>
    %351 = vector.shape_cast %350 : vector<1x128xf32> to vector<1x128xf32>
    %352 = vector.broadcast %351 : vector<1x128xf32> to vector<8x128xf32>
    %353 = arith.addf %308, %346 : vector<8x128xf32>
    %cst_339 = arith.constant 0.000000e+00 : f32
    %354 = vector.broadcast %cst_339 : f32 to vector<8x128xf32>
    %355 = arith.cmpf oge, %353, %354 : vector<8x128xf32>
    %cst_340 = arith.constant 2.000000e-01 : f32
    %356 = vector.broadcast %cst_340 : f32 to vector<8x128xf32>
    %357 = arith.mulf %356, %353 : vector<8x128xf32>
    %358 = arith.select %355, %353, %357 : vector<8x128xi1>, vector<8x128xf32>
    %359 = arith.mulf %358, %349 : vector<8x128xf32>
    %360 = arith.addf %359, %352 : vector<8x128xf32>
    %361 = arith.addf %313, %346 : vector<8x128xf32>
    %cst_341 = arith.constant 0.000000e+00 : f32
    %362 = vector.broadcast %cst_341 : f32 to vector<8x128xf32>
    %363 = arith.cmpf oge, %361, %362 : vector<8x128xf32>
    %cst_342 = arith.constant 2.000000e-01 : f32
    %364 = vector.broadcast %cst_342 : f32 to vector<8x128xf32>
    %365 = arith.mulf %364, %361 : vector<8x128xf32>
    %366 = arith.select %363, %361, %365 : vector<8x128xi1>, vector<8x128xf32>
    %367 = arith.mulf %366, %349 : vector<8x128xf32>
    %368 = arith.addf %367, %352 : vector<8x128xf32>
    %369 = arith.addf %318, %346 : vector<8x128xf32>
    %cst_343 = arith.constant 0.000000e+00 : f32
    %370 = vector.broadcast %cst_343 : f32 to vector<8x128xf32>
    %371 = arith.cmpf oge, %369, %370 : vector<8x128xf32>
    %cst_344 = arith.constant 2.000000e-01 : f32
    %372 = vector.broadcast %cst_344 : f32 to vector<8x128xf32>
    %373 = arith.mulf %372, %369 : vector<8x128xf32>
    %374 = arith.select %371, %369, %373 : vector<8x128xi1>, vector<8x128xf32>
    %375 = arith.mulf %374, %349 : vector<8x128xf32>
    %376 = arith.addf %375, %352 : vector<8x128xf32>
    %377 = arith.addf %323, %346 : vector<8x128xf32>
    %cst_345 = arith.constant 0.000000e+00 : f32
    %378 = vector.broadcast %cst_345 : f32 to vector<8x128xf32>
    %379 = arith.cmpf oge, %377, %378 : vector<8x128xf32>
    %cst_346 = arith.constant 2.000000e-01 : f32
    %380 = vector.broadcast %cst_346 : f32 to vector<8x128xf32>
    %381 = arith.mulf %380, %377 : vector<8x128xf32>
    %382 = arith.select %379, %377, %381 : vector<8x128xi1>, vector<8x128xf32>
    %383 = arith.mulf %382, %349 : vector<8x128xf32>
    %384 = arith.addf %383, %352 : vector<8x128xf32>
    %385 = arith.addf %328, %346 : vector<8x128xf32>
    %cst_347 = arith.constant 0.000000e+00 : f32
    %386 = vector.broadcast %cst_347 : f32 to vector<8x128xf32>
    %387 = arith.cmpf oge, %385, %386 : vector<8x128xf32>
    %cst_348 = arith.constant 2.000000e-01 : f32
    %388 = vector.broadcast %cst_348 : f32 to vector<8x128xf32>
    %389 = arith.mulf %388, %385 : vector<8x128xf32>
    %390 = arith.select %387, %385, %389 : vector<8x128xi1>, vector<8x128xf32>
    %391 = arith.mulf %390, %349 : vector<8x128xf32>
    %392 = arith.addf %391, %352 : vector<8x128xf32>
    %393 = arith.addf %333, %346 : vector<8x128xf32>
    %cst_349 = arith.constant 0.000000e+00 : f32
    %394 = vector.broadcast %cst_349 : f32 to vector<8x128xf32>
    %395 = arith.cmpf oge, %393, %394 : vector<8x128xf32>
    %cst_350 = arith.constant 2.000000e-01 : f32
    %396 = vector.broadcast %cst_350 : f32 to vector<8x128xf32>
    %397 = arith.mulf %396, %393 : vector<8x128xf32>
    %398 = arith.select %395, %393, %397 : vector<8x128xi1>, vector<8x128xf32>
    %399 = arith.mulf %398, %349 : vector<8x128xf32>
    %400 = arith.addf %399, %352 : vector<8x128xf32>
    %401 = arith.addf %338, %346 : vector<8x128xf32>
    %cst_351 = arith.constant 0.000000e+00 : f32
    %402 = vector.broadcast %cst_351 : f32 to vector<8x128xf32>
    %403 = arith.cmpf oge, %401, %402 : vector<8x128xf32>
    %cst_352 = arith.constant 2.000000e-01 : f32
    %404 = vector.broadcast %cst_352 : f32 to vector<8x128xf32>
    %405 = arith.mulf %404, %401 : vector<8x128xf32>
    %406 = arith.select %403, %401, %405 : vector<8x128xi1>, vector<8x128xf32>
    %407 = arith.mulf %406, %349 : vector<8x128xf32>
    %408 = arith.addf %407, %352 : vector<8x128xf32>
    %409 = arith.addf %343, %346 : vector<8x128xf32>
    %cst_353 = arith.constant 0.000000e+00 : f32
    %410 = vector.broadcast %cst_353 : f32 to vector<8x128xf32>
    %411 = arith.cmpf oge, %409, %410 : vector<8x128xf32>
    %cst_354 = arith.constant 2.000000e-01 : f32
    %412 = vector.broadcast %cst_354 : f32 to vector<8x128xf32>
    %413 = arith.mulf %412, %409 : vector<8x128xf32>
    %414 = arith.select %411, %409, %413 : vector<8x128xi1>, vector<8x128xf32>
    %415 = arith.mulf %414, %349 : vector<8x128xf32>
    %416 = arith.addf %415, %352 : vector<8x128xf32>
    %cst_355 = arith.constant 0.000000e+00 : f32
    %417 = vector.broadcast %cst_355 : f32 to vector<10x5x256xf32>
    %c0_356 = arith.constant 0 : index
    %c0_357 = arith.constant 0 : index
    %c0_358 = arith.constant 0 : index
    %418 = vector.load %arg12[%c0_356, %c0_357, %c0_358] : memref<10x5x256xf32, #tpu.memory_space<vmem>>, vector<10x5x256xf32>
    tpu.vector_store %arg12[%c0_356, %c0_357, %c0_358], %417 {strides = array<i32>} : memref<10x5x256xf32, #tpu.memory_space<vmem>>, vector<10x5x256xf32>,
    %c0_359 = arith.constant 0 : index
    %c0_360 = arith.constant 0 : index
    %419 = vector.load %arg10[%c0_359, %c0_360] : memref<8x8xf32, #tpu.memory_space<vmem>>, vector<8x8xf32>
    %cst_361 = arith.constant dense<0.000000e+00> : vector<8x128xf32>
    %420 = tpu.matmul %419, %360, %cst_361 {dimension_numbers = #tpu.dot_dimension_numbers<[1], [0], [0], [1], [0, 0, 1, 1], [], []>} : vector<8x8xf32>, vector<8x128xf32>, vector<8x128xf32> -> vector<8x128xf32>
    %421 = vector.extract_strided_slice %420 {offsets = [0, 0], sizes = [4, 128], strides = [1, 1]} : vector<8x128xf32> to vector<4x128xf32>
    %c1_362 = arith.constant 1 : index
    %c0_363 = arith.constant 0 : index
    %c128 = arith.constant 128 : index
    %422 = vector.load %arg12[%c1_362, %c0_363, %c128] : memref<10x5x256xf32, #tpu.memory_space<vmem>>, vector<1x4x128xf32>
    %423 = vector.shape_cast %422 : vector<1x4x128xf32> to vector<4x128xf32>
    %424 = vector.shape_cast %421 : vector<4x128xf32> to vector<1x4x128xf32>
    tpu.vector_store %arg12[%c1_362, %c0_363, %c128], %424 {strides = array<i32>} : memref<10x5x256xf32, #tpu.memory_space<vmem>>, vector<1x4x128xf32>,
    %425 = vector.extract_strided_slice %420 {offsets = [4, 0], sizes = [4, 128], strides = [1, 1]} : vector<8x128xf32> to vector<4x128xf32>
    %c1_364 = arith.constant 1 : index
    %c1_365 = arith.constant 1 : index
    %c0_366 = arith.constant 0 : index
    %426 = vector.load %arg12[%c1_364, %c1_365, %c0_366] : memref<10x5x256xf32, #tpu.memory_space<vmem>>, vector<1x4x128xf32>
    %427 = vector.shape_cast %426 : vector<1x4x128xf32> to vector<4x128xf32>
    %428 = vector.shape_cast %425 : vector<4x128xf32> to vector<1x4x128xf32>
    tpu.vector_store %arg12[%c1_364, %c1_365, %c0_366], %428 {strides = array<i32>} : memref<10x5x256xf32, #tpu.memory_space<vmem>>, vector<1x4x128xf32>,
    %cst_367 = arith.constant dense<0.000000e+00> : vector<8x128xf32>
    %429 = tpu.matmul %419, %368, %cst_367 {dimension_numbers = #tpu.dot_dimension_numbers<[1], [0], [0], [1], [0, 0, 1, 1], [], []>} : vector<8x8xf32>, vector<8x128xf32>, vector<8x128xf32> -> vector<8x128xf32>
    %430 = vector.extract_strided_slice %429 {offsets = [0, 0], sizes = [4, 128], strides = [1, 1]} : vector<8x128xf32> to vector<4x128xf32>
    %c2_368 = arith.constant 2 : index
    %c0_369 = arith.constant 0 : index
    %c128_370 = arith.constant 128 : index
    %431 = vector.load %arg12[%c2_368, %c0_369, %c128_370] : memref<10x5x256xf32, #tpu.memory_space<vmem>>, vector<1x4x128xf32>
    %432 = vector.shape_cast %431 : vector<1x4x128xf32> to vector<4x128xf32>
    %433 = vector.shape_cast %430 : vector<4x128xf32> to vector<1x4x128xf32>
    tpu.vector_store %arg12[%c2_368, %c0_369, %c128_370], %433 {strides = array<i32>} : memref<10x5x256xf32, #tpu.memory_space<vmem>>, vector<1x4x128xf32>,
    %434 = vector.extract_strided_slice %429 {offsets = [4, 0], sizes = [4, 128], strides = [1, 1]} : vector<8x128xf32> to vector<4x128xf32>
    %c2_371 = arith.constant 2 : index
    %c1_372 = arith.constant 1 : index
    %c0_373 = arith.constant 0 : index
    %435 = vector.load %arg12[%c2_371, %c1_372, %c0_373] : memref<10x5x256xf32, #tpu.memory_space<vmem>>, vector<1x4x128xf32>
    %436 = vector.shape_cast %435 : vector<1x4x128xf32> to vector<4x128xf32>
    %437 = vector.shape_cast %434 : vector<4x128xf32> to vector<1x4x128xf32>
    tpu.vector_store %arg12[%c2_371, %c1_372, %c0_373], %437 {strides = array<i32>} : memref<10x5x256xf32, #tpu.memory_space<vmem>>, vector<1x4x128xf32>,
    %cst_374 = arith.constant dense<0.000000e+00> : vector<8x128xf32>
    %438 = tpu.matmul %419, %376, %cst_374 {dimension_numbers = #tpu.dot_dimension_numbers<[1], [0], [0], [1], [0, 0, 1, 1], [], []>} : vector<8x8xf32>, vector<8x128xf32>, vector<8x128xf32> -> vector<8x128xf32>
    %439 = vector.extract_strided_slice %438 {offsets = [0, 0], sizes = [4, 128], strides = [1, 1]} : vector<8x128xf32> to vector<4x128xf32>
    %c3_375 = arith.constant 3 : index
    %c0_376 = arith.constant 0 : index
    %c128_377 = arith.constant 128 : index
    %440 = vector.load %arg12[%c3_375, %c0_376, %c128_377] : memref<10x5x256xf32, #tpu.memory_space<vmem>>, vector<1x4x128xf32>
    %441 = vector.shape_cast %440 : vector<1x4x128xf32> to vector<4x128xf32>
    %442 = vector.shape_cast %439 : vector<4x128xf32> to vector<1x4x128xf32>
    tpu.vector_store %arg12[%c3_375, %c0_376, %c128_377], %442 {strides = array<i32>} : memref<10x5x256xf32, #tpu.memory_space<vmem>>, vector<1x4x128xf32>,
    %443 = vector.extract_strided_slice %438 {offsets = [4, 0], sizes = [4, 128], strides = [1, 1]} : vector<8x128xf32> to vector<4x128xf32>
    %c3_378 = arith.constant 3 : index
    %c1_379 = arith.constant 1 : index
    %c0_380 = arith.constant 0 : index
    %444 = vector.load %arg12[%c3_378, %c1_379, %c0_380] : memref<10x5x256xf32, #tpu.memory_space<vmem>>, vector<1x4x128xf32>
    %445 = vector.shape_cast %444 : vector<1x4x128xf32> to vector<4x128xf32>
    %446 = vector.shape_cast %443 : vector<4x128xf32> to vector<1x4x128xf32>
    tpu.vector_store %arg12[%c3_378, %c1_379, %c0_380], %446 {strides = array<i32>} : memref<10x5x256xf32, #tpu.memory_space<vmem>>, vector<1x4x128xf32>,
    %cst_381 = arith.constant dense<0.000000e+00> : vector<8x128xf32>
    %447 = tpu.matmul %419, %384, %cst_381 {dimension_numbers = #tpu.dot_dimension_numbers<[1], [0], [0], [1], [0, 0, 1, 1], [], []>} : vector<8x8xf32>, vector<8x128xf32>, vector<8x128xf32> -> vector<8x128xf32>
    %448 = vector.extract_strided_slice %447 {offsets = [0, 0], sizes = [4, 128], strides = [1, 1]} : vector<8x128xf32> to vector<4x128xf32>
    %c4_382 = arith.constant 4 : index
    %c0_383 = arith.constant 0 : index
    %c128_384 = arith.constant 128 : index
    %449 = vector.load %arg12[%c4_382, %c0_383, %c128_384] : memref<10x5x256xf32, #tpu.memory_space<vmem>>, vector<1x4x128xf32>
    %450 = vector.shape_cast %449 : vector<1x4x128xf32> to vector<4x128xf32>
    %451 = vector.shape_cast %448 : vector<4x128xf32> to vector<1x4x128xf32>
    tpu.vector_store %arg12[%c4_382, %c0_383, %c128_384], %451 {strides = array<i32>} : memref<10x5x256xf32, #tpu.memory_space<vmem>>, vector<1x4x128xf32>,
    %452 = vector.extract_strided_slice %447 {offsets = [4, 0], sizes = [4, 128], strides = [1, 1]} : vector<8x128xf32> to vector<4x128xf32>
    %c4_385 = arith.constant 4 : index
    %c1_386 = arith.constant 1 : index
    %c0_387 = arith.constant 0 : index
    %453 = vector.load %arg12[%c4_385, %c1_386, %c0_387] : memref<10x5x256xf32, #tpu.memory_space<vmem>>, vector<1x4x128xf32>
    %454 = vector.shape_cast %453 : vector<1x4x128xf32> to vector<4x128xf32>
    %455 = vector.shape_cast %452 : vector<4x128xf32> to vector<1x4x128xf32>
    tpu.vector_store %arg12[%c4_385, %c1_386, %c0_387], %455 {strides = array<i32>} : memref<10x5x256xf32, #tpu.memory_space<vmem>>, vector<1x4x128xf32>,
    %cst_388 = arith.constant dense<0.000000e+00> : vector<8x128xf32>
    %456 = tpu.matmul %419, %392, %cst_388 {dimension_numbers = #tpu.dot_dimension_numbers<[1], [0], [0], [1], [0, 0, 1, 1], [], []>} : vector<8x8xf32>, vector<8x128xf32>, vector<8x128xf32> -> vector<8x128xf32>
    %457 = vector.extract_strided_slice %456 {offsets = [0, 0], sizes = [4, 128], strides = [1, 1]} : vector<8x128xf32> to vector<4x128xf32>
    %c5_389 = arith.constant 5 : index
    %c0_390 = arith.constant 0 : index
    %c128_391 = arith.constant 128 : index
    %458 = vector.load %arg12[%c5_389, %c0_390, %c128_391] : memref<10x5x256xf32, #tpu.memory_space<vmem>>, vector<1x4x128xf32>
    %459 = vector.shape_cast %458 : vector<1x4x128xf32> to vector<4x128xf32>
    %460 = vector.shape_cast %457 : vector<4x128xf32> to vector<1x4x128xf32>
    tpu.vector_store %arg12[%c5_389, %c0_390, %c128_391], %460 {strides = array<i32>} : memref<10x5x256xf32, #tpu.memory_space<vmem>>, vector<1x4x128xf32>,
    %461 = vector.extract_strided_slice %456 {offsets = [4, 0], sizes = [4, 128], strides = [1, 1]} : vector<8x128xf32> to vector<4x128xf32>
    %c5_392 = arith.constant 5 : index
    %c1_393 = arith.constant 1 : index
    %c0_394 = arith.constant 0 : index
    %462 = vector.load %arg12[%c5_392, %c1_393, %c0_394] : memref<10x5x256xf32, #tpu.memory_space<vmem>>, vector<1x4x128xf32>
    %463 = vector.shape_cast %462 : vector<1x4x128xf32> to vector<4x128xf32>
    %464 = vector.shape_cast %461 : vector<4x128xf32> to vector<1x4x128xf32>
    tpu.vector_store %arg12[%c5_392, %c1_393, %c0_394], %464 {strides = array<i32>} : memref<10x5x256xf32, #tpu.memory_space<vmem>>, vector<1x4x128xf32>,
    %cst_395 = arith.constant dense<0.000000e+00> : vector<8x128xf32>
    %465 = tpu.matmul %419, %400, %cst_395 {dimension_numbers = #tpu.dot_dimension_numbers<[1], [0], [0], [1], [0, 0, 1, 1], [], []>} : vector<8x8xf32>, vector<8x128xf32>, vector<8x128xf32> -> vector<8x128xf32>
    %466 = vector.extract_strided_slice %465 {offsets = [0, 0], sizes = [4, 128], strides = [1, 1]} : vector<8x128xf32> to vector<4x128xf32>
    %c6_396 = arith.constant 6 : index
    %c0_397 = arith.constant 0 : index
    %c128_398 = arith.constant 128 : index
    %467 = vector.load %arg12[%c6_396, %c0_397, %c128_398] : memref<10x5x256xf32, #tpu.memory_space<vmem>>, vector<1x4x128xf32>
    %468 = vector.shape_cast %467 : vector<1x4x128xf32> to vector<4x128xf32>
    %469 = vector.shape_cast %466 : vector<4x128xf32> to vector<1x4x128xf32>
    tpu.vector_store %arg12[%c6_396, %c0_397, %c128_398], %469 {strides = array<i32>} : memref<10x5x256xf32, #tpu.memory_space<vmem>>, vector<1x4x128xf32>,
    %470 = vector.extract_strided_slice %465 {offsets = [4, 0], sizes = [4, 128], strides = [1, 1]} : vector<8x128xf32> to vector<4x128xf32>
    %c6_399 = arith.constant 6 : index
    %c1_400 = arith.constant 1 : index
    %c0_401 = arith.constant 0 : index
    %471 = vector.load %arg12[%c6_399, %c1_400, %c0_401] : memref<10x5x256xf32, #tpu.memory_space<vmem>>, vector<1x4x128xf32>
    %472 = vector.shape_cast %471 : vector<1x4x128xf32> to vector<4x128xf32>
    %473 = vector.shape_cast %470 : vector<4x128xf32> to vector<1x4x128xf32>
    tpu.vector_store %arg12[%c6_399, %c1_400, %c0_401], %473 {strides = array<i32>} : memref<10x5x256xf32, #tpu.memory_space<vmem>>, vector<1x4x128xf32>,
    %cst_402 = arith.constant dense<0.000000e+00> : vector<8x128xf32>
    %474 = tpu.matmul %419, %408, %cst_402 {dimension_numbers = #tpu.dot_dimension_numbers<[1], [0], [0], [1], [0, 0, 1, 1], [], []>} : vector<8x8xf32>, vector<8x128xf32>, vector<8x128xf32> -> vector<8x128xf32>
    %475 = vector.extract_strided_slice %474 {offsets = [0, 0], sizes = [4, 128], strides = [1, 1]} : vector<8x128xf32> to vector<4x128xf32>
    %c7_403 = arith.constant 7 : index
    %c0_404 = arith.constant 0 : index
    %c128_405 = arith.constant 128 : index
    %476 = vector.load %arg12[%c7_403, %c0_404, %c128_405] : memref<10x5x256xf32, #tpu.memory_space<vmem>>, vector<1x4x128xf32>
    %477 = vector.shape_cast %476 : vector<1x4x128xf32> to vector<4x128xf32>
    %478 = vector.shape_cast %475 : vector<4x128xf32> to vector<1x4x128xf32>
    tpu.vector_store %arg12[%c7_403, %c0_404, %c128_405], %478 {strides = array<i32>} : memref<10x5x256xf32, #tpu.memory_space<vmem>>, vector<1x4x128xf32>,
    %479 = vector.extract_strided_slice %474 {offsets = [4, 0], sizes = [4, 128], strides = [1, 1]} : vector<8x128xf32> to vector<4x128xf32>
    %c7_406 = arith.constant 7 : index
    %c1_407 = arith.constant 1 : index
    %c0_408 = arith.constant 0 : index
    %480 = vector.load %arg12[%c7_406, %c1_407, %c0_408] : memref<10x5x256xf32, #tpu.memory_space<vmem>>, vector<1x4x128xf32>
    %481 = vector.shape_cast %480 : vector<1x4x128xf32> to vector<4x128xf32>
    %482 = vector.shape_cast %479 : vector<4x128xf32> to vector<1x4x128xf32>
    tpu.vector_store %arg12[%c7_406, %c1_407, %c0_408], %482 {strides = array<i32>} : memref<10x5x256xf32, #tpu.memory_space<vmem>>, vector<1x4x128xf32>,
    %cst_409 = arith.constant dense<0.000000e+00> : vector<8x128xf32>
    %483 = tpu.matmul %419, %416, %cst_409 {dimension_numbers = #tpu.dot_dimension_numbers<[1], [0], [0], [1], [0, 0, 1, 1], [], []>} : vector<8x8xf32>, vector<8x128xf32>, vector<8x128xf32> -> vector<8x128xf32>
    %484 = vector.extract_strided_slice %483 {offsets = [0, 0], sizes = [4, 128], strides = [1, 1]} : vector<8x128xf32> to vector<4x128xf32>
    %c8_410 = arith.constant 8 : index
    %c0_411 = arith.constant 0 : index
    %c128_412 = arith.constant 128 : index
    %485 = vector.load %arg12[%c8_410, %c0_411, %c128_412] : memref<10x5x256xf32, #tpu.memory_space<vmem>>, vector<1x4x128xf32>
    %486 = vector.shape_cast %485 : vector<1x4x128xf32> to vector<4x128xf32>
    %487 = vector.shape_cast %484 : vector<4x128xf32> to vector<1x4x128xf32>
    tpu.vector_store %arg12[%c8_410, %c0_411, %c128_412], %487 {strides = array<i32>} : memref<10x5x256xf32, #tpu.memory_space<vmem>>, vector<1x4x128xf32>,
    %488 = vector.extract_strided_slice %483 {offsets = [4, 0], sizes = [4, 128], strides = [1, 1]} : vector<8x128xf32> to vector<4x128xf32>
    %c8_413 = arith.constant 8 : index
    %c1_414 = arith.constant 1 : index
    %c0_415 = arith.constant 0 : index
    %489 = vector.load %arg12[%c8_413, %c1_414, %c0_415] : memref<10x5x256xf32, #tpu.memory_space<vmem>>, vector<1x4x128xf32>
    %490 = vector.shape_cast %489 : vector<1x4x128xf32> to vector<4x128xf32>
    %491 = vector.shape_cast %488 : vector<4x128xf32> to vector<1x4x128xf32>
    tpu.vector_store %arg12[%c8_413, %c1_414, %c0_415], %491 {strides = array<i32>} : memref<10x5x256xf32, #tpu.memory_space<vmem>>, vector<1x4x128xf32>,
    %cst_416 = arith.constant 0.000000e+00 : f32
    %492 = vector.broadcast %cst_416 : f32 to vector<4x128xf32>
    %cst_417 = arith.constant 0.000000e+00 : f32
    %493 = vector.broadcast %cst_417 : f32 to vector<4x128xf32>
    %cst_418 = arith.constant 0.000000e+00 : f32
    %494 = vector.broadcast %cst_418 : f32 to vector<4x128xf32>
    %cst_419 = arith.constant 0.000000e+00 : f32
    %495 = vector.broadcast %cst_419 : f32 to vector<4x128xf32>
    %c0_420 = arith.constant 0 : index
    %c0_421 = arith.constant 0 : index
    %c0_422 = arith.constant 0 : index
    %496 = vector.load %arg6[%c0_420, %c0_421, %c0_422] : memref<8x256x128xbf16, #tpu.memory_space<vmem>>, vector<1x256x128xbf16>
    %497 = vector.shape_cast %496 : vector<1x256x128xbf16> to vector<256x128xbf16>
    %c0_423 = arith.constant 0 : index
    %c0_424 = arith.constant 0 : index
    %c0_425 = arith.constant 0 : index
    %498 = vector.load %arg12[%c0_423, %c0_424, %c0_425] : memref<10x5x256xf32, #tpu.memory_space<vmem>>, vector<1x4x256xf32>
    %499 = vector.shape_cast %498 : vector<1x4x256xf32> to vector<4x256xf32>
    %500 = arith.truncf %499 : vector<4x256xf32> to vector<4x256xbf16>
    %cst_426 = arith.constant dense<0.000000e+00> : vector<4x128xf32>
    %501 = tpu.matmul %500, %497, %cst_426 {dimension_numbers = #tpu.dot_dimension_numbers<[1], [0], [0], [1], [0, 0, 1, 1], [], []>} : vector<4x256xbf16>, vector<256x128xbf16>, vector<4x128xf32> -> vector<4x128xf32>
    %502 = arith.addf %492, %501 : vector<4x128xf32>
    %c2_427 = arith.constant 2 : index
    %c0_428 = arith.constant 0 : index
    %c0_429 = arith.constant 0 : index
    %503 = vector.load %arg12[%c2_427, %c0_428, %c0_429] : memref<10x5x256xf32, #tpu.memory_space<vmem>>, vector<1x4x256xf32>
    %504 = vector.shape_cast %503 : vector<1x4x256xf32> to vector<4x256xf32>
    %505 = arith.truncf %504 : vector<4x256xf32> to vector<4x256xbf16>
    %cst_430 = arith.constant dense<0.000000e+00> : vector<4x128xf32>
    %506 = tpu.matmul %505, %497, %cst_430 {dimension_numbers = #tpu.dot_dimension_numbers<[1], [0], [0], [1], [0, 0, 1, 1], [], []>} : vector<4x256xbf16>, vector<256x128xbf16>, vector<4x128xf32> -> vector<4x128xf32>
    %507 = arith.addf %493, %506 : vector<4x128xf32>
    %c4_431 = arith.constant 4 : index
    %c0_432 = arith.constant 0 : index
    %c0_433 = arith.constant 0 : index
    %508 = vector.load %arg12[%c4_431, %c0_432, %c0_433] : memref<10x5x256xf32, #tpu.memory_space<vmem>>, vector<1x4x256xf32>
    %509 = vector.shape_cast %508 : vector<1x4x256xf32> to vector<4x256xf32>
    %510 = arith.truncf %509 : vector<4x256xf32> to vector<4x256xbf16>
    %cst_434 = arith.constant dense<0.000000e+00> : vector<4x128xf32>
    %511 = tpu.matmul %510, %497, %cst_434 {dimension_numbers = #tpu.dot_dimension_numbers<[1], [0], [0], [1], [0, 0, 1, 1], [], []>} : vector<4x256xbf16>, vector<256x128xbf16>, vector<4x128xf32> -> vector<4x128xf32>
    %512 = arith.addf %494, %511 : vector<4x128xf32>
    %c6_435 = arith.constant 6 : index
    %c0_436 = arith.constant 0 : index
    %c0_437 = arith.constant 0 : index
    %513 = vector.load %arg12[%c6_435, %c0_436, %c0_437] : memref<10x5x256xf32, #tpu.memory_space<vmem>>, vector<1x4x256xf32>
    %514 = vector.shape_cast %513 : vector<1x4x256xf32> to vector<4x256xf32>
    %515 = arith.truncf %514 : vector<4x256xf32> to vector<4x256xbf16>
    %cst_438 = arith.constant dense<0.000000e+00> : vector<4x128xf32>
    %516 = tpu.matmul %515, %497, %cst_438 {dimension_numbers = #tpu.dot_dimension_numbers<[1], [0], [0], [1], [0, 0, 1, 1], [], []>} : vector<4x256xbf16>, vector<256x128xbf16>, vector<4x128xf32> -> vector<4x128xf32>
    %517 = arith.addf %495, %516 : vector<4x128xf32>
    %c1_439 = arith.constant 1 : index
    %c0_440 = arith.constant 0 : index
    %c0_441 = arith.constant 0 : index
    %518 = vector.load %arg6[%c1_439, %c0_440, %c0_441] : memref<8x256x128xbf16, #tpu.memory_space<vmem>>, vector<1x256x128xbf16>
    %519 = vector.shape_cast %518 : vector<1x256x128xbf16> to vector<256x128xbf16>
    %c0_442 = arith.constant 0 : index
    %c1_443 = arith.constant 1 : index
    %c0_444 = arith.constant 0 : index
    %520 = vector.load %arg12[%c0_442, %c1_443, %c0_444] : memref<10x5x256xf32, #tpu.memory_space<vmem>>, vector<1x4x256xf32>
    %521 = vector.shape_cast %520 : vector<1x4x256xf32> to vector<4x256xf32>
    %522 = arith.truncf %521 : vector<4x256xf32> to vector<4x256xbf16>
    %cst_445 = arith.constant dense<0.000000e+00> : vector<4x128xf32>
    %523 = tpu.matmul %522, %519, %cst_445 {dimension_numbers = #tpu.dot_dimension_numbers<[1], [0], [0], [1], [0, 0, 1, 1], [], []>} : vector<4x256xbf16>, vector<256x128xbf16>, vector<4x128xf32> -> vector<4x128xf32>
    %524 = arith.addf %502, %523 : vector<4x128xf32>
    %c2_446 = arith.constant 2 : index
    %c1_447 = arith.constant 1 : index
    %c0_448 = arith.constant 0 : index
    %525 = vector.load %arg12[%c2_446, %c1_447, %c0_448] : memref<10x5x256xf32, #tpu.memory_space<vmem>>, vector<1x4x256xf32>
    %526 = vector.shape_cast %525 : vector<1x4x256xf32> to vector<4x256xf32>
    %527 = arith.truncf %526 : vector<4x256xf32> to vector<4x256xbf16>
    %cst_449 = arith.constant dense<0.000000e+00> : vector<4x128xf32>
    %528 = tpu.matmul %527, %519, %cst_449 {dimension_numbers = #tpu.dot_dimension_numbers<[1], [0], [0], [1], [0, 0, 1, 1], [], []>} : vector<4x256xbf16>, vector<256x128xbf16>, vector<4x128xf32> -> vector<4x128xf32>
    %529 = arith.addf %507, %528 : vector<4x128xf32>
    %c4_450 = arith.constant 4 : index
    %c1_451 = arith.constant 1 : index
    %c0_452 = arith.constant 0 : index
    %530 = vector.load %arg12[%c4_450, %c1_451, %c0_452] : memref<10x5x256xf32, #tpu.memory_space<vmem>>, vector<1x4x256xf32>
    %531 = vector.shape_cast %530 : vector<1x4x256xf32> to vector<4x256xf32>
    %532 = arith.truncf %531 : vector<4x256xf32> to vector<4x256xbf16>
    %cst_453 = arith.constant dense<0.000000e+00> : vector<4x128xf32>
    %533 = tpu.matmul %532, %519, %cst_453 {dimension_numbers = #tpu.dot_dimension_numbers<[1], [0], [0], [1], [0, 0, 1, 1], [], []>} : vector<4x256xbf16>, vector<256x128xbf16>, vector<4x128xf32> -> vector<4x128xf32>
    %534 = arith.addf %512, %533 : vector<4x128xf32>
    %c6_454 = arith.constant 6 : index
    %c1_455 = arith.constant 1 : index
    %c0_456 = arith.constant 0 : index
    %535 = vector.load %arg12[%c6_454, %c1_455, %c0_456] : memref<10x5x256xf32, #tpu.memory_space<vmem>>, vector<1x4x256xf32>
    %536 = vector.shape_cast %535 : vector<1x4x256xf32> to vector<4x256xf32>
    %537 = arith.truncf %536 : vector<4x256xf32> to vector<4x256xbf16>
    %cst_457 = arith.constant dense<0.000000e+00> : vector<4x128xf32>
    %538 = tpu.matmul %537, %519, %cst_457 {dimension_numbers = #tpu.dot_dimension_numbers<[1], [0], [0], [1], [0, 0, 1, 1], [], []>} : vector<4x256xbf16>, vector<256x128xbf16>, vector<4x128xf32> -> vector<4x128xf32>
    %539 = arith.addf %517, %538 : vector<4x128xf32>
    %c2_458 = arith.constant 2 : index
    %c0_459 = arith.constant 0 : index
    %c0_460 = arith.constant 0 : index
    %540 = vector.load %arg6[%c2_458, %c0_459, %c0_460] : memref<8x256x128xbf16, #tpu.memory_space<vmem>>, vector<1x256x128xbf16>
    %541 = vector.shape_cast %540 : vector<1x256x128xbf16> to vector<256x128xbf16>
    %c1_461 = arith.constant 1 : index
    %c0_462 = arith.constant 0 : index
    %c0_463 = arith.constant 0 : index
    %542 = vector.load %arg12[%c1_461, %c0_462, %c0_463] : memref<10x5x256xf32, #tpu.memory_space<vmem>>, vector<1x4x256xf32>
    %543 = vector.shape_cast %542 : vector<1x4x256xf32> to vector<4x256xf32>
    %544 = arith.truncf %543 : vector<4x256xf32> to vector<4x256xbf16>
    %cst_464 = arith.constant dense<0.000000e+00> : vector<4x128xf32>
    %545 = tpu.matmul %544, %541, %cst_464 {dimension_numbers = #tpu.dot_dimension_numbers<[1], [0], [0], [1], [0, 0, 1, 1], [], []>} : vector<4x256xbf16>, vector<256x128xbf16>, vector<4x128xf32> -> vector<4x128xf32>
    %546 = arith.addf %524, %545 : vector<4x128xf32>
    %c3_465 = arith.constant 3 : index
    %c0_466 = arith.constant 0 : index
    %c0_467 = arith.constant 0 : index
    %547 = vector.load %arg12[%c3_465, %c0_466, %c0_467] : memref<10x5x256xf32, #tpu.memory_space<vmem>>, vector<1x4x256xf32>
    %548 = vector.shape_cast %547 : vector<1x4x256xf32> to vector<4x256xf32>
    %549 = arith.truncf %548 : vector<4x256xf32> to vector<4x256xbf16>
    %cst_468 = arith.constant dense<0.000000e+00> : vector<4x128xf32>
    %550 = tpu.matmul %549, %541, %cst_468 {dimension_numbers = #tpu.dot_dimension_numbers<[1], [0], [0], [1], [0, 0, 1, 1], [], []>} : vector<4x256xbf16>, vector<256x128xbf16>, vector<4x128xf32> -> vector<4x128xf32>
    %551 = arith.addf %529, %550 : vector<4x128xf32>
    %c5_469 = arith.constant 5 : index
    %c0_470 = arith.constant 0 : index
    %c0_471 = arith.constant 0 : index
    %552 = vector.load %arg12[%c5_469, %c0_470, %c0_471] : memref<10x5x256xf32, #tpu.memory_space<vmem>>, vector<1x4x256xf32>
    %553 = vector.shape_cast %552 : vector<1x4x256xf32> to vector<4x256xf32>
    %554 = arith.truncf %553 : vector<4x256xf32> to vector<4x256xbf16>
    %cst_472 = arith.constant dense<0.000000e+00> : vector<4x128xf32>
    %555 = tpu.matmul %554, %541, %cst_472 {dimension_numbers = #tpu.dot_dimension_numbers<[1], [0], [0], [1], [0, 0, 1, 1], [], []>} : vector<4x256xbf16>, vector<256x128xbf16>, vector<4x128xf32> -> vector<4x128xf32>
    %556 = arith.addf %534, %555 : vector<4x128xf32>
    %c7_473 = arith.constant 7 : index
    %c0_474 = arith.constant 0 : index
    %c0_475 = arith.constant 0 : index
    %557 = vector.load %arg12[%c7_473, %c0_474, %c0_475] : memref<10x5x256xf32, #tpu.memory_space<vmem>>, vector<1x4x256xf32>
    %558 = vector.shape_cast %557 : vector<1x4x256xf32> to vector<4x256xf32>
    %559 = arith.truncf %558 : vector<4x256xf32> to vector<4x256xbf16>
    %cst_476 = arith.constant dense<0.000000e+00> : vector<4x128xf32>
    %560 = tpu.matmul %559, %541, %cst_476 {dimension_numbers = #tpu.dot_dimension_numbers<[1], [0], [0], [1], [0, 0, 1, 1], [], []>} : vector<4x256xbf16>, vector<256x128xbf16>, vector<4x128xf32> -> vector<4x128xf32>
    %561 = arith.addf %539, %560 : vector<4x128xf32>
    %c3_477 = arith.constant 3 : index
    %c0_478 = arith.constant 0 : index
    %c0_479 = arith.constant 0 : index
    %562 = vector.load %arg6[%c3_477, %c0_478, %c0_479] : memref<8x256x128xbf16, #tpu.memory_space<vmem>>, vector<1x256x128xbf16>
    %563 = vector.shape_cast %562 : vector<1x256x128xbf16> to vector<256x128xbf16>
    %c1_480 = arith.constant 1 : index
    %c1_481 = arith.constant 1 : index
    %c0_482 = arith.constant 0 : index
    %564 = vector.load %arg12[%c1_480, %c1_481, %c0_482] : memref<10x5x256xf32, #tpu.memory_space<vmem>>, vector<1x4x256xf32>
    %565 = vector.shape_cast %564 : vector<1x4x256xf32> to vector<4x256xf32>
    %566 = arith.truncf %565 : vector<4x256xf32> to vector<4x256xbf16>
    %cst_483 = arith.constant dense<0.000000e+00> : vector<4x128xf32>
    %567 = tpu.matmul %566, %563, %cst_483 {dimension_numbers = #tpu.dot_dimension_numbers<[1], [0], [0], [1], [0, 0, 1, 1], [], []>} : vector<4x256xbf16>, vector<256x128xbf16>, vector<4x128xf32> -> vector<4x128xf32>
    %568 = arith.addf %546, %567 : vector<4x128xf32>
    %c3_484 = arith.constant 3 : index
    %c1_485 = arith.constant 1 : index
    %c0_486 = arith.constant 0 : index
    %569 = vector.load %arg12[%c3_484, %c1_485, %c0_486] : memref<10x5x256xf32, #tpu.memory_space<vmem>>, vector<1x4x256xf32>
    %570 = vector.shape_cast %569 : vector<1x4x256xf32> to vector<4x256xf32>
    %571 = arith.truncf %570 : vector<4x256xf32> to vector<4x256xbf16>
    %cst_487 = arith.constant dense<0.000000e+00> : vector<4x128xf32>
    %572 = tpu.matmul %571, %563, %cst_487 {dimension_numbers = #tpu.dot_dimension_numbers<[1], [0], [0], [1], [0, 0, 1, 1], [], []>} : vector<4x256xbf16>, vector<256x128xbf16>, vector<4x128xf32> -> vector<4x128xf32>
    %573 = arith.addf %551, %572 : vector<4x128xf32>
    %c5_488 = arith.constant 5 : index
    %c1_489 = arith.constant 1 : index
    %c0_490 = arith.constant 0 : index
    %574 = vector.load %arg12[%c5_488, %c1_489, %c0_490] : memref<10x5x256xf32, #tpu.memory_space<vmem>>, vector<1x4x256xf32>
    %575 = vector.shape_cast %574 : vector<1x4x256xf32> to vector<4x256xf32>
    %576 = arith.truncf %575 : vector<4x256xf32> to vector<4x256xbf16>
    %cst_491 = arith.constant dense<0.000000e+00> : vector<4x128xf32>
    %577 = tpu.matmul %576, %563, %cst_491 {dimension_numbers = #tpu.dot_dimension_numbers<[1], [0], [0], [1], [0, 0, 1, 1], [], []>} : vector<4x256xbf16>, vector<256x128xbf16>, vector<4x128xf32> -> vector<4x128xf32>
    %578 = arith.addf %556, %577 : vector<4x128xf32>
    %c7_492 = arith.constant 7 : index
    %c1_493 = arith.constant 1 : index
    %c0_494 = arith.constant 0 : index
    %579 = vector.load %arg12[%c7_492, %c1_493, %c0_494] : memref<10x5x256xf32, #tpu.memory_space<vmem>>, vector<1x4x256xf32>
    %580 = vector.shape_cast %579 : vector<1x4x256xf32> to vector<4x256xf32>
    %581 = arith.truncf %580 : vector<4x256xf32> to vector<4x256xbf16>
    %cst_495 = arith.constant dense<0.000000e+00> : vector<4x128xf32>
    %582 = tpu.matmul %581, %563, %cst_495 {dimension_numbers = #tpu.dot_dimension_numbers<[1], [0], [0], [1], [0, 0, 1, 1], [], []>} : vector<4x256xbf16>, vector<256x128xbf16>, vector<4x128xf32> -> vector<4x128xf32>
    %583 = arith.addf %561, %582 : vector<4x128xf32>
    %c4_496 = arith.constant 4 : index
    %c0_497 = arith.constant 0 : index
    %c0_498 = arith.constant 0 : index
    %584 = vector.load %arg6[%c4_496, %c0_497, %c0_498] : memref<8x256x128xbf16, #tpu.memory_space<vmem>>, vector<1x256x128xbf16>
    %585 = vector.shape_cast %584 : vector<1x256x128xbf16> to vector<256x128xbf16>
    %c2_499 = arith.constant 2 : index
    %c0_500 = arith.constant 0 : index
    %c0_501 = arith.constant 0 : index
    %586 = vector.load %arg12[%c2_499, %c0_500, %c0_501] : memref<10x5x256xf32, #tpu.memory_space<vmem>>, vector<1x4x256xf32>
    %587 = vector.shape_cast %586 : vector<1x4x256xf32> to vector<4x256xf32>
    %588 = arith.truncf %587 : vector<4x256xf32> to vector<4x256xbf16>
    %cst_502 = arith.constant dense<0.000000e+00> : vector<4x128xf32>
    %589 = tpu.matmul %588, %585, %cst_502 {dimension_numbers = #tpu.dot_dimension_numbers<[1], [0], [0], [1], [0, 0, 1, 1], [], []>} : vector<4x256xbf16>, vector<256x128xbf16>, vector<4x128xf32> -> vector<4x128xf32>
    %590 = arith.addf %568, %589 : vector<4x128xf32>
    %c4_503 = arith.constant 4 : index
    %c0_504 = arith.constant 0 : index
    %c0_505 = arith.constant 0 : index
    %591 = vector.load %arg12[%c4_503, %c0_504, %c0_505] : memref<10x5x256xf32, #tpu.memory_space<vmem>>, vector<1x4x256xf32>
    %592 = vector.shape_cast %591 : vector<1x4x256xf32> to vector<4x256xf32>
    %593 = arith.truncf %592 : vector<4x256xf32> to vector<4x256xbf16>
    %cst_506 = arith.constant dense<0.000000e+00> : vector<4x128xf32>
    %594 = tpu.matmul %593, %585, %cst_506 {dimension_numbers = #tpu.dot_dimension_numbers<[1], [0], [0], [1], [0, 0, 1, 1], [], []>} : vector<4x256xbf16>, vector<256x128xbf16>, vector<4x128xf32> -> vector<4x128xf32>
    %595 = arith.addf %573, %594 : vector<4x128xf32>
    %c6_507 = arith.constant 6 : index
    %c0_508 = arith.constant 0 : index
    %c0_509 = arith.constant 0 : index
    %596 = vector.load %arg12[%c6_507, %c0_508, %c0_509] : memref<10x5x256xf32, #tpu.memory_space<vmem>>, vector<1x4x256xf32>
    %597 = vector.shape_cast %596 : vector<1x4x256xf32> to vector<4x256xf32>
    %598 = arith.truncf %597 : vector<4x256xf32> to vector<4x256xbf16>
    %cst_510 = arith.constant dense<0.000000e+00> : vector<4x128xf32>
    %599 = tpu.matmul %598, %585, %cst_510 {dimension_numbers = #tpu.dot_dimension_numbers<[1], [0], [0], [1], [0, 0, 1, 1], [], []>} : vector<4x256xbf16>, vector<256x128xbf16>, vector<4x128xf32> -> vector<4x128xf32>
    %600 = arith.addf %578, %599 : vector<4x128xf32>
    %c8_511 = arith.constant 8 : index
    %c0_512 = arith.constant 0 : index
    %c0_513 = arith.constant 0 : index
    %601 = vector.load %arg12[%c8_511, %c0_512, %c0_513] : memref<10x5x256xf32, #tpu.memory_space<vmem>>, vector<1x4x256xf32>
    %602 = vector.shape_cast %601 : vector<1x4x256xf32> to vector<4x256xf32>
    %603 = arith.truncf %602 : vector<4x256xf32> to vector<4x256xbf16>
    %cst_514 = arith.constant dense<0.000000e+00> : vector<4x128xf32>
    %604 = tpu.matmul %603, %585, %cst_514 {dimension_numbers = #tpu.dot_dimension_numbers<[1], [0], [0], [1], [0, 0, 1, 1], [], []>} : vector<4x256xbf16>, vector<256x128xbf16>, vector<4x128xf32> -> vector<4x128xf32>
    %605 = arith.addf %583, %604 : vector<4x128xf32>
    %c5_515 = arith.constant 5 : index
    %c0_516 = arith.constant 0 : index
    %c0_517 = arith.constant 0 : index
    %606 = vector.load %arg6[%c5_515, %c0_516, %c0_517] : memref<8x256x128xbf16, #tpu.memory_space<vmem>>, vector<1x256x128xbf16>
    %607 = vector.shape_cast %606 : vector<1x256x128xbf16> to vector<256x128xbf16>
    %c2_518 = arith.constant 2 : index
    %c1_519 = arith.constant 1 : index
    %c0_520 = arith.constant 0 : index
    %608 = vector.load %arg12[%c2_518, %c1_519, %c0_520] : memref<10x5x256xf32, #tpu.memory_space<vmem>>, vector<1x4x256xf32>
    %609 = vector.shape_cast %608 : vector<1x4x256xf32> to vector<4x256xf32>
    %610 = arith.truncf %609 : vector<4x256xf32> to vector<4x256xbf16>
    %cst_521 = arith.constant dense<0.000000e+00> : vector<4x128xf32>
    %611 = tpu.matmul %610, %607, %cst_521 {dimension_numbers = #tpu.dot_dimension_numbers<[1], [0], [0], [1], [0, 0, 1, 1], [], []>} : vector<4x256xbf16>, vector<256x128xbf16>, vector<4x128xf32> -> vector<4x128xf32>
    %612 = arith.addf %590, %611 : vector<4x128xf32>
    %c4_522 = arith.constant 4 : index
    %c1_523 = arith.constant 1 : index
    %c0_524 = arith.constant 0 : index
    %613 = vector.load %arg12[%c4_522, %c1_523, %c0_524] : memref<10x5x256xf32, #tpu.memory_space<vmem>>, vector<1x4x256xf32>
    %614 = vector.shape_cast %613 : vector<1x4x256xf32> to vector<4x256xf32>
    %615 = arith.truncf %614 : vector<4x256xf32> to vector<4x256xbf16>
    %cst_525 = arith.constant dense<0.000000e+00> : vector<4x128xf32>
    %616 = tpu.matmul %615, %607, %cst_525 {dimension_numbers = #tpu.dot_dimension_numbers<[1], [0], [0], [1], [0, 0, 1, 1], [], []>} : vector<4x256xbf16>, vector<256x128xbf16>, vector<4x128xf32> -> vector<4x128xf32>
    %617 = arith.addf %595, %616 : vector<4x128xf32>
    %c6_526 = arith.constant 6 : index
    %c1_527 = arith.constant 1 : index
    %c0_528 = arith.constant 0 : index
    %618 = vector.load %arg12[%c6_526, %c1_527, %c0_528] : memref<10x5x256xf32, #tpu.memory_space<vmem>>, vector<1x4x256xf32>
    %619 = vector.shape_cast %618 : vector<1x4x256xf32> to vector<4x256xf32>
    %620 = arith.truncf %619 : vector<4x256xf32> to vector<4x256xbf16>
    %cst_529 = arith.constant dense<0.000000e+00> : vector<4x128xf32>
    %621 = tpu.matmul %620, %607, %cst_529 {dimension_numbers = #tpu.dot_dimension_numbers<[1], [0], [0], [1], [0, 0, 1, 1], [], []>} : vector<4x256xbf16>, vector<256x128xbf16>, vector<4x128xf32> -> vector<4x128xf32>
    %622 = arith.addf %600, %621 : vector<4x128xf32>
    %c8_530 = arith.constant 8 : index
    %c1_531 = arith.constant 1 : index
    %c0_532 = arith.constant 0 : index
    %623 = vector.load %arg12[%c8_530, %c1_531, %c0_532] : memref<10x5x256xf32, #tpu.memory_space<vmem>>, vector<1x4x256xf32>
    %624 = vector.shape_cast %623 : vector<1x4x256xf32> to vector<4x256xf32>
    %625 = arith.truncf %624 : vector<4x256xf32> to vector<4x256xbf16>
    %cst_533 = arith.constant dense<0.000000e+00> : vector<4x128xf32>
    %626 = tpu.matmul %625, %607, %cst_533 {dimension_numbers = #tpu.dot_dimension_numbers<[1], [0], [0], [1], [0, 0, 1, 1], [], []>} : vector<4x256xbf16>, vector<256x128xbf16>, vector<4x128xf32> -> vector<4x128xf32>
    %627 = arith.addf %605, %626 : vector<4x128xf32>
    %c6_534 = arith.constant 6 : index
    %c0_535 = arith.constant 0 : index
    %c0_536 = arith.constant 0 : index
    %628 = vector.load %arg6[%c6_534, %c0_535, %c0_536] : memref<8x256x128xbf16, #tpu.memory_space<vmem>>, vector<1x256x128xbf16>
    %629 = vector.shape_cast %628 : vector<1x256x128xbf16> to vector<256x128xbf16>
    %c3_537 = arith.constant 3 : index
    %c0_538 = arith.constant 0 : index
    %c0_539 = arith.constant 0 : index
    %630 = vector.load %arg12[%c3_537, %c0_538, %c0_539] : memref<10x5x256xf32, #tpu.memory_space<vmem>>, vector<1x4x256xf32>
    %631 = vector.shape_cast %630 : vector<1x4x256xf32> to vector<4x256xf32>
    %632 = arith.truncf %631 : vector<4x256xf32> to vector<4x256xbf16>
    %cst_540 = arith.constant dense<0.000000e+00> : vector<4x128xf32>
    %633 = tpu.matmul %632, %629, %cst_540 {dimension_numbers = #tpu.dot_dimension_numbers<[1], [0], [0], [1], [0, 0, 1, 1], [], []>} : vector<4x256xbf16>, vector<256x128xbf16>, vector<4x128xf32> -> vector<4x128xf32>
    %634 = arith.addf %612, %633 : vector<4x128xf32>
    %c5_541 = arith.constant 5 : index
    %c0_542 = arith.constant 0 : index
    %c0_543 = arith.constant 0 : index
    %635 = vector.load %arg12[%c5_541, %c0_542, %c0_543] : memref<10x5x256xf32, #tpu.memory_space<vmem>>, vector<1x4x256xf32>
    %636 = vector.shape_cast %635 : vector<1x4x256xf32> to vector<4x256xf32>
    %637 = arith.truncf %636 : vector<4x256xf32> to vector<4x256xbf16>
    %cst_544 = arith.constant dense<0.000000e+00> : vector<4x128xf32>
    %638 = tpu.matmul %637, %629, %cst_544 {dimension_numbers = #tpu.dot_dimension_numbers<[1], [0], [0], [1], [0, 0, 1, 1], [], []>} : vector<4x256xbf16>, vector<256x128xbf16>, vector<4x128xf32> -> vector<4x128xf32>
    %639 = arith.addf %617, %638 : vector<4x128xf32>
    %c7_545 = arith.constant 7 : index
    %c0_546 = arith.constant 0 : index
    %c0_547 = arith.constant 0 : index
    %640 = vector.load %arg12[%c7_545, %c0_546, %c0_547] : memref<10x5x256xf32, #tpu.memory_space<vmem>>, vector<1x4x256xf32>
    %641 = vector.shape_cast %640 : vector<1x4x256xf32> to vector<4x256xf32>
    %642 = arith.truncf %641 : vector<4x256xf32> to vector<4x256xbf16>
    %cst_548 = arith.constant dense<0.000000e+00> : vector<4x128xf32>
    %643 = tpu.matmul %642, %629, %cst_548 {dimension_numbers = #tpu.dot_dimension_numbers<[1], [0], [0], [1], [0, 0, 1, 1], [], []>} : vector<4x256xbf16>, vector<256x128xbf16>, vector<4x128xf32> -> vector<4x128xf32>
    %644 = arith.addf %622, %643 : vector<4x128xf32>
    %c9_549 = arith.constant 9 : index
    %c0_550 = arith.constant 0 : index
    %c0_551 = arith.constant 0 : index
    %645 = vector.load %arg12[%c9_549, %c0_550, %c0_551] : memref<10x5x256xf32, #tpu.memory_space<vmem>>, vector<1x4x256xf32>
    %646 = vector.shape_cast %645 : vector<1x4x256xf32> to vector<4x256xf32>
    %647 = arith.truncf %646 : vector<4x256xf32> to vector<4x256xbf16>
    %cst_552 = arith.constant dense<0.000000e+00> : vector<4x128xf32>
    %648 = tpu.matmul %647, %629, %cst_552 {dimension_numbers = #tpu.dot_dimension_numbers<[1], [0], [0], [1], [0, 0, 1, 1], [], []>} : vector<4x256xbf16>, vector<256x128xbf16>, vector<4x128xf32> -> vector<4x128xf32>
    %649 = arith.addf %627, %648 : vector<4x128xf32>
    %c7_553 = arith.constant 7 : index
    %c0_554 = arith.constant 0 : index
    %c0_555 = arith.constant 0 : index
    %650 = vector.load %arg6[%c7_553, %c0_554, %c0_555] : memref<8x256x128xbf16, #tpu.memory_space<vmem>>, vector<1x256x128xbf16>
    %651 = vector.shape_cast %650 : vector<1x256x128xbf16> to vector<256x128xbf16>
    %c3_556 = arith.constant 3 : index
    %c1_557 = arith.constant 1 : index
    %c0_558 = arith.constant 0 : index
    %652 = vector.load %arg12[%c3_556, %c1_557, %c0_558] : memref<10x5x256xf32, #tpu.memory_space<vmem>>, vector<1x4x256xf32>
    %653 = vector.shape_cast %652 : vector<1x4x256xf32> to vector<4x256xf32>
    %654 = arith.truncf %653 : vector<4x256xf32> to vector<4x256xbf16>
    %cst_559 = arith.constant dense<0.000000e+00> : vector<4x128xf32>
    %655 = tpu.matmul %654, %651, %cst_559 {dimension_numbers = #tpu.dot_dimension_numbers<[1], [0], [0], [1], [0, 0, 1, 1], [], []>} : vector<4x256xbf16>, vector<256x128xbf16>, vector<4x128xf32> -> vector<4x128xf32>
    %656 = arith.addf %634, %655 : vector<4x128xf32>
    %c5_560 = arith.constant 5 : index
    %c1_561 = arith.constant 1 : index
    %c0_562 = arith.constant 0 : index
    %657 = vector.load %arg12[%c5_560, %c1_561, %c0_562] : memref<10x5x256xf32, #tpu.memory_space<vmem>>, vector<1x4x256xf32>
    %658 = vector.shape_cast %657 : vector<1x4x256xf32> to vector<4x256xf32>
    %659 = arith.truncf %658 : vector<4x256xf32> to vector<4x256xbf16>
    %cst_563 = arith.constant dense<0.000000e+00> : vector<4x128xf32>
    %660 = tpu.matmul %659, %651, %cst_563 {dimension_numbers = #tpu.dot_dimension_numbers<[1], [0], [0], [1], [0, 0, 1, 1], [], []>} : vector<4x256xbf16>, vector<256x128xbf16>, vector<4x128xf32> -> vector<4x128xf32>
    %661 = arith.addf %639, %660 : vector<4x128xf32>
    %c7_564 = arith.constant 7 : index
    %c1_565 = arith.constant 1 : index
    %c0_566 = arith.constant 0 : index
    %662 = vector.load %arg12[%c7_564, %c1_565, %c0_566] : memref<10x5x256xf32, #tpu.memory_space<vmem>>, vector<1x4x256xf32>
    %663 = vector.shape_cast %662 : vector<1x4x256xf32> to vector<4x256xf32>
    %664 = arith.truncf %663 : vector<4x256xf32> to vector<4x256xbf16>
    %cst_567 = arith.constant dense<0.000000e+00> : vector<4x128xf32>
    %665 = tpu.matmul %664, %651, %cst_567 {dimension_numbers = #tpu.dot_dimension_numbers<[1], [0], [0], [1], [0, 0, 1, 1], [], []>} : vector<4x256xbf16>, vector<256x128xbf16>, vector<4x128xf32> -> vector<4x128xf32>
    %666 = arith.addf %644, %665 : vector<4x128xf32>
    %c9_568 = arith.constant 9 : index
    %c1_569 = arith.constant 1 : index
    %c0_570 = arith.constant 0 : index
    %667 = vector.load %arg12[%c9_568, %c1_569, %c0_570] : memref<10x5x256xf32, #tpu.memory_space<vmem>>, vector<1x4x256xf32>
    %668 = vector.shape_cast %667 : vector<1x4x256xf32> to vector<4x256xf32>
    %669 = arith.truncf %668 : vector<4x256xf32> to vector<4x256xbf16>
    %cst_571 = arith.constant dense<0.000000e+00> : vector<4x128xf32>
    %670 = tpu.matmul %669, %651, %cst_571 {dimension_numbers = #tpu.dot_dimension_numbers<[1], [0], [0], [1], [0, 0, 1, 1], [], []>} : vector<4x256xbf16>, vector<256x128xbf16>, vector<4x128xf32> -> vector<4x128xf32>
    %671 = arith.addf %649, %670 : vector<4x128xf32>
    %c0_572 = arith.constant 0 : index
    %c0_573 = arith.constant 0 : index
    %672 = vector.load %arg7[%c0_572, %c0_573] : memref<1x128xf32, #tpu.memory_space<vmem>>, vector<1x128xf32>
    %673 = vector.shape_cast %672 : vector<1x128xf32> to vector<1x128xf32>
    %674 = vector.broadcast %673 : vector<1x128xf32> to vector<4x128xf32>
    %c0_574 = arith.constant 0 : index
    %c0_575 = arith.constant 0 : index
    %675 = vector.load %arg8[%c0_574, %c0_575] : memref<1x128xf32, #tpu.memory_space<vmem>>, vector<1x128xf32>
    %676 = vector.shape_cast %675 : vector<1x128xf32> to vector<1x128xf32>
    %677 = vector.broadcast %676 : vector<1x128xf32> to vector<4x128xf32>
    %c0_576 = arith.constant 0 : index
    %c0_577 = arith.constant 0 : index
    %678 = vector.load %arg9[%c0_576, %c0_577] : memref<1x128xf32, #tpu.memory_space<vmem>>, vector<1x128xf32>
    %679 = vector.shape_cast %678 : vector<1x128xf32> to vector<1x128xf32>
    %680 = vector.broadcast %679 : vector<1x128xf32> to vector<4x128xf32>
    %681 = arith.addf %656, %674 : vector<4x128xf32>
    %cst_578 = arith.constant 0.000000e+00 : f32
    %682 = vector.broadcast %cst_578 : f32 to vector<4x128xf32>
    %683 = arith.cmpf oge, %681, %682 : vector<4x128xf32>
    %cst_579 = arith.constant 2.000000e-01 : f32
    %684 = vector.broadcast %cst_579 : f32 to vector<4x128xf32>
    %685 = arith.mulf %684, %681 : vector<4x128xf32>
    %686 = arith.select %683, %681, %685 : vector<4x128xi1>, vector<4x128xf32>
    %687 = arith.mulf %686, %677 : vector<4x128xf32>
    %688 = arith.addf %687, %680 : vector<4x128xf32>
    %689 = arith.addf %661, %674 : vector<4x128xf32>
    %cst_580 = arith.constant 0.000000e+00 : f32
    %690 = vector.broadcast %cst_580 : f32 to vector<4x128xf32>
    %691 = arith.cmpf oge, %689, %690 : vector<4x128xf32>
    %cst_581 = arith.constant 2.000000e-01 : f32
    %692 = vector.broadcast %cst_581 : f32 to vector<4x128xf32>
    %693 = arith.mulf %692, %689 : vector<4x128xf32>
    %694 = arith.select %691, %689, %693 : vector<4x128xi1>, vector<4x128xf32>
    %695 = arith.mulf %694, %677 : vector<4x128xf32>
    %696 = arith.addf %695, %680 : vector<4x128xf32>
    %697 = arith.addf %666, %674 : vector<4x128xf32>
    %cst_582 = arith.constant 0.000000e+00 : f32
    %698 = vector.broadcast %cst_582 : f32 to vector<4x128xf32>
    %699 = arith.cmpf oge, %697, %698 : vector<4x128xf32>
    %cst_583 = arith.constant 2.000000e-01 : f32
    %700 = vector.broadcast %cst_583 : f32 to vector<4x128xf32>
    %701 = arith.mulf %700, %697 : vector<4x128xf32>
    %702 = arith.select %699, %697, %701 : vector<4x128xi1>, vector<4x128xf32>
    %703 = arith.mulf %702, %677 : vector<4x128xf32>
    %704 = arith.addf %703, %680 : vector<4x128xf32>
    %705 = arith.addf %671, %674 : vector<4x128xf32>
    %cst_584 = arith.constant 0.000000e+00 : f32
    %706 = vector.broadcast %cst_584 : f32 to vector<4x128xf32>
    %707 = arith.cmpf oge, %705, %706 : vector<4x128xf32>
    %cst_585 = arith.constant 2.000000e-01 : f32
    %708 = vector.broadcast %cst_585 : f32 to vector<4x128xf32>
    %709 = arith.mulf %708, %705 : vector<4x128xf32>
    %710 = arith.select %707, %705, %709 : vector<4x128xi1>, vector<4x128xf32>
    %711 = arith.mulf %710, %677 : vector<4x128xf32>
    %712 = arith.addf %711, %680 : vector<4x128xf32>
    %c0_586 = arith.constant 0 : index
    %c0_587 = arith.constant 0 : index
    %c0_588 = arith.constant 0 : index
    %c0_589 = arith.constant 0 : index
    %713 = vector.load %arg11[%c0_586, %c0_587, %c0_588, %c0_589] : memref<1x4x4x128xf32, #tpu.memory_space<vmem>>, vector<1x1x4x128xf32>
    %714 = vector.shape_cast %713 : vector<1x1x4x128xf32> to vector<4x128xf32>
    %715 = vector.shape_cast %688 : vector<4x128xf32> to vector<1x1x4x128xf32>
    tpu.vector_store %arg11[%c0_586, %c0_587, %c0_588, %c0_589], %715 {strides = array<i32>} : memref<1x4x4x128xf32, #tpu.memory_space<vmem>>, vector<1x1x4x128xf32>,
    %c0_590 = arith.constant 0 : index
    %c1_591 = arith.constant 1 : index
    %c0_592 = arith.constant 0 : index
    %c0_593 = arith.constant 0 : index
    %716 = vector.load %arg11[%c0_590, %c1_591, %c0_592, %c0_593] : memref<1x4x4x128xf32, #tpu.memory_space<vmem>>, vector<1x1x4x128xf32>
    %717 = vector.shape_cast %716 : vector<1x1x4x128xf32> to vector<4x128xf32>
    %718 = vector.shape_cast %696 : vector<4x128xf32> to vector<1x1x4x128xf32>
    tpu.vector_store %arg11[%c0_590, %c1_591, %c0_592, %c0_593], %718 {strides = array<i32>} : memref<1x4x4x128xf32, #tpu.memory_space<vmem>>, vector<1x1x4x128xf32>,
    %c0_594 = arith.constant 0 : index
    %c2_595 = arith.constant 2 : index
    %c0_596 = arith.constant 0 : index
    %c0_597 = arith.constant 0 : index
    %719 = vector.load %arg11[%c0_594, %c2_595, %c0_596, %c0_597] : memref<1x4x4x128xf32, #tpu.memory_space<vmem>>, vector<1x1x4x128xf32>
    %720 = vector.shape_cast %719 : vector<1x1x4x128xf32> to vector<4x128xf32>
    %721 = vector.shape_cast %704 : vector<4x128xf32> to vector<1x1x4x128xf32>
    tpu.vector_store %arg11[%c0_594, %c2_595, %c0_596, %c0_597], %721 {strides = array<i32>} : memref<1x4x4x128xf32, #tpu.memory_space<vmem>>, vector<1x1x4x128xf32>,
    %c0_598 = arith.constant 0 : index
    %c3_599 = arith.constant 3 : index
    %c0_600 = arith.constant 0 : index
    %c0_601 = arith.constant 0 : index
    %722 = vector.load %arg11[%c0_598, %c3_599, %c0_600, %c0_601] : memref<1x4x4x128xf32, #tpu.memory_space<vmem>>, vector<1x1x4x128xf32>
    %723 = vector.shape_cast %722 : vector<1x1x4x128xf32> to vector<4x128xf32>
    %724 = vector.shape_cast %712 : vector<4x128xf32> to vector<1x1x4x128xf32>
    tpu.vector_store %arg11[%c0_598, %c3_599, %c0_600, %c0_601], %724 {strides = array<i32>} : memref<1x4x4x128xf32, #tpu.memory_space<vmem>>, vector<1x1x4x128xf32>,
    return
  }
  func.func @transform_0(%arg0: i32) -> (i32, i32, i32, i32) {
    %c0_i32 = arith.constant 0 : i32
    %c0_i32_0 = arith.constant 0 : i32
    %c0_i32_1 = arith.constant 0 : i32
    %c0_i32_2 = arith.constant 0 : i32
    return %arg0, %c0_i32, %c0_i32_0, %c0_i32_1 : i32, i32, i32, i32
  }
  func.func @transform_1(%arg0: i32) -> (i32, i32, i32) {
    %c0_i32 = arith.constant 0 : i32
    %c0_i32_0 = arith.constant 0 : i32
    %c0_i32_1 = arith.constant 0 : i32
    %c0_i32_2 = arith.constant 0 : i32
    return %c0_i32, %c0_i32_0, %c0_i32_1 : i32, i32, i32
  }
  func.func @transform_2(%arg0: i32) -> (i32, i32) {
    %c0_i32 = arith.constant 0 : i32
    %c0_i32_0 = arith.constant 0 : i32
    %c0_i32_1 = arith.constant 0 : i32
    return %c0_i32, %c0_i32_0 : i32, i32
  }
  func.func @transform_3(%arg0: i32) -> (i32, i32) {
    %c0_i32 = arith.constant 0 : i32
    %c0_i32_0 = arith.constant 0 : i32
    %c0_i32_1 = arith.constant 0 : i32
    return %c0_i32, %c0_i32_0 : i32, i32
  }
  func.func @transform_4(%arg0: i32) -> (i32, i32) {
    %c0_i32 = arith.constant 0 : i32
    %c0_i32_0 = arith.constant 0 : i32
    %c0_i32_1 = arith.constant 0 : i32
    return %c0_i32, %c0_i32_0 : i32, i32
  }
  func.func @transform_5(%arg0: i32) -> (i32, i32, i32) {
    %c0_i32 = arith.constant 0 : i32
    %c0_i32_0 = arith.constant 0 : i32
    %c0_i32_1 = arith.constant 0 : i32
    %c0_i32_2 = arith.constant 0 : i32
    return %c0_i32, %c0_i32_0, %c0_i32_1 : i32, i32, i32
  }
  func.func @transform_6(%arg0: i32) -> (i32, i32) {
    %c0_i32 = arith.constant 0 : i32
    %c0_i32_0 = arith.constant 0 : i32
    %c0_i32_1 = arith.constant 0 : i32
    return %c0_i32, %c0_i32_0 : i32, i32
  }
  func.func @transform_7(%arg0: i32) -> (i32, i32) {
    %c0_i32 = arith.constant 0 : i32
    %c0_i32_0 = arith.constant 0 : i32
    %c0_i32_1 = arith.constant 0 : i32
    return %c0_i32, %c0_i32_0 : i32, i32
  }
  func.func @transform_8(%arg0: i32) -> (i32, i32) {
    %c0_i32 = arith.constant 0 : i32
    %c0_i32_0 = arith.constant 0 : i32
    %c0_i32_1 = arith.constant 0 : i32
    return %c0_i32, %c0_i32_0 : i32, i32
  }
  func.func @transform_9(%arg0: i32) -> (i32, i32) {
    %c0_i32 = arith.constant 0 : i32
    %c0_i32_0 = arith.constant 0 : i32
    %c0_i32_1 = arith.constant 0 : i32
    return %c0_i32, %c0_i32_0 : i32, i32
  }
  func.func @transform_10(%arg0: i32) -> (i32, i32, i32, i32) {
    %c0_i32 = arith.constant 0 : i32
    %c0_i32_0 = arith.constant 0 : i32
    %c0_i32_1 = arith.constant 0 : i32
    %c0_i32_2 = arith.constant 0 : i32
    return %arg0, %c0_i32, %c0_i32_0, %c0_i32_1 : i32, i32, i32, i32
  }
}

</mosaic_0001>

<bundles_post_ra>
// kernel: cnn_module_forward.1
= control target key start
LH: loop header
LB: loop body
LE: loop exit
PB: predicated region body
PF: predicated region fallthrough
CT: control target
= control target key end

     0   :  { %s10452_s13 = smov 0   ;;  %s13720_s0 = inlined_call_operand.vmem [shape: f32[2,18,9,128], index: 0, kind: input, shape index: {}]   ;;  %s13721_s1 = inlined_call_operand.vmem [shape: bf16[8,128,128], index: 1, kind: input, shape index: {}]   ;;  %s13722_s2 = inlined_call_operand.vmem [shape: f32[1,128], index: 2, kind: input, shape index: {}]   ;;  %s13723_s3 = inlined_call_operand.vmem [shape: f32[1,128], index: 3, kind: input, shape index: {}]   ;;  %s13724_s4 = inlined_call_operand.vmem [shape: f32[1,128], index: 4, kind: input, shape index: {}]   ;;  %s13725_s5 = inlined_call_operand.vmem [shape: bf16[8,256,128], index: 5, kind: input, shape index: {}]   ;;  %s13726_s6 = inlined_call_operand.vmem [shape: f32[1,128], index: 6, kind: input, shape index: {}]   ;;  %s13727_s7 = inlined_call_operand.vmem [shape: f32[1,128], index: 7, kind: input, shape index: {}]   ;;  %s13728_s8 = inlined_call_operand.vmem [shape: f32[1,128], index: 8, kind: input, shape index: {}]   ;;  %s13729_s9 = inlined_call_operand.vmem [shape: f32[8,8], index: 9, kind: input, shape index: {}]   ;;  %s13730_s10 = inlined_call_operand.vmem [shape: f32[2,4,4,128], index: 10, kind: output, shape index: {}]  }
   0x1 LB: > { %s6962_s14 = sadd.s32 4294967295, %s10393_s13   ;;  %p6966_p0 = scmp.ge.s32.totalorder %s10393_s13, 1  ;;  %s10393_s13 = sphi %s10452_s13, %s20_s13  }
   0x2   : > { %p312_p1 = scmp.lt.s32.totalorder %s10393_s13, 3 }
   0x4   : > { %p313_p2 = pnand %p6966_p0, %p312_p1 }
   0x5   : > { %v10463_v0 = vld [vmem:[%s13721_s1 + $0x40] sm:$0xff] (!%p313_p2)   ;;  %v10395_v1 = vmov (!%p313_p2), 0.0   ;;  %v10496_v3 = vld [vmem:[%s13721_s1 + $0x48] sm:$0xff] (!%p313_p2)   ;;  %vm10396_vm0 = vmmov (!%p313_p2), 0   ;;  %v10514_v5 = vld [vmem:[%s13721_s1 + $0x50] sm:$0xff] (!%p313_p2)   ;;  %p350_p3 = scmp.lt.s32.totalorder (!%p313_p2), %s6962_s14, 1 }
   0x6   : > { %316 = sbr.rel (%p313_p2) target bundleno = 2065 (0x811), region = 60  ;;  %8848 = vmatprep.subr.bf16.mxu0 (!%p313_p2), %v10395_v1  ;;  %3646 = vst [vmem:[#allocation2] sm:$0x1f] (!%p313_p2), %v10395_v1  ;;  %3647 = vst [vmem:[#allocation2 + $0x8] sm:$0x1f] (!%p313_p2), %v10395_v1  ;;  %8868 = vmatprep.subr.bf16.mxu1 (!%p313_p2), %v10395_v1  ;;  %v10490_v2 = vld [vmem:[%s13721_s1] sm:$0xff] (!%p313_p2)  }
   0x7   : > { %3648 = vst [vmem:[#allocation2 + $0x10] sm:$0x1f] (!%p313_p2), %v10395_v1  ;;  %3649 = vst [vmem:[#allocation2 + $0x18] sm:$0x1f] (!%p313_p2), %v10395_v1  ;;  %8849 = vmatpush3.bf16.msra.mxu0 (!%p313_p2), %v10463_v0  ;;  %8884 = vmatprep.mubr.msk.bf16.mxu1 (!%p313_p2), %vm10396_vm0, %v10395_v1  ;;  %v10505_v4 = vld [vmem:[%s13721_s1 + $0x8] sm:$0xff] (!%p313_p2)   ;;  %v10521_v6 = vld [vmem:[%s13721_s1 + $0x10] sm:$0xff] (!%p313_p2)  }
   0x8   : > { %3650 = vst [vmem:[#allocation2 + $0x20] sm:$0x1f] (!%p313_p2), %v10395_v1  ;;  %3651 = vst [vmem:[#allocation2 + $0x28] sm:$0x1f] (!%p313_p2), %v10395_v1  ;;  %8869 = vmatpush3.bf16.msra.mxu1 (!%p313_p2), %v10490_v2  ;;  %8850 = vmatprep.subr.bf16.mxu0 (!%p313_p2), %v10395_v1  ;;  %v10530_v7 = vld [vmem:[%s13721_s1 + $0x58] sm:$0xff] (!%p313_p2)   ;;  %v10548_v9 = vld [vmem:[%s13721_s1 + $0x60] sm:$0xff] (!%p313_p2)  }
   0x9   : > { %3652 = vst [vmem:[#allocation2 + $0x30] sm:$0x1f] (!%p313_p2), %v10395_v1  ;;  %3653 = vst [vmem:[#allocation2 + $0x38] sm:$0x1f] (!%p313_p2), %v10395_v1  ;;  %8870 = vmatprep.subr.bf16.mxu1 (!%p313_p2), %v10395_v1  ;;  %8864 = vmatprep.mubr.msk.bf16.mxu0 (!%p313_p2), %vm10396_vm0, %v10395_v1  ;;  %v10537_v8 = vld [vmem:[%s13721_s1 + $0x18] sm:$0xff] (!%p313_p2)   ;;  %v10555_v10 = vld [vmem:[%s13721_s1 + $0x20] sm:$0xff] (!%p313_p2)  }
   0xa   : > { %3654 = vst [vmem:[#allocation2 + $0x40] sm:$0x1f] (!%p313_p2), %v10395_v1  ;;  %3655 = vst [vmem:[#allocation2 + $0x48] sm:$0x1f] (!%p313_p2), %v10395_v1  ;;  %v10563_v11 = vld [vmem:[%s13721_s1 + $0x68] sm:$0xff] (!%p313_p2)   ;;  %v10576_v13 = vld [vmem:[%s13721_s1 + $0x70] sm:$0xff] (!%p313_p2)  }
   0xb   : > { %3656 = vst [vmem:[#allocation2 + $0x50] sm:$0x1f] (!%p313_p2), %v10395_v1  ;;  %3657 = vst [vmem:[#allocation2 + $0x58] sm:$0x1f] (!%p313_p2), %v10395_v1  ;;  %8851 = vmatpush3.bf16.msra.mxu0 (!%p313_p2), %v10496_v3  ;;  %v10568_v12 = vld [vmem:[%s13721_s1 + $0x28] sm:$0xff] (!%p313_p2)   ;;  %v10581_v14 = vld [vmem:[%s13721_s1 + $0x30] sm:$0xff] (!%p313_p2)  }
   0xc   : > { %3658 = vst [vmem:[#allocation2 + $0x60] sm:$0x1f] (!%p313_p2), %v10395_v1  ;;  %3659 = vst [vmem:[#allocation2 + $0x68] sm:$0x1f] (!%p313_p2), %v10395_v1  ;;  %8871 = vmatpush3.bf16.msra.mxu1 (!%p313_p2), %v10505_v4  ;;  %8852 = vmatprep.subr.bf16.mxu0 (!%p313_p2), %v10395_v1  ;;  %v10595_v15 = vld [vmem:[%s13721_s1 + $0x78] sm:$0xff] (!%p313_p2)   ;;  %v10747_v33 = vld [vmem:[%s13721_s1 + $0x40] sm:$0xff] (!%p313_p2)  }
   0xd   : > { %3660 = vst [vmem:[#allocation2 + $0x70] sm:$0x1f] %v10395_v1  ;;  %3661 = vst [vmem:[#allocation2 + $0x78] sm:$0x1f] %v10395_v1  ;;  %8872 = vmatprep.subr.bf16.mxu1 %v10395_v1  ;;  %s13732_s14 = smov (!%p350_p3, %s6962_s14), 1  ;;  %v10601_v17 = vld [vmem:[%s13721_s1 + $0x38] sm:$0xff]  }
   0xe   : > { %3662 = vst [vmem:[#allocation2 + $0x80] sm:$0x1f] %v10395_v1  ;;  %3663 = vst [vmem:[#allocation2 + $0x88] sm:$0x1f] %v10395_v1  ;;  %s10168_s17 = smul.u32 288, %s13732_s14  ;;  %v10753_v34 = vld [vmem:[%s13721_s1] sm:$0xff]  }
   0xf   : > { %3664 = vst [vmem:[#allocation2 + $0x90] sm:$0x1f] %v10395_v1  ;;  %3665 = vst [vmem:[#allocation2 + $0x98] sm:$0x1f] %v10395_v1  ;;  %8853 = vmatpush3.bf16.msra.mxu0 %v10514_v5  ;;  %v10765_v35 = vld [vmem:[%s13721_s1 + $0x48] sm:$0xff]   ;;  %v10779_v37 = vld [vmem:[%s13721_s1 + $0x50] sm:$0xff]  }
  0x10   : > { %8873 = vmatpush3.bf16.msra.mxu1 %v10521_v6  ;;  %8854 = vmatprep.subr.bf16.mxu0 %v10395_v1  ;;  %s10586_s28 = scalar_lea.vmem %s13720_s0, %s10168_s17  ;;  %v10771_v36 = vld [vmem:[%s13721_s1 + $0x8] sm:$0xff]   ;;  %v10785_v38 = vld [vmem:[%s13721_s1 + $0x10] sm:$0xff]   ;;  %v10793_v39 = vld [vmem:[%s13721_s1 + $0x58] sm:$0xff]   ;;  %vm3667_vm3 = vcmask 64512   ;;  %s7551_s22 = sshll.u32 %s13732_s14, 4 }
  0x11   : > { %8874 = vmatprep.subr.bf16.mxu1 %v10395_v1  ;;  %v417_v16 = vld [vmem:[%s10586_s28 + $0x1] sm:$0xff]  ;;  %v10799_v40 = vld [vmem:[%s13721_s1 + $0x18] sm:$0xff]   ;;  %v10835_v45 = vld [vmem:[%s13721_s1 + $0x70] sm:$0xff]   ;;  %s13711_s26 = scalar_lea.vmem %s13730_s10, %s7551_s22 }
  0x12   : > { %v377_v18 = vld [vmem:[%s10586_s28] sm:$0xff]  ;;  %v418_v19 = vpack.c.bf16 %v417_v16, %v417_v16  ;;  %v10821_v43 = vld [vmem:[%s13721_s1 + $0x68] sm:$0xff]   ;;  %v10842_v47 = vld [vmem:[%s13721_s1 + $0x30] sm:$0xff]  }
  0x13   : > { %8855 = vmatpush3.bf16.msra.mxu0 %v10530_v7  ;;  %v378_v20 = vpack.c.bf16 %v377_v18, %v377_v18  ;;  %v7009_v21 = vld [vmem:[%s10586_s28 + $0x21] sm:$0xff]  ;;  %v10897_v54 = vld [vmem:[%s13721_s1 + $0x78] sm:$0xff]  }
  0x14   : > { %8875 = vmatpush3.bf16.msra.mxu1 %v10537_v8  ;;  %8856 = vmatprep.subr.bf16.mxu0 %v10395_v1  ;;  %v6970_v22 = vld [vmem:[%s10586_s28 + $0x20] sm:$0xff]  ;;  %v10646_v23 = vpack.c.bf16 %v7009_v21, %v7009_v21  ;;  %v10827_v44 = vld [vmem:[%s13721_s1 + $0x28] sm:$0xff]   ;;  %v10905_v56 = vld [vmem:[%s13721_s1 + $0x38] sm:$0xff]  }
  0x15   : > { %8876 = vmatprep.subr.bf16.mxu1 %v10395_v1  ;;  %v10649_v24 = vpack.c.bf16 %v6970_v22, %v6970_v22  ;;  %v7010_v25 = vld [vmem:[%s10586_s28 + $0x41] sm:$0xff]  ;;  %v11062_v22 = vld [vmem:[%s13721_s1 + $0xb0] sm:$0xff]  }
  0x16   : > { %v6971_v26 = vld [vmem:[%s10586_s28 + $0x40] sm:$0xff]  ;;  %v10690_v27 = vpack.c.bf16 %v7010_v25, %v7010_v25  ;;  %v11051_v16 = vld [vmem:[%s13721_s1 + $0xa8] sm:$0xff]  }
  0x17   : > { %8857 = vmatpush3.bf16.msra.mxu0 %v10548_v9  ;;  %v10693_v28 = vpack.c.bf16 %v6971_v26, %v6971_v26  ;;  %v7011_v29 = vld [vmem:[%s10586_s28 + $0x61] sm:$0xff] }
  0x18   : > { %8877 = vmatpush3.bf16.msra.mxu1 %v10555_v10  ;;  %8858 = vmatprep.subr.bf16.mxu0 %v10395_v1  ;;  %v6972_v30 = vld [vmem:[%s10586_s28 + $0x60] sm:$0xff]  ;;  %v10734_v31 = vpack.c.bf16 %v7011_v29, %v7011_v29 }
  0x19   : > { %8878 = vmatprep.subr.bf16.mxu1 %v10395_v1  ;;  %v10737_v32 = vpack.c.bf16 %v6972_v30, %v6972_v30  ;;  %v10807_v41 = vld [vmem:[%s13721_s1 + $0x60] sm:$0xff]  }
  0x1a   : > { %v10813_v42 = vld [vmem:[%s13721_s1 + $0x20] sm:$0xff]  }
  0x1b   : > { %8859 = vmatpush3.bf16.msra.mxu0 %v10563_v11  ;;  %v7012_v46 = vld [vmem:[%s10586_s28 + $0x81] sm:$0xff] }
  0x1c   : > { %8879 = vmatpush3.bf16.msra.mxu1 %v10568_v12  ;;  %8860 = vmatprep.subr.bf16.mxu0 %v10395_v1  ;;  %v6973_v48 = vld [vmem:[%s10586_s28 + $0x80] sm:$0xff]  ;;  %v10848_v49 = vpack.c.bf16 %v7012_v46, %v7012_v46 }
  0x1d   : > { %8880 = vmatprep.subr.bf16.mxu1 %v10395_v1  ;;  %v10851_v50 = vpack.c.bf16 %v6973_v48, %v6973_v48  ;;  %v7013_v51 = vld [vmem:[%s10586_s28 + $0xa1] sm:$0xff]  ;;  %v7043_v48 = vld [vmem:[%s10586_s28 + $0x70] sm:$0xff] }
  0x1e   : > { %v6974_v52 = vld [vmem:[%s10586_s28 + $0xa0] sm:$0xff]  ;;  %v10892_v53 = vpack.c.bf16 %v7013_v51, %v7013_v51 }
  0x1f   : > { %8861 = vmatpush3.bf16.msra.mxu0 %v10576_v13  ;;  %v10900_v55 = vpack.c.bf16 %v6974_v52, %v6974_v52  ;;  %v7014_v57 = vld [vmem:[%s10586_s28 + $0xc1] sm:$0xff]  ;;  %v11124_v52 = vpack.c.bf16 %v7043_v48, %v7043_v48  ;;  %v11292_v48 = vld [vmem:[%s13721_s1 + $0xf8] sm:$0xff]  }
  0x20   : > { %8881 = vmatpush3.bf16.msra.mxu1 %v10581_v14  ;;  %8862 = vmatprep.subr.bf16.mxu0 %v10395_v1  ;;  %v6975_v58 = vld [vmem:[%s10586_s28 + $0xc0] sm:$0xff]  ;;  %v10946_v59 = vpack.c.bf16 %v7014_v57, %v7014_v57 }
  0x21   : > { %8882 = vmatprep.subr.bf16.mxu1 %v10395_v1  ;;  %v10949_v60 = vpack.c.bf16 %v6975_v58, %v6975_v58 }
  0x23   : > { %8863 = vmatpush3.bf16.msra.mxu0 %v10595_v15 }
  0x24   : > { %8883 = vmatpush3.bf16.msra.mxu1 %v10601_v17  ;;  %8888 = vmatprep.subr.bf16.mxu0 %v10395_v1 }
  0x25   : > { %8908 = vmatprep.subr.bf16.mxu1 %v10395_v1 }
  0x26   : > { %8865 = vmatmul.mubr.bf16.vlgmr.msra.gmra.mrb[0].mxu0 %v418_v19 }
  0x27   : > { %8885 = vmatmul.mubr.bf16.vlgmr.msra.gmra.mrb[0].mxu1 %v378_v20  ;;  %8889 = vmatpush3.bf16.msra.mxu0 %v10463_v0 }
  0x28   : > { %8909 = vmatpush3.bf16.msra.mxu1 %v10490_v2  ;;  %8890 = vmatprep.subr.bf16.mxu0 %v10395_v1 }
  0x29   : > { %8910 = vmatprep.subr.bf16.mxu1 %v10395_v1  ;;  %8924 = vmatprep.mubr.msk.bf16.mxu1 %vm10396_vm0, %v10395_v1 }
  0x2a   : > { %8904 = vmatprep.mubr.msk.bf16.mxu0 %vm10396_vm0, %v10395_v1 }
  0x2b   : > { %8891 = vmatpush3.bf16.msra.mxu0 %v10496_v3 }
  0x2c   : > { %8911 = vmatpush3.bf16.msra.mxu1 %v10505_v4  ;;  %8892 = vmatprep.subr.bf16.mxu0 %v10395_v1 }
  0x2d   : > { %8912 = vmatprep.subr.bf16.mxu1 %v10395_v1 }
  0x2f   : > { %8893 = vmatpush3.bf16.msra.mxu0 %v10514_v5 }
  0x30   : > { %8913 = vmatpush3.bf16.msra.mxu1 %v10521_v6  ;;  %8894 = vmatprep.subr.bf16.mxu0 %v10395_v1 }
  0x31   : > { %8914 = vmatprep.subr.bf16.mxu1 %v10395_v1 }
  0x33   : > { %8895 = vmatpush3.bf16.msra.mxu0 %v10530_v7 }
  0x34   : > { %8915 = vmatpush3.bf16.msra.mxu1 %v10537_v8  ;;  %8896 = vmatprep.subr.bf16.mxu0 %v10395_v1 }
  0x35   : > { %8916 = vmatprep.subr.bf16.mxu1 %v10395_v1 }
  0x37   : > { %8897 = vmatpush3.bf16.msra.mxu0 %v10548_v9 }
  0x38   : > { %8917 = vmatpush3.bf16.msra.mxu1 %v10555_v10  ;;  %8898 = vmatprep.subr.bf16.mxu0 %v10395_v1 }
  0x39   : > { %8918 = vmatprep.subr.bf16.mxu1 %v10395_v1 }
  0x3b   : > { %8899 = vmatpush3.bf16.msra.mxu0 %v10563_v11 }
  0x3c   : > { %8919 = vmatpush3.bf16.msra.mxu1 %v10568_v12  ;;  %8900 = vmatprep.subr.bf16.mxu0 %v10395_v1 }
  0x3d   : > { %8920 = vmatprep.subr.bf16.mxu1 %v10395_v1 }
  0x3f   : > { %8901 = vmatpush3.bf16.msra.mxu0 %v10576_v13 }
  0x40   : > { %8921 = vmatpush3.bf16.msra.mxu1 %v10581_v14  ;;  %8902 = vmatprep.subr.bf16.mxu0 %v10395_v1 }
  0x41   : > { %8922 = vmatprep.subr.bf16.mxu1 %v10395_v1 }
  0x43   : > { %8903 = vmatpush3.bf16.msra.mxu0 %v10595_v15 }
  0x44   : > { %8923 = vmatpush3.bf16.msra.mxu1 %v10601_v17  ;;  %8928 = vmatprep.subr.bf16.mxu0 %v10395_v1 }
  0x45   : > { %8948 = vmatprep.subr.bf16.mxu1 %v10395_v1 }
  0x46   : > { %8905 = vmatmul.mubr.bf16.vlgmr.msra.gmra.mrb[4].mxu0 %v10646_v23 }
  0x47   : > { %8925 = vmatmul.mubr.bf16.vlgmr.msra.gmra.mrb[4].mxu1 %v10649_v24  ;;  %8929 = vmatpush3.bf16.msra.mxu0 %v10463_v0 }
  0x48   : > { %8949 = vmatpush3.bf16.msra.mxu1 %v10490_v2  ;;  %8930 = vmatprep.subr.bf16.mxu0 %v10395_v1 }
  0x49   : > { %8950 = vmatprep.subr.bf16.mxu1 %v10395_v1  ;;  %8964 = vmatprep.mubr.msk.bf16.mxu1 %vm10396_vm0, %v10395_v1 }
  0x4a   : > { %8944 = vmatprep.mubr.msk.bf16.mxu0 %vm10396_vm0, %v10395_v1 }
  0x4b   : > { %8931 = vmatpush3.bf16.msra.mxu0 %v10496_v3 }
  0x4c   : > { %8951 = vmatpush3.bf16.msra.mxu1 %v10505_v4  ;;  %8932 = vmatprep.subr.bf16.mxu0 %v10395_v1 }
  0x4d   : > { %8952 = vmatprep.subr.bf16.mxu1 %v10395_v1 }
  0x4f   : > { %8933 = vmatpush3.bf16.msra.mxu0 %v10514_v5 }
  0x50   : > { %8953 = vmatpush3.bf16.msra.mxu1 %v10521_v6  ;;  %8934 = vmatprep.subr.bf16.mxu0 %v10395_v1 }
  0x51   : > { %8954 = vmatprep.subr.bf16.mxu1 %v10395_v1 }
  0x53   : > { %8935 = vmatpush3.bf16.msra.mxu0 %v10530_v7 }
  0x54   : > { %8955 = vmatpush3.bf16.msra.mxu1 %v10537_v8  ;;  %8936 = vmatprep.subr.bf16.mxu0 %v10395_v1 }
  0x55   : > { %8956 = vmatprep.subr.bf16.mxu1 %v10395_v1 }
  0x57   : > { %8937 = vmatpush3.bf16.msra.mxu0 %v10548_v9 }
  0x58   : > { %8957 = vmatpush3.bf16.msra.mxu1 %v10555_v10  ;;  %8938 = vmatprep.subr.bf16.mxu0 %v10395_v1 }
  0x59   : > { %8958 = vmatprep.subr.bf16.mxu1 %v10395_v1 }
  0x5b   : > { %8939 = vmatpush3.bf16.msra.mxu0 %v10563_v11 }
  0x5c   : > { %8959 = vmatpush3.bf16.msra.mxu1 %v10568_v12  ;;  %8940 = vmatprep.subr.bf16.mxu0 %v10395_v1 }
  0x5d   : > { %8960 = vmatprep.subr.bf16.mxu1 %v10395_v1 }
  0x5f   : > { %8941 = vmatpush3.bf16.msra.mxu0 %v10576_v13 }
  0x60   : > { %8961 = vmatpush3.bf16.msra.mxu1 %v10581_v14  ;;  %8942 = vmatprep.subr.bf16.mxu0 %v10395_v1 }
  0x61   : > { %8962 = vmatprep.subr.bf16.mxu1 %v10395_v1 }
  0x63   : > { %8943 = vmatpush3.bf16.msra.mxu0 %v10595_v15 }
  0x64   : > { %8963 = vmatpush3.bf16.msra.mxu1 %v10601_v17  ;;  %8968 = vmatprep.subr.bf16.mxu0 %v10395_v1 }
  0x65   : > { %8988 = vmatprep.subr.bf16.mxu1 %v10395_v1 }
  0x66   : > { %8945 = vmatmul.mubr.bf16.vlgmr.msra.gmra.mrb[8].mxu0 %v10690_v27 }
  0x67   : > { %8965 = vmatmul.mubr.bf16.vlgmr.msra.gmra.mrb[8].mxu1 %v10693_v28  ;;  %8969 = vmatpush3.bf16.msra.mxu0 %v10463_v0 }
  0x68   : > { %8989 = vmatpush3.bf16.msra.mxu1 %v10490_v2  ;;  %8970 = vmatprep.subr.bf16.mxu0 %v10395_v1 }
  0x69   : > { %8990 = vmatprep.subr.bf16.mxu1 %v10395_v1  ;;  %9004 = vmatprep.mubr.msk.bf16.mxu1 %vm10396_vm0, %v10395_v1 }
  0x6a   : > { %8984 = vmatprep.mubr.msk.bf16.mxu0 %vm10396_vm0, %v10395_v1 }
  0x6b   : > { %8971 = vmatpush3.bf16.msra.mxu0 %v10496_v3 }
  0x6c   : > { %8991 = vmatpush3.bf16.msra.mxu1 %v10505_v4  ;;  %8972 = vmatprep.subr.bf16.mxu0 %v10395_v1 }
  0x6d   : > { %8992 = vmatprep.subr.bf16.mxu1 %v10395_v1 }
  0x6f   : > { %8973 = vmatpush3.bf16.msra.mxu0 %v10514_v5 }
  0x70   : > { %8993 = vmatpush3.bf16.msra.mxu1 %v10521_v6  ;;  %8974 = vmatprep.subr.bf16.mxu0 %v10395_v1 }
  0x71   : > { %8994 = vmatprep.subr.bf16.mxu1 %v10395_v1 }
  0x73   : > { %8975 = vmatpush3.bf16.msra.mxu0 %v10530_v7  ;;  %v7015_v7 = vld [vmem:[%s10586_s28 + $0xe1] sm:$0xff] }
  0x74   : > { %8995 = vmatpush3.bf16.msra.mxu1 %v10537_v8  ;;  %8976 = vmatprep.subr.bf16.mxu0 %v10395_v1  ;;  %v6976_v8 = vld [vmem:[%s10586_s28 + $0xe0] sm:$0xff] }
  0x75   : > { %8996 = vmatprep.subr.bf16.mxu1 %v10395_v1 }
  0x77   : > { %8977 = vmatpush3.bf16.msra.mxu0 %v10548_v9  ;;  %v10992_v9 = vpack.c.bf16 %v7015_v7, %v7015_v7 }
  0x78   : > { %8997 = vmatpush3.bf16.msra.mxu1 %v10555_v10  ;;  %8978 = vmatprep.subr.bf16.mxu0 %v10395_v1  ;;  %v10995_v10 = vpack.c.bf16 %v6976_v8, %v6976_v8 }
  0x79   : > { %8998 = vmatprep.subr.bf16.mxu1 %v10395_v1 }
  0x7b   : > { %8979 = vmatpush3.bf16.msra.mxu0 %v10563_v11  ;;  %v11000_v11 = vld [vmem:[%s13721_s1 + $0x80] sm:$0xff]  }
  0x7c   : > { %8999 = vmatpush3.bf16.msra.mxu1 %v10568_v12  ;;  %8980 = vmatprep.subr.bf16.mxu0 %v10395_v1  ;;  %v11011_v12 = vld [vmem:[%s13721_s1 + $0x88] sm:$0xff]  }
  0x7d   : > { %9000 = vmatprep.subr.bf16.mxu1 %v10395_v1 }
  0x7f   : > { %8981 = vmatpush3.bf16.msra.mxu0 %v10576_v13  ;;  %v11024_v13 = vld [vmem:[%s13721_s1 + $0x90] sm:$0xff]  }
  0x80   : > { %9001 = vmatpush3.bf16.msra.mxu1 %v10581_v14  ;;  %8982 = vmatprep.subr.bf16.mxu0 %v10395_v1  ;;  %v11033_v14 = vld [vmem:[%s13721_s1 + $0x98] sm:$0xff]  }
  0x81   : > { %9002 = vmatprep.subr.bf16.mxu1 %v10395_v1 }
  0x83   : > { %8983 = vmatpush3.bf16.msra.mxu0 %v10595_v15 }
  0x84   : > { %9003 = vmatpush3.bf16.msra.mxu1 %v10601_v17  ;;  %9008 = vmatprep.subr.bf16.mxu0 %v10395_v1 }
  0x85   : > { %9028 = vmatprep.subr.bf16.mxu1 %v10395_v1 }
  0x86   : > { %8985 = vmatmul.mubr.bf16.vlgmr.msra.gmra.mrb[12].mxu0 %v10734_v31 }
  0x87   : > { %9005 = vmatmul.mubr.bf16.vlgmr.msra.gmra.mrb[12].mxu1 %v10737_v32  ;;  %9009 = vmatpush3.bf16.msra.mxu0 %v10747_v33 }
  0x88   : > { %9029 = vmatpush3.bf16.msra.mxu1 %v10753_v34  ;;  %9010 = vmatprep.subr.bf16.mxu0 %v10395_v1 }
  0x89   : > { %9030 = vmatprep.subr.bf16.mxu1 %v10395_v1  ;;  %9044 = vmatprep.mubr.msk.bf16.mxu1 %vm10396_vm0, %v10395_v1 }
  0x8a   : > { %9024 = vmatprep.mubr.msk.bf16.mxu0 %vm10396_vm0, %v10395_v1 }
  0x8b   : > { %9011 = vmatpush3.bf16.msra.mxu0 %v10765_v35 }
  0x8c   : > { %9031 = vmatpush3.bf16.msra.mxu1 %v10771_v36  ;;  %9012 = vmatprep.subr.bf16.mxu0 %v10395_v1 }
  0x8d   : > { %9032 = vmatprep.subr.bf16.mxu1 %v10395_v1 }
  0x8f   : > { %9013 = vmatpush3.bf16.msra.mxu0 %v10779_v37 }
  0x90   : > { %9033 = vmatpush3.bf16.msra.mxu1 %v10785_v38  ;;  %9014 = vmatprep.subr.bf16.mxu0 %v10395_v1 }
  0x91   : > { %9034 = vmatprep.subr.bf16.mxu1 %v10395_v1 }
  0x93   : > { %9015 = vmatpush3.bf16.msra.mxu0 %v10793_v39 }
  0x94   : > { %9035 = vmatpush3.bf16.msra.mxu1 %v10799_v40  ;;  %9016 = vmatprep.subr.bf16.mxu0 %v10395_v1 }
  0x95   : > { %9036 = vmatprep.subr.bf16.mxu1 %v10395_v1 }
  0x97   : > { %9017 = vmatpush3.bf16.msra.mxu0 %v10807_v41 }
  0x98   : > { %9037 = vmatpush3.bf16.msra.mxu1 %v10813_v42  ;;  %9018 = vmatprep.subr.bf16.mxu0 %v10395_v1 }
  0x99   : > { %9038 = vmatprep.subr.bf16.mxu1 %v10395_v1 }
  0x9b   : > { %9019 = vmatpush3.bf16.msra.mxu0 %v10821_v43 }
  0x9c   : > { %9039 = vmatpush3.bf16.msra.mxu1 %v10827_v44  ;;  %9020 = vmatprep.subr.bf16.mxu0 %v10395_v1 }
  0x9d   : > { %9040 = vmatprep.subr.bf16.mxu1 %v10395_v1 }
  0x9f   : > { %9021 = vmatpush3.bf16.msra.mxu0 %v10835_v45 }
  0xa0   : > { %9041 = vmatpush3.bf16.msra.mxu1 %v10842_v47  ;;  %9022 = vmatprep.subr.bf16.mxu0 %v10395_v1 }
  0xa1   : > { %9042 = vmatprep.subr.bf16.mxu1 %v10395_v1 }
  0xa3   : > { %9023 = vmatpush3.bf16.msra.mxu0 %v10595_v15  ;;  %v11042_v15 = vld [vmem:[%s13721_s1 + $0xa0] sm:$0xff]  }
  0xa4   : > { %9043 = vmatpush3.bf16.msra.mxu1 %v10601_v17  ;;  %9048 = vmatprep.subr.bf16.mxu0 %v10395_v1 }
  0xa5   : > { %9068 = vmatprep.subr.bf16.mxu1 %v10395_v1 }
  0xa6   : > { %9025 = vmatmul.mubr.bf16.vlgmr.msra.gmra.mrb[16].mxu0 %v10848_v49 }
  0xa7   : > { %9045 = vmatmul.mubr.bf16.vlgmr.msra.gmra.mrb[16].mxu1 %v10851_v50  ;;  %9049 = vmatpush3.bf16.msra.mxu0 %v10747_v33 }
  0xa8   : > { %9069 = vmatpush3.bf16.msra.mxu1 %v10753_v34  ;;  %9050 = vmatprep.subr.bf16.mxu0 %v10395_v1 }
  0xa9   : > { %9070 = vmatprep.subr.bf16.mxu1 %v10395_v1  ;;  %9084 = vmatprep.mubr.msk.bf16.mxu1 %vm10396_vm0, %v10395_v1 }
  0xaa   : > { %9064 = vmatprep.mubr.msk.bf16.mxu0 %vm10396_vm0, %v10395_v1 }
  0xab   : > { %9051 = vmatpush3.bf16.msra.mxu0 %v10765_v35 }
  0xac   : > { %9071 = vmatpush3.bf16.msra.mxu1 %v10771_v36  ;;  %9052 = vmatprep.subr.bf16.mxu0 %v10395_v1 }
  0xad   : > { %9072 = vmatprep.subr.bf16.mxu1 %v10395_v1 }
  0xaf   : > { %9053 = vmatpush3.bf16.msra.mxu0 %v10779_v37 }
  0xb0   : > { %9073 = vmatpush3.bf16.msra.mxu1 %v10785_v38  ;;  %9054 = vmatprep.subr.bf16.mxu0 %v10395_v1 }
  0xb1   : > { %9074 = vmatprep.subr.bf16.mxu1 %v10395_v1 }
  0xb3   : > { %9055 = vmatpush3.bf16.msra.mxu0 %v10793_v39 }
  0xb4   : > { %9075 = vmatpush3.bf16.msra.mxu1 %v10799_v40  ;;  %9056 = vmatprep.subr.bf16.mxu0 %v10395_v1 }
  0xb5   : > { %9076 = vmatprep.subr.bf16.mxu1 %v10395_v1 }
  0xb7   : > { %9057 = vmatpush3.bf16.msra.mxu0 %v10807_v41 }
  0xb8   : > { %9077 = vmatpush3.bf16.msra.mxu1 %v10813_v42  ;;  %9058 = vmatprep.subr.bf16.mxu0 %v10395_v1 }
  0xb9   : > { %9078 = vmatprep.subr.bf16.mxu1 %v10395_v1 }
  0xbb   : > { %9059 = vmatpush3.bf16.msra.mxu0 %v10821_v43 }
  0xbc   : > { %9079 = vmatpush3.bf16.msra.mxu1 %v10827_v44  ;;  %9060 = vmatprep.subr.bf16.mxu0 %v10395_v1 }
  0xbd   : > { %9080 = vmatprep.subr.bf16.mxu1 %v10395_v1 }
  0xbf   : > { %9061 = vmatpush3.bf16.msra.mxu0 %v10835_v45 }
  0xc0   : > { %9081 = vmatpush3.bf16.msra.mxu1 %v10842_v47  ;;  %9062 = vmatprep.subr.bf16.mxu0 %v10395_v1 }
  0xc1   : > { %9082 = vmatprep.subr.bf16.mxu1 %v10395_v1 }
  0xc3   : > { %9063 = vmatpush3.bf16.msra.mxu0 %v10897_v54 }
  0xc4   : > { %9083 = vmatpush3.bf16.msra.mxu1 %v10905_v56  ;;  %9088 = vmatprep.subr.bf16.mxu0 %v10395_v1 }
  0xc5   : > { %9108 = vmatprep.subr.bf16.mxu1 %v10395_v1 }
  0xc6   : > { %9065 = vmatmul.mubr.bf16.vlgmr.msra.gmra.mrb[20].mxu0 %v10892_v53 }
  0xc7   : > { %9085 = vmatmul.mubr.bf16.vlgmr.msra.gmra.mrb[20].mxu1 %v10900_v55  ;;  %9089 = vmatpush3.bf16.msra.mxu0 %v10747_v33 }
  0xc8   : > { %9109 = vmatpush3.bf16.msra.mxu1 %v10753_v34  ;;  %9090 = vmatprep.subr.bf16.mxu0 %v10395_v1 }
  0xc9   : > { %9110 = vmatprep.subr.bf16.mxu1 %v10395_v1  ;;  %9124 = vmatprep.mubr.msk.bf16.mxu1 %vm10396_vm0, %v10395_v1 }
  0xca   : > { %9104 = vmatprep.mubr.msk.bf16.mxu0 %vm10396_vm0, %v10395_v1 }
  0xcb   : > { %9091 = vmatpush3.bf16.msra.mxu0 %v10765_v35 }
  0xcc   : > { %9111 = vmatpush3.bf16.msra.mxu1 %v10771_v36  ;;  %9092 = vmatprep.subr.bf16.mxu0 %v10395_v1 }
  0xcd   : > { %9112 = vmatprep.subr.bf16.mxu1 %v10395_v1 }
  0xcf   : > { %9093 = vmatpush3.bf16.msra.mxu0 %v10779_v37 }
  0xd0   : > { %9113 = vmatpush3.bf16.msra.mxu1 %v10785_v38  ;;  %9094 = vmatprep.subr.bf16.mxu0 %v10395_v1 }
  0xd1   : > { %9114 = vmatprep.subr.bf16.mxu1 %v10395_v1 }
  0xd3   : > { %9095 = vmatpush3.bf16.msra.mxu0 %v10793_v39 }
  0xd4   : > { %9115 = vmatpush3.bf16.msra.mxu1 %v10799_v40  ;;  %9096 = vmatprep.subr.bf16.mxu0 %v10395_v1 }
  0xd5   : > { %9116 = vmatprep.subr.bf16.mxu1 %v10395_v1 }
  0xd7   : > { %9097 = vmatpush3.bf16.msra.mxu0 %v10807_v41 }
  0xd8   : > { %9117 = vmatpush3.bf16.msra.mxu1 %v10813_v42  ;;  %9098 = vmatprep.subr.bf16.mxu0 %v10395_v1 }
  0xd9   : > { %9118 = vmatprep.subr.bf16.mxu1 %v10395_v1 }
  0xdb   : > { %9099 = vmatpush3.bf16.msra.mxu0 %v10821_v43 }
  0xdc   : > { %9119 = vmatpush3.bf16.msra.mxu1 %v10827_v44  ;;  %9100 = vmatprep.subr.bf16.mxu0 %v10395_v1 }
  0xdd   : > { %9120 = vmatprep.subr.bf16.mxu1 %v10395_v1 }
  0xdf   : > { %9101 = vmatpush3.bf16.msra.mxu0 %v10835_v45 }
  0xe0   : > { %9121 = vmatpush3.bf16.msra.mxu1 %v10842_v47  ;;  %9102 = vmatprep.subr.bf16.mxu0 %v10395_v1 }
  0xe1   : > { %9122 = vmatprep.subr.bf16.mxu1 %v10395_v1 }
  0xe3   : > { %9103 = vmatpush3.bf16.msra.mxu0 %v10897_v54 }
  0xe4   : > { %9123 = vmatpush3.bf16.msra.mxu1 %v10905_v56  ;;  %9128 = vmatprep.subr.bf16.mxu0 %v10395_v1 }
  0xe5   : > { %9148 = vmatprep.subr.bf16.mxu1 %v10395_v1 }
  0xe6   : > { %9105 = vmatmul.mubr.bf16.vlgmr.msra.gmra.mrb[24].mxu0 %v10946_v59 }
  0xe7   : > { %9125 = vmatmul.mubr.bf16.vlgmr.msra.gmra.mrb[24].mxu1 %v10949_v60  ;;  %9129 = vmatpush3.bf16.msra.mxu0 %v10747_v33  ;;  %v11071_v33 = vld [vmem:[%s13721_s1 + $0xb8] sm:$0xff]  }
  0xe8   : > { %9149 = vmatpush3.bf16.msra.mxu1 %v10753_v34  ;;  %9130 = vmatprep.subr.bf16.mxu0 %v10395_v1  ;;  %v7032_v34 = vld [vmem:[%s10586_s28 + $0x10] sm:$0xff] }
  0xe9   : > { %9150 = vmatprep.subr.bf16.mxu1 %v10395_v1  ;;  %9164 = vmatprep.mubr.msk.bf16.mxu1 %vm10396_vm0, %v10395_v1 }
  0xea   : > { %9144 = vmatprep.mubr.msk.bf16.mxu0 %vm10396_vm0, %v10395_v1 }
  0xeb   : > { %9131 = vmatpush3.bf16.msra.mxu0 %v10765_v35  ;;  %v7041_v35 = vld [vmem:[%s10586_s28 + $0x30] sm:$0xff] }
  0xec   : > { %9151 = vmatpush3.bf16.msra.mxu1 %v10771_v36  ;;  %9132 = vmatprep.subr.bf16.mxu0 %v10395_v1  ;;  %v1188_v36 = vpack.c.bf16 %v7032_v34, %v7032_v34  ;;  %v11263_v34 = vld [vmem:[%s13721_s1 + $0xe0] sm:$0xff]  }
  0xed   : > { %9152 = vmatprep.subr.bf16.mxu1 %v10395_v1 }
  0xef   : > { %9133 = vmatpush3.bf16.msra.mxu0 %v10779_v37  ;;  %v11079_v37 = vpack.c.bf16 %v7041_v35, %v7041_v35  ;;  %v11272_v35 = vld [vmem:[%s13721_s1 + $0xe8] sm:$0xff]  }
  0xf0   : > { %9153 = vmatpush3.bf16.msra.mxu1 %v10785_v38  ;;  %9134 = vmatprep.subr.bf16.mxu0 %v10395_v1 }
  0xf1   : > { %9154 = vmatprep.subr.bf16.mxu1 %v10395_v1 }
  0xf3   : > { %9135 = vmatpush3.bf16.msra.mxu0 %v10793_v39 }
  0xf4   : > { %9155 = vmatpush3.bf16.msra.mxu1 %v10799_v40  ;;  %9136 = vmatprep.subr.bf16.mxu0 %v10395_v1 }
  0xf5   : > { %9156 = vmatprep.subr.bf16.mxu1 %v10395_v1 }
  0xf7   : > { %9137 = vmatpush3.bf16.msra.mxu0 %v10807_v41 }
  0xf8   : > { %9157 = vmatpush3.bf16.msra.mxu1 %v10813_v42  ;;  %9138 = vmatprep.subr.bf16.mxu0 %v10395_v1 }
  0xf9   : > { %v501_v61 = vpop.f32.mrb[0].mxu0  ;;  %9158 = vmatprep.subr.bf16.mxu1 %v10395_v1 }
  0xfa   : > { %v589_v62 = vpop.f32.mrb[0].mxu1  ;;  %v8866_v63 = vpop.f32.mrb[1].mxu0 }
  0xfb   : > { %v10980_v0 = vadd.f32 %v589_v62, %v501_v61  ;;  %v8886_v2 = vpop.f32.mrb[1].mxu1  ;;  %9139 = vmatpush3.bf16.msra.mxu0 %v10821_v43  ;;  %v504_v3 = vpop.f32.mrb[2].mxu0 }
  0xfc   : > { %v592_v4 = vpop.f32.mrb[2].mxu1  ;;  %9159 = vmatpush3.bf16.msra.mxu1 %v10827_v44  ;;  %9140 = vmatprep.subr.bf16.mxu0 %v10395_v1  ;;  %v8867_v5 = vpop.f32.mrb[3].mxu0 }
  0xfd   : > { %v8887_v6 = vpop.f32.mrb[3].mxu1  ;;  %9160 = vmatprep.subr.bf16.mxu1 %v10395_v1  ;;  %v7044_v4 = vld [vmem:[%s10586_s28 + $0x90] sm:$0xff] }
  0xfe   : > { %v7045_v5 = vld [vmem:[%s10586_s28 + $0xb0] sm:$0xff]  ;;  %v11167_v6 = vpack.c.bf16 %v7044_v4, %v7044_v4 }
  0xff   : > { %9141 = vmatpush3.bf16.msra.mxu0 %v10835_v45  ;;  %v11170_v7 = vpack.c.bf16 %v7045_v5, %v7045_v5 }
 0x100   : > { %9161 = vmatpush3.bf16.msra.mxu1 %v10842_v47  ;;  %9142 = vmatprep.subr.bf16.mxu0 %v10395_v1  ;;  %v7042_v47 = vld [vmem:[%s10586_s28 + $0x50] sm:$0xff] }
 0x101   : > { %9162 = vmatprep.subr.bf16.mxu1 %v10395_v1  ;;  %v11121_v51 = vpack.c.bf16 %v7042_v47, %v7042_v47 }
 0x103   : > { %9143 = vmatpush3.bf16.msra.mxu0 %v10897_v54 }
 0x104   : > { %9163 = vmatpush3.bf16.msra.mxu1 %v10905_v56  ;;  %9168 = vmatprep.subr.bf16.mxu0 %v10395_v1 }
 0x105   : > { %9188 = vmatprep.subr.bf16.mxu1 %v10395_v1 }
 0x106   : > { %9145 = vmatmul.mubr.bf16.vlgmr.msra.gmra.mrb[28].mxu0 %v10992_v9 }
 0x107   : > { %9165 = vmatmul.mubr.bf16.vlgmr.msra.gmra.mrb[28].mxu1 %v10995_v10  ;;  %9169 = vmatpush3.bf16.msra.mxu0 %v11000_v11 }
 0x108   : > { %9189 = vmatpush3.bf16.msra.mxu1 %v11000_v11  ;;  %9170 = vmatprep.subr.bf16.mxu0 %v10395_v1 }
 0x109   : > { %9190 = vmatprep.subr.bf16.mxu1 %v10395_v1  ;;  %9184 = vmatprep.mubr.msk.bf16.mxu0 %vm10396_vm0, %v10395_v1 }
 0x10a   : > { %9204 = vmatprep.mubr.msk.bf16.mxu1 %vm10396_vm0, %v10395_v1 }
 0x10b   : > { %9171 = vmatpush3.bf16.msra.mxu0 %v11011_v12 }
 0x10c   : > { %9191 = vmatpush3.bf16.msra.mxu1 %v11011_v12  ;;  %9172 = vmatprep.subr.bf16.mxu0 %v10395_v1 }
 0x10d   : > { %9192 = vmatprep.subr.bf16.mxu1 %v10395_v1 }
 0x10f   : > { %9173 = vmatpush3.bf16.msra.mxu0 %v11024_v13 }
 0x110   : > { %9193 = vmatpush3.bf16.msra.mxu1 %v11024_v13  ;;  %9174 = vmatprep.subr.bf16.mxu0 %v10395_v1 }
 0x111   : > { %9194 = vmatprep.subr.bf16.mxu1 %v10395_v1 }
 0x113   : > { %9175 = vmatpush3.bf16.msra.mxu0 %v11033_v14 }
 0x114   : > { %9195 = vmatpush3.bf16.msra.mxu1 %v11033_v14  ;;  %9176 = vmatprep.subr.bf16.mxu0 %v10395_v1 }
 0x115   : > { %9196 = vmatprep.subr.bf16.mxu1 %v10395_v1 }
 0x117   : > { %9177 = vmatpush3.bf16.msra.mxu0 %v11042_v15 }
 0x118   : > { %9197 = vmatpush3.bf16.msra.mxu1 %v11042_v15  ;;  %9178 = vmatprep.subr.bf16.mxu0 %v10395_v1 }
 0x119   : > { %v631_v17 = vpop.f32.mrb[4].mxu0  ;;  %9198 = vmatprep.subr.bf16.mxu1 %v10395_v1 }
 0x11a   : > { %v671_v18 = vpop.f32.mrb[4].mxu1  ;;  %v8906_v19 = vpop.f32.mrb[5].mxu0 }
 0x11b   : > { %v11056_v20 = vadd.f32 %v671_v18, %v631_v17  ;;  %v8926_v21 = vpop.f32.mrb[5].mxu1  ;;  %9179 = vmatpush3.bf16.msra.mxu0 %v11051_v16  ;;  %v634_v25 = vpop.f32.mrb[6].mxu0 }
 0x11c   : > { %v674_v26 = vpop.f32.mrb[6].mxu1  ;;  %9199 = vmatpush3.bf16.msra.mxu1 %v11051_v16  ;;  %9180 = vmatprep.subr.bf16.mxu0 %v10395_v1  ;;  %v8907_v29 = vpop.f32.mrb[7].mxu0  ;;  %v7046_v21 = vld [vmem:[%s10586_s28 + $0xd0] sm:$0xff] }
 0x11d   : > { %v8927_v30 = vpop.f32.mrb[7].mxu1  ;;  %9200 = vmatprep.subr.bf16.mxu1 %v10395_v1  ;;  %v7047_v25 = vld [vmem:[%s10586_s28 + $0xf0] sm:$0xff]  ;;  %v11213_v26 = vpack.c.bf16 %v7046_v21, %v7046_v21  ;;  %v11221_v29 = vld [vmem:[%s13721_s1 + $0xc0] sm:$0xff]  }
 0x11e   : > { %v11245_v30 = vld [vmem:[%s13721_s1 + $0xd0] sm:$0xff]  }
 0x11f   : > { %9181 = vmatpush3.bf16.msra.mxu0 %v11062_v22 }
 0x120   : > { %9201 = vmatpush3.bf16.msra.mxu1 %v11062_v22  ;;  %9182 = vmatprep.subr.bf16.mxu0 %v10395_v1 }
 0x121   : > { %9202 = vmatprep.subr.bf16.mxu1 %v10395_v1 }
 0x123   : > { %9183 = vmatpush3.bf16.msra.mxu0 %v11071_v33 }
 0x124   : > { %9203 = vmatpush3.bf16.msra.mxu1 %v11071_v33  ;;  %9208 = vmatprep.subr.bf16.mxu0 %v10395_v1 }
 0x125   : > { %9228 = vmatprep.subr.bf16.mxu1 %v10395_v1 }
 0x126   : > { %9185 = vmatmul.mubr.bf16.vlgmr.msra.gmra.mrb[32].mxu0 %v1188_v36 }
 0x127   : > { %9205 = vmatmul.mubr.bf16.vlgmr.msra.gmra.mrb[32].mxu1 %v11079_v37  ;;  %9209 = vmatpush3.bf16.msra.mxu0 %v11000_v11 }
 0x128   : > { %9229 = vmatpush3.bf16.msra.mxu1 %v11000_v11  ;;  %9210 = vmatprep.subr.bf16.mxu0 %v10395_v1 }
 0x129   : > { %9230 = vmatprep.subr.bf16.mxu1 %v10395_v1  ;;  %9224 = vmatprep.mubr.msk.bf16.mxu0 %vm10396_vm0, %v10395_v1 }
 0x12a   : > { %9244 = vmatprep.mubr.msk.bf16.mxu1 %vm10396_vm0, %v10395_v1 }
 0x12b   : > { %9211 = vmatpush3.bf16.msra.mxu0 %v11011_v12 }
 0x12c   : > { %9231 = vmatpush3.bf16.msra.mxu1 %v11011_v12  ;;  %9212 = vmatprep.subr.bf16.mxu0 %v10395_v1 }
 0x12d   : > { %9232 = vmatprep.subr.bf16.mxu1 %v10395_v1 }
 0x12f   : > { %9213 = vmatpush3.bf16.msra.mxu0 %v11024_v13 }
 0x130   : > { %9233 = vmatpush3.bf16.msra.mxu1 %v11024_v13  ;;  %9214 = vmatprep.subr.bf16.mxu0 %v10395_v1 }
 0x131   : > { %9234 = vmatprep.subr.bf16.mxu1 %v10395_v1 }
 0x133   : > { %9215 = vmatpush3.bf16.msra.mxu0 %v11033_v14 }
 0x134   : > { %9235 = vmatpush3.bf16.msra.mxu1 %v11033_v14  ;;  %9216 = vmatprep.subr.bf16.mxu0 %v10395_v1 }
 0x135   : > { %9236 = vmatprep.subr.bf16.mxu1 %v10395_v1 }
 0x137   : > { %9217 = vmatpush3.bf16.msra.mxu0 %v11042_v15 }
 0x138   : > { %9237 = vmatpush3.bf16.msra.mxu1 %v11042_v15  ;;  %9218 = vmatprep.subr.bf16.mxu0 %v10395_v1 }
 0x139   : > { %v713_v38 = vpop.f32.mrb[8].mxu0  ;;  %9238 = vmatprep.subr.bf16.mxu1 %v10395_v1 }
 0x13a   : > { %v753_v39 = vpop.f32.mrb[8].mxu1  ;;  %v8946_v40 = vpop.f32.mrb[9].mxu0 }
 0x13b   : > { %v11109_v41 = vadd.f32 %v753_v39, %v713_v38  ;;  %v8966_v42 = vpop.f32.mrb[9].mxu1  ;;  %9219 = vmatpush3.bf16.msra.mxu0 %v11051_v16  ;;  %v716_v43 = vpop.f32.mrb[10].mxu0 }
 0x13c   : > { %v756_v44 = vpop.f32.mrb[10].mxu1  ;;  %9239 = vmatpush3.bf16.msra.mxu1 %v11051_v16  ;;  %9220 = vmatprep.subr.bf16.mxu0 %v10395_v1  ;;  %v8947_v45 = vpop.f32.mrb[11].mxu0  ;;  %v11283_v43 = vld [vmem:[%s13721_s1 + $0xf0] sm:$0xff]  }
 0x13d   : > { %v8967_v46 = vpop.f32.mrb[11].mxu1  ;;  %9240 = vmatprep.subr.bf16.mxu1 %v10395_v1 }
 0x13f   : > { %9221 = vmatpush3.bf16.msra.mxu0 %v11062_v22 }
 0x140   : > { %9241 = vmatpush3.bf16.msra.mxu1 %v11062_v22  ;;  %9222 = vmatprep.subr.bf16.mxu0 %v10395_v1 }
 0x141   : > { %9242 = vmatprep.subr.bf16.mxu1 %v10395_v1 }
 0x143   : > { %9223 = vmatpush3.bf16.msra.mxu0 %v11071_v33 }
 0x144   : > { %9243 = vmatpush3.bf16.msra.mxu1 %v11071_v33  ;;  %9248 = vmatprep.subr.bf16.mxu0 %v10395_v1 }
 0x145   : > { %9268 = vmatprep.subr.bf16.mxu1 %v10395_v1 }
 0x146   : > { %9225 = vmatmul.mubr.bf16.vlgmr.msra.gmra.mrb[36].mxu0 %v11121_v51 }
 0x147   : > { %9245 = vmatmul.mubr.bf16.vlgmr.msra.gmra.mrb[36].mxu1 %v11124_v52  ;;  %9249 = vmatpush3.bf16.msra.mxu0 %v11000_v11 }
 0x148   : > { %9269 = vmatpush3.bf16.msra.mxu1 %v11000_v11  ;;  %9250 = vmatprep.subr.bf16.mxu0 %v10395_v1 }
 0x149   : > { %9270 = vmatprep.subr.bf16.mxu1 %v10395_v1  ;;  %9264 = vmatprep.mubr.msk.bf16.mxu0 %vm10396_vm0, %v10395_v1 }
 0x14a   : > { %9284 = vmatprep.mubr.msk.bf16.mxu1 %vm10396_vm0, %v10395_v1 }
 0x14b   : > { %9251 = vmatpush3.bf16.msra.mxu0 %v11011_v12 }
 0x14c   : > { %9271 = vmatpush3.bf16.msra.mxu1 %v11011_v12  ;;  %9252 = vmatprep.subr.bf16.mxu0 %v10395_v1 }
 0x14d   : > { %9272 = vmatprep.subr.bf16.mxu1 %v10395_v1 }
 0x14f   : > { %9253 = vmatpush3.bf16.msra.mxu0 %v11024_v13 }
 0x150   : > { %9273 = vmatpush3.bf16.msra.mxu1 %v11024_v13  ;;  %9254 = vmatprep.subr.bf16.mxu0 %v10395_v1 }
 0x151   : > { %9274 = vmatprep.subr.bf16.mxu1 %v10395_v1 }
 0x153   : > { %9255 = vmatpush3.bf16.msra.mxu0 %v11033_v14 }
 0x154   : > { %9275 = vmatpush3.bf16.msra.mxu1 %v11033_v14  ;;  %9256 = vmatprep.subr.bf16.mxu0 %v10395_v1 }
 0x155   : > { %9276 = vmatprep.subr.bf16.mxu1 %v10395_v1 }
 0x157   : > { %9257 = vmatpush3.bf16.msra.mxu0 %v11042_v15 }
 0x158   : > { %9277 = vmatpush3.bf16.msra.mxu1 %v11042_v15  ;;  %9258 = vmatprep.subr.bf16.mxu0 %v10395_v1 }
 0x159   : > { %v795_v54 = vpop.f32.mrb[12].mxu0  ;;  %9278 = vmatprep.subr.bf16.mxu1 %v10395_v1 }
 0x15a   : > { %v835_v56 = vpop.f32.mrb[12].mxu1  ;;  %v8986_v57 = vpop.f32.mrb[13].mxu0 }
 0x15b   : > { %v11155_v58 = vadd.f32 %v835_v56, %v795_v54  ;;  %v9006_v61 = vpop.f32.mrb[13].mxu1  ;;  %9259 = vmatpush3.bf16.msra.mxu0 %v11051_v16  ;;  %v798_v62 = vpop.f32.mrb[14].mxu0  ;;  %v7064_v54 = vld [vmem:[%s10586_s28 + $0x11] sm:$0xff] }
 0x15c   : > { %v838_v63 = vpop.f32.mrb[14].mxu1  ;;  %9279 = vmatpush3.bf16.msra.mxu1 %v11051_v16  ;;  %9260 = vmatprep.subr.bf16.mxu0 %v10395_v1  ;;  %v8987_v2 = vpop.f32.mrb[15].mxu0  ;;  %v7073_v56 = vld [vmem:[%s10586_s28 + $0x31] sm:$0xff]  ;;  %v1604_v57 = vpack.c.bf16 %v7064_v54, %v7064_v54 }
 0x15d   : > { %v9007_v3 = vpop.f32.mrb[15].mxu1  ;;  %9280 = vmatprep.subr.bf16.mxu1 %v10395_v1  ;;  %v11300_v61 = vpack.c.bf16 %v7073_v56, %v7073_v56 }
 0x15f   : > { %9261 = vmatpush3.bf16.msra.mxu0 %v11062_v22 }
 0x160   : > { %9281 = vmatpush3.bf16.msra.mxu1 %v11062_v22  ;;  %9262 = vmatprep.subr.bf16.mxu0 %v10395_v1 }
 0x161   : > { %9282 = vmatprep.subr.bf16.mxu1 %v10395_v1 }
 0x163   : > { %9263 = vmatpush3.bf16.msra.mxu0 %v11071_v33 }
 0x164   : > { %9283 = vmatpush3.bf16.msra.mxu1 %v11071_v33  ;;  %9288 = vmatprep.subr.bf16.mxu0 %v10395_v1 }
 0x165   : > { %9308 = vmatprep.subr.bf16.mxu1 %v10395_v1 }
 0x166   : > { %9265 = vmatmul.mubr.bf16.vlgmr.msra.gmra.mrb[40].mxu0 %v11167_v6 }
 0x167   : > { %9285 = vmatmul.mubr.bf16.vlgmr.msra.gmra.mrb[40].mxu1 %v11170_v7  ;;  %9289 = vmatpush3.bf16.msra.mxu0 %v11000_v11 }
 0x168   : > { %9309 = vmatpush3.bf16.msra.mxu1 %v11000_v11  ;;  %9290 = vmatprep.subr.bf16.mxu0 %v10395_v1 }
 0x169   : > { %9310 = vmatprep.subr.bf16.mxu1 %v10395_v1  ;;  %9304 = vmatprep.mubr.msk.bf16.mxu0 %vm10396_vm0, %v10395_v1 }
 0x16a   : > { %9324 = vmatprep.mubr.msk.bf16.mxu1 %vm10396_vm0, %v10395_v1 }
 0x16b   : > { %9291 = vmatpush3.bf16.msra.mxu0 %v11011_v12 }
 0x16c   : > { %9311 = vmatpush3.bf16.msra.mxu1 %v11011_v12  ;;  %9292 = vmatprep.subr.bf16.mxu0 %v10395_v1 }
 0x16d   : > { %9312 = vmatprep.subr.bf16.mxu1 %v10395_v1 }
 0x16f   : > { %9293 = vmatpush3.bf16.msra.mxu0 %v11024_v13 }
 0x170   : > { %9313 = vmatpush3.bf16.msra.mxu1 %v11024_v13  ;;  %9294 = vmatprep.subr.bf16.mxu0 %v10395_v1 }
 0x171   : > { %9314 = vmatprep.subr.bf16.mxu1 %v10395_v1 }
 0x173   : > { %9295 = vmatpush3.bf16.msra.mxu0 %v11033_v14 }
 0x174   : > { %9315 = vmatpush3.bf16.msra.mxu1 %v11033_v14  ;;  %9296 = vmatprep.subr.bf16.mxu0 %v10395_v1 }
 0x175   : > { %9316 = vmatprep.subr.bf16.mxu1 %v10395_v1 }
 0x177   : > { %9297 = vmatpush3.bf16.msra.mxu0 %v11042_v15 }
 0x178   : > { %9317 = vmatpush3.bf16.msra.mxu1 %v11042_v15  ;;  %9298 = vmatprep.subr.bf16.mxu0 %v10395_v1 }
 0x179   : > { %v877_v8 = vpop.f32.mrb[16].mxu0  ;;  %9318 = vmatprep.subr.bf16.mxu1 %v10395_v1 }
 0x17a   : > { %v917_v11 = vpop.f32.mrb[16].mxu1  ;;  %v9026_v12 = vpop.f32.mrb[17].mxu0 }
 0x17b   : > { %v11201_v13 = vadd.f32 %v917_v11, %v877_v8  ;;  %v9046_v14 = vpop.f32.mrb[17].mxu1  ;;  %9299 = vmatpush3.bf16.msra.mxu0 %v11051_v16  ;;  %v880_v17 = vpop.f32.mrb[18].mxu0 }
 0x17c   : > { %v920_v18 = vpop.f32.mrb[18].mxu1  ;;  %9319 = vmatpush3.bf16.msra.mxu1 %v11051_v16  ;;  %9300 = vmatprep.subr.bf16.mxu0 %v10395_v1  ;;  %v9027_v15 = vpop.f32.mrb[19].mxu0  ;;  %v11216_v16 = vpack.c.bf16 %v7047_v25, %v7047_v25  ;;  %v7074_v14 = vld [vmem:[%s10586_s28 + $0x51] sm:$0xff] }
 0x17d   : > { %v9047_v19 = vpop.f32.mrb[19].mxu1  ;;  %9320 = vmatprep.subr.bf16.mxu1 %v10395_v1  ;;  %v7075_v17 = vld [vmem:[%s10586_s28 + $0x71] sm:$0xff]  ;;  %v11342_v18 = vpack.c.bf16 %v7074_v14, %v7074_v14  ;;  %v11497_v14 = vld [vmem:[%s13721_s1 + $0x128] sm:$0xff]  }
 0x17e   : > { %v11345_v15 = vpack.c.bf16 %v7075_v17, %v7075_v17 }
 0x17f   : > { %9301 = vmatpush3.bf16.msra.mxu0 %v11062_v22 }
 0x180   : > { %9321 = vmatpush3.bf16.msra.mxu1 %v11062_v22  ;;  %9302 = vmatprep.subr.bf16.mxu0 %v10395_v1  ;;  %v11232_v22 = vld [vmem:[%s13721_s1 + $0xc8] sm:$0xff]  }
 0x181   : > { %9322 = vmatprep.subr.bf16.mxu1 %v10395_v1 }
 0x183   : > { %9303 = vmatpush3.bf16.msra.mxu0 %v11071_v33 }
 0x184   : > { %9323 = vmatpush3.bf16.msra.mxu1 %v11071_v33  ;;  %9328 = vmatprep.subr.bf16.mxu0 %v10395_v1  ;;  %v11254_v33 = vld [vmem:[%s13721_s1 + $0xd8] sm:$0xff]  }
 0x185   : > { %9348 = vmatprep.subr.bf16.mxu1 %v10395_v1 }
 0x186   : > { %9305 = vmatmul.mubr.bf16.vlgmr.msra.gmra.mrb[44].mxu0 %v11213_v26 }
 0x187   : > { %9325 = vmatmul.mubr.bf16.vlgmr.msra.gmra.mrb[44].mxu1 %v11216_v16  ;;  %9329 = vmatpush3.bf16.msra.mxu0 %v11221_v29 }
 0x188   : > { %9349 = vmatpush3.bf16.msra.mxu1 %v11221_v29  ;;  %9330 = vmatprep.subr.bf16.mxu0 %v10395_v1 }
 0x189   : > { %9350 = vmatprep.subr.bf16.mxu1 %v10395_v1  ;;  %9344 = vmatprep.mubr.msk.bf16.mxu0 %vm10396_vm0, %v10395_v1 }
 0x18a   : > { %9364 = vmatprep.mubr.msk.bf16.mxu1 %vm10396_vm0, %v10395_v1 }
 0x18b   : > { %9331 = vmatpush3.bf16.msra.mxu0 %v11232_v22 }
 0x18c   : > { %9351 = vmatpush3.bf16.msra.mxu1 %v11232_v22  ;;  %9332 = vmatprep.subr.bf16.mxu0 %v10395_v1 }
 0x18d   : > { %9352 = vmatprep.subr.bf16.mxu1 %v10395_v1 }
 0x18f   : > { %9333 = vmatpush3.bf16.msra.mxu0 %v11245_v30 }
 0x190   : > { %9353 = vmatpush3.bf16.msra.mxu1 %v11245_v30  ;;  %9334 = vmatprep.subr.bf16.mxu0 %v10395_v1 }
 0x191   : > { %9354 = vmatprep.subr.bf16.mxu1 %v10395_v1 }
 0x193   : > { %9335 = vmatpush3.bf16.msra.mxu0 %v11254_v33 }
 0x194   : > { %9355 = vmatpush3.bf16.msra.mxu1 %v11254_v33  ;;  %9336 = vmatprep.subr.bf16.mxu0 %v10395_v1 }
 0x195   : > { %9356 = vmatprep.subr.bf16.mxu1 %v10395_v1 }
 0x197   : > { %9337 = vmatpush3.bf16.msra.mxu0 %v11263_v34 }
 0x198   : > { %9357 = vmatpush3.bf16.msra.mxu1 %v11263_v34  ;;  %9338 = vmatprep.subr.bf16.mxu0 %v10395_v1 }
 0x199   : > { %v959_v36 = vpop.f32.mrb[20].mxu0  ;;  %9358 = vmatprep.subr.bf16.mxu1 %v10395_v1 }
 0x19a   : > { %v999_v38 = vpop.f32.mrb[20].mxu1  ;;  %v9066_v39 = vpop.f32.mrb[21].mxu0 }
 0x19b   : > { %v11277_v40 = vadd.f32 %v999_v38, %v959_v36  ;;  %v9086_v42 = vpop.f32.mrb[21].mxu1  ;;  %9339 = vmatpush3.bf16.msra.mxu0 %v11272_v35  ;;  %v962_v44 = vpop.f32.mrb[22].mxu0 }
 0x19c   : > { %v1002_v45 = vpop.f32.mrb[22].mxu1  ;;  %9359 = vmatpush3.bf16.msra.mxu1 %v11272_v35  ;;  %9340 = vmatprep.subr.bf16.mxu0 %v10395_v1  ;;  %v9067_v46 = vpop.f32.mrb[23].mxu0 }
 0x19d   : > { %v9087_v47 = vpop.f32.mrb[23].mxu1  ;;  %9360 = vmatprep.subr.bf16.mxu1 %v10395_v1  ;;  %v7076_v46 = vld [vmem:[%s10586_s28 + $0x91] sm:$0xff] }
 0x19e   : > { %v7077_v47 = vld [vmem:[%s10586_s28 + $0xb1] sm:$0xff]  ;;  %v11388_v54 = vpack.c.bf16 %v7076_v46, %v7076_v46 }
 0x19f   : > { %9341 = vmatpush3.bf16.msra.mxu0 %v11283_v43  ;;  %v11391_v56 = vpack.c.bf16 %v7077_v47, %v7077_v47 }
 0x1a0   : > { %9361 = vmatpush3.bf16.msra.mxu1 %v11283_v43  ;;  %9342 = vmatprep.subr.bf16.mxu0 %v10395_v1 }
 0x1a1   : > { %9362 = vmatprep.subr.bf16.mxu1 %v10395_v1 }
 0x1a3   : > { %9343 = vmatpush3.bf16.msra.mxu0 %v11292_v48 }
 0x1a4   : > { %9363 = vmatpush3.bf16.msra.mxu1 %v11292_v48  ;;  %9368 = vmatprep.subr.bf16.mxu0 %v10395_v1 }
 0x1a5   : > { %9388 = vmatprep.subr.bf16.mxu1 %v10395_v1 }
 0x1a6   : > { %9345 = vmatmul.mubr.bf16.vlgmr.msra.gmra.mrb[48].mxu0 %v1604_v57 }
 0x1a7   : > { %9365 = vmatmul.mubr.bf16.vlgmr.msra.gmra.mrb[48].mxu1 %v11300_v61  ;;  %9369 = vmatpush3.bf16.msra.mxu0 %v11221_v29 }
 0x1a8   : > { %9389 = vmatpush3.bf16.msra.mxu1 %v11221_v29  ;;  %9370 = vmatprep.subr.bf16.mxu0 %v10395_v1 }
 0x1a9   : > { %9390 = vmatprep.subr.bf16.mxu1 %v10395_v1  ;;  %9384 = vmatprep.mubr.msk.bf16.mxu0 %vm10396_vm0, %v10395_v1 }
 0x1aa   : > { %9404 = vmatprep.mubr.msk.bf16.mxu1 %vm10396_vm0, %v10395_v1 }
 0x1ab   : > { %9371 = vmatpush3.bf16.msra.mxu0 %v11232_v22 }
 0x1ac   : > { %9391 = vmatpush3.bf16.msra.mxu1 %v11232_v22  ;;  %9372 = vmatprep.subr.bf16.mxu0 %v10395_v1 }
 0x1ad   : > { %9392 = vmatprep.subr.bf16.mxu1 %v10395_v1 }
 0x1af   : > { %9373 = vmatpush3.bf16.msra.mxu0 %v11245_v30 }
 0x1b0   : > { %9393 = vmatpush3.bf16.msra.mxu1 %v11245_v30  ;;  %9374 = vmatprep.subr.bf16.mxu0 %v10395_v1 }
 0x1b1   : > { %9394 = vmatprep.subr.bf16.mxu1 %v10395_v1 }
 0x1b3   : > { %9375 = vmatpush3.bf16.msra.mxu0 %v11254_v33 }
 0x1b4   : > { %9395 = vmatpush3.bf16.msra.mxu1 %v11254_v33  ;;  %9376 = vmatprep.subr.bf16.mxu0 %v10395_v1 }
 0x1b5   : > { %9396 = vmatprep.subr.bf16.mxu1 %v10395_v1 }
 0x1b7   : > { %9377 = vmatpush3.bf16.msra.mxu0 %v11263_v34 }
 0x1b8   : > { %9397 = vmatpush3.bf16.msra.mxu1 %v11263_v34  ;;  %9378 = vmatprep.subr.bf16.mxu0 %v10395_v1 }
 0x1b9   : > { %v1041_v62 = vpop.f32.mrb[24].mxu0  ;;  %9398 = vmatprep.subr.bf16.mxu1 %v10395_v1 }
 0x1ba   : > { %v1081_v63 = vpop.f32.mrb[24].mxu1  ;;  %v9106_v2 = vpop.f32.mrb[25].mxu0 }
 0x1bb   : > { %v11330_v3 = vadd.f32 %v1081_v63, %v1041_v62  ;;  %v9126_v4 = vpop.f32.mrb[25].mxu1  ;;  %9379 = vmatpush3.bf16.msra.mxu0 %v11272_v35  ;;  %v1044_v5 = vpop.f32.mrb[26].mxu0 }
 0x1bc   : > { %v1084_v8 = vpop.f32.mrb[26].mxu1  ;;  %9399 = vmatpush3.bf16.msra.mxu1 %v11272_v35  ;;  %9380 = vmatprep.subr.bf16.mxu0 %v10395_v1  ;;  %v9107_v11 = vpop.f32.mrb[27].mxu0 }
 0x1bd   : > { %v9127_v12 = vpop.f32.mrb[27].mxu1  ;;  %9400 = vmatprep.subr.bf16.mxu1 %v10395_v1  ;;  %v11446_v8 = vld [vmem:[%s13721_s1 + $0x100] sm:$0xff]   ;;  %v11479_v11 = vld [vmem:[%s13721_s1 + $0x118] sm:$0xff]  }
 0x1be   : > { %v11488_v12 = vld [vmem:[%s13721_s1 + $0x120] sm:$0xff]  }
 0x1bf   : > { %9381 = vmatpush3.bf16.msra.mxu0 %v11283_v43 }
 0x1c0   : > { %9401 = vmatpush3.bf16.msra.mxu1 %v11283_v43  ;;  %9382 = vmatprep.subr.bf16.mxu0 %v10395_v1 }
 0x1c1   : > { %9402 = vmatprep.subr.bf16.mxu1 %v10395_v1 }
 0x1c3   : > { %9383 = vmatpush3.bf16.msra.mxu0 %v11292_v48 }
 0x1c4   : > { %9403 = vmatpush3.bf16.msra.mxu1 %v11292_v48  ;;  %9408 = vmatprep.subr.bf16.mxu0 %v10395_v1 }
 0x1c5   : > { %9428 = vmatprep.subr.bf16.mxu1 %v10395_v1 }
 0x1c6   : > { %9385 = vmatmul.mubr.bf16.vlgmr.msra.gmra.mrb[52].mxu0 %v11342_v18 }
 0x1c7   : > { %9405 = vmatmul.mubr.bf16.vlgmr.msra.gmra.mrb[52].mxu1 %v11345_v15  ;;  %9409 = vmatpush3.bf16.msra.mxu0 %v11221_v29 }
 0x1c8   : > { %9429 = vmatpush3.bf16.msra.mxu1 %v11221_v29  ;;  %9410 = vmatprep.subr.bf16.mxu0 %v10395_v1 }
 0x1c9   : > { %9430 = vmatprep.subr.bf16.mxu1 %v10395_v1  ;;  %9424 = vmatprep.mubr.msk.bf16.mxu0 %vm10396_vm0, %v10395_v1 }
 0x1ca   : > { %9444 = vmatprep.mubr.msk.bf16.mxu1 %vm10396_vm0, %v10395_v1 }
 0x1cb   : > { %9411 = vmatpush3.bf16.msra.mxu0 %v11232_v22 }
 0x1cc   : > { %9431 = vmatpush3.bf16.msra.mxu1 %v11232_v22  ;;  %9412 = vmatprep.subr.bf16.mxu0 %v10395_v1 }
 0x1cd   : > { %9432 = vmatprep.subr.bf16.mxu1 %v10395_v1 }
 0x1cf   : > { %9413 = vmatpush3.bf16.msra.mxu0 %v11245_v30 }
 0x1d0   : > { %9433 = vmatpush3.bf16.msra.mxu1 %v11245_v30  ;;  %9414 = vmatprep.subr.bf16.mxu0 %v10395_v1 }
 0x1d1   : > { %9434 = vmatprep.subr.bf16.mxu1 %v10395_v1 }
 0x1d3   : > { %9415 = vmatpush3.bf16.msra.mxu0 %v11254_v33 }
 0x1d4   : > { %9435 = vmatpush3.bf16.msra.mxu1 %v11254_v33  ;;  %9416 = vmatprep.subr.bf16.mxu0 %v10395_v1 }
 0x1d5   : > { %9436 = vmatprep.subr.bf16.mxu1 %v10395_v1 }
 0x1d7   : > { %9417 = vmatpush3.bf16.msra.mxu0 %v11263_v34 }
 0x1d8   : > { %9437 = vmatpush3.bf16.msra.mxu1 %v11263_v34  ;;  %9418 = vmatprep.subr.bf16.mxu0 %v10395_v1 }
 0x1d9   : > { %v1123_v19 = vpop.f32.mrb[28].mxu0  ;;  %9438 = vmatprep.subr.bf16.mxu1 %v10395_v1 }
 0x1da   : > { %v1163_v21 = vpop.f32.mrb[28].mxu1  ;;  %v9146_v25 = vpop.f32.mrb[29].mxu0 }
 0x1db   : > { %v11376_v36 = vadd.f32 %v1163_v21, %v1123_v19  ;;  %v9166_v38 = vpop.f32.mrb[29].mxu1  ;;  %9419 = vmatpush3.bf16.msra.mxu0 %v11272_v35  ;;  %v1126_v39 = vpop.f32.mrb[30].mxu0 }
 0x1dc   : > { %v1166_v42 = vpop.f32.mrb[30].mxu1  ;;  %9439 = vmatpush3.bf16.msra.mxu1 %v11272_v35  ;;  %9420 = vmatprep.subr.bf16.mxu0 %v10395_v1  ;;  %v9147_v44 = vpop.f32.mrb[31].mxu0 }
 0x1dd   : > { %v9167_v45 = vpop.f32.mrb[31].mxu1  ;;  %9440 = vmatprep.subr.bf16.mxu1 %v10395_v1  ;;  %v11512_v42 = vld [vmem:[%s13721_s1 + $0x130] sm:$0xff]  }
 0x1df   : > { %9421 = vmatpush3.bf16.msra.mxu0 %v11283_v43 }
 0x1e0   : > { %9441 = vmatpush3.bf16.msra.mxu1 %v11283_v43  ;;  %9422 = vmatprep.subr.bf16.mxu0 %v10395_v1 }
 0x1e1   : > { %9442 = vmatprep.subr.bf16.mxu1 %v10395_v1 }
 0x1e3   : > { %9423 = vmatpush3.bf16.msra.mxu0 %v11292_v48 }
 0x1e4   : > { %9443 = vmatpush3.bf16.msra.mxu1 %v11292_v48  ;;  %9448 = vmatprep.subr.bf16.mxu0 %v10395_v1 }
 0x1e5   : > { %9468 = vmatprep.subr.bf16.mxu1 %v10395_v1 }
 0x1e6   : > { %9425 = vmatmul.mubr.bf16.vlgmr.msra.gmra.mrb[56].mxu0 %v11388_v54 }
 0x1e7   : > { %9445 = vmatmul.mubr.bf16.vlgmr.msra.gmra.mrb[56].mxu1 %v11391_v56  ;;  %9449 = vmatpush3.bf16.msra.mxu0 %v11221_v29 }
 0x1e8   : > { %9469 = vmatpush3.bf16.msra.mxu1 %v11221_v29  ;;  %9450 = vmatprep.subr.bf16.mxu0 %v10395_v1 }
 0x1e9   : > { %9470 = vmatprep.subr.bf16.mxu1 %v10395_v1  ;;  %9464 = vmatprep.mubr.msk.bf16.mxu0 %vm10396_vm0, %v10395_v1 }
 0x1ea   : > { %9484 = vmatprep.mubr.msk.bf16.mxu1 %vm10396_vm0, %v10395_v1 }
 0x1eb   : > { %9451 = vmatpush3.bf16.msra.mxu0 %v11232_v22 }
 0x1ec   : > { %9471 = vmatpush3.bf16.msra.mxu1 %v11232_v22  ;;  %9452 = vmatprep.subr.bf16.mxu0 %v10395_v1 }
 0x1ed   : > { %9472 = vmatprep.subr.bf16.mxu1 %v10395_v1 }
 0x1ef   : > { %9453 = vmatpush3.bf16.msra.mxu0 %v11245_v30 }
 0x1f0   : > { %9473 = vmatpush3.bf16.msra.mxu1 %v11245_v30  ;;  %9454 = vmatprep.subr.bf16.mxu0 %v10395_v1 }
 0x1f1   : > { %9474 = vmatprep.subr.bf16.mxu1 %v10395_v1 }
 0x1f3   : > { %9455 = vmatpush3.bf16.msra.mxu0 %v11254_v33 }
 0x1f4   : > { %9475 = vmatpush3.bf16.msra.mxu1 %v11254_v33  ;;  %9456 = vmatprep.subr.bf16.mxu0 %v10395_v1 }
 0x1f5   : > { %9476 = vmatprep.subr.bf16.mxu1 %v10395_v1 }
 0x1f7   : > { %9457 = vmatpush3.bf16.msra.mxu0 %v11263_v34 }
 0x1f8   : > { %9477 = vmatpush3.bf16.msra.mxu1 %v11263_v34  ;;  %9458 = vmatprep.subr.bf16.mxu0 %v10395_v1 }
 0x1f9   : > { %v1271_v29 = vpop.f32.mrb[32].mxu0  ;;  %9478 = vmatprep.subr.bf16.mxu1 %v10395_v1 }
 0x1fa   : > { %v11423_v22 = vadd.f32 %v1271_v29, %v10980_v0  ;;  %v1315_v30 = vpop.f32.mrb[32].mxu1  ;;  %v9186_v33 = vpop.f32.mrb[33].mxu0  ;;  %v7078_v0 = vld [vmem:[%s10586_s28 + $0xd1] sm:$0xff] }
 0x1fb   : > { %v11426_v57 = vadd.f32 %v1315_v30, %v11056_v20  ;;  %v9206_v62 = vpop.f32.mrb[33].mxu1  ;;  %9459 = vmatpush3.bf16.msra.mxu0 %v11272_v35  ;;  %v1274_v63 = vpop.f32.mrb[34].mxu0  ;;  %v7079_v20 = vld [vmem:[%s10586_s28 + $0xf1] sm:$0xff]  ;;  %v11438_v5 = vpack.c.bf16 %v7078_v0, %v7078_v0 }
 0x1fc   : > { %v1318_v34 = vpop.f32.mrb[34].mxu1  ;;  %9479 = vmatpush3.bf16.msra.mxu1 %v11272_v35  ;;  %9460 = vmatprep.subr.bf16.mxu0 %v10395_v1  ;;  %v9187_v2 = vpop.f32.mrb[35].mxu0  ;;  %v11441_v35 = vpack.c.bf16 %v7079_v20, %v7079_v20 }
 0x1fd   : > { %v9207_v4 = vpop.f32.mrb[35].mxu1  ;;  %9480 = vmatprep.subr.bf16.mxu1 %v10395_v1 }
 0x1ff   : > { %9461 = vmatpush3.bf16.msra.mxu0 %v11283_v43 }
 0x200   : > { %9481 = vmatpush3.bf16.msra.mxu1 %v11283_v43  ;;  %9462 = vmatprep.subr.bf16.mxu0 %v10395_v1  ;;  %v11457_v43 = vld [vmem:[%s13721_s1 + $0x108] sm:$0xff]  }
 0x201   : > { %9482 = vmatprep.subr.bf16.mxu1 %v10395_v1 }
 0x203   : > { %9463 = vmatpush3.bf16.msra.mxu0 %v11292_v48 }
 0x204   : > { %9483 = vmatpush3.bf16.msra.mxu1 %v11292_v48  ;;  %9488 = vmatprep.subr.bf16.mxu0 %v10395_v1  ;;  %v11470_v48 = vld [vmem:[%s13721_s1 + $0x110] sm:$0xff]  }
 0x205   : > { %9508 = vmatprep.subr.bf16.mxu1 %v10395_v1 }
 0x206   : > { %9465 = vmatmul.mubr.bf16.vlgmr.msra.gmra.mrb[60].mxu0 %v11438_v5 }
 0x207   : > { %9485 = vmatmul.mubr.bf16.vlgmr.msra.gmra.mrb[60].mxu1 %v11441_v35  ;;  %9489 = vmatpush3.bf16.msra.mxu0 %v11446_v8 }
 0x208   : > { %9509 = vmatpush3.bf16.msra.mxu1 %v11446_v8  ;;  %9490 = vmatprep.subr.bf16.mxu0 %v10395_v1 }
 0x209   : > { %9510 = vmatprep.subr.bf16.mxu1 %v10395_v1  ;;  %9504 = vmatprep.mubr.msk.bf16.mxu0 %vm10396_vm0, %v10395_v1 }
 0x20a   : > { %9524 = vmatprep.mubr.msk.bf16.mxu1 %vm10396_vm0, %v10395_v1 }
 0x20b   : > { %9491 = vmatpush3.bf16.msra.mxu0 %v11457_v43 }
 0x20c   : > { %9511 = vmatpush3.bf16.msra.mxu1 %v11457_v43  ;;  %9492 = vmatprep.subr.bf16.mxu0 %v10395_v1 }
 0x20d   : > { %9512 = vmatprep.subr.bf16.mxu1 %v10395_v1 }
 0x20f   : > { %9493 = vmatpush3.bf16.msra.mxu0 %v11470_v48 }
 0x210   : > { %9513 = vmatpush3.bf16.msra.mxu1 %v11470_v48  ;;  %9494 = vmatprep.subr.bf16.mxu0 %v10395_v1 }
 0x211   : > { %9514 = vmatprep.subr.bf16.mxu1 %v10395_v1 }
 0x213   : > { %9495 = vmatpush3.bf16.msra.mxu0 %v11479_v11 }
 0x214   : > { %9515 = vmatpush3.bf16.msra.mxu1 %v11479_v11  ;;  %9496 = vmatprep.subr.bf16.mxu0 %v10395_v1 }
 0x215   : > { %9516 = vmatprep.subr.bf16.mxu1 %v10395_v1 }
 0x217   : > { %9497 = vmatpush3.bf16.msra.mxu0 %v11488_v12 }
 0x218   : > { %9517 = vmatpush3.bf16.msra.mxu1 %v11488_v12  ;;  %9498 = vmatprep.subr.bf16.mxu0 %v10395_v1 }
 0x219   : > { %v1359_v17 = vpop.f32.mrb[36].mxu0  ;;  %9518 = vmatprep.subr.bf16.mxu1 %v10395_v1 }
 0x21a   : > { %v11503_v19 = vadd.f32 %v1359_v17, %v11109_v41  ;;  %v1403_v21 = vpop.f32.mrb[36].mxu1  ;;  %v9226_v25 = vpop.f32.mrb[37].mxu0 }
 0x21b   : > { %v11506_v38 = vadd.f32 %v1403_v21, %v11155_v58  ;;  %v9246_v39 = vpop.f32.mrb[37].mxu1  ;;  %9499 = vmatpush3.bf16.msra.mxu0 %v11497_v14  ;;  %v1362_v44 = vpop.f32.mrb[38].mxu0  ;;  %v11521_v58 = vld [vmem:[%s13721_s1 + $0x138] sm:$0xff]  }
 0x21c   : > { %v1406_v45 = vpop.f32.mrb[38].mxu1  ;;  %9519 = vmatpush3.bf16.msra.mxu1 %v11497_v14  ;;  %9500 = vmatprep.subr.bf16.mxu0 %v10395_v1  ;;  %v9227_v41 = vpop.f32.mrb[39].mxu0  ;;  %v11695_v44 = vld [vmem:[%s13721_s1 + $0x158] sm:$0xff]  }
 0x21d   : > { %v9247_v46 = vpop.f32.mrb[39].mxu1  ;;  %9520 = vmatprep.subr.bf16.mxu1 %v10395_v1  ;;  %v11704_v45 = vld [vmem:[%s13721_s1 + $0x160] sm:$0xff]   ;;  %v11713_v41 = vld [vmem:[%s13721_s1 + $0x168] sm:$0xff]  }
 0x21f   : > { %9501 = vmatpush3.bf16.msra.mxu0 %v11512_v42 }
 0x220   : > { %9521 = vmatpush3.bf16.msra.mxu1 %v11512_v42  ;;  %9502 = vmatprep.subr.bf16.mxu0 %v10395_v1 }
 0x221   : > { %9522 = vmatprep.subr.bf16.mxu1 %v10395_v1 }
 0x223   : > { %9503 = vmatpush3.bf16.msra.mxu0 %v11521_v58 }
 0x224   : > { %9523 = vmatpush3.bf16.msra.mxu1 %v11521_v58  ;;  %9528 = vmatprep.subr.bf16.mxu0 %v10395_v1 }
 0x225   : > { %9548 = vmatprep.subr.bf16.mxu1 %v10395_v1 }
 0x226   : > { %9505 = vmatmul.mubr.bf16.vlgmr.msra.gmra.mrb[64].mxu0 %v10649_v24 }
 0x227   : > { %9525 = vmatmul.mubr.bf16.vlgmr.msra.gmra.mrb[64].mxu1 %v10693_v28  ;;  %9529 = vmatpush3.bf16.msra.mxu0 %v11446_v8 }
 0x228   : > { %9549 = vmatpush3.bf16.msra.mxu1 %v11446_v8  ;;  %9530 = vmatprep.subr.bf16.mxu0 %v10395_v1 }
 0x229   : > { %9550 = vmatprep.subr.bf16.mxu1 %v10395_v1  ;;  %9544 = vmatprep.mubr.msk.bf16.mxu0 %vm10396_vm0, %v10395_v1 }
 0x22a   : > { %9564 = vmatprep.mubr.msk.bf16.mxu1 %vm10396_vm0, %v10395_v1 }
 0x22b   : > { %9531 = vmatpush3.bf16.msra.mxu0 %v11457_v43 }
 0x22c   : > { %9551 = vmatpush3.bf16.msra.mxu1 %v11457_v43  ;;  %9532 = vmatprep.subr.bf16.mxu0 %v10395_v1 }
 0x22d   : > { %9552 = vmatprep.subr.bf16.mxu1 %v10395_v1 }
 0x22f   : > { %9533 = vmatpush3.bf16.msra.mxu0 %v11470_v48 }
 0x230   : > { %9553 = vmatpush3.bf16.msra.mxu1 %v11470_v48  ;;  %9534 = vmatprep.subr.bf16.mxu0 %v10395_v1 }
 0x231   : > { %9554 = vmatprep.subr.bf16.mxu1 %v10395_v1 }
 0x233   : > { %9535 = vmatpush3.bf16.msra.mxu0 %v11479_v11 }
 0x234   : > { %9555 = vmatpush3.bf16.msra.mxu1 %v11479_v11  ;;  %9536 = vmatprep.subr.bf16.mxu0 %v10395_v1 }
 0x235   : > { %9556 = vmatprep.subr.bf16.mxu1 %v10395_v1 }
 0x237   : > { %9537 = vmatpush3.bf16.msra.mxu0 %v11488_v12 }
 0x238   : > { %9557 = vmatpush3.bf16.msra.mxu1 %v11488_v12  ;;  %9538 = vmatprep.subr.bf16.mxu0 %v10395_v1 }
 0x239   : > { %v1447_v24 = vpop.f32.mrb[40].mxu0  ;;  %9558 = vmatprep.subr.bf16.mxu1 %v10395_v1 }
 0x23a   : > { %v11557_v28 = vadd.f32 %v1447_v24, %v11201_v13  ;;  %v1491_v47 = vpop.f32.mrb[40].mxu1  ;;  %v9266_v29 = vpop.f32.mrb[41].mxu0 }
 0x23b   : > { %v11560_v30 = vadd.f32 %v1491_v47, %v11277_v40  ;;  %v9286_v33 = vpop.f32.mrb[41].mxu1  ;;  %9539 = vmatpush3.bf16.msra.mxu0 %v11497_v14  ;;  %v1450_v62 = vpop.f32.mrb[42].mxu0 }
 0x23c   : > { %v1494_v63 = vpop.f32.mrb[42].mxu1  ;;  %9559 = vmatpush3.bf16.msra.mxu1 %v11497_v14  ;;  %9540 = vmatprep.subr.bf16.mxu0 %v10395_v1  ;;  %v9267_v34 = vpop.f32.mrb[43].mxu0  ;;  %v11728_v62 = vld [vmem:[%s13721_s1 + $0x170] sm:$0xff]  }
 0x23d   : > { %v9287_v2 = vpop.f32.mrb[43].mxu1  ;;  %9560 = vmatprep.subr.bf16.mxu1 %v10395_v1 }
 0x23f   : > { %9541 = vmatpush3.bf16.msra.mxu0 %v11512_v42 }
 0x240   : > { %9561 = vmatpush3.bf16.msra.mxu1 %v11512_v42  ;;  %9542 = vmatprep.subr.bf16.mxu0 %v10395_v1 }
 0x241   : > { %9562 = vmatprep.subr.bf16.mxu1 %v10395_v1 }
 0x243   : > { %9543 = vmatpush3.bf16.msra.mxu0 %v11521_v58 }
 0x244   : > { %9563 = vmatpush3.bf16.msra.mxu1 %v11521_v58  ;;  %9568 = vmatprep.subr.bf16.mxu0 %v10395_v1 }
 0x245   : > { %9588 = vmatprep.subr.bf16.mxu1 %v10395_v1 }
 0x246   : > { %9545 = vmatmul.mubr.bf16.vlgmr.msra.gmra.mrb[68].mxu0 %v10737_v32 }
 0x247   : > { %9565 = vmatmul.mubr.bf16.vlgmr.msra.gmra.mrb[68].mxu1 %v10851_v50  ;;  %9569 = vmatpush3.bf16.msra.mxu0 %v11446_v8 }
 0x248   : > { %9589 = vmatpush3.bf16.msra.mxu1 %v11446_v8  ;;  %9570 = vmatprep.subr.bf16.mxu0 %v10395_v1 }
 0x249   : > { %9590 = vmatprep.subr.bf16.mxu1 %v10395_v1  ;;  %9584 = vmatprep.mubr.msk.bf16.mxu0 %vm10396_vm0, %v10395_v1 }
 0x24a   : > { %9604 = vmatprep.mubr.msk.bf16.mxu1 %vm10396_vm0, %v10395_v1 }
 0x24b   : > { %9571 = vmatpush3.bf16.msra.mxu0 %v11457_v43 }
 0x24c   : > { %9591 = vmatpush3.bf16.msra.mxu1 %v11457_v43  ;;  %9572 = vmatprep.subr.bf16.mxu0 %v10395_v1 }
 0x24d   : > { %9592 = vmatprep.subr.bf16.mxu1 %v10395_v1 }
 0x24f   : > { %9573 = vmatpush3.bf16.msra.mxu0 %v11470_v48 }
 0x250   : > { %9593 = vmatpush3.bf16.msra.mxu1 %v11470_v48  ;;  %9574 = vmatprep.subr.bf16.mxu0 %v10395_v1 }
 0x251   : > { %9594 = vmatprep.subr.bf16.mxu1 %v10395_v1 }
 0x253   : > { %9575 = vmatpush3.bf16.msra.mxu0 %v11479_v11 }
 0x254   : > { %9595 = vmatpush3.bf16.msra.mxu1 %v11479_v11  ;;  %9576 = vmatprep.subr.bf16.mxu0 %v10395_v1 }
 0x255   : > { %9596 = vmatprep.subr.bf16.mxu1 %v10395_v1 }
 0x257   : > { %9577 = vmatpush3.bf16.msra.mxu0 %v11488_v12 }
 0x258   : > { %9597 = vmatpush3.bf16.msra.mxu1 %v11488_v12  ;;  %9578 = vmatprep.subr.bf16.mxu0 %v10395_v1 }
 0x259   : > { %v1535_v32 = vpop.f32.mrb[44].mxu0  ;;  %9598 = vmatprep.subr.bf16.mxu1 %v10395_v1 }
 0x25a   : > { %v11601_v50 = vadd.f32 %v1535_v32, %v11330_v3  ;;  %v1579_v13 = vpop.f32.mrb[44].mxu1  ;;  %v9306_v40 = vpop.f32.mrb[45].mxu0 }
 0x25b   : > { %v11604_v4 = vadd.f32 %v1579_v13, %v11376_v36  ;;  %v9326_v0 = vpop.f32.mrb[45].mxu1  ;;  %9579 = vmatpush3.bf16.msra.mxu0 %v11497_v14  ;;  %v1538_v20 = vpop.f32.mrb[46].mxu0 }
 0x25c   : > { %v1582_v17 = vpop.f32.mrb[46].mxu1  ;;  %9599 = vmatpush3.bf16.msra.mxu1 %v11497_v14  ;;  %9580 = vmatprep.subr.bf16.mxu0 %v10395_v1  ;;  %v9307_v21 = vpop.f32.mrb[47].mxu0 }
 0x25d   : > { %v9327_v25 = vpop.f32.mrb[47].mxu1  ;;  %9600 = vmatprep.subr.bf16.mxu1 %v10395_v1 }
 0x25f   : > { %9581 = vmatpush3.bf16.msra.mxu0 %v11512_v42 }
 0x260   : > { %9601 = vmatpush3.bf16.msra.mxu1 %v11512_v42  ;;  %9582 = vmatprep.subr.bf16.mxu0 %v10395_v1 }
 0x261   : > { %9602 = vmatprep.subr.bf16.mxu1 %v10395_v1 }
 0x263   : > { %9583 = vmatpush3.bf16.msra.mxu0 %v11521_v58 }
 0x264   : > { %9603 = vmatpush3.bf16.msra.mxu1 %v11521_v58  ;;  %9608 = vmatprep.subr.bf16.mxu0 %v10395_v1 }
 0x265   : > { %9628 = vmatprep.subr.bf16.mxu1 %v10395_v1 }
 0x266   : > { %9585 = vmatmul.mubr.bf16.vlgmr.msra.gmra.mrb[72].mxu0 %v10900_v55 }
 0x267   : > { %9605 = vmatmul.mubr.bf16.vlgmr.msra.gmra.mrb[72].mxu1 %v10949_v60  ;;  %9609 = vmatpush3.bf16.msra.mxu0 %v11446_v8 }
 0x268   : > { %9629 = vmatpush3.bf16.msra.mxu1 %v11446_v8  ;;  %9610 = vmatprep.subr.bf16.mxu0 %v10395_v1 }
 0x269   : > { %9630 = vmatprep.subr.bf16.mxu1 %v10395_v1  ;;  %9624 = vmatprep.mubr.msk.bf16.mxu0 %vm10396_vm0, %v10395_v1 }
 0x26a   : > { %9644 = vmatprep.mubr.msk.bf16.mxu1 %vm10396_vm0, %v10395_v1 }
 0x26b   : > { %9611 = vmatpush3.bf16.msra.mxu0 %v11457_v43 }
 0x26c   : > { %9631 = vmatpush3.bf16.msra.mxu1 %v11457_v43  ;;  %9612 = vmatprep.subr.bf16.mxu0 %v10395_v1 }
 0x26d   : > { %9632 = vmatprep.subr.bf16.mxu1 %v10395_v1 }
 0x26f   : > { %9613 = vmatpush3.bf16.msra.mxu0 %v11470_v48 }
 0x270   : > { %9633 = vmatpush3.bf16.msra.mxu1 %v11470_v48  ;;  %9614 = vmatprep.subr.bf16.mxu0 %v10395_v1 }
 0x271   : > { %9634 = vmatprep.subr.bf16.mxu1 %v10395_v1 }
 0x273   : > { %9615 = vmatpush3.bf16.msra.mxu0 %v11479_v11 }
 0x274   : > { %9635 = vmatpush3.bf16.msra.mxu1 %v11479_v11  ;;  %9616 = vmatprep.subr.bf16.mxu0 %v10395_v1 }
 0x275   : > { %9636 = vmatprep.subr.bf16.mxu1 %v10395_v1 }
 0x277   : > { %9617 = vmatpush3.bf16.msra.mxu0 %v11488_v12 }
 0x278   : > { %9637 = vmatpush3.bf16.msra.mxu1 %v11488_v12  ;;  %9618 = vmatprep.subr.bf16.mxu0 %v10395_v1 }
 0x279   : > { %v1687_v55 = vpop.f32.mrb[48].mxu0  ;;  %9638 = vmatprep.subr.bf16.mxu1 %v10395_v1 }
 0x27a   : > { %v11645_v60 = vadd.f32 %v1687_v55, %v11423_v22  ;;  %v1730_v3 = vpop.f32.mrb[48].mxu1  ;;  %v9346_v36 = vpop.f32.mrb[49].mxu0  ;;  %v7104_v22 = vld [vmem:[%s10586_s28 + $0x100] sm:$0xff] }
 0x27b   : > { %v11648_v8 = vadd.f32 %v1730_v3, %v11426_v57  ;;  %v9366_v43 = vpop.f32.mrb[49].mxu1  ;;  %9619 = vmatpush3.bf16.msra.mxu0 %v11497_v14  ;;  %v1690_v48 = vpop.f32.mrb[50].mxu0  ;;  %v2349_v57 = vpack.c.bf16 %v7104_v22, %v7104_v22 }
 0x27c   : > { %v1733_v11 = vpop.f32.mrb[50].mxu1  ;;  %9639 = vmatpush3.bf16.msra.mxu1 %v11497_v14  ;;  %9620 = vmatprep.subr.bf16.mxu0 %v10395_v1  ;;  %v9347_v12 = vpop.f32.mrb[51].mxu0  ;;  %v11663_v14 = vld [vmem:[%s13721_s1 + $0x140] sm:$0xff]  }
 0x27d   : > { %v9367_v39 = vpop.f32.mrb[51].mxu1  ;;  %9640 = vmatprep.subr.bf16.mxu1 %v10395_v1 }
 0x27f   : > { %9621 = vmatpush3.bf16.msra.mxu0 %v11512_v42 }
 0x280   : > { %9641 = vmatpush3.bf16.msra.mxu1 %v11512_v42  ;;  %9622 = vmatprep.subr.bf16.mxu0 %v10395_v1  ;;  %v11673_v42 = vld [vmem:[%s13721_s1 + $0x148] sm:$0xff]  }
 0x281   : > { %9642 = vmatprep.subr.bf16.mxu1 %v10395_v1 }
 0x283   : > { %9623 = vmatpush3.bf16.msra.mxu0 %v11521_v58 }
 0x284   : > { %9643 = vmatpush3.bf16.msra.mxu1 %v11521_v58  ;;  %9648 = vmatprep.subr.bf16.mxu0 %v10395_v1 }
 0x285   : > { %9668 = vmatprep.subr.bf16.mxu1 %v10395_v1 }
 0x286   : > { %9625 = vmatmul.mubr.bf16.vlgmr.msra.gmra.mrb[76].mxu0 %v10995_v10  ;;  %v11686_v10 = vld [vmem:[%s13721_s1 + $0x150] sm:$0xff]  }
 0x287   : > { %9645 = vmatmul.mubr.bf16.vlgmr.msra.gmra.mrb[76].mxu1 %v2349_v57  ;;  %9649 = vmatpush3.bf16.msra.mxu0 %v11663_v14 }
 0x288   : > { %9669 = vmatpush3.bf16.msra.mxu1 %v11663_v14  ;;  %9650 = vmatprep.subr.bf16.mxu0 %v10395_v1 }
 0x289   : > { %9670 = vmatprep.subr.bf16.mxu1 %v10395_v1  ;;  %9664 = vmatprep.mubr.msk.bf16.mxu0 %vm10396_vm0, %v10395_v1 }
 0x28a   : > { %9684 = vmatprep.mubr.msk.bf16.mxu1 %vm10396_vm0, %v10395_v1 }
 0x28b   : > { %9651 = vmatpush3.bf16.msra.mxu0 %v11673_v42 }
 0x28c   : > { %9671 = vmatpush3.bf16.msra.mxu1 %v11673_v42  ;;  %9652 = vmatprep.subr.bf16.mxu0 %v10395_v1 }
 0x28d   : > { %9672 = vmatprep.subr.bf16.mxu1 %v10395_v1 }
 0x28f   : > { %9653 = vmatpush3.bf16.msra.mxu0 %v11686_v10 }
 0x290   : > { %9673 = vmatpush3.bf16.msra.mxu1 %v11686_v10  ;;  %9654 = vmatprep.subr.bf16.mxu0 %v10395_v1 }
 0x291   : > { %9674 = vmatprep.subr.bf16.mxu1 %v10395_v1 }
 0x293   : > { %9655 = vmatpush3.bf16.msra.mxu0 %v11695_v44 }
 0x294   : > { %9675 = vmatpush3.bf16.msra.mxu1 %v11695_v44  ;;  %9656 = vmatprep.subr.bf16.mxu0 %v10395_v1 }
 0x295   : > { %9676 = vmatprep.subr.bf16.mxu1 %v10395_v1 }
 0x297   : > { %9657 = vmatpush3.bf16.msra.mxu0 %v11704_v45 }
 0x298   : > { %9677 = vmatpush3.bf16.msra.mxu1 %v11704_v45  ;;  %9658 = vmatprep.subr.bf16.mxu0 %v10395_v1 }
 0x299   : > { %v1773_v46 = vpop.f32.mrb[52].mxu0  ;;  %9678 = vmatprep.subr.bf16.mxu1 %v10395_v1 }
 0x29a   : > { %v11719_v58 = vadd.f32 %v1773_v46, %v11503_v19  ;;  %v1816_v24 = vpop.f32.mrb[52].mxu1  ;;  %v9386_v47 = vpop.f32.mrb[53].mxu0  ;;  %v11929_v46 = vld [vmem:[%s13721_s1 + $0x1a8] sm:$0xff]  }
 0x29b   : > { %v11722_v29 = vadd.f32 %v1816_v24, %v11506_v38  ;;  %v9406_v33 = vpop.f32.mrb[53].mxu1  ;;  %9659 = vmatpush3.bf16.msra.mxu0 %v11713_v41  ;;  %v1776_v63 = vpop.f32.mrb[54].mxu0  ;;  %v11737_v38 = vld [vmem:[%s13721_s1 + $0x178] sm:$0xff]  }
 0x29c   : > { %v1819_v34 = vpop.f32.mrb[54].mxu1  ;;  %9679 = vmatpush3.bf16.msra.mxu1 %v11713_v41  ;;  %9660 = vmatprep.subr.bf16.mxu0 %v10395_v1  ;;  %v9387_v19 = vpop.f32.mrb[55].mxu0 }
 0x29d   : > { %v9407_v2 = vpop.f32.mrb[55].mxu1  ;;  %9680 = vmatprep.subr.bf16.mxu1 %v10395_v1  ;;  %v11944_v19 = vld [vmem:[%s13721_s1 + $0x1b0] sm:$0xff]  }
 0x29f   : > { %9661 = vmatpush3.bf16.msra.mxu0 %v11728_v62 }
 0x2a0   : > { %9681 = vmatpush3.bf16.msra.mxu1 %v11728_v62  ;;  %9662 = vmatprep.subr.bf16.mxu0 %v10395_v1 }
 0x2a1   : > { %9682 = vmatprep.subr.bf16.mxu1 %v10395_v1 }
 0x2a3   : > { %9663 = vmatpush3.bf16.msra.mxu0 %v11737_v38 }
 0x2a4   : > { %9683 = vmatpush3.bf16.msra.mxu1 %v11737_v38  ;;  %9688 = vmatprep.subr.bf16.mxu0 %v10395_v1 }
 0x2a5   : > { %9708 = vmatprep.subr.bf16.mxu1 %v10395_v1 }
 0x2a6   : > { %9665 = vmatmul.mubr.bf16.vlgmr.msra.gmra.mrb[80].mxu0 %v10646_v23 }
 0x2a7   : > { %9685 = vmatmul.mubr.bf16.vlgmr.msra.gmra.mrb[80].mxu1 %v10690_v27  ;;  %9689 = vmatpush3.bf16.msra.mxu0 %v11663_v14 }
 0x2a8   : > { %9709 = vmatpush3.bf16.msra.mxu1 %v11663_v14  ;;  %9690 = vmatprep.subr.bf16.mxu0 %v10395_v1 }
 0x2a9   : > { %9710 = vmatprep.subr.bf16.mxu1 %v10395_v1  ;;  %9704 = vmatprep.mubr.msk.bf16.mxu0 %vm10396_vm0, %v10395_v1 }
 0x2aa   : > { %9724 = vmatprep.mubr.msk.bf16.mxu1 %vm10396_vm0, %v10395_v1 }
 0x2ab   : > { %9691 = vmatpush3.bf16.msra.mxu0 %v11673_v42 }
 0x2ac   : > { %9711 = vmatpush3.bf16.msra.mxu1 %v11673_v42  ;;  %9692 = vmatprep.subr.bf16.mxu0 %v10395_v1 }
 0x2ad   : > { %9712 = vmatprep.subr.bf16.mxu1 %v10395_v1 }
 0x2af   : > { %9693 = vmatpush3.bf16.msra.mxu0 %v11686_v10 }
 0x2b0   : > { %9713 = vmatpush3.bf16.msra.mxu1 %v11686_v10  ;;  %9694 = vmatprep.subr.bf16.mxu0 %v10395_v1 }
 0x2b1   : > { %9714 = vmatprep.subr.bf16.mxu1 %v10395_v1 }
 0x2b3   : > { %9695 = vmatpush3.bf16.msra.mxu0 %v11695_v44 }
 0x2b4   : > { %9715 = vmatpush3.bf16.msra.mxu1 %v11695_v44  ;;  %9696 = vmatprep.subr.bf16.mxu0 %v10395_v1 }
 0x2b5   : > { %9716 = vmatprep.subr.bf16.mxu1 %v10395_v1 }
 0x2b7   : > { %9697 = vmatpush3.bf16.msra.mxu0 %v11704_v45 }
 0x2b8   : > { %9717 = vmatpush3.bf16.msra.mxu1 %v11704_v45  ;;  %9698 = vmatprep.subr.bf16.mxu0 %v10395_v1 }
 0x2b9   : > { %v1859_v23 = vpop.f32.mrb[56].mxu0  ;;  %9718 = vmatprep.subr.bf16.mxu1 %v10395_v1 }
 0x2ba   : > { %v11773_v27 = vadd.f32 %v1859_v23, %v11557_v28  ;;  %v1902_v32 = vpop.f32.mrb[56].mxu1  ;;  %v9426_v13 = vpop.f32.mrb[57].mxu0 }
 0x2bb   : > { %v11776_v40 = vadd.f32 %v1902_v32, %v11560_v30  ;;  %v9446_v0 = vpop.f32.mrb[57].mxu1  ;;  %9699 = vmatpush3.bf16.msra.mxu0 %v11713_v41  ;;  %v1862_v20 = vpop.f32.mrb[58].mxu0 }
 0x2bc   : > { %v1905_v17 = vpop.f32.mrb[58].mxu1  ;;  %9719 = vmatpush3.bf16.msra.mxu1 %v11713_v41  ;;  %9700 = vmatprep.subr.bf16.mxu0 %v10395_v1  ;;  %v9427_v21 = vpop.f32.mrb[59].mxu0 }
 0x2bd   : > { %v9447_v25 = vpop.f32.mrb[59].mxu1  ;;  %9720 = vmatprep.subr.bf16.mxu1 %v10395_v1 }
 0x2bf   : > { %9701 = vmatpush3.bf16.msra.mxu0 %v11728_v62 }
 0x2c0   : > { %9721 = vmatpush3.bf16.msra.mxu1 %v11728_v62  ;;  %9702 = vmatprep.subr.bf16.mxu0 %v10395_v1 }
 0x2c1   : > { %9722 = vmatprep.subr.bf16.mxu1 %v10395_v1 }
 0x2c3   : > { %9703 = vmatpush3.bf16.msra.mxu0 %v11737_v38 }
 0x2c4   : > { %9723 = vmatpush3.bf16.msra.mxu1 %v11737_v38  ;;  %9728 = vmatprep.subr.bf16.mxu0 %v10395_v1 }
 0x2c5   : > { %9748 = vmatprep.subr.bf16.mxu1 %v10395_v1 }
 0x2c6   : > { %9705 = vmatmul.mubr.bf16.vlgmr.msra.gmra.mrb[84].mxu0 %v10734_v31 }
 0x2c7   : > { %9725 = vmatmul.mubr.bf16.vlgmr.msra.gmra.mrb[84].mxu1 %v10848_v49  ;;  %9729 = vmatpush3.bf16.msra.mxu0 %v11663_v14 }
 0x2c8   : > { %9749 = vmatpush3.bf16.msra.mxu1 %v11663_v14  ;;  %9730 = vmatprep.subr.bf16.mxu0 %v10395_v1 }
 0x2c9   : > { %9750 = vmatprep.subr.bf16.mxu1 %v10395_v1  ;;  %9744 = vmatprep.mubr.msk.bf16.mxu0 %vm10396_vm0, %v10395_v1 }
 0x2ca   : > { %9764 = vmatprep.mubr.msk.bf16.mxu1 %vm10396_vm0, %v10395_v1 }
 0x2cb   : > { %9731 = vmatpush3.bf16.msra.mxu0 %v11673_v42 }
 0x2cc   : > { %9751 = vmatpush3.bf16.msra.mxu1 %v11673_v42  ;;  %9732 = vmatprep.subr.bf16.mxu0 %v10395_v1 }
 0x2cd   : > { %9752 = vmatprep.subr.bf16.mxu1 %v10395_v1 }
 0x2cf   : > { %9733 = vmatpush3.bf16.msra.mxu0 %v11686_v10 }
 0x2d0   : > { %9753 = vmatpush3.bf16.msra.mxu1 %v11686_v10  ;;  %9734 = vmatprep.subr.bf16.mxu0 %v10395_v1 }
 0x2d1   : > { %9754 = vmatprep.subr.bf16.mxu1 %v10395_v1 }
 0x2d3   : > { %9735 = vmatpush3.bf16.msra.mxu0 %v11695_v44 }
 0x2d4   : > { %9755 = vmatpush3.bf16.msra.mxu1 %v11695_v44  ;;  %9736 = vmatprep.subr.bf16.mxu0 %v10395_v1 }
 0x2d5   : > { %9756 = vmatprep.subr.bf16.mxu1 %v10395_v1 }
 0x2d7   : > { %9737 = vmatpush3.bf16.msra.mxu0 %v11704_v45 }
 0x2d8   : > { %9757 = vmatpush3.bf16.msra.mxu1 %v11704_v45  ;;  %9738 = vmatprep.subr.bf16.mxu0 %v10395_v1 }
 0x2d9   : > { %v1945_v31 = vpop.f32.mrb[60].mxu0  ;;  %9758 = vmatprep.subr.bf16.mxu1 %v10395_v1 }
 0x2da   : > { %v11817_v49 = vadd.f32 %v1945_v31, %v11601_v50  ;;  %v1988_v28 = vpop.f32.mrb[60].mxu1  ;;  %v9466_v30 = vpop.f32.mrb[61].mxu0 }
 0x2db   : > { %v11820_v55 = vadd.f32 %v1988_v28, %v11604_v4  ;;  %v9486_v3 = vpop.f32.mrb[61].mxu1  ;;  %9739 = vmatpush3.bf16.msra.mxu0 %v11713_v41  ;;  %v1948_v36 = vpop.f32.mrb[62].mxu0 }
 0x2dc   : > { %v1991_v43 = vpop.f32.mrb[62].mxu1  ;;  %9759 = vmatpush3.bf16.msra.mxu1 %v11713_v41  ;;  %9740 = vmatprep.subr.bf16.mxu0 %v10395_v1  ;;  %v9467_v48 = vpop.f32.mrb[63].mxu0 }
 0x2dd   : > { %v9487_v11 = vpop.f32.mrb[63].mxu1  ;;  %9760 = vmatprep.subr.bf16.mxu1 %v10395_v1 }
 0x2df   : > { %9741 = vmatpush3.bf16.msra.mxu0 %v11728_v62 }
 0x2e0   : > { %9761 = vmatpush3.bf16.msra.mxu1 %v11728_v62  ;;  %9742 = vmatprep.subr.bf16.mxu0 %v10395_v1 }
 0x2e1   : > { %9762 = vmatprep.subr.bf16.mxu1 %v10395_v1 }
 0x2e3   : > { %9743 = vmatpush3.bf16.msra.mxu0 %v11737_v38 }
 0x2e4   : > { %9763 = vmatpush3.bf16.msra.mxu1 %v11737_v38  ;;  %9768 = vmatprep.subr.bf16.mxu0 %v10395_v1 }
 0x2e5   : > { %9788 = vmatprep.subr.bf16.mxu1 %v10395_v1 }
 0x2e6   : > { %9745 = vmatmul.mubr.bf16.vlgmr.msra.gmra.mrb[88].mxu0 %v10892_v53 }
 0x2e7   : > { %9765 = vmatmul.mubr.bf16.vlgmr.msra.gmra.mrb[88].mxu1 %v10946_v59  ;;  %9769 = vmatpush3.bf16.msra.mxu0 %v11663_v14 }
 0x2e8   : > { %9789 = vmatpush3.bf16.msra.mxu1 %v11663_v14  ;;  %9770 = vmatprep.subr.bf16.mxu0 %v10395_v1 }
 0x2e9   : > { %9790 = vmatprep.subr.bf16.mxu1 %v10395_v1  ;;  %9784 = vmatprep.mubr.msk.bf16.mxu0 %vm10396_vm0, %v10395_v1 }
 0x2ea   : > { %9804 = vmatprep.mubr.msk.bf16.mxu1 %vm10396_vm0, %v10395_v1 }
 0x2eb   : > { %9771 = vmatpush3.bf16.msra.mxu0 %v11673_v42 }
 0x2ec   : > { %9791 = vmatpush3.bf16.msra.mxu1 %v11673_v42  ;;  %9772 = vmatprep.subr.bf16.mxu0 %v10395_v1 }
 0x2ed   : > { %9792 = vmatprep.subr.bf16.mxu1 %v10395_v1 }
 0x2ef   : > { %9773 = vmatpush3.bf16.msra.mxu0 %v11686_v10 }
 0x2f0   : > { %9793 = vmatpush3.bf16.msra.mxu1 %v11686_v10  ;;  %9774 = vmatprep.subr.bf16.mxu0 %v10395_v1  ;;  %v11879_v10 = vld [vmem:[%s13721_s1 + $0x180] sm:$0xff]  }
 0x2f1   : > { %9794 = vmatprep.subr.bf16.mxu1 %v10395_v1 }
 0x2f3   : > { %9775 = vmatpush3.bf16.msra.mxu0 %v11695_v44 }
 0x2f4   : > { %9795 = vmatpush3.bf16.msra.mxu1 %v11695_v44  ;;  %9776 = vmatprep.subr.bf16.mxu0 %v10395_v1  ;;  %v11889_v44 = vld [vmem:[%s13721_s1 + $0x188] sm:$0xff]  }
 0x2f5   : > { %9796 = vmatprep.subr.bf16.mxu1 %v10395_v1 }
 0x2f7   : > { %9777 = vmatpush3.bf16.msra.mxu0 %v11704_v45 }
 0x2f8   : > { %9797 = vmatpush3.bf16.msra.mxu1 %v11704_v45  ;;  %9778 = vmatprep.subr.bf16.mxu0 %v10395_v1  ;;  %v11911_v45 = vld [vmem:[%s13721_s1 + $0x198] sm:$0xff]  }
 0x2f9   : > { %v2094_v53 = vpop.f32.mrb[64].mxu0  ;;  %9798 = vmatprep.subr.bf16.mxu1 %v10395_v1 }
 0x2fa   : > { %v11861_v59 = vadd.f32 %v2094_v53, %v11645_v60  ;;  %v2135_v50 = vpop.f32.mrb[64].mxu1  ;;  %v9506_v4 = vpop.f32.mrb[65].mxu0  ;;  %v7129_v60 = vld [vmem:[%s10586_s28 + $0x101] sm:$0xff] }
 0x2fb   : > { %v11864_v12 = vadd.f32 %v2135_v50, %v11648_v8  ;;  %v9526_v39 = vpop.f32.mrb[65].mxu1  ;;  %9779 = vmatpush3.bf16.msra.mxu0 %v11713_v41  ;;  %v2097_v22 = vpop.f32.mrb[66].mxu0  ;;  %v2744_v8 = vpack.c.bf16 %v7129_v60, %v7129_v60  ;;  %v12136_v60 = vld [vmem:[%s13721_s1 + $0x1e0] sm:$0xff]  }
 0x2fc   : > { %v2138_v57 = vpop.f32.mrb[66].mxu1  ;;  %9799 = vmatpush3.bf16.msra.mxu1 %v11713_v41  ;;  %9780 = vmatprep.subr.bf16.mxu0 %v10395_v1  ;;  %v9507_v14 = vpop.f32.mrb[67].mxu0  ;;  %v11920_v41 = vld [vmem:[%s13721_s1 + $0x1a0] sm:$0xff]  }
 0x2fd   : > { %v9527_v42 = vpop.f32.mrb[67].mxu1  ;;  %9800 = vmatprep.subr.bf16.mxu1 %v10395_v1  ;;  %v12095_v57 = vld [vmem:[%s13721_s1 + $0x1c0] sm:$0xff]   ;;  %v12105_v14 = vld [vmem:[%s13721_s1 + $0x1c8] sm:$0xff]  }
 0x2fe   : > { %v12127_v42 = vld [vmem:[%s13721_s1 + $0x1d8] sm:$0xff]  }
 0x2ff   : > { %9781 = vmatpush3.bf16.msra.mxu0 %v11728_v62 }
 0x300   : > { %9801 = vmatpush3.bf16.msra.mxu1 %v11728_v62  ;;  %9782 = vmatprep.subr.bf16.mxu0 %v10395_v1 }
 0x301   : > { %9802 = vmatprep.subr.bf16.mxu1 %v10395_v1 }
 0x303   : > { %9783 = vmatpush3.bf16.msra.mxu0 %v11737_v38 }
 0x304   : > { %9803 = vmatpush3.bf16.msra.mxu1 %v11737_v38  ;;  %9808 = vmatprep.subr.bf16.mxu0 %v10395_v1 }
 0x305   : > { %9828 = vmatprep.subr.bf16.mxu1 %v10395_v1 }
 0x306   : > { %9785 = vmatmul.mubr.bf16.vlgmr.msra.gmra.mrb[92].mxu0 %v10992_v9  ;;  %v11902_v9 = vld [vmem:[%s13721_s1 + $0x190] sm:$0xff]  }
 0x307   : > { %9805 = vmatmul.mubr.bf16.vlgmr.msra.gmra.mrb[92].mxu1 %v2744_v8  ;;  %9809 = vmatpush3.bf16.msra.mxu0 %v11879_v10  ;;  %v12145_v8 = vld [vmem:[%s13721_s1 + $0x1e8] sm:$0xff]  }
 0x308   : > { %9829 = vmatpush3.bf16.msra.mxu1 %v11879_v10  ;;  %9810 = vmatprep.subr.bf16.mxu0 %v10395_v1 }
 0x309   : > { %9830 = vmatprep.subr.bf16.mxu1 %v10395_v1  ;;  %9824 = vmatprep.mubr.msk.bf16.mxu0 %vm10396_vm0, %v10395_v1 }
 0x30a   : > { %9844 = vmatprep.mubr.msk.bf16.mxu1 %vm10396_vm0, %v10395_v1 }
 0x30b   : > { %9811 = vmatpush3.bf16.msra.mxu0 %v11889_v44 }
 0x30c   : > { %9831 = vmatpush3.bf16.msra.mxu1 %v11889_v44  ;;  %9812 = vmatprep.subr.bf16.mxu0 %v10395_v1 }
 0x30d   : > { %9832 = vmatprep.subr.bf16.mxu1 %v10395_v1 }
 0x30f   : > { %9813 = vmatpush3.bf16.msra.mxu0 %v11902_v9 }
 0x310   : > { %9833 = vmatpush3.bf16.msra.mxu1 %v11902_v9  ;;  %9814 = vmatprep.subr.bf16.mxu0 %v10395_v1 }
 0x311   : > { %9834 = vmatprep.subr.bf16.mxu1 %v10395_v1 }
 0x313   : > { %9815 = vmatpush3.bf16.msra.mxu0 %v11911_v45 }
 0x314   : > { %9835 = vmatpush3.bf16.msra.mxu1 %v11911_v45  ;;  %9816 = vmatprep.subr.bf16.mxu0 %v10395_v1 }
 0x315   : > { %9836 = vmatprep.subr.bf16.mxu1 %v10395_v1 }
 0x317   : > { %9817 = vmatpush3.bf16.msra.mxu0 %v11920_v41 }
 0x318   : > { %9837 = vmatpush3.bf16.msra.mxu1 %v11920_v41  ;;  %9818 = vmatprep.subr.bf16.mxu0 %v10395_v1 }
 0x319   : > { %v2176_v24 = vpop.f32.mrb[68].mxu0  ;;  %9838 = vmatprep.subr.bf16.mxu1 %v10395_v1 }
 0x31a   : > { %v11935_v47 = vadd.f32 %v2176_v24, %v11719_v58  ;;  %v2217_v33 = vpop.f32.mrb[68].mxu1  ;;  %v9546_v62 = vpop.f32.mrb[69].mxu0  ;;  %v12160_v24 = vld [vmem:[%s13721_s1 + $0x1f0] sm:$0xff]  }
 0x31b   : > { %v11938_v63 = vadd.f32 %v2217_v33, %v11722_v29  ;;  %v9566_v34 = vpop.f32.mrb[69].mxu1  ;;  %9819 = vmatpush3.bf16.msra.mxu0 %v11929_v46  ;;  %v2179_v2 = vpop.f32.mrb[70].mxu0  ;;  %v11953_v29 = vld [vmem:[%s13721_s1 + $0x1b8] sm:$0xff]  }
 0x31c   : > { %v2220_v38 = vpop.f32.mrb[70].mxu1  ;;  %9839 = vmatpush3.bf16.msra.mxu1 %v11929_v46  ;;  %9820 = vmatprep.subr.bf16.mxu0 %v10395_v1  ;;  %v9547_v58 = vpop.f32.mrb[71].mxu0 }
 0x31d   : > { %v9567_v23 = vpop.f32.mrb[71].mxu1  ;;  %9840 = vmatprep.subr.bf16.mxu1 %v10395_v1 }
 0x31f   : > { %9821 = vmatpush3.bf16.msra.mxu0 %v11944_v19 }
 0x320   : > { %9841 = vmatpush3.bf16.msra.mxu1 %v11944_v19  ;;  %9822 = vmatprep.subr.bf16.mxu0 %v10395_v1 }
 0x321   : > { %9842 = vmatprep.subr.bf16.mxu1 %v10395_v1 }
 0x323   : > { %9823 = vmatpush3.bf16.msra.mxu0 %v11953_v29 }
 0x324   : > { %9843 = vmatpush3.bf16.msra.mxu1 %v11953_v29  ;;  %9848 = vmatprep.subr.bf16.mxu0 %v10395_v1 }
 0x325   : > { %9868 = vmatprep.subr.bf16.mxu1 %v10395_v1 }
 0x326   : > { %9825 = vmatmul.mubr.bf16.vlgmr.msra.gmra.mrb[96].mxu0 %v11079_v37 }
 0x327   : > { %9845 = vmatmul.mubr.bf16.vlgmr.msra.gmra.mrb[96].mxu1 %v11121_v51  ;;  %9849 = vmatpush3.bf16.msra.mxu0 %v11879_v10 }
 0x328   : > { %9869 = vmatpush3.bf16.msra.mxu1 %v11879_v10  ;;  %9850 = vmatprep.subr.bf16.mxu0 %v10395_v1 }
 0x329   : > { %9870 = vmatprep.subr.bf16.mxu1 %v10395_v1  ;;  %9864 = vmatprep.mubr.msk.bf16.mxu0 %vm10396_vm0, %v10395_v1 }
 0x32a   : > { %9884 = vmatprep.mubr.msk.bf16.mxu1 %vm10396_vm0, %v10395_v1 }
 0x32b   : > { %9851 = vmatpush3.bf16.msra.mxu0 %v11889_v44 }
 0x32c   : > { %9871 = vmatpush3.bf16.msra.mxu1 %v11889_v44  ;;  %9852 = vmatprep.subr.bf16.mxu0 %v10395_v1 }
 0x32d   : > { %9872 = vmatprep.subr.bf16.mxu1 %v10395_v1 }
 0x32f   : > { %9853 = vmatpush3.bf16.msra.mxu0 %v11902_v9 }
 0x330   : > { %9873 = vmatpush3.bf16.msra.mxu1 %v11902_v9  ;;  %9854 = vmatprep.subr.bf16.mxu0 %v10395_v1 }
 0x331   : > { %9874 = vmatprep.subr.bf16.mxu1 %v10395_v1 }
 0x333   : > { %9855 = vmatpush3.bf16.msra.mxu0 %v11911_v45 }
 0x334   : > { %9875 = vmatpush3.bf16.msra.mxu1 %v11911_v45  ;;  %9856 = vmatprep.subr.bf16.mxu0 %v10395_v1 }
 0x335   : > { %9876 = vmatprep.subr.bf16.mxu1 %v10395_v1 }
 0x337   : > { %9857 = vmatpush3.bf16.msra.mxu0 %v11920_v41 }
 0x338   : > { %9877 = vmatpush3.bf16.msra.mxu1 %v11920_v41  ;;  %9858 = vmatprep.subr.bf16.mxu0 %v10395_v1 }
 0x339   : > { %v2258_v37 = vpop.f32.mrb[72].mxu0  ;;  %9878 = vmatprep.subr.bf16.mxu1 %v10395_v1 }
 0x33a   : > { %v11989_v51 = vadd.f32 %v2258_v37, %v11773_v27  ;;  %v2299_v32 = vpop.f32.mrb[72].mxu1  ;;  %v9586_v13 = vpop.f32.mrb[73].mxu0 }
 0x33b   : > { %v11992_v0 = vadd.f32 %v2299_v32, %v11776_v40  ;;  %v9606_v20 = vpop.f32.mrb[73].mxu1  ;;  %9859 = vmatpush3.bf16.msra.mxu0 %v11929_v46  ;;  %v2261_v17 = vpop.f32.mrb[74].mxu0 }
 0x33c   : > { %v2302_v21 = vpop.f32.mrb[74].mxu1  ;;  %9879 = vmatpush3.bf16.msra.mxu1 %v11929_v46  ;;  %9860 = vmatprep.subr.bf16.mxu0 %v10395_v1  ;;  %v9587_v25 = vpop.f32.mrb[75].mxu0 }
 0x33d   : > { %v9607_v31 = vpop.f32.mrb[75].mxu1  ;;  %9880 = vmatprep.subr.bf16.mxu1 %v10395_v1 }
 0x33f   : > { %9861 = vmatpush3.bf16.msra.mxu0 %v11944_v19 }
 0x340   : > { %9881 = vmatpush3.bf16.msra.mxu1 %v11944_v19  ;;  %9862 = vmatprep.subr.bf16.mxu0 %v10395_v1 }
 0x341   : > { %9882 = vmatprep.subr.bf16.mxu1 %v10395_v1 }
 0x343   : > { %9863 = vmatpush3.bf16.msra.mxu0 %v11953_v29 }
 0x344   : > { %9883 = vmatpush3.bf16.msra.mxu1 %v11953_v29  ;;  %9888 = vmatprep.subr.bf16.mxu0 %v10395_v1 }
 0x345   : > { %9908 = vmatprep.subr.bf16.mxu1 %v10395_v1 }
 0x346   : > { %9865 = vmatmul.mubr.bf16.vlgmr.msra.gmra.mrb[100].mxu0 %v11124_v52 }
 0x347   : > { %9885 = vmatmul.mubr.bf16.vlgmr.msra.gmra.mrb[100].mxu1 %v11167_v6  ;;  %9889 = vmatpush3.bf16.msra.mxu0 %v11879_v10 }
 0x348   : > { %9909 = vmatpush3.bf16.msra.mxu1 %v11879_v10  ;;  %9890 = vmatprep.subr.bf16.mxu0 %v10395_v1 }
 0x349   : > { %9910 = vmatprep.subr.bf16.mxu1 %v10395_v1  ;;  %9904 = vmatprep.mubr.msk.bf16.mxu0 %vm10396_vm0, %v10395_v1 }
 0x34a   : > { %9924 = vmatprep.mubr.msk.bf16.mxu1 %vm10396_vm0, %v10395_v1 }
 0x34b   : > { %9891 = vmatpush3.bf16.msra.mxu0 %v11889_v44 }
 0x34c   : > { %9911 = vmatpush3.bf16.msra.mxu1 %v11889_v44  ;;  %9892 = vmatprep.subr.bf16.mxu0 %v10395_v1 }
 0x34d   : > { %9912 = vmatprep.subr.bf16.mxu1 %v10395_v1 }
 0x34f   : > { %9893 = vmatpush3.bf16.msra.mxu0 %v11902_v9 }
 0x350   : > { %9913 = vmatpush3.bf16.msra.mxu1 %v11902_v9  ;;  %9894 = vmatprep.subr.bf16.mxu0 %v10395_v1 }
 0x351   : > { %9914 = vmatprep.subr.bf16.mxu1 %v10395_v1 }
 0x353   : > { %9895 = vmatpush3.bf16.msra.mxu0 %v11911_v45 }
 0x354   : > { %9915 = vmatpush3.bf16.msra.mxu1 %v11911_v45  ;;  %9896 = vmatprep.subr.bf16.mxu0 %v10395_v1 }
 0x355   : > { %9916 = vmatprep.subr.bf16.mxu1 %v10395_v1 }
 0x357   : > { %9897 = vmatpush3.bf16.msra.mxu0 %v11920_v41 }
 0x358   : > { %9917 = vmatpush3.bf16.msra.mxu1 %v11920_v41  ;;  %9898 = vmatprep.subr.bf16.mxu0 %v10395_v1 }
 0x359   : > { %v2340_v52 = vpop.f32.mrb[76].mxu0  ;;  %9918 = vmatprep.subr.bf16.mxu1 %v10395_v1 }
 0x35a   : > { %v12033_v6 = vadd.f32 %v2340_v52, %v11817_v49  ;;  %v2384_v27 = vpop.f32.mrb[76].mxu1  ;;  %v9626_v40 = vpop.f32.mrb[77].mxu0 }
 0x35b   : > { %v12036_v28 = vadd.f32 %v2384_v27, %v11820_v55  ;;  %v9646_v30 = vpop.f32.mrb[77].mxu1  ;;  %9899 = vmatpush3.bf16.msra.mxu0 %v11929_v46  ;;  %v2343_v3 = vpop.f32.mrb[78].mxu0 }
 0x35c   : > { %v2387_v36 = vpop.f32.mrb[78].mxu1  ;;  %9919 = vmatpush3.bf16.msra.mxu1 %v11929_v46  ;;  %9900 = vmatprep.subr.bf16.mxu0 %v10395_v1  ;;  %v9627_v43 = vpop.f32.mrb[79].mxu0 }
 0x35d   : > { %v9647_v48 = vpop.f32.mrb[79].mxu1  ;;  %9920 = vmatprep.subr.bf16.mxu1 %v10395_v1  ;;  %v7179_v43 = vld [vmem:[%s10586_s28 + $0x111] sm:$0xff] }
 0x35e   : > { %v3535_v48 = vpack.c.bf16 %v7179_v43, %v7179_v43 }
 0x35f   : > { %9901 = vmatpush3.bf16.msra.mxu0 %v11944_v19 }
 0x360   : > { %9921 = vmatpush3.bf16.msra.mxu1 %v11944_v19  ;;  %9902 = vmatprep.subr.bf16.mxu0 %v10395_v1 }
 0x361   : > { %9922 = vmatprep.subr.bf16.mxu1 %v10395_v1 }
 0x363   : > { %9903 = vmatpush3.bf16.msra.mxu0 %v11953_v29 }
 0x364   : > { %9923 = vmatpush3.bf16.msra.mxu1 %v11953_v29  ;;  %9928 = vmatprep.subr.bf16.mxu0 %v10395_v1 }
 0x365   : > { %9948 = vmatprep.subr.bf16.mxu1 %v10395_v1 }
 0x366   : > { %9905 = vmatmul.mubr.bf16.vlgmr.msra.gmra.mrb[104].mxu0 %v11170_v7 }
 0x367   : > { %9925 = vmatmul.mubr.bf16.vlgmr.msra.gmra.mrb[104].mxu1 %v11213_v26  ;;  %9929 = vmatpush3.bf16.msra.mxu0 %v11879_v10 }
 0x368   : > { %9949 = vmatpush3.bf16.msra.mxu1 %v11879_v10  ;;  %9930 = vmatprep.subr.bf16.mxu0 %v10395_v1 }
 0x369   : > { %9950 = vmatprep.subr.bf16.mxu1 %v10395_v1  ;;  %9944 = vmatprep.mubr.msk.bf16.mxu0 %vm10396_vm0, %v10395_v1 }
 0x36a   : > { %9964 = vmatprep.mubr.msk.bf16.mxu1 %vm10396_vm0, %v10395_v1 }
 0x36b   : > { %9931 = vmatpush3.bf16.msra.mxu0 %v11889_v44 }
 0x36c   : > { %9951 = vmatpush3.bf16.msra.mxu1 %v11889_v44  ;;  %9932 = vmatprep.subr.bf16.mxu0 %v10395_v1 }
 0x36d   : > { %9952 = vmatprep.subr.bf16.mxu1 %v10395_v1 }
 0x36f   : > { %9933 = vmatpush3.bf16.msra.mxu0 %v11902_v9 }
 0x370   : > { %9953 = vmatpush3.bf16.msra.mxu1 %v11902_v9  ;;  %9934 = vmatprep.subr.bf16.mxu0 %v10395_v1 }
 0x371   : > { %9954 = vmatprep.subr.bf16.mxu1 %v10395_v1 }
 0x373   : > { %9935 = vmatpush3.bf16.msra.mxu0 %v11911_v45 }
 0x374   : > { %9955 = vmatpush3.bf16.msra.mxu1 %v11911_v45  ;;  %9936 = vmatprep.subr.bf16.mxu0 %v10395_v1 }
 0x375   : > { %9956 = vmatprep.subr.bf16.mxu1 %v10395_v1 }
 0x377   : > { %9937 = vmatpush3.bf16.msra.mxu0 %v11920_v41 }
 0x378   : > { %9957 = vmatpush3.bf16.msra.mxu1 %v11920_v41  ;;  %9938 = vmatprep.subr.bf16.mxu0 %v10395_v1 }
 0x379   : > { %v2490_v7 = vpop.f32.mrb[80].mxu0  ;;  %9958 = vmatprep.subr.bf16.mxu1 %v10395_v1 }
 0x37a   : > { %v12077_v26 = vadd.f32 %v2490_v7, %v11861_v59  ;;  %v2531_v49 = vpop.f32.mrb[80].mxu1  ;;  %v9666_v55 = vpop.f32.mrb[81].mxu0  ;;  %v7154_v59 = vld [vmem:[%s10586_s28 + $0x110] sm:$0xff] }
 0x37b   : > { %v12080_v11 = vadd.f32 %v2531_v49, %v11864_v12  ;;  %v9686_v53 = vpop.f32.mrb[81].mxu1  ;;  %9939 = vmatpush3.bf16.msra.mxu0 %v11929_v46  ;;  %v2493_v50 = vpop.f32.mrb[82].mxu0  ;;  %v3140_v12 = vpack.c.bf16 %v7154_v59, %v7154_v59 }
 0x37c   : > { %v2534_v4 = vpop.f32.mrb[82].mxu1  ;;  %9959 = vmatpush3.bf16.msra.mxu1 %v11929_v46  ;;  %9940 = vmatprep.subr.bf16.mxu0 %v10395_v1  ;;  %v9667_v39 = vpop.f32.mrb[83].mxu0 }
 0x37d   : > { %v9687_v22 = vpop.f32.mrb[83].mxu1  ;;  %9960 = vmatprep.subr.bf16.mxu1 %v10395_v1 }
 0x37f   : > { %9941 = vmatpush3.bf16.msra.mxu0 %v11944_v19 }
 0x380   : > { %9961 = vmatpush3.bf16.msra.mxu1 %v11944_v19  ;;  %9942 = vmatprep.subr.bf16.mxu0 %v10395_v1 }
 0x381   : > { %9962 = vmatprep.subr.bf16.mxu1 %v10395_v1 }
 0x383   : > { %9943 = vmatpush3.bf16.msra.mxu0 %v11953_v29 }
 0x384   : > { %9963 = vmatpush3.bf16.msra.mxu1 %v11953_v29  ;;  %9968 = vmatprep.subr.bf16.mxu0 %v10395_v1 }
 0x385   : > { %9988 = vmatprep.subr.bf16.mxu1 %v10395_v1 }
 0x386   : > { %9945 = vmatmul.mubr.bf16.vlgmr.msra.gmra.mrb[108].mxu0 %v11216_v16  ;;  %v12118_v16 = vld [vmem:[%s13721_s1 + $0x1d0] sm:$0xff]  }
 0x387   : > { %9965 = vmatmul.mubr.bf16.vlgmr.msra.gmra.mrb[108].mxu1 %v3140_v12  ;;  %9969 = vmatpush3.bf16.msra.mxu0 %v12095_v57 }
 0x388   : > { %9989 = vmatpush3.bf16.msra.mxu1 %v12095_v57  ;;  %9970 = vmatprep.subr.bf16.mxu0 %v10395_v1 }
 0x389   : > { %9990 = vmatprep.subr.bf16.mxu1 %v10395_v1  ;;  %9984 = vmatprep.mubr.msk.bf16.mxu0 %vm10396_vm0, %v10395_v1 }
 0x38a   : > { %10004 = vmatprep.mubr.msk.bf16.mxu1 %vm10396_vm0, %v10395_v1 }
 0x38b   : > { %9971 = vmatpush3.bf16.msra.mxu0 %v12105_v14 }
 0x38c   : > { %9991 = vmatpush3.bf16.msra.mxu1 %v12105_v14  ;;  %9972 = vmatprep.subr.bf16.mxu0 %v10395_v1 }
 0x38d   : > { %9992 = vmatprep.subr.bf16.mxu1 %v10395_v1 }
 0x38f   : > { %9973 = vmatpush3.bf16.msra.mxu0 %v12118_v16 }
 0x390   : > { %9993 = vmatpush3.bf16.msra.mxu1 %v12118_v16  ;;  %9974 = vmatprep.subr.bf16.mxu0 %v10395_v1 }
 0x391   : > { %9994 = vmatprep.subr.bf16.mxu1 %v10395_v1 }
 0x393   : > { %9975 = vmatpush3.bf16.msra.mxu0 %v12127_v42 }
 0x394   : > { %9995 = vmatpush3.bf16.msra.mxu1 %v12127_v42  ;;  %9976 = vmatprep.subr.bf16.mxu0 %v10395_v1 }
 0x395   : > { %9996 = vmatprep.subr.bf16.mxu1 %v10395_v1 }
 0x397   : > { %9977 = vmatpush3.bf16.msra.mxu0 %v12136_v60 }
 0x398   : > { %9997 = vmatpush3.bf16.msra.mxu1 %v12136_v60  ;;  %9978 = vmatprep.subr.bf16.mxu0 %v10395_v1 }
 0x399   : > { %v2572_v10 = vpop.f32.mrb[84].mxu0  ;;  %9998 = vmatprep.subr.bf16.mxu1 %v10395_v1 }
 0x39a   : > { %v12151_v44 = vadd.f32 %v2572_v10, %v11935_v47  ;;  %v2613_v9 = vpop.f32.mrb[84].mxu1  ;;  %v9706_v45 = vpop.f32.mrb[85].mxu0 }
 0x39b   : > { %v12154_v41 = vadd.f32 %v2613_v9, %v11938_v63  ;;  %v9726_v46 = vpop.f32.mrb[85].mxu1  ;;  %9979 = vmatpush3.bf16.msra.mxu0 %v12145_v8  ;;  %v2575_v33 = vpop.f32.mrb[86].mxu0  ;;  %v12169_v63 = vld [vmem:[%s13721_s1 + $0x1f8] sm:$0xff]  }
 0x39c   : > { %v2616_v62 = vpop.f32.mrb[86].mxu1  ;;  %9999 = vmatpush3.bf16.msra.mxu1 %v12145_v8  ;;  %9980 = vmatprep.subr.bf16.mxu0 %v10395_v1  ;;  %v9707_v47 = vpop.f32.mrb[87].mxu0 }
 0x39d   : > { %v9727_v34 = vpop.f32.mrb[87].mxu1  ;;  %10000 = vmatprep.subr.bf16.mxu1 %v10395_v1 }
 0x39f   : > { %9981 = vmatpush3.bf16.msra.mxu0 %v12160_v24 }
 0x3a0   : > { %10001 = vmatpush3.bf16.msra.mxu1 %v12160_v24  ;;  %9982 = vmatprep.subr.bf16.mxu0 %v10395_v1 }
 0x3a1   : > { %10002 = vmatprep.subr.bf16.mxu1 %v10395_v1 }
 0x3a3   : > { %9983 = vmatpush3.bf16.msra.mxu0 %v12169_v63 }
 0x3a4   : > { %10003 = vmatpush3.bf16.msra.mxu1 %v12169_v63  ;;  %10008 = vmatprep.subr.bf16.mxu0 %v10395_v1 }
 0x3a5   : > { %10028 = vmatprep.subr.bf16.mxu1 %v10395_v1 }
 0x3a6   : > { %9985 = vmatmul.mubr.bf16.vlgmr.msra.gmra.mrb[112].mxu0 %v11300_v61 }
 0x3a7   : > { %10005 = vmatmul.mubr.bf16.vlgmr.msra.gmra.mrb[112].mxu1 %v11342_v18  ;;  %10009 = vmatpush3.bf16.msra.mxu0 %v12095_v57 }
 0x3a8   : > { %10029 = vmatpush3.bf16.msra.mxu1 %v12095_v57  ;;  %10010 = vmatprep.subr.bf16.mxu0 %v10395_v1 }
 0x3a9   : > { %10030 = vmatprep.subr.bf16.mxu1 %v10395_v1  ;;  %10024 = vmatprep.mubr.msk.bf16.mxu0 %vm10396_vm0, %v10395_v1 }
 0x3aa   : > { %10044 = vmatprep.mubr.msk.bf16.mxu1 %vm10396_vm0, %v10395_v1 }
 0x3ab   : > { %10011 = vmatpush3.bf16.msra.mxu0 %v12105_v14 }
 0x3ac   : > { %10031 = vmatpush3.bf16.msra.mxu1 %v12105_v14  ;;  %10012 = vmatprep.subr.bf16.mxu0 %v10395_v1 }
 0x3ad   : > { %10032 = vmatprep.subr.bf16.mxu1 %v10395_v1 }
 0x3af   : > { %10013 = vmatpush3.bf16.msra.mxu0 %v12118_v16 }
 0x3b0   : > { %10033 = vmatpush3.bf16.msra.mxu1 %v12118_v16  ;;  %10014 = vmatprep.subr.bf16.mxu0 %v10395_v1 }
 0x3b1   : > { %10034 = vmatprep.subr.bf16.mxu1 %v10395_v1 }
 0x3b3   : > { %10015 = vmatpush3.bf16.msra.mxu0 %v12127_v42 }
 0x3b4   : > { %10035 = vmatpush3.bf16.msra.mxu1 %v12127_v42  ;;  %10016 = vmatprep.subr.bf16.mxu0 %v10395_v1 }
 0x3b5   : > { %10036 = vmatprep.subr.bf16.mxu1 %v10395_v1 }
 0x3b7   : > { %10017 = vmatpush3.bf16.msra.mxu0 %v12136_v60 }
 0x3b8   : > { %10037 = vmatpush3.bf16.msra.mxu1 %v12136_v60  ;;  %10018 = vmatprep.subr.bf16.mxu0 %v10395_v1 }
 0x3b9   : > { %v2654_v61 = vpop.f32.mrb[88].mxu0  ;;  %10038 = vmatprep.subr.bf16.mxu1 %v10395_v1 }
 0x3ba   : > { %v12205_v18 = vadd.f32 %v2654_v61, %v11989_v51  ;;  %v2695_v19 = vpop.f32.mrb[88].mxu1  ;;  %v9746_v2 = vpop.f32.mrb[89].mxu0  ;;  %v12333_v61 = vld [vmem:[%s13722_s2] ss:$0 sm:$0xff] }
 0x3bb   : > { %v12208_v38 = vadd.f32 %v2695_v19, %v11992_v0  ;;  %v9766_v58 = vpop.f32.mrb[89].mxu1  ;;  %10019 = vmatpush3.bf16.msra.mxu0 %v12145_v8  ;;  %v2657_v23 = vpop.f32.mrb[90].mxu0 }
 0x3bc   : > { %v2698_v29 = vpop.f32.mrb[90].mxu1  ;;  %10039 = vmatpush3.bf16.msra.mxu1 %v12145_v8  ;;  %10020 = vmatprep.subr.bf16.mxu0 %v10395_v1  ;;  %v9747_v37 = vpop.f32.mrb[91].mxu0 }
 0x3bd   : > { %v9767_v32 = vpop.f32.mrb[91].mxu1  ;;  %10040 = vmatprep.subr.bf16.mxu1 %v10395_v1 }
 0x3bf   : > { %10021 = vmatpush3.bf16.msra.mxu0 %v12160_v24 }
 0x3c0   : > { %10041 = vmatpush3.bf16.msra.mxu1 %v12160_v24  ;;  %10022 = vmatprep.subr.bf16.mxu0 %v10395_v1 }
 0x3c1   : > { %10042 = vmatprep.subr.bf16.mxu1 %v10395_v1 }
 0x3c3   : > { %10023 = vmatpush3.bf16.msra.mxu0 %v12169_v63 }
 0x3c4   : > { %10043 = vmatpush3.bf16.msra.mxu1 %v12169_v63  ;;  %10048 = vmatprep.subr.bf16.mxu0 %v10395_v1 }
 0x3c5   : > { %10068 = vmatprep.subr.bf16.mxu1 %v10395_v1 }
 0x3c6   : > { %10025 = vmatmul.mubr.bf16.vlgmr.msra.gmra.mrb[116].mxu0 %v11345_v15 }
 0x3c7   : > { %10045 = vmatmul.mubr.bf16.vlgmr.msra.gmra.mrb[116].mxu1 %v11388_v54  ;;  %10049 = vmatpush3.bf16.msra.mxu0 %v12095_v57 }
 0x3c8   : > { %10069 = vmatpush3.bf16.msra.mxu1 %v12095_v57  ;;  %10050 = vmatprep.subr.bf16.mxu0 %v10395_v1 }
 0x3c9   : > { %10070 = vmatprep.subr.bf16.mxu1 %v10395_v1  ;;  %10064 = vmatprep.mubr.msk.bf16.mxu0 %vm10396_vm0, %v10395_v1 }
 0x3ca   : > { %10084 = vmatprep.mubr.msk.bf16.mxu1 %vm10396_vm0, %v10395_v1 }
 0x3cb   : > { %10051 = vmatpush3.bf16.msra.mxu0 %v12105_v14 }
 0x3cc   : > { %10071 = vmatpush3.bf16.msra.mxu1 %v12105_v14  ;;  %10052 = vmatprep.subr.bf16.mxu0 %v10395_v1 }
 0x3cd   : > { %10072 = vmatprep.subr.bf16.mxu1 %v10395_v1 }
 0x3cf   : > { %10053 = vmatpush3.bf16.msra.mxu0 %v12118_v16 }
 0x3d0   : > { %10073 = vmatpush3.bf16.msra.mxu1 %v12118_v16  ;;  %10054 = vmatprep.subr.bf16.mxu0 %v10395_v1 }
 0x3d1   : > { %10074 = vmatprep.subr.bf16.mxu1 %v10395_v1 }
 0x3d3   : > { %10055 = vmatpush3.bf16.msra.mxu0 %v12127_v42 }
 0x3d4   : > { %10075 = vmatpush3.bf16.msra.mxu1 %v12127_v42  ;;  %10056 = vmatprep.subr.bf16.mxu0 %v10395_v1 }
 0x3d5   : > { %10076 = vmatprep.subr.bf16.mxu1 %v10395_v1 }
 0x3d7   : > { %10057 = vmatpush3.bf16.msra.mxu0 %v12136_v60 }
 0x3d8   : > { %10077 = vmatpush3.bf16.msra.mxu1 %v12136_v60  ;;  %10058 = vmatprep.subr.bf16.mxu0 %v10395_v1 }
 0x3d9   : > { %v2736_v15 = vpop.f32.mrb[92].mxu0  ;;  %10078 = vmatprep.subr.bf16.mxu1 %v10395_v1 }
 0x3da   : > { %v12249_v54 = vadd.f32 %v2736_v15, %v12033_v6  ;;  %v2779_v51 = vpop.f32.mrb[92].mxu1  ;;  %v9786_v13 = vpop.f32.mrb[93].mxu0 }
 0x3db   : > { %v12252_v0 = vadd.f32 %v2779_v51, %v12036_v28  ;;  %v9806_v20 = vpop.f32.mrb[93].mxu1  ;;  %10059 = vmatpush3.bf16.msra.mxu0 %v12145_v8  ;;  %v2739_v17 = vpop.f32.mrb[94].mxu0  ;;  %v12340_v51 = vld [vmem:[%s13723_s3] ss:$0 sm:$0xff] }
 0x3dc   : > { %v2782_v21 = vpop.f32.mrb[94].mxu1  ;;  %10079 = vmatpush3.bf16.msra.mxu1 %v12145_v8  ;;  %10060 = vmatprep.subr.bf16.mxu0 %v10395_v1  ;;  %v9787_v25 = vpop.f32.mrb[95].mxu0  ;;  %v12345_v17 = vld [vmem:[%s13724_s4] ss:$0 sm:$0xff] }
 0x3dd   : > { %v9807_v31 = vpop.f32.mrb[95].mxu1  ;;  %10080 = vmatprep.subr.bf16.mxu1 %v10395_v1 }
 0x3df   : > { %10061 = vmatpush3.bf16.msra.mxu0 %v12160_v24 }
 0x3e0   : > { %10081 = vmatpush3.bf16.msra.mxu1 %v12160_v24  ;;  %10062 = vmatprep.subr.bf16.mxu0 %v10395_v1 }
 0x3e1   : > { %10082 = vmatprep.subr.bf16.mxu1 %v10395_v1 }
 0x3e3   : > { %10063 = vmatpush3.bf16.msra.mxu0 %v12169_v63 }
 0x3e4   : > { %10083 = vmatpush3.bf16.msra.mxu1 %v12169_v63  ;;  %10088 = vmatprep.subr.bf16.mxu0 %v10395_v1 }
 0x3e5   : > { %10108 = vmatprep.subr.bf16.mxu1 %v10395_v1 }
 0x3e6   : > { %10065 = vmatmul.mubr.bf16.vlgmr.msra.gmra.mrb[120].mxu0 %v11391_v56 }
 0x3e7   : > { %10085 = vmatmul.mubr.bf16.vlgmr.msra.gmra.mrb[120].mxu1 %v11438_v5  ;;  %10089 = vmatpush3.bf16.msra.mxu0 %v12095_v57 }
 0x3e8   : > { %10109 = vmatpush3.bf16.msra.mxu1 %v12095_v57  ;;  %10090 = vmatprep.subr.bf16.mxu0 %v10395_v1 }
 0x3e9   : > { %10110 = vmatprep.subr.bf16.mxu1 %v10395_v1  ;;  %10104 = vmatprep.mubr.msk.bf16.mxu0 %vm10396_vm0, %v10395_v1 }
 0x3ea   : > { %10124 = vmatprep.mubr.msk.bf16.mxu1 %vm10396_vm0, %v10395_v1 }
 0x3eb   : > { %10091 = vmatpush3.bf16.msra.mxu0 %v12105_v14 }
 0x3ec   : > { %10111 = vmatpush3.bf16.msra.mxu1 %v12105_v14  ;;  %10092 = vmatprep.subr.bf16.mxu0 %v10395_v1 }
 0x3ed   : > { %10112 = vmatprep.subr.bf16.mxu1 %v10395_v1 }
 0x3ef   : > { %10093 = vmatpush3.bf16.msra.mxu0 %v12118_v16 }
 0x3f0   : > { %10113 = vmatpush3.bf16.msra.mxu1 %v12118_v16  ;;  %10094 = vmatprep.subr.bf16.mxu0 %v10395_v1 }
 0x3f1   : > { %10114 = vmatprep.subr.bf16.mxu1 %v10395_v1 }
 0x3f3   : > { %10095 = vmatpush3.bf16.msra.mxu0 %v12127_v42 }
 0x3f4   : > { %10115 = vmatpush3.bf16.msra.mxu1 %v12127_v42  ;;  %10096 = vmatprep.subr.bf16.mxu0 %v10395_v1 }
 0x3f5   : > { %10116 = vmatprep.subr.bf16.mxu1 %v10395_v1 }
 0x3f7   : > { %10097 = vmatpush3.bf16.msra.mxu0 %v12136_v60 }
 0x3f8   : > { %10117 = vmatpush3.bf16.msra.mxu1 %v12136_v60  ;;  %10098 = vmatprep.subr.bf16.mxu0 %v10395_v1 }
 0x3f9   : > { %v2885_v56 = vpop.f32.mrb[96].mxu0  ;;  %10118 = vmatprep.subr.bf16.mxu1 %v10395_v1 }
 0x3fa   : > { %v2891_v5 = vadd.f32 %v2885_v56, %v12077_v26  ;;  %v2926_v52 = vpop.f32.mrb[96].mxu1  ;;  %v9826_v6 = vpop.f32.mrb[97].mxu0 }
 0x3fb   : > { %v2932_v27 = vadd.f32 %v2926_v52, %v12080_v11  ;;  %v9846_v40 = vpop.f32.mrb[97].mxu1  ;;  %10099 = vmatpush3.bf16.msra.mxu0 %v12145_v8  ;;  %v2888_v28 = vpop.f32.mrb[98].mxu0  ;;  %v12354_v52 = vld [vmem:[%s13729_s9] sm:$0xff] }
 0x3fc   : > { %v2929_v30 = vpop.f32.mrb[98].mxu1  ;;  %10119 = vmatpush3.bf16.msra.mxu1 %v12145_v8  ;;  %10100 = vmatprep.subr.bf16.mxu0 %v10395_v1  ;;  %v9827_v3 = vpop.f32.mrb[99].mxu0 }
 0x3fd   : > { %v9847_v36 = vpop.f32.mrb[99].mxu1  ;;  %10120 = vmatprep.subr.bf16.mxu1 %v10395_v1 }
 0x3ff   : > { %10101 = vmatpush3.bf16.msra.mxu0 %v12160_v24 }
 0x400   : > { %10121 = vmatpush3.bf16.msra.mxu1 %v12160_v24  ;;  %10102 = vmatprep.subr.bf16.mxu0 %v10395_v1 }
 0x401   : > { %10122 = vmatprep.subr.bf16.mxu1 %v10395_v1 }
 0x403   : > { %10103 = vmatpush3.bf16.msra.mxu0 %v12169_v63 }
 0x404   : > { %10123 = vmatpush3.bf16.msra.mxu1 %v12169_v63  ;;  %10128 = vmatprep.subr.mxu0 %v10395_v1 }
 0x405   : > { %10133 = vmatprep.subr.mxu1 %v10395_v1 }
 0x406   : > { %10105 = vmatmul.mubr.bf16.vlgmr.msra.gmra.mrb[124].mxu0 %v11441_v35 }
 0x407   : > { %10125 = vmatmul.mubr.bf16.vlgmr.msra.gmra.mrb[124].mxu1 %v3535_v48  ;;  %10130 = vmatprep.mubr.msk.f32.mxu0 %vm10396_vm0, %v10395_v1 }
 0x408   : > { %10135 = vmatprep.mubr.msk.f32.mxu1 %vm10396_vm0, %v10395_v1 }
 0x419   : > { %v2967_v7 = vpop.f32.mrb[100].mxu0 }
 0x41a   : > { %v12313_v26 = vadd.f32 %v2967_v7, %v12151_v44  ;;  %v3008_v49 = vpop.f32.mrb[100].mxu1  ;;  %v9866_v55 = vpop.f32.mrb[101].mxu0 }
 0x41b   : > { %v12316_v11 = vadd.f32 %v3008_v49, %v12154_v41  ;;  %v9886_v53 = vpop.f32.mrb[101].mxu1  ;;  %v2970_v50 = vpop.f32.mrb[102].mxu0 }
 0x41c   : > { %v3011_v4 = vpop.f32.mrb[102].mxu1  ;;  %v9867_v35 = vpop.f32.mrb[103].mxu0 }
 0x41d   : > { %v9887_v39 = vpop.f32.mrb[103].mxu1 }
 0x439   : > { %v3049_v22 = vpop.f32.mrb[104].mxu0 }
 0x43a   : > { %v12319_v59 = vadd.f32 %v3049_v22, %v12205_v18  ;;  %v3090_v12 = vpop.f32.mrb[104].mxu1  ;;  %v9906_v57 = vpop.f32.mrb[105].mxu0 }
 0x43b   : > { %v12322_v14 = vadd.f32 %v3090_v12, %v12208_v38  ;;  %v9926_v16 = vpop.f32.mrb[105].mxu1  ;;  %v3052_v42 = vpop.f32.mrb[106].mxu0 }
 0x43c   : > { %v3093_v60 = vpop.f32.mrb[106].mxu1  ;;  %v9907_v8 = vpop.f32.mrb[107].mxu0 }
 0x43d   : > { %v9927_v10 = vpop.f32.mrb[107].mxu1 }
 0x459   : > { %v3131_v44 = vpop.f32.mrb[108].mxu0 }
 0x45a   : > { %v12325_v9 = vadd.f32 %v3131_v44, %v12249_v54  ;;  %v3175_v45 = vpop.f32.mrb[108].mxu1  ;;  %v9946_v41 = vpop.f32.mrb[109].mxu0 }
 0x45b   : > { %v12328_v46 = vadd.f32 %v3175_v45, %v12252_v0  ;;  %v9966_v24 = vpop.f32.mrb[109].mxu1  ;;  %v3134_v33 = vpop.f32.mrb[110].mxu0 }
 0x45c   : > { %v3178_v62 = vpop.f32.mrb[110].mxu1  ;;  %v9947_v47 = vpop.f32.mrb[111].mxu0 }
 0x45d   : > { %v9967_v34 = vpop.f32.mrb[111].mxu1 }
 0x479   : > { %v3281_v63 = vpop.f32.mrb[112].mxu0 }
 0x47a   : > { %v3287_v18 = vadd.f32 %v3281_v63, %v2891_v5  ;;  %v3322_v19 = vpop.f32.mrb[112].mxu1  ;;  %v9986_v2 = vpop.f32.mrb[113].mxu0 }
 0x47b   : > { %v3328_v38 = vadd.f32 %v3322_v19, %v2932_v27  ;;  %v10006_v58 = vpop.f32.mrb[113].mxu1  ;;  %v3284_v23 = vpop.f32.mrb[114].mxu0  ;;  %v4361_v2 = vld [vmem:[#allocation2 + $0x8] sm:$0x1e] }
 0x47c   : > { %v3598_v29 = vadd.f32 %v12333_v61, %v3287_v18  ;;  %v3325_v37 = vpop.f32.mrb[114].mxu1  ;;  %v9987_v32 = vpop.f32.mrb[115].mxu0 }
 0x47d   : > { %v3604_v15 = vadd.f32 %v12333_v61, %v3328_v38  ;;  %v10007_v54 = vpop.f32.mrb[115].mxu1 }
 0x47e   : > { %vm3599_vm1 = vcmp.ge.f32.partialorder %v3598_v29, 0.0  ;;  %v3600_v13 = vmul.f32 0.2, %v3598_v29  ;;  %v4363_v54 = vpack.c.bf16 %v4361_v2, %v4361_v2 }
 0x47f   : > { %vm3605_vm2 = vcmp.ge.f32.partialorder %v3604_v15, 0.0  ;;  %v3606_v0 = vmul.f32 0.2, %v3604_v15 }
 0x480   : > { %v3601_v20 = vsel %vm3599_vm1, %v3598_v29, %v3600_v13 }
 0x481   : > { %v3602_v21 = vmul.f32 %v12340_v51, %v3601_v20  ;;  %v3607_v25 = vsel %vm3605_vm2, %v3604_v15, %v3606_v0 }
 0x482   : > { %v3608_v31 = vmul.f32 %v12340_v51, %v3607_v25 }
 0x483   : > { %v3603_v56 = vadd.f32 %v12345_v17, %v3602_v21 }
 0x484   : > { %v3609_v5 = vadd.f32 %v12345_v17, %v3608_v31 }
 0x485   : > { %10129 = vmatpush3.msra.mxu0 %v3603_v56  ;;  %v4374_v56 = vshll.u32 %v4363_v54, 16 }
 0x486   : > { %10134 = vmatpush3.msra.mxu1 %v3609_v5  ;;  %10138 = vmatprep.subr.mxu0 %v10395_v1 }
 0x487   : > { %10136 = vmatmul.mubr.msk.f32.vlgmr.msra.gmra.mrb[128].mxu1 %vm3667_vm3, %v12354_v52  ;;  %10143 = vmatprep.subr.mxu1 %v10395_v1 }
 0x488   : > { %10131 = vmatmul.mubr.msk.f32.vlgmr.msra.gmra.mrb[128].mxu0 %vm3667_vm3, %v12354_v52  ;;  %10145 = vmatprep.mubr.msk.f32.mxu1 %vm10396_vm0, %v10395_v1 }
 0x489   : > { %10140 = vmatprep.mubr.msk.f32.mxu0 %vm10396_vm0, %v10395_v1 }
 0x499   : > { %v3363_v6 = vpop.f32.mrb[116].mxu0 }
 0x49a   : > { %v3369_v27 = vadd.f32 %v3363_v6, %v12313_v26  ;;  %v3404_v40 = vpop.f32.mrb[116].mxu1  ;;  %v10026_v28 = vpop.f32.mrb[117].mxu0 }
 0x49b   : > { %v3410_v30 = vadd.f32 %v3404_v40, %v12316_v11  ;;  %v10046_v3 = vpop.f32.mrb[117].mxu1  ;;  %v3366_v36 = vpop.f32.mrb[118].mxu0  ;;  %v12412_v40 = vld [vmem:[%s13725_s5 + $0x40] sm:$0xff]   ;;  %v4372_v28 = vshrl.u32 %v4363_v54, 16 }
 0x49c   : > { %v3610_v43 = vadd.f32 %v12333_v61, %v3369_v27  ;;  %v3407_v48 = vpop.f32.mrb[118].mxu1  ;;  %v10027_v7 = vpop.f32.mrb[119].mxu0  ;;  %v12418_v36 = vld [vmem:[%s13725_s5] sm:$0xff]  }
 0x49d   : > { %v3616_v49 = vadd.f32 %v12333_v61, %v3410_v30  ;;  %v10047_v55 = vpop.f32.mrb[119].mxu1  ;;  %v4376_v30 = vrot.slane %v4374_v56, 1  ;;  %v12440_v48 = vld [vmem:[%s13725_s5 + $0xc8] sm:$0xff]  }
 0x49e   : > { %vm3611_vm4 = vcmp.ge.f32.partialorder %v3610_v43, 0.0  ;;  %v3612_v53 = vmul.f32 0.2, %v3610_v43  ;;  %v12449_v55 = vld [vmem:[%s13725_s5 + $0x8] sm:$0xff]  }
 0x49f   : > { %vm3617_vm5 = vcmp.ge.f32.partialorder %v3616_v49, 0.0  ;;  %v3618_v50 = vmul.f32 0.2, %v3616_v49 }
 0x4a0   : > { %v3613_v4 = vsel %vm3611_vm4, %v3610_v43, %v3612_v53  ;;  %v12428_v43 = vld [vmem:[%s13725_s5 + $0x48] sm:$0xff]   ;;  %v12457_v53 = vld [vmem:[%s13725_s5 + $0x50] sm:$0xff]  }
 0x4a1   : > { %v3614_v26 = vmul.f32 %v12340_v51, %v3613_v4  ;;  %v3619_v35 = vsel %vm3617_vm5, %v3616_v49, %v3618_v50  ;;  %v4377_v49 = vor.u32 %v4376_v30, %v4372_v28  ;;  %v12468_v50 = vld [vmem:[%s13725_s5 + $0xd0] sm:$0xff]  }
 0x4a2   : > { %v3620_v39 = vmul.f32 %v12340_v51, %v3619_v35  ;;  %v12474_v4 = vld [vmem:[%s13725_s5 + $0x10] sm:$0xff]  }
 0x4a3   : > { %v3615_v11 = vadd.f32 %v12345_v17, %v3614_v26  ;;  %v12481_v26 = vld [vmem:[%s13725_s5 + $0x58] sm:$0xff]   ;;  %v12486_v35 = vld [vmem:[%s13725_s5 + $0x90] sm:$0xff]  }
 0x4a4   : > { %v3621_v22 = vadd.f32 %v12345_v17, %v3620_v39  ;;  %v12492_v39 = vld [vmem:[%s13725_s5 + $0xd8] sm:$0xff]  }
 0x4a5   : > { %10139 = vmatpush3.msra.mxu0 %v3615_v11  ;;  %v12498_v11 = vld [vmem:[%s13725_s5 + $0x18] sm:$0xff]  }
 0x4a6   : > { %10144 = vmatpush3.msra.mxu1 %v3621_v22  ;;  %10148 = vmatprep.subr.mxu0 %v10395_v1  ;;  %v12505_v22 = vld [vmem:[%s13725_s5 + $0x60] sm:$0xff]  }
 0x4a7   : > { %10146 = vmatmul.mubr.msk.f32.vlgmr.msra.gmra.mrb[130].mxu1 %vm3667_vm3, %v12354_v52  ;;  %10153 = vmatprep.subr.mxu1 %v10395_v1 }
 0x4a8   : > { %10141 = vmatmul.mubr.msk.f32.vlgmr.msra.gmra.mrb[130].mxu0 %vm3667_vm3, %v12354_v52  ;;  %10155 = vmatprep.mubr.msk.f32.mxu1 %vm10396_vm0, %v10395_v1 }
 0x4a9   : > { %10150 = vmatprep.mubr.msk.f32.mxu0 %vm10396_vm0, %v10395_v1 }
 0x4b9   : > { %v3445_v12 = vpop.f32.mrb[120].mxu0 }
 0x4ba   : > { %v3451_v57 = vadd.f32 %v3445_v12, %v12319_v59  ;;  %v3486_v16 = vpop.f32.mrb[120].mxu1  ;;  %v10066_v42 = vpop.f32.mrb[121].mxu0  ;;  %v12510_v12 = vld [vmem:[%s13725_s5 + $0x98] sm:$0xff]  }
 0x4bb   : > { %v3492_v60 = vadd.f32 %v3486_v16, %v12322_v14  ;;  %v10086_v8 = vpop.f32.mrb[121].mxu1  ;;  %v3448_v10 = vpop.f32.mrb[122].mxu0  ;;  %v12522_v16 = vld [vmem:[%s13725_s5 + $0x20] sm:$0xff]   ;;  %v12529_v42 = vld [vmem:[%s13725_s5 + $0x68] sm:$0xff]  }
 0x4bc   : > { %v3622_v44 = vadd.f32 %v12333_v61, %v3451_v57  ;;  %v3489_v45 = vpop.f32.mrb[122].mxu1  ;;  %v10067_v41 = vpop.f32.mrb[123].mxu0  ;;  %v12516_v57 = vld [vmem:[%s13725_s5 + $0xe0] sm:$0xff]   ;;  %v12540_v10 = vld [vmem:[%s13725_s5 + $0xe8] sm:$0xff]  }
 0x4bd   : > { %v3628_v24 = vadd.f32 %v12333_v61, %v3492_v60  ;;  %v10087_v33 = vpop.f32.mrb[123].mxu1  ;;  %v12534_v60 = vld [vmem:[%s13725_s5 + $0xa0] sm:$0xff]   ;;  %v12553_v41 = vld [vmem:[%s13725_s5 + $0x70] sm:$0xff]  }
 0x4be   : > { %vm3623_vm6 = vcmp.ge.f32.partialorder %v3622_v44, 0.0  ;;  %v3624_v62 = vmul.f32 0.2, %v3622_v44  ;;  %v4360_v8 = vld [vmem:[#allocation2] sm:$0x1e]  ;;  %v12564_v33 = vld [vmem:[%s13725_s5 + $0xf0] sm:$0xff]  }
 0x4bf   : > { %vm3629_vm7 = vcmp.ge.f32.partialorder %v3628_v24, 0.0  ;;  %v3630_v47 = vmul.f32 0.2, %v3628_v24  ;;  %v4362_v45 = vpack.c.bf16 %v4360_v8, %v4360_v8 }
 0x4c0   : > { %v3625_v34 = vsel %vm3623_vm6, %v3622_v44, %v3624_v62  ;;  %v12546_v44 = vld [vmem:[%s13725_s5 + $0x28] sm:$0xff]   ;;  %v12570_v62 = vld [vmem:[%s13725_s5 + $0x30] sm:$0xff]  }
 0x4c1   : > { %v3626_v59 = vmul.f32 %v12340_v51, %v3625_v34  ;;  %v3631_v63 = vsel %vm3629_vm7, %v3628_v24, %v3630_v47  ;;  %v12558_v24 = vld [vmem:[%s13725_s5 + $0xa8] sm:$0xff]   ;;  %v4367_v47 = vshll.u32 %v4362_v45, 16  ;;  %v12577_v34 = vld [vmem:[%s13725_s5 + $0x78] sm:$0xff]  }
 0x4c2   : > { %v3632_v18 = vmul.f32 %v12340_v51, %v3631_v63  ;;  %v12588_v63 = vld [vmem:[%s13725_s5 + $0xf8] sm:$0xff]  }
 0x4c3   : > { %v3627_v14 = vadd.f32 %v12345_v17, %v3626_v59  ;;  %v12582_v59 = vld [vmem:[%s13725_s5 + $0xb0] sm:$0xff]   ;;  %v4369_v2 = vrot.slane %v4367_v47, 1 }
 0x4c4   : > { %v3633_v19 = vadd.f32 %v12345_v17, %v3632_v18  ;;  %v12594_v18 = vld [vmem:[%s13725_s5 + $0x38] sm:$0xff]  }
 0x4c5   : > { %10149 = vmatpush3.msra.mxu0 %v3627_v14  ;;  %v4311_v14 = vld [vmem:[#allocation2] sm:$0xf] }
 0x4c6   : > { %10154 = vmatpush3.msra.mxu1 %v3633_v19  ;;  %10158 = vmatprep.subr.mxu0 %v10395_v1  ;;  %v4365_v19 = vshrl.u32 %v4362_v45, 16 }
 0x4c7   : > { %10156 = vmatmul.mubr.msk.f32.vlgmr.msra.gmra.mrb[132].mxu1 %vm3667_vm3, %v12354_v52  ;;  %10163 = vmatprep.subr.mxu1 %v10395_v1 }
 0x4c8   : > { %10151 = vmatmul.mubr.msk.f32.vlgmr.msra.gmra.mrb[132].mxu0 %vm3667_vm3, %v12354_v52  ;;  %10165 = vmatprep.mubr.msk.f32.mxu1 %vm10396_vm0, %v10395_v1 }
 0x4c9   : > { %10160 = vmatprep.mubr.msk.f32.mxu0 %vm10396_vm0, %v10395_v1 }
 0x4d9   : > { %v3527_v38 = vpop.f32.mrb[124].mxu0 }
 0x4da   : > { %v3533_v58 = vadd.f32 %v3527_v38, %v12325_v9  ;;  %v3570_v23 = vpop.f32.mrb[124].mxu1  ;;  %v10106_v29 = vpop.f32.mrb[125].mxu0  ;;  %v12601_v38 = vld [vmem:[%s13725_s5 + $0xb8] sm:$0xff]  }
 0x4db   : > { %v3576_v37 = vadd.f32 %v3570_v23, %v12328_v46  ;;  %v3530_v32 = vpop.f32.mrb[126].mxu0  ;;  %v10126_v15 = vpop.f32.mrb[125].mxu1  ;;  %v4370_v23 = vor.u32 %v4369_v2, %v4365_v19 }
 0x4dc   : > { %v3634_v13 = vadd.f32 %v12333_v61, %v3533_v58  ;;  %v10107_v0 = vpop.f32.mrb[127].mxu0  ;;  %v3573_v20 = vpop.f32.mrb[126].mxu1  ;;  %v4313_v58 = vpack.c.bf16 %v4311_v14, %v4311_v14 }
 0x4dd   : > { %v3640_v21 = vadd.f32 %v12333_v61, %v3576_v37  ;;  %v10127_v25 = vpop.f32.mrb[127].mxu1  ;;  %v4312_v61 = vld [vmem:[#allocation2 + $0x8] sm:$0xf] }
 0x4de   : > { %vm3635_vm8 = vcmp.ge.f32.partialorder %v3634_v13, 0.0  ;;  %v3636_v1 = vmul.f32 0.2, %v3634_v13  ;;  %v4314_v7 = vpack.c.bf16 %v4312_v61, %v4312_v61 }
 0x4df   : > { %vm3641_vm9 = vcmp.ge.f32.partialorder %v3640_v21, 0.0  ;;  %v3642_v31 = vmul.f32 0.2, %v3640_v21 }
 0x4e0   : > { %v3637_v9 = vsel %vm3635_vm8, %v3634_v13, %v3636_v1 }
 0x4e1   : > { %v3638_v5 = vmul.f32 %v12340_v51, %v3637_v9  ;;  %v3643_v6 = vsel %vm3641_vm9, %v3640_v21, %v3642_v31 }
 0x4e2   : > { %v3644_v46 = vmul.f32 %v12340_v51, %v3643_v6  ;;  %v12423_v51 = vld [vmem:[%s13725_s5 + $0xc0] sm:$0xff]  }
 0x4e3   : > { %v3639_v27 = vadd.f32 %v12345_v17, %v3638_v5 }
 0x4e4   : > { %v3645_v3 = vadd.f32 %v12345_v17, %v3644_v46  ;;  %v12433_v17 = vld [vmem:[%s13725_s5 + $0x80] sm:$0xff]  }
 0x4e5   : > { %10159 = vmatpush3.msra.mxu0 %v3639_v27 }
 0x4e6   : > { %10164 = vmatpush3.msra.mxu1 %v3645_v3  ;;  %10161 = vmatmul.mubr.msk.f32.vlgmr.msra.gmra.mrb[134].mxu0 %vm3667_vm3, %v12354_v52 }
 0x4e7   : > { %8166 = vmatprep.subr.bf16.mxu1 %v12412_v40  ;;  %10166 = vmatmul.mubr.msk.f32.vlgmr.msra.gmra.mrb[134].mxu1 %vm3667_vm3, %v12354_v52  ;;  %v12462_v52 = vld [vmem:[%s13725_s5 + $0x88] sm:$0xff]  }
 0x4e8   : > { %8167 = vmatpush3.bf16.msra.mxu1 %v12418_v36  ;;  %8144 = vmatprep.subr.bf16.mxu0 %v12423_v51 }
 0x4e9   : > { %8168 = vmatprep.subr.bf16.mxu1 %v12428_v43  ;;  %8145 = vmatpush3.bf16.msra.mxu0 %v12433_v17 }
 0x4ea   : > { %8146 = vmatprep.subr.bf16.mxu0 %v12440_v48  ;;  %4644 = vmatprep.mubr.bf16.mxu1 %v4314_v7 }
 0x4eb   : > { %4508 = vmatprep.mubr.bf16.mxu0 %v4377_v49 }
 0x4ec   : > { %8169 = vmatpush3.bf16.msra.mxu1 %v12449_v55 }
 0x4ed   : > { %8170 = vmatprep.subr.bf16.mxu1 %v12457_v53  ;;  %8147 = vmatpush3.bf16.msra.mxu0 %v12462_v52 }
 0x4ee   : > { %8148 = vmatprep.subr.bf16.mxu0 %v12468_v50 }
 0x4f0   : > { %8171 = vmatpush3.bf16.msra.mxu1 %v12474_v4 }
 0x4f1   : > { %8172 = vmatprep.subr.bf16.mxu1 %v12481_v26  ;;  %8149 = vmatpush3.bf16.msra.mxu0 %v12486_v35 }
 0x4f2   : > { %8150 = vmatprep.subr.bf16.mxu0 %v12492_v39 }
 0x4f4   : > { %8173 = vmatpush3.bf16.msra.mxu1 %v12498_v11 }
 0x4f5   : > { %8174 = vmatprep.subr.bf16.mxu1 %v12505_v22  ;;  %8151 = vmatpush3.bf16.msra.mxu0 %v12510_v12 }
 0x4f6   : > { %8152 = vmatprep.subr.bf16.mxu0 %v12516_v57 }
 0x4f8   : > { %8175 = vmatpush3.bf16.msra.mxu1 %v12522_v16 }
 0x4f9   : > { %8176 = vmatprep.subr.bf16.mxu1 %v12529_v42  ;;  %8153 = vmatpush3.bf16.msra.mxu0 %v12534_v60 }
 0x4fa   : > { %8154 = vmatprep.subr.bf16.mxu0 %v12540_v10 }
 0x4fc   : > { %8177 = vmatpush3.bf16.msra.mxu1 %v12546_v44 }
 0x4fd   : > { %8178 = vmatprep.subr.bf16.mxu1 %v12553_v41  ;;  %8155 = vmatpush3.bf16.msra.mxu0 %v12558_v24 }
 0x4fe   : > { %8156 = vmatprep.subr.bf16.mxu0 %v12564_v33 }
 0x500   : > { %8179 = vmatpush3.bf16.msra.mxu1 %v12570_v62 }
 0x501   : > { %8180 = vmatprep.subr.bf16.mxu1 %v12577_v34  ;;  %8157 = vmatpush3.bf16.msra.mxu0 %v12582_v59 }
 0x502   : > { %8158 = vmatprep.subr.bf16.mxu0 %v12588_v63 }
 0x504   : > { %8181 = vmatpush3.bf16.msra.mxu1 %v12594_v18 }
 0x505   : > { %8210 = vmatprep.subr.bf16.mxu1 %v12412_v40  ;;  %8159 = vmatpush3.bf16.msra.mxu0 %v12601_v38 }
 0x506   : > { %8188 = vmatprep.subr.bf16.mxu0 %v12423_v51 }
 0x507   : > { %4645 = vmatmul.mubr.bf16.vlgmr.msra.gmra.mrb[136].mxu1 %v4313_v58 }
 0x508   : > { %8211 = vmatpush3.bf16.msra.mxu1 %v12418_v36  ;;  %4509 = vmatmul.mubr.bf16.vlgmr.msra.gmra.mrb[136].mxu0 %v4370_v23 }
 0x509   : > { %8212 = vmatprep.subr.bf16.mxu1 %v12428_v43  ;;  %8189 = vmatpush3.bf16.msra.mxu0 %v12433_v17 }
 0x50a   : > { %8190 = vmatprep.subr.bf16.mxu0 %v12440_v48 }
 0x50c   : > { %8213 = vmatpush3.bf16.msra.mxu1 %v12449_v55 }
 0x50d   : > { %8214 = vmatprep.subr.bf16.mxu1 %v12457_v53  ;;  %8191 = vmatpush3.bf16.msra.mxu0 %v12462_v52 }
 0x50e   : > { %8192 = vmatprep.subr.bf16.mxu0 %v12468_v50 }
 0x510   : > { %8215 = vmatpush3.bf16.msra.mxu1 %v12474_v4 }
 0x511   : > { %8216 = vmatprep.subr.bf16.mxu1 %v12481_v26  ;;  %8193 = vmatpush3.bf16.msra.mxu0 %v12486_v35 }
 0x512   : > { %8194 = vmatprep.subr.bf16.mxu0 %v12492_v39 }
 0x514   : > { %8217 = vmatpush3.bf16.msra.mxu1 %v12498_v11 }
 0x515   : > { %8218 = vmatprep.subr.bf16.mxu1 %v12505_v22  ;;  %8195 = vmatpush3.bf16.msra.mxu0 %v12510_v12 }
 0x516   : > { %8196 = vmatprep.subr.bf16.mxu0 %v12516_v57 }
 0x518   : > { %8219 = vmatpush3.bf16.msra.mxu1 %v12522_v16 }
 0x519   : > { %8220 = vmatprep.subr.bf16.mxu1 %v12529_v42  ;;  %8197 = vmatpush3.bf16.msra.mxu0 %v12534_v60 }
 0x51a   : > { %8198 = vmatprep.subr.bf16.mxu0 %v12540_v10 }
 0x51c   : > { %8221 = vmatpush3.bf16.msra.mxu1 %v12546_v44 }
 0x51d   : > { %8222 = vmatprep.subr.bf16.mxu1 %v12553_v41  ;;  %8199 = vmatpush3.bf16.msra.mxu0 %v12558_v24 }
 0x51e   : > { %8200 = vmatprep.subr.bf16.mxu0 %v12564_v33 }
 0x520   : > { %8223 = vmatpush3.bf16.msra.mxu1 %v12570_v62 }
 0x521   : > { %8224 = vmatprep.subr.bf16.mxu1 %v12577_v34  ;;  %8201 = vmatpush3.bf16.msra.mxu0 %v12582_v59 }
 0x522   : > { %8202 = vmatprep.subr.bf16.mxu0 %v12588_v63 }
 0x524   : > { %8225 = vmatpush3.bf16.msra.mxu1 %v12594_v18 }
 0x525   : > { %8254 = vmatprep.subr.bf16.mxu1 %v12412_v40  ;;  %8203 = vmatpush3.bf16.msra.mxu0 %v12601_v38 }
 0x526   : > { %8232 = vmatprep.subr.bf16.mxu0 %v12423_v51 }
 0x55a   : > { %v3813_v29 = vpop.f32.mrb[128].mxu1 }
 0x55b   : > { %3818 = vst [vmem:[#allocation2 + $0x28] sm:$0xf] %v3813_v29  ;;  %v3820_v37 = vrot.slane %v3813_v29, 3  ;;  %v10137_v32 = vpop.f32.mrb[129].mxu1  ;;  %v3737_v15 = vpop.f32.mrb[128].mxu0 }
 0x55c   : > { %3742 = vst [vmem:[#allocation2 + $0x18] sm:$0xf] %v3737_v15  ;;  %v3744_v54 = vrot.slane %v3737_v15, 3  ;;  %v10132_v13 = vpop.f32.mrb[129].mxu0 }
 0x55d   : > { %3822 = vst [vmem:[#allocation2 + $0x20] sm:$0x1e] %v3820_v37 }
 0x55e   : > { %3746 = vst [vmem:[#allocation2 + $0x10] sm:$0x1e] %v3744_v54 }
 0x562   : > { %v4316_v0 = vld [vmem:[#allocation2 + $0x28] sm:$0xf] }
 0x563   : > { %v4653_v20 = vld [vmem:[#allocation2 + $0x28] sm:$0x1e]  ;;  %v12640_v21 = vpack.c.bf16 %v4316_v0, %v4316_v0 }
 0x564   : > { %v4655_v25 = vpack.c.bf16 %v4653_v20, %v4653_v20  ;;  %v4315_v1 = vld [vmem:[#allocation2 + $0x20] sm:$0xf] }
 0x565   : > { %v4652_v31 = vld [vmem:[#allocation2 + $0x20] sm:$0x1e]  ;;  %4744 = vmatprep.mubr.bf16.mxu1 %v12640_v21  ;;  %v12643_v56 = vpack.c.bf16 %v4315_v1, %v4315_v1 }
 0x566   : > { %v4666_v9 = vshll.u32 %v4655_v25, 16  ;;  %v4654_v5 = vpack.c.bf16 %v4652_v31, %v4652_v31  ;;  %v4664_v6 = vshrl.u32 %v4655_v25, 16 }
 0x567   : > { %4745 = vmatmul.mubr.bf16.vlgmr.msra.gmra.mrb[140].mxu1 %v12643_v56 }
 0x568   : > { %v4668_v46 = vrot.slane %v4666_v9, 1  ;;  %v4659_v27 = vshll.u32 %v4654_v5, 16  ;;  %8255 = vmatpush3.bf16.msra.mxu1 %v12418_v36  ;;  %v4657_v28 = vshrl.u32 %v4654_v5, 16  ;;  %v12773_v5 = vld [vmem:[%s13725_s5 + $0x110] sm:$0xff]  }
 0x569   : > { %8256 = vmatprep.subr.bf16.mxu1 %v12428_v43 }
 0x56a   : > { %v12648_v61 = vor.u32 %v4668_v46, %v4664_v6  ;;  %v4661_v30 = vrot.slane %v4659_v27, 1  ;;  %v12788_v6 = vld [vmem:[%s13725_s5 + $0x118] sm:$0xff]   ;;  %v12794_v46 = vld [vmem:[%s13725_s5 + $0x160] sm:$0xff]  }
 0x56b   : > { %v12802_v27 = vld [vmem:[%s13725_s5 + $0x120] sm:$0xff]  }
 0x56c   : > { %4704 = vmatprep.mubr.bf16.mxu0 %v12648_v61  ;;  %v12651_v3 = vor.u32 %v4661_v30, %v4657_v28  ;;  %8257 = vmatpush3.bf16.msra.mxu1 %v12449_v55  ;;  %v12808_v28 = vld [vmem:[%s13725_s5 + $0x168] sm:$0xff]  }
 0x56d   : > { %8258 = vmatprep.subr.bf16.mxu1 %v12457_v53  ;;  %v12816_v30 = vld [vmem:[%s13725_s5 + $0x128] sm:$0xff]  }
 0x56e   : > { %4705 = vmatmul.mubr.bf16.vlgmr.msra.gmra.mrb[140].mxu0 %v12651_v3 }
 0x56f   : > { %8233 = vmatpush3.bf16.msra.mxu0 %v12433_v17 }
 0x570   : > { %8234 = vmatprep.subr.bf16.mxu0 %v12440_v48  ;;  %8259 = vmatpush3.bf16.msra.mxu1 %v12474_v4 }
 0x571   : > { %8260 = vmatprep.subr.bf16.mxu1 %v12481_v26 }
 0x573   : > { %8235 = vmatpush3.bf16.msra.mxu0 %v12462_v52 }
 0x574   : > { %8236 = vmatprep.subr.bf16.mxu0 %v12468_v50  ;;  %8261 = vmatpush3.bf16.msra.mxu1 %v12498_v11 }
 0x575   : > { %8262 = vmatprep.subr.bf16.mxu1 %v12505_v22 }
 0x577   : > { %8237 = vmatpush3.bf16.msra.mxu0 %v12486_v35 }
 0x578   : > { %8238 = vmatprep.subr.bf16.mxu0 %v12492_v39  ;;  %8263 = vmatpush3.bf16.msra.mxu1 %v12522_v16 }
 0x579   : > { %8264 = vmatprep.subr.bf16.mxu1 %v12529_v42 }
 0x57a   : > { %v3965_v7 = vpop.f32.mrb[130].mxu1 }
 0x57b   : > { %8239 = vmatpush3.bf16.msra.mxu0 %v12510_v12  ;;  %3970 = vst [vmem:[#allocation2 + $0x48] sm:$0xf] %v3965_v7  ;;  %v3972_v49 = vrot.slane %v3965_v7, 3  ;;  %v10147_v8 = vpop.f32.mrb[131].mxu1  ;;  %v3889_v45 = vpop.f32.mrb[130].mxu0  ;;  %v12822_v7 = vld [vmem:[%s13725_s5 + $0x170] sm:$0xff]  }
 0x57c   : > { %8240 = vmatprep.subr.bf16.mxu0 %v12516_v57  ;;  %8265 = vmatpush3.bf16.msra.mxu1 %v12546_v44  ;;  %3894 = vst [vmem:[#allocation2 + $0x38] sm:$0xf] %v3889_v45  ;;  %v3896_v47 = vrot.slane %v3889_v45, 3  ;;  %v10142_v14 = vpop.f32.mrb[131].mxu0 }
 0x57d   : > { %3974 = vst [vmem:[#allocation2 + $0x40] sm:$0x1e] %v3972_v49  ;;  %8266 = vmatprep.subr.bf16.mxu1 %v12553_v41 }
 0x57e   : > { %3898 = vst [vmem:[#allocation2 + $0x30] sm:$0x1e] %v3896_v47 }
 0x57f   : > { %8241 = vmatpush3.bf16.msra.mxu0 %v12534_v60 }
 0x580   : > { %8242 = vmatprep.subr.bf16.mxu0 %v12540_v10  ;;  %8267 = vmatpush3.bf16.msra.mxu1 %v12570_v62 }
 0x581   : > { %8268 = vmatprep.subr.bf16.mxu1 %v12577_v34 }
 0x582   : > { %v4320_v19 = vld [vmem:[#allocation2 + $0x48] sm:$0xf] }
 0x583   : > { %8243 = vmatpush3.bf16.msra.mxu0 %v12558_v24  ;;  %v4753_v2 = vld [vmem:[#allocation2 + $0x48] sm:$0x1e]  ;;  %v12678_v58 = vpack.c.bf16 %v4320_v19, %v4320_v19 }
 0x584   : > { %8244 = vmatprep.subr.bf16.mxu0 %v12564_v33  ;;  %v4755_v23 = vpack.c.bf16 %v4753_v2, %v4753_v2  ;;  %8269 = vmatpush3.bf16.msra.mxu1 %v12594_v18  ;;  %v4319_v29 = vld [vmem:[#allocation2 + $0x40] sm:$0xf]  ;;  %v12830_v2 = vld [vmem:[%s13725_s5 + $0x130] sm:$0xff]  }
 0x585   : > { %v4752_v37 = vld [vmem:[#allocation2 + $0x40] sm:$0x1e]  ;;  %4844 = vmatprep.mubr.bf16.mxu1 %v12678_v58  ;;  %8298 = vmatprep.subr.bf16.mxu1 %v12412_v40  ;;  %v12683_v32 = vpack.c.bf16 %v4319_v29, %v4319_v29  ;;  %v12844_v29 = vld [vmem:[%s13725_s5 + $0x138] sm:$0xff]  }
 0x586   : > { %v4766_v15 = vshll.u32 %v4755_v23, 16  ;;  %v4754_v54 = vpack.c.bf16 %v4752_v37, %v4752_v37  ;;  %v4764_v13 = vshrl.u32 %v4755_v23, 16  ;;  %v12836_v23 = vld [vmem:[%s13725_s5 + $0x178] sm:$0xff]   ;;  %v5126_v37 = vld [vmem:[#allocation2 + $0x30] sm:$0xf] }
 0x587   : > { %8245 = vmatpush3.bf16.msra.mxu0 %v12582_v59  ;;  %4845 = vmatmul.mubr.bf16.vlgmr.msra.gmra.mrb[144].mxu1 %v12683_v32 }
 0x588   : > { %8246 = vmatprep.subr.bf16.mxu0 %v12588_v63  ;;  %v4768_v0 = vrot.slane %v4766_v15, 1  ;;  %v4759_v20 = vshll.u32 %v4754_v54, 16  ;;  %8299 = vmatpush3.bf16.msra.mxu1 %v12418_v36  ;;  %v4757_v40 = vshrl.u32 %v4754_v54, 16  ;;  %v12849_v54 = vpack.c.bf16 %v5126_v37, %v5126_v37 }
 0x589   : > { %8300 = vmatprep.subr.bf16.mxu1 %v12428_v43 }
 0x58a   : > { %v12690_v25 = vor.u32 %v4768_v0, %v4764_v13  ;;  %v4761_v1 = vrot.slane %v4759_v20, 1  ;;  %v4985_v20 = vld [vmem:[#allocation2 + $0x10] sm:$0xf] }
 0x58b   : > { %8247 = vmatpush3.bf16.msra.mxu0 %v12601_v38 }
 0x58c   : > { %4804 = vmatprep.mubr.bf16.mxu0 %v12690_v25  ;;  %8276 = vmatprep.subr.bf16.mxu0 %v12423_v51  ;;  %v12695_v31 = vor.u32 %v4761_v1, %v4757_v40  ;;  %v4987_v1 = vpack.c.bf16 %v4985_v20, %v4985_v20  ;;  %v13000_v20 = vld [vmem:[%s13725_s5 + $0x1f8] sm:$0xff]  }
 0x58d   : > { %8301 = vmatpush3.bf16.msra.mxu1 %v12449_v55 }
 0x58e   : > { %4805 = vmatmul.mubr.bf16.vlgmr.msra.gmra.mrb[144].mxu0 %v12695_v31  ;;  %8302 = vmatprep.subr.bf16.mxu1 %v12457_v53  ;;  %v12723_v53 = vld [vmem:[%s13725_s5 + $0x140] sm:$0xff]  }
 0x58f   : > { %8277 = vmatpush3.bf16.msra.mxu0 %v12433_v17 }
 0x590   : > { %8278 = vmatprep.subr.bf16.mxu0 %v12440_v48 }
 0x591   : > { %8303 = vmatpush3.bf16.msra.mxu1 %v12474_v4 }
 0x592   : > { %8304 = vmatprep.subr.bf16.mxu1 %v12481_v26 }
 0x593   : > { %8279 = vmatpush3.bf16.msra.mxu0 %v12462_v52  ;;  %v5127_v52 = vld [vmem:[#allocation2 + $0x38] sm:$0xf] }
 0x594   : > { %8280 = vmatprep.subr.bf16.mxu0 %v12468_v50 }
 0x595   : > { %8305 = vmatpush3.bf16.msra.mxu1 %v12498_v11  ;;  %v12733_v11 = vld [vmem:[%s13725_s5 + $0x100] sm:$0xff]  }
 0x596   : > { %8306 = vmatprep.subr.bf16.mxu1 %v12505_v22 }
 0x597   : > { %8281 = vmatpush3.bf16.msra.mxu0 %v12486_v35 }
 0x598   : > { %8282 = vmatprep.subr.bf16.mxu0 %v12492_v39 }
 0x599   : > { %8307 = vmatpush3.bf16.msra.mxu1 %v12522_v16  ;;  %v12744_v16 = vld [vmem:[%s13725_s5 + $0x148] sm:$0xff]  }
 0x59a   : > { %8308 = vmatprep.subr.bf16.mxu1 %v12529_v42  ;;  %v4117_v36 = vpop.f32.mrb[132].mxu1 }
 0x59b   : > { %8283 = vmatpush3.bf16.msra.mxu0 %v12510_v12  ;;  %4122 = vst [vmem:[#allocation2 + $0x68] sm:$0xf] %v4117_v36  ;;  %v4124_v51 = vrot.slane %v4117_v36, 3  ;;  %v10157_v43 = vpop.f32.mrb[133].mxu1  ;;  %v4041_v17 = vpop.f32.mrb[132].mxu0  ;;  %v12735_v12 = vpack.c.bf16 %v5127_v52, %v5127_v52 }
 0x59c   : > { %8284 = vmatprep.subr.bf16.mxu0 %v12516_v57  ;;  %4046 = vst [vmem:[#allocation2 + $0x58] sm:$0xf] %v4041_v17  ;;  %v4048_v48 = vrot.slane %v4041_v17, 3  ;;  %v10152_v55 = vpop.f32.mrb[133].mxu0  ;;  %v5452_v36 = vld [vmem:[#allocation2 + $0x38] sm:$0x1e] }
 0x59d   : > { %8309 = vmatpush3.bf16.msra.mxu1 %v12546_v44  ;;  %4126 = vst [vmem:[#allocation2 + $0x60] sm:$0x1e] %v4124_v51  ;;  %v5454_v51 = vpack.c.bf16 %v5452_v36, %v5452_v36 }
 0x59e   : > { %8310 = vmatprep.subr.bf16.mxu1 %v12553_v41  ;;  %4050 = vst [vmem:[#allocation2 + $0x50] sm:$0x1e] %v4048_v48 }
 0x59f   : > { %8285 = vmatpush3.bf16.msra.mxu0 %v12534_v60 }
 0x5a0   : > { %8286 = vmatprep.subr.bf16.mxu0 %v12540_v10 }
 0x5a1   : > { %8311 = vmatpush3.bf16.msra.mxu1 %v12570_v62 }
 0x5a2   : > { %8312 = vmatprep.subr.bf16.mxu1 %v12577_v34  ;;  %v4324_v50 = vld [vmem:[#allocation2 + $0x68] sm:$0xf] }
 0x5a3   : > { %8287 = vmatpush3.bf16.msra.mxu0 %v12558_v24  ;;  %v4853_v4 = vld [vmem:[#allocation2 + $0x68] sm:$0x1e]  ;;  %v12727_v26 = vpack.c.bf16 %v4324_v50, %v4324_v50  ;;  %v4986_v24 = vld [vmem:[#allocation2 + $0x18] sm:$0xf] }
 0x5a4   : > { %8288 = vmatprep.subr.bf16.mxu0 %v12564_v33  ;;  %v4855_v35 = vpack.c.bf16 %v4853_v4, %v4853_v4  ;;  %v4323_v39 = vld [vmem:[#allocation2 + $0x60] sm:$0xf]  ;;  %v12753_v33 = vld [vmem:[%s13725_s5 + $0x108] sm:$0xff]   ;;  %v5172_v0 = vld [vmem:[#allocation2 + $0x58] sm:$0xf] }
 0x5a5   : > { %8313 = vmatpush3.bf16.msra.mxu1 %v12594_v18  ;;  %v4852_v22 = vld [vmem:[#allocation2 + $0x60] sm:$0x1e]  ;;  %4944 = vmatprep.mubr.bf16.mxu1 %v12727_v26  ;;  %v12739_v57 = vpack.c.bf16 %v4323_v39, %v4323_v39  ;;  %v4988_v18 = vpack.c.bf16 %v4986_v24, %v4986_v24  ;;  %v12862_v40 = vpack.c.bf16 %v5172_v0, %v5172_v0  ;;  %v5295_v50 = vld [vmem:[#allocation2 + $0x18] sm:$0x1e]  ;;  %v5294_v0 = vld [vmem:[#allocation2 + $0x10] sm:$0x1e] }
 0x5a6   : > { %8342 = vmatprep.subr.bf16.mxu1 %v12723_v53  ;;  %v4866_v42 = vshll.u32 %v4855_v35, 16  ;;  %v4854_v60 = vpack.c.bf16 %v4852_v22, %v4852_v22  ;;  %v4864_v10 = vshrl.u32 %v4855_v35, 16  ;;  %v5513_v36 = vld [vmem:[#allocation2 + $0x58] sm:$0x1e] }
 0x5a7   : > { %8289 = vmatpush3.bf16.msra.mxu0 %v12582_v59 }
 0x5a8   : > { %4945 = vmatmul.mubr.bf16.vlgmr.msra.gmra.mrb[148].mxu1 %v12739_v57  ;;  %8290 = vmatprep.subr.bf16.mxu0 %v12588_v63  ;;  %v4868_v44 = vrot.slane %v4866_v42, 1  ;;  %v4859_v41 = vshll.u32 %v4854_v60, 16  ;;  %v4857_v34 = vshrl.u32 %v4854_v60, 16  ;;  %v12762_v63 = vld [vmem:[%s13725_s5 + $0x150] sm:$0xff]   ;;  %v5297_v60 = vpack.c.bf16 %v5295_v50, %v5295_v50 }
 0x5a9   : > { %8343 = vmatpush3.bf16.msra.mxu1 %v12733_v11  ;;  %5162 = vmatprep.mubr.bf16.mxu1 %v12735_v12 }
 0x5aa   : > { %8344 = vmatprep.subr.bf16.mxu1 %v12744_v16  ;;  %v12757_v62 = vor.u32 %v4868_v44, %v4864_v10  ;;  %v4861_v59 = vrot.slane %v4859_v41, 1  ;;  %v12893_v10 = vld [vmem:[%s13725_s5 + $0x1c0] sm:$0xff]   ;;  %v5463_v44 = vshrl.u32 %v5454_v51, 16 }
 0x5ab   : > { %8291 = vmatpush3.bf16.msra.mxu0 %v12601_v38  ;;  %v12780_v38 = vld [vmem:[%s13725_s5 + $0x158] sm:$0xff]  }
 0x5ac   : > { %4904 = vmatprep.mubr.bf16.mxu0 %v12757_v62  ;;  %8320 = vmatprep.subr.bf16.mxu0 %v12723_v53  ;;  %v12767_v9 = vor.u32 %v4861_v59, %v4857_v34  ;;  %v5308_v34 = vshll.u32 %v5297_v60, 16  ;;  %v12909_v59 = vld [vmem:[%s13725_s5 + $0x1c8] sm:$0xff]  }
 0x5ad   : > { %8345 = vmatpush3.bf16.msra.mxu1 %v12753_v33 }
 0x5ae   : > { %4905 = vmatmul.mubr.bf16.vlgmr.msra.gmra.mrb[148].mxu0 %v12767_v9  ;;  %8346 = vmatprep.subr.bf16.mxu1 %v12762_v63 }
 0x5af   : > { %8321 = vmatpush3.bf16.msra.mxu0 %v12733_v11  ;;  %5117 = vmatprep.mubr.bf16.mxu0 %v4988_v18  ;;  %v12921_v18 = vld [vmem:[%s13725_s5 + $0x188] sm:$0xff]  }
 0x5b0   : > { %8322 = vmatprep.subr.bf16.mxu0 %v12744_v16 }
 0x5b1   : > { %8347 = vmatpush3.bf16.msra.mxu1 %v12773_v5 }
 0x5b2   : > { %8348 = vmatprep.subr.bf16.mxu1 %v12780_v38 }
 0x5b3   : > { %8323 = vmatpush3.bf16.msra.mxu0 %v12753_v33 }
 0x5b4   : > { %8324 = vmatprep.subr.bf16.mxu0 %v12762_v63 }
 0x5b5   : > { %8349 = vmatpush3.bf16.msra.mxu1 %v12788_v6 }
 0x5b6   : > { %8350 = vmatprep.subr.bf16.mxu1 %v12794_v46 }
 0x5b7   : > { %8325 = vmatpush3.bf16.msra.mxu0 %v12773_v5 }
 0x5b8   : > { %8326 = vmatprep.subr.bf16.mxu0 %v12780_v38 }
 0x5b9   : > { %8351 = vmatpush3.bf16.msra.mxu1 %v12802_v27  ;;  %v4193_v49 = vpop.f32.mrb[134].mxu0 }
 0x5ba   : > { %8352 = vmatprep.subr.bf16.mxu1 %v12808_v28  ;;  %4198 = vst [vmem:[#allocation2 + $0x78] sm:$0xf] %v4193_v49  ;;  %v4200_v8 = vrot.slane %v4193_v49, 3  ;;  %v10162_v45 = vpop.f32.mrb[135].mxu0  ;;  %v4269_v47 = vpop.f32.mrb[134].mxu1  ;;  %v12952_v49 = vld [vmem:[%s13725_s5 + $0x198] sm:$0xff]  }
 0x5bb   : > { %8327 = vmatpush3.bf16.msra.mxu0 %v12788_v6  ;;  %4274 = vst [vmem:[#allocation2 + $0x88] sm:$0xf] %v4269_v47  ;;  %v4276_v14 = vrot.slane %v4269_v47, 3  ;;  %v10167_v19 = vpop.f32.mrb[135].mxu1  ;;  %v12966_v45 = vld [vmem:[%s13725_s5 + $0x1a0] sm:$0xff]   ;;  %v12972_v47 = vld [vmem:[%s13725_s5 + $0x1e8] sm:$0xff]  }
 0x5bc   : > { %8328 = vmatprep.subr.bf16.mxu0 %v12794_v46  ;;  %4202 = vst [vmem:[#allocation2 + $0x70] sm:$0x1e] %v4200_v8  ;;  %v12958_v8 = vld [vmem:[%s13725_s5 + $0x1e0] sm:$0xff]  }
 0x5bd   : > { %8353 = vmatpush3.bf16.msra.mxu1 %v12816_v30  ;;  %4278 = vst [vmem:[#allocation2 + $0x80] sm:$0x1e] %v4276_v14  ;;  %v5451_v14 = vld [vmem:[#allocation2 + $0x30] sm:$0x1e] }
 0x5be   : > { %8354 = vmatprep.subr.bf16.mxu1 %v12822_v7 }
 0x5bf   : > { %8329 = vmatpush3.bf16.msra.mxu0 %v12802_v27 }
 0x5c0   : > { %8330 = vmatprep.subr.bf16.mxu0 %v12808_v28 }
 0x5c1   : > { %8355 = vmatpush3.bf16.msra.mxu1 %v12830_v2  ;;  %v5217_v15 = vld [vmem:[#allocation2 + $0x78] sm:$0xf] }
 0x5c2   : > { %8356 = vmatprep.subr.bf16.mxu1 %v12836_v23  ;;  %v12852_v13 = vpack.c.bf16 %v5217_v15, %v5217_v15  ;;  %v5574_v19 = vld [vmem:[#allocation2 + $0x78] sm:$0x1e]  ;;  %v12994_v15 = vld [vmem:[%s13725_s5 + $0x1b0] sm:$0xff]  }
 0x5c3   : > { %8331 = vmatpush3.bf16.msra.mxu0 %v12816_v30  ;;  %v5216_v42 = vld [vmem:[#allocation2 + $0x70] sm:$0xf]  ;;  %v5576_v37 = vpack.c.bf16 %v5574_v19, %v5574_v19 }
 0x5c4   : > { %8332 = vmatprep.subr.bf16.mxu0 %v12822_v7  ;;  %v12897_v24 = vpack.c.bf16 %v5216_v42, %v5216_v42 }
 0x5c5   : > { %8357 = vmatpush3.bf16.msra.mxu1 %v12844_v29 }
 0x5c6   : > { %8386 = vmatprep.subr.bf16.mxu1 %v12723_v53 }
 0x5c7   : > { %8333 = vmatpush3.bf16.msra.mxu0 %v12830_v2 }
 0x5c8   : > { %5163 = vmatmul.mubr.bf16.vlgmr.msra.gmra.mrb[152].mxu1 %v12849_v54  ;;  %8334 = vmatprep.subr.bf16.mxu0 %v12836_v23 }
 0x5c9   : > { %8387 = vmatpush3.bf16.msra.mxu1 %v12733_v11  ;;  %5252 = vmatprep.mubr.bf16.mxu1 %v12852_v13 }
 0x5ca   : > { %8388 = vmatprep.subr.bf16.mxu1 %v12744_v16 }
 0x5cb   : > { %8335 = vmatpush3.bf16.msra.mxu0 %v12844_v29 }
 0x5cc   : > { %8364 = vmatprep.subr.bf16.mxu0 %v12723_v53 }
 0x5cd   : > { %8389 = vmatpush3.bf16.msra.mxu1 %v12753_v33 }
 0x5ce   : > { %5118 = vmatmul.mubr.bf16.vlgmr.msra.gmra.mrb[152].mxu0 %v4987_v1  ;;  %8390 = vmatprep.subr.bf16.mxu1 %v12762_v63 }
 0x5cf   : > { %8365 = vmatpush3.bf16.msra.mxu0 %v12733_v11  ;;  %5207 = vmatprep.mubr.bf16.mxu0 %v12862_v40  ;;  %v5465_v11 = vshll.u32 %v5454_v51, 16  ;;  %v5587_v51 = vshll.u32 %v5576_v37, 16 }
 0x5d0   : > { %8366 = vmatprep.subr.bf16.mxu0 %v12744_v16 }
 0x5d1   : > { %8391 = vmatpush3.bf16.msra.mxu1 %v12773_v5  ;;  %v5467_v41 = vrot.slane %v5465_v11, 1  ;;  %v5589_v50 = vrot.slane %v5587_v51, 1  ;;  %v13155_v51 = vld [vmem:[%s13725_s5 + $0x230] sm:$0xff]  }
 0x5d2   : > { %8392 = vmatprep.subr.bf16.mxu1 %v12780_v38 }
 0x5d3   : > { %8367 = vmatpush3.bf16.msra.mxu0 %v12753_v33  ;;  %v12903_v33 = vld [vmem:[%s13725_s5 + $0x180] sm:$0xff]  }
 0x5d4   : > { %8368 = vmatprep.subr.bf16.mxu0 %v12762_v63  ;;  %v12912_v63 = vor.u32 %v5467_v41, %v5463_v44 }
 0x5d5   : > { %8393 = vmatpush3.bf16.msra.mxu1 %v12788_v6 }
 0x5d6   : > { %8394 = vmatprep.subr.bf16.mxu1 %v12794_v46 }
 0x5d7   : > { %8369 = vmatpush3.bf16.msra.mxu0 %v12773_v5  ;;  %v5171_v5 = vld [vmem:[#allocation2 + $0x50] sm:$0xf] }
 0x5d8   : > { %8370 = vmatprep.subr.bf16.mxu0 %v12780_v38  ;;  %v5306_v38 = vshrl.u32 %v5297_v60, 16 }
 0x5d9   : > { %8395 = vmatpush3.bf16.msra.mxu1 %v12802_v27 }
 0x5da   : > { %8396 = vmatprep.subr.bf16.mxu1 %v12808_v28  ;;  %v8182_v43 = vpop.f32.mrb[136].mxu1 }
 0x5db   : > { %8371 = vmatpush3.bf16.msra.mxu0 %v12788_v6  ;;  %v8160_v17 = vpop.f32.mrb[136].mxu0  ;;  %v8183_v48 = vpop.f32.mrb[137].mxu1  ;;  %v5310_v6 = vrot.slane %v5308_v34, 1 }
 0x5dc   : > { %8372 = vmatprep.subr.bf16.mxu0 %v12794_v46  ;;  %v8161_v55 = vpop.f32.mrb[137].mxu0  ;;  %v8184_v53 = vadd.f32 %v8183_v48, %v8182_v43  ;;  %v8185_v52 = vpop.f32.mrb[138].mxu1  ;;  %v12927_v46 = vld [vmem:[%s13725_s5 + $0x1d0] sm:$0xff]   ;;  %v5296_v43 = vpack.c.bf16 %v5294_v0, %v5294_v0  ;;  %v5515_v48 = vpack.c.bf16 %v5513_v36, %v5513_v36 }
 0x5dd   : > { %8397 = vmatpush3.bf16.msra.mxu1 %v12816_v30  ;;  %v8162_v4 = vadd.f32 %v8161_v55, %v8160_v17  ;;  %v8163_v35 = vpop.f32.mrb[138].mxu0  ;;  %v8186_v39 = vpop.f32.mrb[139].mxu1  ;;  %v13008_v17 = vld [vmem:[%s13725_s5 + $0x1b8] sm:$0xff]   ;;  %v5585_v52 = vshrl.u32 %v5576_v37, 16  ;;  %v13133_v37 = vld [vmem:[%s13725_s5 + $0x268] sm:$0xff]   ;;  %v13147_v0 = vld [vmem:[%s13725_s5 + $0x270] sm:$0xff]  }
 0x5de   : > { %8398 = vmatprep.subr.bf16.mxu1 %v12822_v7  ;;  %v8164_v22 = vpop.f32.mrb[139].mxu0  ;;  %v5526_v35 = vshll.u32 %v5515_v48, 16  ;;  %v5524_v60 = vshrl.u32 %v5515_v48, 16  ;;  %v13161_v48 = vld [vmem:[%s13725_s5 + $0x278] sm:$0xff]  }
 0x5df   : > { %8373 = vmatpush3.bf16.msra.mxu0 %v12802_v27  ;;  %v12886_v16 = vadd.f32 %v8184_v53, %v8162_v4  ;;  %v12930_v27 = vpack.c.bf16 %v5171_v5, %v5171_v5  ;;  %v5301_v4 = vshll.u32 %v5296_v43, 16  ;;  %v13018_v11 = vor.u32 %v5589_v50, %v5585_v52 }
 0x5e0   : > { %8374 = vmatprep.subr.bf16.mxu0 %v12808_v28  ;;  %v5311_v28 = vor.u32 %v5310_v6, %v5306_v38  ;;  %v5299_v22 = vshrl.u32 %v5296_v43, 16  ;;  %v5528_v44 = vrot.slane %v5526_v35, 1 }
 0x5e1   : > { %8399 = vmatpush3.bf16.msra.mxu1 %v12830_v2  ;;  %v5303_v42 = vrot.slane %v5301_v4, 1 }
 0x5e2   : > { %8400 = vmatprep.subr.bf16.mxu1 %v12836_v23  ;;  %v13028_v34 = vor.u32 %v5528_v44, %v5524_v60 }
 0x5e3   : > { %8375 = vmatpush3.bf16.msra.mxu0 %v12816_v30  ;;  %v12937_v30 = vld [vmem:[%s13725_s5 + $0x190] sm:$0xff]   ;;  %v5304_v41 = vor.u32 %v5303_v42, %v5299_v22  ;;  %v5887_v22 = vld [vmem:[#allocation2 + $0x88] sm:$0xf] }
 0x5e4   : > { %8376 = vmatprep.subr.bf16.mxu0 %v12822_v7  ;;  %v12944_v7 = vld [vmem:[%s13725_s5 + $0x1d8] sm:$0xff]   ;;  %v5889_v60 = vpack.c.bf16 %v5887_v22, %v5887_v22 }
 0x5e5   : > { %8401 = vmatpush3.bf16.msra.mxu1 %v12844_v29 }
 0x5e6   : > { %8430 = vmatprep.subr.bf16.mxu1 %v12893_v10 }
 0x5e7   : > { %8377 = vmatpush3.bf16.msra.mxu0 %v12830_v2  ;;  %v12980_v2 = vld [vmem:[%s13725_s5 + $0x1a8] sm:$0xff]  }
 0x5e8   : > { %5253 = vmatmul.mubr.bf16.vlgmr.msra.gmra.mrb[156].mxu1 %v12897_v24  ;;  %8378 = vmatprep.subr.bf16.mxu0 %v12836_v23  ;;  %v12986_v23 = vld [vmem:[%s13725_s5 + $0x1f0] sm:$0xff]  }
 0x5e9   : > { %8431 = vmatpush3.bf16.msra.mxu1 %v12903_v33  ;;  %5503 = vmatprep.mubr.bf16.mxu1 %v12912_v63 }
 0x5ea   : > { %8432 = vmatprep.subr.bf16.mxu1 %v12909_v59 }
 0x5eb   : > { %8379 = vmatpush3.bf16.msra.mxu0 %v12844_v29  ;;  %v5453_v29 = vpack.c.bf16 %v5451_v14, %v5451_v14  ;;  %v13087_v14 = vld [vmem:[%s13725_s5 + $0x250] sm:$0xff]  }
 0x5ec   : > { %8408 = vmatprep.subr.bf16.mxu0 %v12893_v10 }
 0x5ed   : > { %8433 = vmatpush3.bf16.msra.mxu1 %v12921_v18  ;;  %v5458_v1 = vshll.u32 %v5453_v29, 16  ;;  %v5456_v55 = vshrl.u32 %v5453_v29, 16  ;;  %v13119_v29 = vld [vmem:[%s13725_s5 + $0x260] sm:$0xff]  }
 0x5ee   : > { %5208 = vmatmul.mubr.bf16.vlgmr.msra.gmra.mrb[156].mxu0 %v12930_v27  ;;  %8434 = vmatprep.subr.bf16.mxu1 %v12927_v46 }
 0x5ef   : > { %8409 = vmatpush3.bf16.msra.mxu0 %v12903_v33  ;;  %5442 = vmatprep.mubr.bf16.mxu0 %v5311_v28  ;;  %v5460_v53 = vrot.slane %v5458_v1, 1 }
 0x5f0   : > { %8410 = vmatprep.subr.bf16.mxu0 %v12909_v59 }
 0x5f1   : > { %8435 = vmatpush3.bf16.msra.mxu1 %v12937_v30  ;;  %v13014_v39 = vor.u32 %v5460_v53, %v5456_v55  ;;  %v13169_v53 = vld [vmem:[%s13725_s5 + $0x238] sm:$0xff]  }
 0x5f2   : > { %8436 = vmatprep.subr.bf16.mxu1 %v12944_v7 }
 0x5f3   : > { %8411 = vmatpush3.bf16.msra.mxu0 %v12921_v18 }
 0x5f4   : > { %8412 = vmatprep.subr.bf16.mxu0 %v12927_v46 }
 0x5f5   : > { %8437 = vmatpush3.bf16.msra.mxu1 %v12952_v49 }
 0x5f6   : > { %8438 = vmatprep.subr.bf16.mxu1 %v12958_v8 }
 0x5f7   : > { %8413 = vmatpush3.bf16.msra.mxu0 %v12937_v30 }
 0x5f8   : > { %8414 = vmatprep.subr.bf16.mxu0 %v12944_v7 }
 0x5f9   : > { %8439 = vmatpush3.bf16.msra.mxu1 %v12966_v45 }
 0x5fa   : > { %8440 = vmatprep.subr.bf16.mxu1 %v12972_v47 }
 0x5fb   : > { %8415 = vmatpush3.bf16.msra.mxu0 %v12952_v49 }
 0x5fc   : > { %8416 = vmatprep.subr.bf16.mxu0 %v12958_v8 }
 0x5fd   : > { %8441 = vmatpush3.bf16.msra.mxu1 %v12980_v2 }
 0x5fe   : > { %8442 = vmatprep.subr.bf16.mxu1 %v12986_v23 }
 0x5ff   : > { %8417 = vmatpush3.bf16.msra.mxu0 %v12966_v45 }
 0x600   : > { %8418 = vmatprep.subr.bf16.mxu0 %v12972_v47 }
 0x601   : > { %8443 = vmatpush3.bf16.msra.mxu1 %v12994_v15 }
 0x602   : > { %8444 = vmatprep.subr.bf16.mxu1 %v13000_v20 }
 0x603   : > { %8419 = vmatpush3.bf16.msra.mxu0 %v12980_v2 }
 0x604   : > { %8420 = vmatprep.subr.bf16.mxu0 %v12986_v23 }
 0x605   : > { %8445 = vmatpush3.bf16.msra.mxu1 %v13008_v17 }
 0x606   : > { %8474 = vmatprep.subr.bf16.mxu1 %v12893_v10 }
 0x607   : > { %8421 = vmatpush3.bf16.msra.mxu0 %v12994_v15 }
 0x608   : > { %5504 = vmatmul.mubr.bf16.vlgmr.msra.gmra.mrb[160].mxu1 %v13014_v39  ;;  %8422 = vmatprep.subr.bf16.mxu0 %v13000_v20 }
 0x609   : > { %8475 = vmatpush3.bf16.msra.mxu1 %v12903_v33  ;;  %5625 = vmatprep.mubr.bf16.mxu1 %v13018_v11 }
 0x60a   : > { %8476 = vmatprep.subr.bf16.mxu1 %v12909_v59 }
 0x60b   : > { %8423 = vmatpush3.bf16.msra.mxu0 %v13008_v17 }
 0x60c   : > { %8452 = vmatprep.subr.bf16.mxu0 %v12893_v10  ;;  %v5573_v10 = vld [vmem:[#allocation2 + $0x70] sm:$0x1e] }
 0x60d   : > { %8477 = vmatpush3.bf16.msra.mxu1 %v12921_v18 }
 0x60e   : > { %5443 = vmatmul.mubr.bf16.vlgmr.msra.gmra.mrb[160].mxu0 %v5304_v41  ;;  %8478 = vmatprep.subr.bf16.mxu1 %v12927_v46 }
 0x60f   : > { %8453 = vmatpush3.bf16.msra.mxu0 %v12903_v33  ;;  %5564 = vmatprep.mubr.bf16.mxu0 %v13028_v34  ;;  %v5575_v33 = vpack.c.bf16 %v5573_v10, %v5573_v10 }
 0x610   : > { %8454 = vmatprep.subr.bf16.mxu0 %v12909_v59  ;;  %v5512_v59 = vld [vmem:[#allocation2 + $0x50] sm:$0x1e] }
 0x611   : > { %8479 = vmatpush3.bf16.msra.mxu1 %v12937_v30  ;;  %v5514_v5 = vpack.c.bf16 %v5512_v59, %v5512_v59  ;;  %v5578_v38 = vshrl.u32 %v5575_v33, 16  ;;  %v13212_v59 = vld [vmem:[%s13725_s5 + $0x2c0] sm:$0xff]  }
 0x612   : > { %8480 = vmatprep.subr.bf16.mxu1 %v12944_v7 }
 0x613   : > { %8455 = vmatpush3.bf16.msra.mxu0 %v12921_v18  ;;  %v5580_v18 = vshll.u32 %v5575_v33, 16  ;;  %v5519_v28 = vshll.u32 %v5514_v5, 16 }
 0x614   : > { %8456 = vmatprep.subr.bf16.mxu0 %v12927_v46  ;;  %v13055_v46 = vld [vmem:[%s13725_s5 + $0x240] sm:$0xff]  }
 0x615   : > { %8481 = vmatpush3.bf16.msra.mxu1 %v12952_v49  ;;  %v5582_v6 = vrot.slane %v5580_v18, 1 }
 0x616   : > { %8482 = vmatprep.subr.bf16.mxu1 %v12958_v8 }
 0x617   : > { %8457 = vmatpush3.bf16.msra.mxu0 %v12937_v30  ;;  %v13063_v30 = vld [vmem:[%s13725_s5 + $0x200] sm:$0xff]  }
 0x618   : > { %8458 = vmatprep.subr.bf16.mxu0 %v12944_v7  ;;  %v13065_v7 = vor.u32 %v5582_v6, %v5578_v38  ;;  %v5886_v38 = vld [vmem:[#allocation2 + $0x80] sm:$0xf] }
 0x619   : > { %8483 = vmatpush3.bf16.msra.mxu1 %v12966_v45 }
 0x61a   : > { %8484 = vmatprep.subr.bf16.mxu1 %v12972_v47 }
 0x61b   : > { %8459 = vmatpush3.bf16.msra.mxu0 %v12952_v49  ;;  %v13071_v49 = vld [vmem:[%s13725_s5 + $0x248] sm:$0xff]  }
 0x61c   : > { %8460 = vmatprep.subr.bf16.mxu0 %v12958_v8  ;;  %v5517_v8 = vshrl.u32 %v5514_v5, 16 }
 0x61d   : > { %8485 = vmatpush3.bf16.msra.mxu1 %v12980_v2 }
 0x61e   : > { %8486 = vmatprep.subr.bf16.mxu1 %v12986_v23 }
 0x61f   : > { %8461 = vmatpush3.bf16.msra.mxu0 %v12966_v45  ;;  %v5521_v45 = vrot.slane %v5519_v28, 1  ;;  %v13222_v28 = vld [vmem:[%s13725_s5 + $0x280] sm:$0xff]  }
 0x620   : > { %8462 = vmatprep.subr.bf16.mxu0 %v12972_v47  ;;  %v13081_v47 = vld [vmem:[%s13725_s5 + $0x208] sm:$0xff]  }
 0x621   : > { %8487 = vmatpush3.bf16.msra.mxu1 %v12994_v15  ;;  %v13090_v19 = vor.u32 %v5521_v45, %v5517_v8  ;;  %v13237_v8 = vld [vmem:[%s13725_s5 + $0x288] sm:$0xff]   ;;  %v13243_v45 = vld [vmem:[%s13725_s5 + $0x2d0] sm:$0xff]  }
 0x622   : > { %8488 = vmatprep.subr.bf16.mxu1 %v13000_v20 }
 0x623   : > { %8463 = vmatpush3.bf16.msra.mxu0 %v12980_v2  ;;  %v13104_v2 = vld [vmem:[%s13725_s5 + $0x258] sm:$0xff]  }
 0x624   : > { %8464 = vmatprep.subr.bf16.mxu0 %v12986_v23  ;;  %v13113_v23 = vld [vmem:[%s13725_s5 + $0x218] sm:$0xff]  }
 0x625   : > { %8489 = vmatpush3.bf16.msra.mxu1 %v13008_v17 }
 0x626   : > { %8518 = vmatprep.subr.bf16.mxu1 %v13055_v46 }
 0x627   : > { %8465 = vmatpush3.bf16.msra.mxu0 %v12994_v15  ;;  %v13141_v15 = vld [vmem:[%s13725_s5 + $0x228] sm:$0xff]  }
 0x628   : > { %5626 = vmatmul.mubr.bf16.vlgmr.msra.gmra.mrb[164].mxu1 %v13065_v7  ;;  %8466 = vmatprep.subr.bf16.mxu0 %v13000_v20 }
 0x629   : > { %8519 = vmatpush3.bf16.msra.mxu1 %v13063_v30  ;;  %5836 = vmatprep.mubr.bf16.mxu1 %v12678_v58  ;;  %v13097_v58 = vld [vmem:[%s13725_s5 + $0x210] sm:$0xff]  }
 0x62a   : > { %8520 = vmatprep.subr.bf16.mxu1 %v13071_v49 }
 0x62b   : > { %8467 = vmatpush3.bf16.msra.mxu0 %v13008_v17 }
 0x62c   : > { %8496 = vmatprep.subr.bf16.mxu0 %v13055_v46 }
 0x62d   : > { %8521 = vmatpush3.bf16.msra.mxu1 %v13081_v47 }
 0x62e   : > { %5565 = vmatmul.mubr.bf16.vlgmr.msra.gmra.mrb[164].mxu0 %v13090_v19  ;;  %8522 = vmatprep.subr.bf16.mxu1 %v13087_v14 }
 0x62f   : > { %8497 = vmatpush3.bf16.msra.mxu0 %v13063_v30  ;;  %5795 = vmatprep.mubr.bf16.mxu0 %v12640_v21  ;;  %v13127_v21 = vld [vmem:[%s13725_s5 + $0x220] sm:$0xff]  }
 0x630   : > { %8498 = vmatprep.subr.bf16.mxu0 %v13071_v49 }
 0x631   : > { %8523 = vmatpush3.bf16.msra.mxu1 %v13097_v58 }
 0x632   : > { %8524 = vmatprep.subr.bf16.mxu1 %v13104_v2 }
 0x633   : > { %8499 = vmatpush3.bf16.msra.mxu0 %v13081_v47 }
 0x634   : > { %8500 = vmatprep.subr.bf16.mxu0 %v13087_v14 }
 0x635   : > { %8525 = vmatpush3.bf16.msra.mxu1 %v13113_v23 }
 0x636   : > { %8526 = vmatprep.subr.bf16.mxu1 %v13119_v29 }
 0x637   : > { %8501 = vmatpush3.bf16.msra.mxu0 %v13097_v58 }
 0x638   : > { %8502 = vmatprep.subr.bf16.mxu0 %v13104_v2 }
 0x639   : > { %8527 = vmatpush3.bf16.msra.mxu1 %v13127_v21 }
 0x63a   : > { %8528 = vmatprep.subr.bf16.mxu1 %v13133_v37  ;;  %v8226_v20 = vpop.f32.mrb[140].mxu1 }
 0x63b   : > { %8503 = vmatpush3.bf16.msra.mxu0 %v13113_v23  ;;  %v8227_v1 = vpop.f32.mrb[141].mxu1 }
 0x63c   : > { %8504 = vmatprep.subr.bf16.mxu0 %v13119_v29  ;;  %v8228_v36 = vadd.f32 %v8227_v1, %v8226_v20  ;;  %v8229_v43 = vpop.f32.mrb[142].mxu1  ;;  %v13309_v20 = vld [vmem:[%s13725_s5 + $0x2b0] sm:$0xff]  }
 0x63d   : > { %8529 = vmatpush3.bf16.msra.mxu1 %v13141_v15  ;;  %v8230_v17 = vpop.f32.mrb[143].mxu1 }
 0x63e   : > { %8530 = vmatprep.subr.bf16.mxu1 %v13147_v0 }
 0x63f   : > { %8505 = vmatpush3.bf16.msra.mxu0 %v13127_v21 }
 0x640   : > { %8506 = vmatprep.subr.bf16.mxu0 %v13133_v37 }
 0x641   : > { %8531 = vmatpush3.bf16.msra.mxu1 %v13155_v51  ;;  %v8204_v55 = vpop.f32.mrb[140].mxu0 }
 0x642   : > { %v8205_v52 = vpop.f32.mrb[141].mxu0  ;;  %8532 = vmatprep.subr.bf16.mxu1 %v13161_v48 }
 0x643   : > { %v8206_v50 = vadd.f32 %v8205_v52, %v8204_v55  ;;  %8507 = vmatpush3.bf16.msra.mxu0 %v13141_v15  ;;  %v8207_v4 = vpop.f32.mrb[142].mxu0 }
 0x644   : > { %8508 = vmatprep.subr.bf16.mxu0 %v13147_v0  ;;  %v8208_v35 = vpop.f32.mrb[143].mxu0 }
 0x645   : > { %v13174_v42 = vadd.f32 %v8228_v36, %v8206_v50  ;;  %8533 = vmatpush3.bf16.msra.mxu1 %v13169_v53 }
 0x646   : > { %8562 = vmatprep.subr.bf16.mxu1 %v13055_v46 }
 0x647   : > { %8509 = vmatpush3.bf16.msra.mxu0 %v13155_v51 }
 0x648   : > { %5837 = vmatmul.mubr.bf16.vlgmr.msra.gmra.mrb[168].mxu1 %v12683_v32  ;;  %8510 = vmatprep.subr.bf16.mxu0 %v13161_v48 }
 0x649   : > { %8563 = vmatpush3.bf16.msra.mxu1 %v13063_v30  ;;  %5922 = vmatprep.mubr.bf16.mxu1 %v5889_v60 }
 0x64a   : > { %8564 = vmatprep.subr.bf16.mxu1 %v13071_v49 }
 0x64b   : > { %8511 = vmatpush3.bf16.msra.mxu0 %v13169_v53 }
 0x64c   : > { %8540 = vmatprep.subr.bf16.mxu0 %v13055_v46 }
 0x64d   : > { %8565 = vmatpush3.bf16.msra.mxu1 %v13081_v47 }
 0x64e   : > { %5796 = vmatmul.mubr.bf16.vlgmr.msra.gmra.mrb[168].mxu0 %v12643_v56  ;;  %8566 = vmatprep.subr.bf16.mxu1 %v13087_v14 }
 0x64f   : > { %8541 = vmatpush3.bf16.msra.mxu0 %v13063_v30  ;;  %5877 = vmatprep.mubr.bf16.mxu0 %v12727_v26  ;;  %v5888_v30 = vpack.c.bf16 %v5886_v38, %v5886_v38  ;;  %v13369_v38 = vld [vmem:[%s13725_s5 + $0x340] sm:$0xff]  }
 0x650   : > { %8542 = vmatprep.subr.bf16.mxu0 %v13071_v49  ;;  %v13228_v49 = vld [vmem:[%s13725_s5 + $0x2c8] sm:$0xff]  }
 0x651   : > { %8567 = vmatpush3.bf16.msra.mxu1 %v13097_v58 }
 0x652   : > { %8568 = vmatprep.subr.bf16.mxu1 %v13104_v2 }
 0x653   : > { %8543 = vmatpush3.bf16.msra.mxu0 %v13081_v47  ;;  %v13258_v47 = vld [vmem:[%s13725_s5 + $0x2d8] sm:$0xff]  }
 0x654   : > { %8544 = vmatprep.subr.bf16.mxu0 %v13087_v14  ;;  %v13267_v14 = vld [vmem:[%s13725_s5 + $0x298] sm:$0xff]  }
 0x655   : > { %8569 = vmatpush3.bf16.msra.mxu1 %v13113_v23 }
 0x656   : > { %8570 = vmatprep.subr.bf16.mxu1 %v13119_v29 }
 0x657   : > { %8545 = vmatpush3.bf16.msra.mxu0 %v13097_v58  ;;  %v13287_v58 = vld [vmem:[%s13725_s5 + $0x2e8] sm:$0xff]  }
 0x658   : > { %8546 = vmatprep.subr.bf16.mxu0 %v13104_v2  ;;  %v6184_v2 = vld [vmem:[#allocation2 + $0x88] sm:$0x1e] }
 0x659   : > { %8571 = vmatpush3.bf16.msra.mxu1 %v13127_v21 }
 0x65a   : > { %8572 = vmatprep.subr.bf16.mxu1 %v13133_v37  ;;  %v8270_v56 = vpop.f32.mrb[144].mxu1 }
 0x65b   : > { %8547 = vmatpush3.bf16.msra.mxu0 %v13113_v23  ;;  %v8271_v32 = vpop.f32.mrb[145].mxu1  ;;  %v13295_v23 = vld [vmem:[%s13725_s5 + $0x2a8] sm:$0xff]  }
 0x65c   : > { %8548 = vmatprep.subr.bf16.mxu0 %v13119_v29  ;;  %v8272_v26 = vadd.f32 %v8271_v32, %v8270_v56  ;;  %v8273_v44 = vpop.f32.mrb[146].mxu1  ;;  %v13301_v29 = vld [vmem:[%s13725_s5 + $0x2f0] sm:$0xff]  }
 0x65d   : > { %8573 = vmatpush3.bf16.msra.mxu1 %v13141_v15  ;;  %v8274_v41 = vpop.f32.mrb[147].mxu1 }
 0x65e   : > { %8574 = vmatprep.subr.bf16.mxu1 %v13147_v0 }
 0x65f   : > { %8549 = vmatpush3.bf16.msra.mxu0 %v13127_v21 }
 0x660   : > { %8550 = vmatprep.subr.bf16.mxu0 %v13133_v37  ;;  %v6186_v37 = vpack.c.bf16 %v6184_v2, %v6184_v2 }
 0x661   : > { %8575 = vmatpush3.bf16.msra.mxu1 %v13155_v51  ;;  %v8248_v10 = vpop.f32.mrb[144].mxu0 }
 0x662   : > { %v8249_v33 = vpop.f32.mrb[145].mxu0  ;;  %8576 = vmatprep.subr.bf16.mxu1 %v13161_v48  ;;  %v6197_v43 = vshll.u32 %v6186_v37, 16  ;;  %v6195_v50 = vshrl.u32 %v6186_v37, 16 }
 0x663   : > { %v8250_v18 = vadd.f32 %v8249_v33, %v8248_v10  ;;  %8551 = vmatpush3.bf16.msra.mxu0 %v13141_v15  ;;  %v8251_v5 = vpop.f32.mrb[146].mxu0 }
 0x664   : > { %8552 = vmatprep.subr.bf16.mxu0 %v13147_v0  ;;  %v8252_v6 = vpop.f32.mrb[147].mxu0  ;;  %v6199_v4 = vrot.slane %v6197_v43, 1  ;;  %v6498_v43 = vld [vmem:[#allocation2 + $0x98] sm:$0xf] }
 0x665   : > { %v13216_v46 = vadd.f32 %v8272_v26, %v8250_v18  ;;  %8577 = vmatpush3.bf16.msra.mxu1 %v13169_v53 }
 0x666   : > { %8606 = vmatprep.subr.bf16.mxu1 %v13212_v59  ;;  %v6200_v60 = vor.u32 %v6199_v4, %v6195_v50 }
 0x667   : > { %8553 = vmatpush3.bf16.msra.mxu0 %v13155_v51  ;;  %v13315_v51 = vld [vmem:[%s13725_s5 + $0x2f8] sm:$0xff]  }
 0x668   : > { %5923 = vmatmul.mubr.bf16.vlgmr.msra.gmra.mrb[172].mxu1 %v5888_v30  ;;  %8554 = vmatprep.subr.bf16.mxu0 %v13161_v48  ;;  %v13323_v48 = vld [vmem:[%s13725_s5 + $0x2b8] sm:$0xff]  }
 0x669   : > { %8607 = vmatpush3.bf16.msra.mxu1 %v13222_v28  ;;  %6133 = vmatprep.mubr.bf16.mxu1 %v12690_v25  ;;  %v13251_v25 = vld [vmem:[%s13725_s5 + $0x290] sm:$0xff]  }
 0x66a   : > { %8608 = vmatprep.subr.bf16.mxu1 %v13228_v49 }
 0x66b   : > { %8555 = vmatpush3.bf16.msra.mxu0 %v13169_v53 }
 0x66c   : > { %8584 = vmatprep.subr.bf16.mxu0 %v13212_v59 }
 0x66d   : > { %8609 = vmatpush3.bf16.msra.mxu1 %v13237_v8 }
 0x66e   : > { %5878 = vmatmul.mubr.bf16.vlgmr.msra.gmra.mrb[172].mxu0 %v12739_v57  ;;  %8610 = vmatprep.subr.bf16.mxu1 %v13243_v45  ;;  %v13273_v57 = vld [vmem:[%s13725_s5 + $0x2e0] sm:$0xff]  }
 0x66f   : > { %8585 = vmatpush3.bf16.msra.mxu0 %v13222_v28  ;;  %6092 = vmatprep.mubr.bf16.mxu0 %v12648_v61  ;;  %v13281_v61 = vld [vmem:[%s13725_s5 + $0x2a0] sm:$0xff]  }
 0x670   : > { %8586 = vmatprep.subr.bf16.mxu0 %v13228_v49 }
 0x671   : > { %8611 = vmatpush3.bf16.msra.mxu1 %v13251_v25 }
 0x672   : > { %8612 = vmatprep.subr.bf16.mxu1 %v13258_v47 }
 0x673   : > { %8587 = vmatpush3.bf16.msra.mxu0 %v13237_v8 }
 0x674   : > { %8588 = vmatprep.subr.bf16.mxu0 %v13243_v45 }
 0x675   : > { %8613 = vmatpush3.bf16.msra.mxu1 %v13267_v14 }
 0x676   : > { %8614 = vmatprep.subr.bf16.mxu1 %v13273_v57 }
 0x677   : > { %8589 = vmatpush3.bf16.msra.mxu0 %v13251_v25 }
 0x678   : > { %8590 = vmatprep.subr.bf16.mxu0 %v13258_v47 }
 0x679   : > { %8615 = vmatpush3.bf16.msra.mxu1 %v13281_v61 }
 0x67a   : > { %8616 = vmatprep.subr.bf16.mxu1 %v13287_v58 }
 0x67b   : > { %8591 = vmatpush3.bf16.msra.mxu0 %v13267_v14  ;;  %v8314_v21 = vpop.f32.mrb[148].mxu1 }
 0x67c   : > { %8592 = vmatprep.subr.bf16.mxu0 %v13273_v57  ;;  %v8315_v15 = vpop.f32.mrb[149].mxu1 }
 0x67d   : > { %8617 = vmatpush3.bf16.msra.mxu1 %v13295_v23  ;;  %v8316_v0 = vadd.f32 %v8315_v15, %v8314_v21  ;;  %v8317_v1 = vpop.f32.mrb[150].mxu1  ;;  %v13467_v21 = vld [vmem:[%s13725_s5 + $0x330] sm:$0xff]   ;;  %v13473_v15 = vld [vmem:[%s13725_s5 + $0x378] sm:$0xff]  }
 0x67e   : > { %8618 = vmatprep.subr.bf16.mxu1 %v13301_v29  ;;  %v8318_v36 = vpop.f32.mrb[151].mxu1 }
 0x67f   : > { %8593 = vmatpush3.bf16.msra.mxu0 %v13281_v61  ;;  %v13484_v36 = vld [vmem:[%s13725_s5 + $0x338] sm:$0xff]  }
 0x680   : > { %8594 = vmatprep.subr.bf16.mxu0 %v13287_v58 }
 0x681   : > { %8619 = vmatpush3.bf16.msra.mxu1 %v13309_v20  ;;  %v8292_v17 = vpop.f32.mrb[148].mxu0 }
 0x682   : > { %v8293_v55 = vpop.f32.mrb[149].mxu0  ;;  %8620 = vmatprep.subr.bf16.mxu1 %v13315_v51 }
 0x683   : > { %v8294_v53 = vadd.f32 %v8293_v55, %v8292_v17  ;;  %8595 = vmatpush3.bf16.msra.mxu0 %v13295_v23  ;;  %v8295_v52 = vpop.f32.mrb[150].mxu0 }
 0x684   : > { %8596 = vmatprep.subr.bf16.mxu0 %v13301_v29  ;;  %v8296_v35 = vpop.f32.mrb[151].mxu0  ;;  %v6500_v52 = vpack.c.bf16 %v6498_v43, %v6498_v43 }
 0x685   : > { %v13328_v22 = vadd.f32 %v8316_v0, %v8294_v53  ;;  %8621 = vmatpush3.bf16.msra.mxu1 %v13323_v48 }
 0x686   : > { %8650 = vmatprep.subr.bf16.mxu1 %v13212_v59 }
 0x687   : > { %8597 = vmatpush3.bf16.msra.mxu0 %v13309_v20 }
 0x688   : > { %6134 = vmatmul.mubr.bf16.vlgmr.msra.gmra.mrb[176].mxu1 %v12695_v31  ;;  %8598 = vmatprep.subr.bf16.mxu0 %v13315_v51 }
 0x689   : > { %8651 = vmatpush3.bf16.msra.mxu1 %v13222_v28  ;;  %6235 = vmatprep.mubr.bf16.mxu1 %v6200_v60 }
 0x68a   : > { %8652 = vmatprep.subr.bf16.mxu1 %v13228_v49 }
 0x68b   : > { %8599 = vmatpush3.bf16.msra.mxu0 %v13323_v48 }
 0x68c   : > { %8628 = vmatprep.subr.bf16.mxu0 %v13212_v59 }
 0x68d   : > { %8653 = vmatpush3.bf16.msra.mxu1 %v13237_v8 }
 0x68e   : > { %6093 = vmatmul.mubr.bf16.vlgmr.msra.gmra.mrb[176].mxu0 %v12651_v3  ;;  %8654 = vmatprep.subr.bf16.mxu1 %v13243_v45  ;;  %v6183_v3 = vld [vmem:[#allocation2 + $0x80] sm:$0x1e] }
 0x68f   : > { %8629 = vmatpush3.bf16.msra.mxu0 %v13222_v28  ;;  %6174 = vmatprep.mubr.bf16.mxu0 %v12757_v62  ;;  %v6185_v31 = vpack.c.bf16 %v6183_v3, %v6183_v3  ;;  %v13531_v3 = vld [vmem:[%s13725_s5 + $0x3c0] sm:$0xff]  }
 0x690   : > { %8630 = vmatprep.subr.bf16.mxu0 %v13228_v49  ;;  %v13380_v49 = vld [vmem:[%s13725_s5 + $0x300] sm:$0xff]  }
 0x691   : > { %8655 = vmatpush3.bf16.msra.mxu1 %v13251_v25  ;;  %v6190_v44 = vshll.u32 %v6185_v31, 16  ;;  %v6188_v18 = vshrl.u32 %v6185_v31, 16 }
 0x692   : > { %8656 = vmatprep.subr.bf16.mxu1 %v13258_v47 }
 0x693   : > { %8631 = vmatpush3.bf16.msra.mxu0 %v13237_v8  ;;  %v6192_v5 = vrot.slane %v6190_v44, 1  ;;  %v13542_v44 = vld [vmem:[%s13725_s5 + $0x380] sm:$0xff]  }
 0x694   : > { %8632 = vmatprep.subr.bf16.mxu0 %v13243_v45  ;;  %v13386_v45 = vld [vmem:[%s13725_s5 + $0x348] sm:$0xff]  }
 0x695   : > { %8657 = vmatpush3.bf16.msra.mxu1 %v13267_v14  ;;  %v6193_v8 = vor.u32 %v6192_v5, %v6188_v18  ;;  %v13587_v18 = vld [vmem:[%s13725_s5 + $0x398] sm:$0xff]   ;;  %v13607_v5 = vld [vmem:[%s13725_s5 + $0x3e8] sm:$0xff]  }
 0x696   : > { %8658 = vmatprep.subr.bf16.mxu1 %v13273_v57 }
 0x697   : > { %8633 = vmatpush3.bf16.msra.mxu0 %v13251_v25  ;;  %v13401_v25 = vld [vmem:[%s13725_s5 + $0x350] sm:$0xff]  }
 0x698   : > { %8634 = vmatprep.subr.bf16.mxu0 %v13258_v47  ;;  %v13416_v47 = vld [vmem:[%s13725_s5 + $0x358] sm:$0xff]  }
 0x699   : > { %8659 = vmatpush3.bf16.msra.mxu1 %v13281_v61 }
 0x69a   : > { %8660 = vmatprep.subr.bf16.mxu1 %v13287_v58 }
 0x69b   : > { %v8358_v62 = vpop.f32.mrb[152].mxu1  ;;  %8635 = vmatpush3.bf16.msra.mxu0 %v13267_v14  ;;  %v13425_v14 = vld [vmem:[%s13725_s5 + $0x318] sm:$0xff]  }
 0x69c   : > { %v8359_v56 = vpop.f32.mrb[153].mxu1  ;;  %8636 = vmatprep.subr.bf16.mxu0 %v13273_v57  ;;  %v13445_v57 = vld [vmem:[%s13725_s5 + $0x368] sm:$0xff]  }
 0x69d   : > { %v8360_v32 = vadd.f32 %v8359_v56, %v8358_v62  ;;  %8661 = vmatpush3.bf16.msra.mxu1 %v13295_v23  ;;  %v8361_v26 = vpop.f32.mrb[154].mxu1 }
 0x69e   : > { %8662 = vmatprep.subr.bf16.mxu1 %v13301_v29  ;;  %v8362_v41 = vpop.f32.mrb[155].mxu1 }
 0x69f   : > { %v13360_v10 = vadd.f32 %v8360_v32, %v13174_v42  ;;  %8637 = vmatpush3.bf16.msra.mxu0 %v13281_v61  ;;  %v13453_v61 = vld [vmem:[%s13725_s5 + $0x328] sm:$0xff]  }
 0x6a0   : > { %8638 = vmatprep.subr.bf16.mxu0 %v13287_v58  ;;  %v13459_v58 = vld [vmem:[%s13725_s5 + $0x370] sm:$0xff]   ;;  %v13548_v41 = vld [vmem:[%s13725_s5 + $0x3c8] sm:$0xff]  }
 0x6a1   : > { %v8336_v33 = vpop.f32.mrb[152].mxu0  ;;  %8663 = vmatpush3.bf16.msra.mxu1 %v13309_v20 }
 0x6a2   : > { %v8337_v59 = vpop.f32.mrb[153].mxu0  ;;  %8664 = vmatprep.subr.bf16.mxu1 %v13315_v51 }
 0x6a3   : > { %v8338_v6 = vadd.f32 %v8337_v59, %v8336_v33  ;;  %8639 = vmatpush3.bf16.msra.mxu0 %v13295_v23  ;;  %v8339_v42 = vpop.f32.mrb[154].mxu0  ;;  %v13563_v33 = vld [vmem:[%s13725_s5 + $0x3d0] sm:$0xff]   ;;  %v13578_v59 = vld [vmem:[%s13725_s5 + $0x3d8] sm:$0xff]  }
 0x6a4   : > { %v8340_v28 = vpop.f32.mrb[155].mxu0  ;;  %8640 = vmatprep.subr.bf16.mxu0 %v13301_v29 }
 0x6a5   : > { %v13374_v30 = vadd.f32 %v8338_v6, %v12886_v16  ;;  %8665 = vmatpush3.bf16.msra.mxu1 %v13323_v48  ;;  %v13395_v16 = vld [vmem:[%s13725_s5 + $0x308] sm:$0xff]   ;;  %v13621_v28 = vld [vmem:[%s13725_s5 + $0x3f0] sm:$0xff]  }
 0x6a6   : > { %8694 = vmatprep.subr.bf16.mxu1 %v13369_v38  ;;  %v13615_v6 = vld [vmem:[%s13725_s5 + $0x3a8] sm:$0xff]  }
 0x6a7   : > { %8641 = vmatpush3.bf16.msra.mxu0 %v13309_v20 }
 0x6a8   : > { %6236 = vmatmul.mubr.bf16.vlgmr.msra.gmra.mrb[180].mxu1 %v6193_v8  ;;  %8642 = vmatprep.subr.bf16.mxu0 %v13315_v51 }
 0x6a9   : > { %8695 = vmatpush3.bf16.msra.mxu1 %v13380_v49  ;;  %6446 = vmatprep.mubr.bf16.mxu1 %v12862_v40  ;;  %v13409_v40 = vld [vmem:[%s13725_s5 + $0x310] sm:$0xff]  }
 0x6aa   : > { %8696 = vmatprep.subr.bf16.mxu1 %v13386_v45 }
 0x6ab   : > { %8643 = vmatpush3.bf16.msra.mxu0 %v13323_v48 }
 0x6ac   : > { %8672 = vmatprep.subr.bf16.mxu0 %v13369_v38 }
 0x6ad   : > { %8697 = vmatpush3.bf16.msra.mxu1 %v13395_v16 }
 0x6ae   : > { %6175 = vmatmul.mubr.bf16.vlgmr.msra.gmra.mrb[180].mxu0 %v12767_v9  ;;  %8698 = vmatprep.subr.bf16.mxu1 %v13401_v25  ;;  %v13431_v9 = vld [vmem:[%s13725_s5 + $0x360] sm:$0xff]  }
 0x6af   : > { %8673 = vmatpush3.bf16.msra.mxu0 %v13380_v49  ;;  %6405 = vmatprep.mubr.bf16.mxu0 %v12735_v12  ;;  %v13439_v12 = vld [vmem:[%s13725_s5 + $0x320] sm:$0xff]  }
 0x6b0   : > { %8674 = vmatprep.subr.bf16.mxu0 %v13386_v45 }
 0x6b1   : > { %8699 = vmatpush3.bf16.msra.mxu1 %v13409_v40 }
 0x6b2   : > { %8700 = vmatprep.subr.bf16.mxu1 %v13416_v47 }
 0x6b3   : > { %8675 = vmatpush3.bf16.msra.mxu0 %v13395_v16 }
 0x6b4   : > { %8676 = vmatprep.subr.bf16.mxu0 %v13401_v25 }
 0x6b5   : > { %8701 = vmatpush3.bf16.msra.mxu1 %v13425_v14 }
 0x6b6   : > { %8702 = vmatprep.subr.bf16.mxu1 %v13431_v9 }
 0x6b7   : > { %8677 = vmatpush3.bf16.msra.mxu0 %v13409_v40 }
 0x6b8   : > { %8678 = vmatprep.subr.bf16.mxu0 %v13416_v47 }
 0x6b9   : > { %8703 = vmatpush3.bf16.msra.mxu1 %v13439_v12 }
 0x6ba   : > { %8704 = vmatprep.subr.bf16.mxu1 %v13445_v57 }
 0x6bb   : > { %v8402_v2 = vpop.f32.mrb[156].mxu1  ;;  %8679 = vmatpush3.bf16.msra.mxu0 %v13425_v14 }
 0x6bc   : > { %v8403_v23 = vpop.f32.mrb[157].mxu1  ;;  %8680 = vmatprep.subr.bf16.mxu0 %v13431_v9 }
 0x6bd   : > { %v8404_v29 = vadd.f32 %v8403_v23, %v8402_v2  ;;  %8705 = vmatpush3.bf16.msra.mxu1 %v13453_v61  ;;  %v8405_v37 = vpop.f32.mrb[158].mxu1 }
 0x6be   : > { %8706 = vmatprep.subr.bf16.mxu1 %v13459_v58  ;;  %v8406_v0 = vpop.f32.mrb[159].mxu1 }
 0x6bf   : > { %v13476_v20 = vadd.f32 %v8404_v29, %v13328_v22  ;;  %8681 = vmatpush3.bf16.msra.mxu0 %v13439_v12  ;;  %v6497_v22 = vld [vmem:[#allocation2 + $0x90] sm:$0xf] }
 0x6c0   : > { %8682 = vmatprep.subr.bf16.mxu0 %v13445_v57  ;;  %v6499_v32 = vpack.c.bf16 %v6497_v22, %v6497_v22 }
 0x6c1   : > { %v8380_v1 = vpop.f32.mrb[156].mxu0  ;;  %8707 = vmatpush3.bf16.msra.mxu1 %v13467_v21 }
 0x6c2   : > { %v8381_v51 = vpop.f32.mrb[157].mxu0  ;;  %8708 = vmatprep.subr.bf16.mxu1 %v13473_v15 }
 0x6c3   : > { %v8382_v17 = vadd.f32 %v8381_v51, %v8380_v1  ;;  %8683 = vmatpush3.bf16.msra.mxu0 %v13453_v61  ;;  %v8383_v48 = vpop.f32.mrb[158].mxu0 }
 0x6c4   : > { %v8384_v55 = vpop.f32.mrb[159].mxu0  ;;  %8684 = vmatprep.subr.bf16.mxu0 %v13459_v58 }
 0x6c5   : > { %v13490_v53 = vadd.f32 %v8382_v17, %v13216_v46  ;;  %8709 = vmatpush3.bf16.msra.mxu1 %v13484_v36 }
 0x6c6   : > { %8738 = vmatprep.subr.bf16.mxu1 %v13369_v38 }
 0x6c7   : > { %8685 = vmatpush3.bf16.msra.mxu0 %v13467_v21 }
 0x6c8   : > { %6447 = vmatmul.mubr.bf16.vlgmr.msra.gmra.mrb[184].mxu1 %v12930_v27  ;;  %8686 = vmatprep.subr.bf16.mxu0 %v13473_v15 }
 0x6c9   : > { %8739 = vmatpush3.bf16.msra.mxu1 %v13380_v49  ;;  %6533 = vmatprep.mubr.bf16.mxu1 %v6500_v52 }
 0x6ca   : > { %8740 = vmatprep.subr.bf16.mxu1 %v13386_v45 }
 0x6cb   : > { %8687 = vmatpush3.bf16.msra.mxu0 %v13484_v36 }
 0x6cc   : > { %8716 = vmatprep.subr.bf16.mxu0 %v13369_v38  ;;  %v6795_v38 = vld [vmem:[#allocation2 + $0x98] sm:$0x1e] }
 0x6cd   : > { %8741 = vmatpush3.bf16.msra.mxu1 %v13395_v16  ;;  %v6797_v42 = vpack.c.bf16 %v6795_v38, %v6795_v38 }
 0x6ce   : > { %6406 = vmatmul.mubr.bf16.vlgmr.msra.gmra.mrb[184].mxu0 %v12849_v54  ;;  %8742 = vmatprep.subr.bf16.mxu1 %v13401_v25 }
 0x6cf   : > { %8717 = vmatpush3.bf16.msra.mxu0 %v13380_v49  ;;  %6487 = vmatprep.mubr.bf16.mxu0 %v12852_v13 }
 0x6d0   : > { %8718 = vmatprep.subr.bf16.mxu0 %v13386_v45 }
 0x6d1   : > { %8743 = vmatpush3.bf16.msra.mxu1 %v13409_v40 }
 0x6d2   : > { %8744 = vmatprep.subr.bf16.mxu1 %v13416_v47 }
 0x6d3   : > { %8719 = vmatpush3.bf16.msra.mxu0 %v13395_v16  ;;  %v13629_v16 = vld [vmem:[%s13725_s5 + $0x3b0] sm:$0xff]  }
 0x6d4   : > { %8720 = vmatprep.subr.bf16.mxu0 %v13401_v25  ;;  %v6808_v25 = vshll.u32 %v6797_v42, 16 }
 0x6d5   : > { %8745 = vmatpush3.bf16.msra.mxu1 %v13425_v14 }
 0x6d6   : > { %8746 = vmatprep.subr.bf16.mxu1 %v13431_v9 }
 0x6d7   : > { %8721 = vmatpush3.bf16.msra.mxu0 %v13409_v40 }
 0x6d8   : > { %8722 = vmatprep.subr.bf16.mxu0 %v13416_v47  ;;  %v13635_v47 = vld [vmem:[%s13725_s5 + $0x3f8] sm:$0xff]  }
 0x6d9   : > { %8747 = vmatpush3.bf16.msra.mxu1 %v13439_v12 }
 0x6da   : > { %8748 = vmatprep.subr.bf16.mxu1 %v13445_v57 }
 0x6db   : > { %v8446_v54 = vpop.f32.mrb[160].mxu1  ;;  %8723 = vmatpush3.bf16.msra.mxu0 %v13425_v14 }
 0x6dc   : > { %v8447_v13 = vpop.f32.mrb[161].mxu1  ;;  %8724 = vmatprep.subr.bf16.mxu0 %v13431_v9 }
 0x6dd   : > { %v8448_v27 = vadd.f32 %v8447_v13, %v8446_v54  ;;  %v8449_v46 = vpop.f32.mrb[162].mxu1  ;;  %8749 = vmatpush3.bf16.msra.mxu1 %v13453_v61 }
 0x6de   : > { %v8450_v50 = vpop.f32.mrb[163].mxu1  ;;  %8750 = vmatprep.subr.bf16.mxu1 %v13459_v58 }
 0x6df   : > { %v13522_v4 = vadd.f32 %v8448_v27, %v13360_v10  ;;  %8725 = vmatpush3.bf16.msra.mxu0 %v13439_v12  ;;  %v13557_v10 = vld [vmem:[%s13725_s5 + $0x388] sm:$0xff]   ;;  %v13646_v12 = vld [vmem:[%s13725_s5 + $0x3b8] sm:$0xff]  }
 0x6e0   : > { %8726 = vmatprep.subr.bf16.mxu0 %v13445_v57  ;;  %v6806_v57 = vshrl.u32 %v6797_v42, 16 }
 0x6e1   : > { %v8424_v35 = vpop.f32.mrb[160].mxu0  ;;  %8751 = vmatpush3.bf16.msra.mxu1 %v13467_v21 }
 0x6e2   : > { %v8425_v60 = vpop.f32.mrb[161].mxu0  ;;  %8752 = vmatprep.subr.bf16.mxu1 %v13473_v15 }
 0x6e3   : > { %v8426_v31 = vadd.f32 %v8425_v60, %v8424_v35  ;;  %v8427_v62 = vpop.f32.mrb[162].mxu0  ;;  %8727 = vmatpush3.bf16.msra.mxu0 %v13453_v61  ;;  %v6810_v61 = vrot.slane %v6808_v25, 1 }
 0x6e4   : > { %v8428_v56 = vpop.f32.mrb[163].mxu0  ;;  %8728 = vmatprep.subr.bf16.mxu0 %v13459_v58 }
 0x6e5   : > { %v13536_v26 = vadd.f32 %v8426_v31, %v13374_v30  ;;  %8753 = vmatpush3.bf16.msra.mxu1 %v13484_v36  ;;  %v6811_v37 = vor.u32 %v6810_v61, %v6806_v57 }
 0x6e6   : > { %8782 = vmatprep.subr.bf16.mxu1 %v13531_v3 }
 0x6e7   : > { %8729 = vmatpush3.bf16.msra.mxu0 %v13467_v21 }
 0x6e8   : > { %6534 = vmatmul.mubr.bf16.vlgmr.msra.gmra.mrb[188].mxu1 %v6499_v32  ;;  %8730 = vmatprep.subr.bf16.mxu0 %v13473_v15 }
 0x6e9   : > { %8783 = vmatpush3.bf16.msra.mxu1 %v13542_v44  ;;  %6744 = vmatprep.mubr.bf16.mxu1 %v13028_v34  ;;  %v13571_v34 = vld [vmem:[%s13725_s5 + $0x390] sm:$0xff]  }
 0x6ea   : > { %8784 = vmatprep.subr.bf16.mxu1 %v13548_v41 }
 0x6eb   : > { %8731 = vmatpush3.bf16.msra.mxu0 %v13484_v36 }
 0x6ec   : > { %8760 = vmatprep.subr.bf16.mxu0 %v13531_v3 }
 0x6ed   : > { %8785 = vmatpush3.bf16.msra.mxu1 %v13557_v10 }
 0x6ee   : > { %6488 = vmatmul.mubr.bf16.vlgmr.msra.gmra.mrb[188].mxu0 %v12897_v24  ;;  %8786 = vmatprep.subr.bf16.mxu1 %v13563_v33  ;;  %v13593_v24 = vld [vmem:[%s13725_s5 + $0x3e0] sm:$0xff]  }
 0x6ef   : > { %8761 = vmatpush3.bf16.msra.mxu0 %v13542_v44  ;;  %6703 = vmatprep.mubr.bf16.mxu0 %v12912_v63  ;;  %v13601_v63 = vld [vmem:[%s13725_s5 + $0x3a0] sm:$0xff]  }
 0x6f0   : > { %8762 = vmatprep.subr.bf16.mxu0 %v13548_v41 }
 0x6f1   : > { %8787 = vmatpush3.bf16.msra.mxu1 %v13571_v34 }
 0x6f2   : > { %8788 = vmatprep.subr.bf16.mxu1 %v13578_v59 }
 0x6f3   : > { %8763 = vmatpush3.bf16.msra.mxu0 %v13557_v10 }
 0x6f4   : > { %8764 = vmatprep.subr.bf16.mxu0 %v13563_v33 }
 0x6f5   : > { %8789 = vmatpush3.bf16.msra.mxu1 %v13587_v18 }
 0x6f6   : > { %8790 = vmatprep.subr.bf16.mxu1 %v13593_v24 }
 0x6f7   : > { %8765 = vmatpush3.bf16.msra.mxu0 %v13571_v34 }
 0x6f8   : > { %8766 = vmatprep.subr.bf16.mxu0 %v13578_v59 }
 0x6f9   : > { %8791 = vmatpush3.bf16.msra.mxu1 %v13601_v63 }
 0x6fa   : > { %8792 = vmatprep.subr.bf16.mxu1 %v13607_v5 }
 0x6fb   : > { %v8490_v30 = vpop.f32.mrb[164].mxu1  ;;  %8767 = vmatpush3.bf16.msra.mxu0 %v13587_v18 }
 0x6fc   : > { %v8491_v49 = vpop.f32.mrb[165].mxu1  ;;  %8768 = vmatprep.subr.bf16.mxu0 %v13593_v24 }
 0x6fd   : > { %v8492_v8 = vadd.f32 %v8491_v49, %v8490_v30  ;;  %v8493_v45 = vpop.f32.mrb[166].mxu1  ;;  %8793 = vmatpush3.bf16.msra.mxu1 %v13615_v6 }
 0x6fe   : > { %v8494_v40 = vpop.f32.mrb[167].mxu1  ;;  %8794 = vmatprep.subr.bf16.mxu1 %v13621_v28 }
 0x6ff   : > { %v13638_v14 = vadd.f32 %v8492_v8, %v13476_v20  ;;  %8769 = vmatpush3.bf16.msra.mxu0 %v13601_v63 }
 0x700   : > { %8770 = vmatprep.subr.bf16.mxu0 %v13607_v5 }
 0x701   : > { %v8468_v9 = vpop.f32.mrb[164].mxu0  ;;  %8795 = vmatpush3.bf16.msra.mxu1 %v13629_v16 }
 0x702   : > { %v8469_v58 = vpop.f32.mrb[165].mxu0  ;;  %8796 = vmatprep.subr.bf16.mxu1 %v13635_v47 }
 0x703   : > { %v8470_v2 = vadd.f32 %v8469_v58, %v8468_v9  ;;  %v8471_v23 = vpop.f32.mrb[166].mxu0  ;;  %8771 = vmatpush3.bf16.msra.mxu0 %v13615_v6 }
 0x704   : > { %v8472_v29 = vpop.f32.mrb[167].mxu0  ;;  %8772 = vmatprep.subr.bf16.mxu0 %v13621_v28 }
 0x705   : > { %v13652_v21 = vadd.f32 %v8470_v2, %v13490_v53  ;;  %8797 = vmatpush3.bf16.msra.mxu1 %v13646_v12 }
 0x706   : > { %8826 = vmatprep.subr.bf16.mxu1 %v13531_v3 }
 0x707   : > { %8773 = vmatpush3.bf16.msra.mxu0 %v13629_v16 }
 0x708   : > { %6745 = vmatmul.mubr.bf16.vlgmr.msra.gmra.mrb[192].mxu1 %v13090_v19  ;;  %8774 = vmatprep.subr.bf16.mxu0 %v13635_v47  ;;  %v6794_v19 = vld [vmem:[#allocation2 + $0x90] sm:$0x1e] }
 0x709   : > { %8827 = vmatpush3.bf16.msra.mxu1 %v13542_v44  ;;  %6846 = vmatprep.mubr.bf16.mxu1 %v6811_v37 }
 0x70a   : > { %8828 = vmatprep.subr.bf16.mxu1 %v13548_v41 }
 0x70b   : > { %8775 = vmatpush3.bf16.msra.mxu0 %v13646_v12 }
 0x70c   : > { %8804 = vmatprep.subr.bf16.mxu0 %v13531_v3 }
 0x70d   : > { %8829 = vmatpush3.bf16.msra.mxu1 %v13557_v10 }
 0x70e   : > { %6704 = vmatmul.mubr.bf16.vlgmr.msra.gmra.mrb[192].mxu0 %v13014_v39  ;;  %8830 = vmatprep.subr.bf16.mxu1 %v13563_v33  ;;  %v6796_v39 = vpack.c.bf16 %v6794_v19, %v6794_v19 }
 0x70f   : > { %8805 = vmatpush3.bf16.msra.mxu0 %v13542_v44  ;;  %6785 = vmatprep.mubr.bf16.mxu0 %v13018_v11 }
 0x710   : > { %8806 = vmatprep.subr.bf16.mxu0 %v13548_v41  ;;  %v6801_v0 = vshll.u32 %v6796_v39, 16  ;;  %v6799_v43 = vshrl.u32 %v6796_v39, 16 }
 0x711   : > { %8831 = vmatpush3.bf16.msra.mxu1 %v13571_v34 }
 0x712   : > { %8832 = vmatprep.subr.bf16.mxu1 %v13578_v59  ;;  %v6803_v17 = vrot.slane %v6801_v0, 1 }
 0x713   : > { %8807 = vmatpush3.bf16.msra.mxu0 %v13557_v10 }
 0x714   : > { %8808 = vmatprep.subr.bf16.mxu0 %v13563_v33  ;;  %v6804_v13 = vor.u32 %v6803_v17, %v6799_v43 }
 0x715   : > { %8833 = vmatpush3.bf16.msra.mxu1 %v13587_v18 }
 0x716   : > { %8834 = vmatprep.subr.bf16.mxu1 %v13593_v24 }
 0x717   : > { %8809 = vmatpush3.bf16.msra.mxu0 %v13571_v34 }
 0x718   : > { %8810 = vmatprep.subr.bf16.mxu0 %v13578_v59 }
 0x719   : > { %8835 = vmatpush3.bf16.msra.mxu1 %v13601_v63 }
 0x71a   : > { %8836 = vmatprep.subr.bf16.mxu1 %v13607_v5 }
 0x71b   : > { %v8534_v11 = vpop.f32.mrb[168].mxu1  ;;  %8811 = vmatpush3.bf16.msra.mxu0 %v13587_v18 }
 0x71c   : > { %v8535_v15 = vpop.f32.mrb[169].mxu1  ;;  %8812 = vmatprep.subr.bf16.mxu0 %v13593_v24 }
 0x71d   : > { %v8536_v20 = vadd.f32 %v8535_v15, %v8534_v11  ;;  %v8537_v1 = vpop.f32.mrb[170].mxu1  ;;  %8837 = vmatpush3.bf16.msra.mxu1 %v13615_v6 }
 0x71e   : > { %v8538_v36 = vpop.f32.mrb[171].mxu1  ;;  %8838 = vmatprep.subr.bf16.mxu1 %v13621_v28 }
 0x71f   : > { %v5844_v51 = vadd.f32 %v8536_v20, %v13522_v4  ;;  %8813 = vmatpush3.bf16.msra.mxu0 %v13601_v63 }
 0x720   : > { %8814 = vmatprep.subr.bf16.mxu0 %v13607_v5 }
 0x721   : > { %v8512_v48 = vpop.f32.mrb[168].mxu0  ;;  %8839 = vmatpush3.bf16.msra.mxu1 %v13629_v16 }
 0x722   : > { %v8513_v55 = vpop.f32.mrb[169].mxu0  ;;  %8840 = vmatprep.subr.bf16.mxu1 %v13635_v47 }
 0x723   : > { %v8514_v53 = vadd.f32 %v8513_v55, %v8512_v48  ;;  %v8515_v52 = vpop.f32.mrb[170].mxu0  ;;  %8815 = vmatpush3.bf16.msra.mxu0 %v13615_v6 }
 0x724   : > { %v8516_v54 = vpop.f32.mrb[171].mxu0  ;;  %8816 = vmatprep.subr.bf16.mxu0 %v13621_v28 }
 0x725   : > { %v5803_v27 = vadd.f32 %v8514_v53, %v13536_v26  ;;  %8841 = vmatpush3.bf16.msra.mxu1 %v13646_v12 }
 0x727   : > { %8817 = vmatpush3.bf16.msra.mxu0 %v13629_v16 }
 0x728   : > { %6847 = vmatmul.mubr.bf16.vlgmr.msra.gmra.mrb[196].mxu1 %v6804_v13  ;;  %8818 = vmatprep.subr.bf16.mxu0 %v13635_v47 }
 0x72b   : > { %8819 = vmatpush3.bf16.msra.mxu0 %v13646_v12 }
 0x72e   : > { %6786 = vmatmul.mubr.bf16.vlgmr.msra.gmra.mrb[196].mxu0 %v13065_v7 }
 0x73b   : > { %v8578_v46 = vpop.f32.mrb[172].mxu1 }
 0x73c   : > { %v8579_v50 = vpop.f32.mrb[173].mxu1 }
 0x73d   : > { %v8580_v4 = vadd.f32 %v8579_v50, %v8578_v46  ;;  %v8581_v35 = vpop.f32.mrb[174].mxu1  ;;  %v7543_v46 = vld [vmem:[%s13726_s6] ss:$0 sm:$0xff] }
 0x73e   : > { %v8582_v22 = vpop.f32.mrb[175].mxu1 }
 0x73f   : > { %v5930_v60 = vadd.f32 %v8580_v4, %v13638_v14 }
 0x741   : > { %v8556_v3 = vpop.f32.mrb[172].mxu0 }
 0x742   : > { %v8557_v31 = vpop.f32.mrb[173].mxu0 }
 0x743   : > { %v8558_v62 = vadd.f32 %v8557_v31, %v8556_v3  ;;  %v8559_v56 = vpop.f32.mrb[174].mxu0  ;;  %v7544_v3 = vld [vmem:[%s13727_s7] ss:$0 sm:$0xff] }
 0x744   : > { %v8560_v32 = vpop.f32.mrb[175].mxu0 }
 0x745   : > { %v5885_v26 = vadd.f32 %v8558_v62, %v13652_v21 }
 0x75b   : > { %v8622_v44 = vpop.f32.mrb[176].mxu1 }
 0x75c   : > { %v8623_v41 = vpop.f32.mrb[177].mxu1 }
 0x75d   : > { %v8624_v10 = vadd.f32 %v8623_v41, %v8622_v44  ;;  %v8625_v33 = vpop.f32.mrb[178].mxu1 }
 0x75e   : > { %v8626_v34 = vpop.f32.mrb[179].mxu1 }
 0x75f   : > { %v6141_v7 = vadd.f32 %v8624_v10, %v5844_v51 }
 0x761   : > { %v8600_v59 = vpop.f32.mrb[176].mxu0 }
 0x762   : > { %v8601_v18 = vpop.f32.mrb[177].mxu0 }
 0x763   : > { %v8602_v24 = vadd.f32 %v8601_v18, %v8600_v59  ;;  %v8603_v63 = vpop.f32.mrb[178].mxu0 }
 0x764   : > { %v8604_v5 = vpop.f32.mrb[179].mxu0 }
 0x765   : > { %v6100_v38 = vadd.f32 %v8602_v24, %v5803_v27 }
 0x77b   : > { %v8666_v6 = vpop.f32.mrb[180].mxu1 }
 0x77c   : > { %v8667_v42 = vpop.f32.mrb[181].mxu1 }
 0x77d   : > { %v8668_v28 = vadd.f32 %v8667_v42, %v8666_v6  ;;  %v8669_v30 = vpop.f32.mrb[182].mxu1 }
 0x77e   : > { %v8670_v49 = vpop.f32.mrb[183].mxu1 }
 0x77f   : > { %v6243_v8 = vadd.f32 %v8668_v28, %v5930_v60 }
 0x781   : > { %v8644_v45 = vpop.f32.mrb[180].mxu0 }
 0x782   : > { %v8645_v16 = vpop.f32.mrb[181].mxu0 }
 0x783   : > { %v8646_v25 = vadd.f32 %v8645_v16, %v8644_v45  ;;  %v8647_v40 = vpop.f32.mrb[182].mxu0 }
 0x784   : > { %v8648_v47 = vpop.f32.mrb[183].mxu0 }
 0x785   : > { %v6182_v14 = vadd.f32 %v8646_v25, %v5885_v26  ;;  %v7545_v26 = vld [vmem:[%s13728_s8] ss:$0 sm:$0xff] }
 0x79b   : > { %v8710_v9 = vpop.f32.mrb[184].mxu1 }
 0x79c   : > { %v8711_v12 = vpop.f32.mrb[185].mxu1 }
 0x79d   : > { %v8712_v57 = vadd.f32 %v8711_v12, %v8710_v9  ;;  %v8713_v61 = vpop.f32.mrb[186].mxu1 }
 0x79e   : > { %v8714_v58 = vpop.f32.mrb[187].mxu1 }
 0x79f   : > { %v6454_v2 = vadd.f32 %v8712_v57, %v6141_v7 }
 0x7a1   : > { %v8688_v23 = vpop.f32.mrb[184].mxu0 }
 0x7a2   : > { %v8689_v29 = vpop.f32.mrb[185].mxu0 }
 0x7a3   : > { %v8690_v21 = vadd.f32 %v8689_v29, %v8688_v23  ;;  %v8691_v37 = vpop.f32.mrb[186].mxu0 }
 0x7a4   : > { %v8692_v19 = vpop.f32.mrb[187].mxu0 }
 0x7a5   : > { %v6413_v39 = vadd.f32 %v8690_v21, %v6100_v38 }
 0x7bb   : > { %v8754_v11 = vpop.f32.mrb[188].mxu1 }
 0x7bc   : > { %v8755_v15 = vpop.f32.mrb[189].mxu1 }
 0x7bd   : > { %v8756_v0 = vadd.f32 %v8755_v15, %v8754_v11  ;;  %v8757_v20 = vpop.f32.mrb[190].mxu1 }
 0x7be   : > { %v8758_v1 = vpop.f32.mrb[191].mxu1 }
 0x7bf   : > { %v6541_v36 = vadd.f32 %v8756_v0, %v6243_v8 }
 0x7c1   : > { %v8732_v51 = vpop.f32.mrb[188].mxu0 }
 0x7c2   : > { %v8733_v43 = vpop.f32.mrb[189].mxu0 }
 0x7c3   : > { %v8734_v17 = vadd.f32 %v8733_v43, %v8732_v51  ;;  %v8735_v48 = vpop.f32.mrb[190].mxu0 }
 0x7c4   : > { %v8736_v55 = vpop.f32.mrb[191].mxu0 }
 0x7c5   : > { %v6495_v53 = vadd.f32 %v8734_v17, %v6182_v14 }
 0x7db   : > { %v8798_v52 = vpop.f32.mrb[192].mxu1 }
 0x7dc   : > { %v8799_v54 = vpop.f32.mrb[193].mxu1 }
 0x7dd   : > { %v8800_v13 = vadd.f32 %v8799_v54, %v8798_v52  ;;  %v8801_v27 = vpop.f32.mrb[194].mxu1 }
 0x7de   : > { %v8802_v50 = vpop.f32.mrb[195].mxu1 }
 0x7df   : > { %v6752_v4 = vadd.f32 %v8800_v13, %v6454_v2 }
 0x7e1   : > { %v6882_v35 = vadd.f32 %v7543_v46, %v6752_v4  ;;  %v8776_v22 = vpop.f32.mrb[192].mxu0 }
 0x7e2   : > { %v8777_v60 = vpop.f32.mrb[193].mxu0 }
 0x7e3   : > { %vm6883_vm10 = vcmp.ge.f32.partialorder %v6882_v35, 0.0  ;;  %v6884_v31 = vmul.f32 0.2, %v6882_v35  ;;  %v8778_v62 = vadd.f32 %v8777_v60, %v8776_v22  ;;  %v8779_v56 = vpop.f32.mrb[194].mxu0 }
 0x7e4   : > { %v8780_v32 = vpop.f32.mrb[195].mxu0 }
 0x7e5   : > { %v6885_v44 = vsel %vm6883_vm10, %v6882_v35, %v6884_v31  ;;  %v6711_v41 = vadd.f32 %v8778_v62, %v6413_v39 }
 0x7e6   : > { %v6886_v10 = vmul.f32 %v7544_v3, %v6885_v44 }
 0x7e7   : > { %v6876_v33 = vadd.f32 %v7543_v46, %v6711_v41 }
 0x7e8   : > { %v6887_v34 = vadd.f32 %v7545_v26, %v6886_v10 }
 0x7e9   : > { %vm6877_vm11 = vcmp.ge.f32.partialorder %v6876_v33, 0.0  ;;  %v6878_v7 = vmul.f32 0.2, %v6876_v33 }
 0x7ea   : > { %7546 = vst [vmem:[%s13711_s26 + $0x4] sm:$0xf] %v6887_v34 }
 0x7eb   : > { %v6879_v59 = vsel %vm6877_vm11, %v6876_v33, %v6878_v7 }
 0x7ec   : > { %v6880_v18 = vmul.f32 %v7544_v3, %v6879_v59 }
 0x7ee   : > { %v6881_v24 = vadd.f32 %v7545_v26, %v6880_v18 }
 0x7f0   : > { %6900 = vst [vmem:[%s13711_s26] sm:$0xf] %v6881_v24 }
 0x7fb   : > { %v8842_v63 = vpop.f32.mrb[196].mxu1 }
 0x7fc   : > { %v8843_v5 = vpop.f32.mrb[197].mxu1 }
 0x7fd   : > { %v8844_v38 = vadd.f32 %v8843_v5, %v8842_v63  ;;  %v8845_v6 = vpop.f32.mrb[198].mxu1 }
 0x7fe   : > { %v8846_v42 = vpop.f32.mrb[199].mxu1 }
 0x7ff   : > { %v6854_v28 = vadd.f32 %v8844_v38, %v6541_v36 }
 0x801   : > { %v6894_v30 = vadd.f32 %v7543_v46, %v6854_v28  ;;  %v8820_v49 = vpop.f32.mrb[196].mxu0 }
 0x802   : > { %v8821_v8 = vpop.f32.mrb[197].mxu0 }
 0x803   : > { %vm6895_vm12 = vcmp.ge.f32.partialorder %v6894_v30, 0.0  ;;  %v6896_v45 = vmul.f32 0.2, %v6894_v30  ;;  %v8822_v16 = vadd.f32 %v8821_v8, %v8820_v49  ;;  %v8823_v25 = vpop.f32.mrb[198].mxu0 }
 0x804   : > { %v8824_v40 = vpop.f32.mrb[199].mxu0 }
 0x805   : > { %v6897_v47 = vsel %vm6895_vm12, %v6894_v30, %v6896_v45  ;;  %v6793_v14 = vadd.f32 %v8822_v16, %v6495_v53 }
 0x806   : > { %v6898_v9 = vmul.f32 %v7544_v3, %v6897_v47 }
 0x807   : > { %v6888_v12 = vadd.f32 %v7543_v46, %v6793_v14 }
 0x808   : > { %v6899_v57 = vadd.f32 %v7545_v26, %v6898_v9 }
 0x809   : > { %vm6889_vm13 = vcmp.ge.f32.partialorder %v6888_v12, 0.0  ;;  %v6890_v61 = vmul.f32 0.2, %v6888_v12 }
 0x80a   : > { %7548 = vst [vmem:[%s13711_s26 + $0xc] sm:$0xf] %v6899_v57 }
 0x80b   : > { %v6891_v58 = vsel %vm6889_vm13, %v6888_v12, %v6890_v61 }
 0x80c   : > { %v6892_v2 = vmul.f32 %v7544_v3, %v6891_v58 }
 0x80e   : > { %v6893_v23 = vadd.f32 %v7545_v26, %v6892_v2 }
 0x810   : > { %7547 = vst [vmem:[%s13711_s26 + $0x8] sm:$0xf] %v6893_v23 }
 0x811 PF: > { %s20_s13 = sadd.s32 1, %s10393_s13  }
 0x812   : > { %p17_p4 = scmp.ge.s32.totalorder %s20_s13, 4  }
 0x814   :  { %19 = sbr.rel (!%p17_p4) target bundleno = 1 (0x1), region = 133 }

</bundles_post_ra>
